<compile_context>
chip_gen: v5e
topology: v5e:2x2
jax: 0.10.0
libtpu: 0.0.40
codegen_flags: <defaults>
</compile_context>

<pallas_src>
import jax
import jax.numpy as jnp
from jax.experimental import pallas as pl
from jax.experimental.pallas import tpu as pltpu

LN_EPS = 1e-5
NEG_BIG = -1e30   # finite "masked" score: robust even if a row were fully masked


def _layernorm(x, gamma, beta):
    mu = jnp.mean(x, axis=-1, keepdims=True)
    var = jnp.mean(jnp.square(x - mu), axis=-1, keepdims=True)
    return (x - mu) * jax.lax.rsqrt(var + LN_EPS) * gamma + beta


def _split_heads(x2d, num_heads, head_size):
    """(rows, H*hs) -> (H, rows, hs); once per q-row tile only."""
    rows = x2d.shape[0]
    x3d = x2d.reshape(rows, num_heads, head_size)
    if hasattr(pltpu, "einshape"):
        return pltpu.einshape("rhd->hrd", x3d)
    return jnp.swapaxes(x3d, 0, 1)


def _merge_heads(x3d):
    """(H, rows, hs) -> (rows, H*hs); once per q-row tile only."""
    num_heads, rows, head_size = x3d.shape
    if hasattr(pltpu, "einshape"):
        y = pltpu.einshape("hrd->rhd", x3d)
    else:
        y = jnp.swapaxes(x3d, 0, 1)
    return y.reshape(rows, num_heads * head_size)


def block_kernel(
    qi_map_ref, ki_map_ref,                # scalar prefetch (SMEM): flat step -> (qi, ki)
    xq_ref,                                # (ts, C) f32 q-row tile of x (residual + Q path)
    k_ref, v_ref,                          # (H, ts, hs) bf16 precomputed K/V tiles
    g1_ref, b1_ref,                        # LayerNorm 1
    wq_ref,                                # Q projection (C, C) bf16, hs^-0.5 folded in
    wo_ref, bo_ref,                        # attention output projection (C, C) + bias
    g2_ref, b2_ref,                        # LayerNorm 2
    w1_ref, bf1_ref,                       # FFN Linear(C, 4C) + bias
    w2_ref, bf2_ref,                       # FFN Linear(4C, C) + bias
    o_ref,                                 # (ts, C) output tile
    q_sc, m_sc, l_sc, acc_sc,              # flash-attention state (persists over kv steps)
):
    step = pl.program_id(1)
    qi = qi_map_ref[step]
    ki = ki_map_ref[step]

    H, ts, hs = k_ref.shape
    f32, bf16 = jnp.float32, jnp.bfloat16

    # ---- first kv step of this q-row tile: project Q once, reset online-softmax state ----
    @pl.when(ki == 0)
    def _init():
        hq = _layernorm(xq_ref[...].astype(f32), g1_ref[...], b1_ref[...])
        q = jnp.dot(hq.astype(bf16), wq_ref[...], preferred_element_type=f32)
        q_sc[...] = _split_heads(q, H, hs).astype(bf16)              # (H, ts, hs)
        m_sc[...] = jnp.full(m_sc.shape, -jnp.inf, dtype=m_sc.dtype)
        l_sc[...] = jnp.zeros(l_sc.shape, l_sc.dtype)
        acc_sc[...] = jnp.zeros(acc_sc.shape, acc_sc.dtype)

    def _online_update(s):
        # TODO(synk): on v6e/v7x compute exp/alpha in bf16 (keep stats/acc f32) for ~2x EUP;
        #             kept f32 here so the same kernel stays correct on v5e (no bf16 EUP/VPU).
        m_prev = m_sc[...]                                           # (H, ts, 1)
        m_new = jnp.maximum(m_prev, jnp.max(s, axis=-1, keepdims=True))
        alpha = jnp.exp(m_prev - m_new)
        p = jnp.exp(s - m_new)                                       # (H, ts, ts)
        l_sc[...] = alpha * l_sc[...] + jnp.sum(p, axis=-1, keepdims=True)
        acc_sc[...] = alpha * acc_sc[...] + jnp.einsum(
            "hqk,hkd->hqd", p.astype(bf16), v_ref[...], preferred_element_type=f32)
        m_sc[...] = m_new

    # ---- off-diagonal kv tile: fully unmasked (no iota / select at all) ----
    @pl.when(ki < qi)
    def _attend_full():
        s = jnp.einsum("hqd,hkd->hqk", q_sc[...], k_ref[...],
                       preferred_element_type=f32)
        _online_update(s)

    # ---- diagonal kv tile (always the last step for this q row): mask, finalize, FFN ----
    @pl.when(ki == qi)
    def _attend_diag_and_finalize():
        s = jnp.einsum("hqd,hkd->hqk", q_sc[...], k_ref[...],
                       preferred_element_type=f32)
        row = jax.lax.broadcasted_iota(jnp.int32, (ts, ts), 0)
        col = jax.lax.broadcasted_iota(jnp.int32, (ts, ts), 1)
        s = jnp.where((row >= col)[None, :, :], s, NEG_BIG)          # 2-D mask, bcast over H
        _online_update(s)

        inv_l = pl.reciprocal(l_sc[...], approx=True)                # EUP slot
        attn = _merge_heads(acc_sc[...] * inv_l)                     # (ts, C) f32
        attn = jnp.dot(attn.astype(bf16), wo_ref[...],
                       preferred_element_type=f32) + bo_ref[...]

        x1 = xq_ref[...].astype(f32) + attn                          # residual 1

        h2 = _layernorm(x1, g2_ref[...], b2_ref[...])
        f = jnp.dot(h2.astype(bf16), w1_ref[...],
                    preferred_element_type=f32) + bf1_ref[...]
        f = jnp.maximum(f, 0.0).astype(bf16)                         # ReLU; bf16 immediately
        f = jnp.dot(f, w2_ref[...], preferred_element_type=f32) + bf2_ref[...]

        o_ref[...] = (x1 + f).astype(o_ref.dtype)                    # residual 2


def transformer_block(x, params, *, num_heads: int, seq_tile=None):
    B, T, C = x.shape
    assert C % num_heads == 0, "attention_size must be divisible by num_heads"
    hs = C // num_heads

    ts = seq_tile if seq_tile is not None else min(T, 128)
    assert T % ts == 0 and ts % 16 == 0, "seq tile must divide T and be 16-aligned (bf16 packing)"
    nt = T // ts

    f32, bf16 = jnp.float32, jnp.bfloat16
    scale = float(hs) ** -0.5

    # Matmul weights stored/streamed as bf16 (MXU-native); LN params / biases stay f32.
    g1, b1 = params["g1"].astype(f32), params["b1"].astype(f32)
    g2, b2 = params["g2"].astype(f32), params["b2"].astype(f32)
    wq = (params["wq"] * scale).astype(bf16)          # fold hs^-0.5 into Wq on the host
    wk, wv = params["wk"].astype(bf16), params["wv"].astype(bf16)
    wo, bo = params["wo"].astype(bf16), params["bo"].astype(f32)
    w1, bf1 = params["w1"].astype(bf16), params["bf1"].astype(f32)
    w2, bf2 = params["w2"].astype(bf16), params["bf2"].astype(f32)
    param_list = [g1, b1, wq, wo, bo, g2, b2, w1, bf1, w2, bf2]

    # ---- prologue (plain XLA, once per sequence): LN1 + K/V projections, head-major bf16.
    #      Removes the ~nt/2x redundant per-(q-tile, kv-tile) re-projection. ----
    h1 = _layernorm(x.astype(f32), g1, b1)
    h1b = h1.astype(bf16)
    k = jnp.einsum("btc,cd->btd", h1b, wk, preferred_element_type=f32)
    v = jnp.einsum("btc,cd->btd", h1b, wv, preferred_element_type=f32)
    k_hm = k.reshape(B, T, num_heads, hs).transpose(0, 2, 1, 3).astype(bf16)   # (B,H,T,hs)
    v_hm = v.reshape(B, T, num_heads, hs).transpose(0, 2, 1, 3).astype(bf16)

    # ---- lower-triangular (qi, ki) schedule: masked upper-triangle steps never run ----
    qi_idx, ki_idx = [], []
    for q_t in range(nt):
        for k_t in range(q_t + 1):
            qi_idx.append(q_t)
            ki_idx.append(k_t)
    qi_map = jnp.asarray(qi_idx, jnp.int32)
    ki_map = jnp.asarray(ki_idx, jnp.int32)
    n_steps = len(qi_idx)

    xq_spec = pl.BlockSpec((pl.Squeezed(), ts, C),
                           lambda b, s, qm, km: (b, qm[s], 0))
    kv_spec = pl.BlockSpec((pl.Squeezed(), num_heads, ts, hs),
                           lambda b, s, qm, km: (b, 0, km[s], 0))
    out_spec = pl.BlockSpec((pl.Squeezed(), ts, C),
                            lambda b, s, qm, km: (b, qm[s], 0))
    # Grid-invariant weights: whole array resident in VMEM, single copy (no per-step DMA).
    # TODO(synk): for large C (>=1024) on v7x (64 MiB VMEM), stream w1/w2 from HBM
    #             (pl.ANY + make_async_copy, hidden-dim chunked) instead of holding whole.
    w_specs = [pl.BlockSpec(memory_space=pltpu.MemorySpace.VMEM) for _ in param_list]

    # VMEM budget: ~7/8 of physical, capped at 96 MiB (v5e/v6e: 128 MiB phys; v7x: 64 MiB),
    # floored at the 32 MiB scoped default.
    try:
        vmem_cap = int(getattr(pltpu.get_tpu_info(), "vmem_capacity_bytes", 64 << 20))
    except Exception:
        vmem_cap = 64 << 20
    vmem_limit = max(min((vmem_cap * 7) // 8, 96 << 20), 32 << 20)

    return pl.pallas_call(
        block_kernel,
        out_shape=jax.ShapeDtypeStruct((B, T, C), x.dtype),
        grid_spec=pltpu.PrefetchScalarGridSpec(
            num_scalar_prefetch=2,
            grid=(B, n_steps),
            in_specs=[xq_spec, kv_spec, kv_spec] + w_specs,
            out_specs=out_spec,
            scratch_shapes=[
                pltpu.VMEM((num_heads, ts, hs), bf16),    # q (scale folded, head-major)
                pltpu.VMEM((num_heads, ts, 1), f32),      # running max
                pltpu.VMEM((num_heads, ts, 1), f32),      # running denominator
                pltpu.VMEM((num_heads, ts, hs), f32),     # running numerator
            ],
        ),
        compiler_params=pltpu.CompilerParams(
            dimension_semantics=("parallel", "arbitrary"),
            vmem_limit_bytes=int(vmem_limit),
        ),
    )(qi_map, ki_map, x, k_hm, v_hm, *param_list)


def init_params(key, C, hidden):
    ks = jax.random.split(key, 8)
    std = 0.02
    return {
        # LayerNorm 1 / 2 (gamma=1, beta=0 like nn.LayerNorm init)
        "g1": jnp.ones((1, C), jnp.float32),
        "b1": jnp.zeros((1, C), jnp.float32),
        "g2": jnp.ones((1, C), jnp.float32),
        "b2": jnp.zeros((1, C), jnp.float32),
        # per-head Q/K/V projections stacked along the output dim (bias=False)
        "wq": jax.random.normal(ks[0], (C, C), jnp.float32) * std,
        "wk": jax.random.normal(ks[1], (C, C), jnp.float32) * std,
        "wv": jax.random.normal(ks[2], (C, C), jnp.float32) * std,
        # attention output projection
        "wo": jax.random.normal(ks[3], (C, C), jnp.float32) * std,
        "bo": jax.random.normal(ks[4], (1, C), jnp.float32) * std,
        # feed-forward
        "w1": jax.random.normal(ks[5], (C, hidden), jnp.float32) * std,
        "bf1": jnp.zeros((1, hidden), jnp.float32),
        "w2": jax.random.normal(ks[6], (hidden, C), jnp.float32) * std,
        "bf2": jnp.zeros((1, C), jnp.float32),
    }


def reference_block(x, p, *, num_heads):
    """Pure-JAX f32 reference of the same forward pass (sanity check)."""
    B, T, C = x.shape
    hs = C // num_heads

    def ln(v, g, b):
        mu = v.mean(-1, keepdims=True)
        var = ((v - mu) ** 2).mean(-1, keepdims=True)
        return (v - mu) / jnp.sqrt(var + LN_EPS) * g + b

    h = ln(x, p["g1"], p["b1"])
    q = h @ p["wq"]; k = h @ p["wk"]; v = h @ p["wv"]
    q = q.reshape(B, T, num_heads, hs).transpose(0, 2, 1, 3)
    k = k.reshape(B, T, num_heads, hs).transpose(0, 2, 1, 3)
    v = v.reshape(B, T, num_heads, hs).transpose(0, 2, 1, 3)
    s = jnp.einsum("bhqd,bhkd->bhqk", q, k) * (hs ** -0.5)
    mask = jnp.tril(jnp.ones((T, T), bool))
    s = jnp.where(mask, s, -jnp.inf)
    a = jax.nn.softmax(s, axis=-1)
    o = jnp.einsum("bhqk,bhkd->bhqd", a, v).transpose(0, 2, 1, 3).reshape(B, T, C)
    x = x + (o @ p["wo"] + p["bo"])
    h2 = ln(x, p["g2"], p["b2"])
    f = jax.nn.relu(h2 @ p["w1"] + p["bf1"]) @ p["w2"] + p["bf2"]
    return x + f


if __name__ == "__main__":
    # small shapes consistent with the module (n_embedd == attention_size = C);
    # C is a lane-dense multiple of 128, T/ts chosen so the triangular schedule
    # exercises init / off-diagonal / diagonal+finalize paths (nt=3 -> 6 steps).
    B, T, C = 2, 192, 128       # batch, block_size (seq), attention_size
    num_heads = 4               # individual_head_size = 128 // 4 = 32
    hidden = 4 * C              # FeedForward expansion

    key = jax.random.PRNGKey(0)
    kx, kp = jax.random.split(key)
    x = jax.random.normal(kx, (B, T, C), jnp.float32)
    params = init_params(kp, C, hidden)

    fn = jax.jit(lambda xx, pp: transformer_block(xx, pp, num_heads=num_heads, seq_tile=64))
    out = jax.block_until_ready(fn(x, params))

    ref = reference_block(x, params, num_heads=num_heads)
    assert out.shape == (B, T, C)
    max_err = float(jnp.max(jnp.abs(out - ref)))
    # bf16 matmul operands + approx softmax reciprocal vs. a pure-f32 reference
    assert jnp.allclose(out, ref, atol=3e-2, rtol=3e-2), f"mismatch vs. reference (max err {max_err})"

    print("KERNEL_OK")
</pallas_src>

<mosaic_0001>
module attributes {stable_mosaic.version = 11 : i64} {
  func.func @block_kernel(%arg0: i32, %arg1: i32, %arg2: memref<6xi32, #tpu.memory_space<smem>>, %arg3: memref<6xi32, #tpu.memory_space<smem>>, %arg4: memref<1x64x128xf32, #tpu.memory_space<vmem>>, %arg5: memref<1x4x64x32xbf16, #tpu.memory_space<vmem>>, %arg6: memref<1x4x64x32xbf16, #tpu.memory_space<vmem>>, %arg7: memref<1x128xf32, #tpu.memory_space<vmem>>, %arg8: memref<1x128xf32, #tpu.memory_space<vmem>>, %arg9: memref<128x128xbf16, #tpu.memory_space<vmem>>, %arg10: memref<128x128xbf16, #tpu.memory_space<vmem>>, %arg11: memref<1x128xf32, #tpu.memory_space<vmem>>, %arg12: memref<1x128xf32, #tpu.memory_space<vmem>>, %arg13: memref<1x128xf32, #tpu.memory_space<vmem>>, %arg14: memref<128x512xbf16, #tpu.memory_space<vmem>>, %arg15: memref<1x512xf32, #tpu.memory_space<vmem>>, %arg16: memref<512x128xbf16, #tpu.memory_space<vmem>>, %arg17: memref<1x128xf32, #tpu.memory_space<vmem>>, %arg18: memref<1x64x128xf32, #tpu.memory_space<vmem>>, %arg19: memref<4x64x32xbf16, #tpu.memory_space<vmem>>, %arg20: memref<4x64x1xf32, #tpu.memory_space<vmem>>, %arg21: memref<4x64x1xf32, #tpu.memory_space<vmem>>, %arg22: memref<4x64x32xf32, #tpu.memory_space<vmem>>) attributes {dimension_semantics = [#tpu.dimension_semantics<parallel>, #tpu.dimension_semantics<arbitrary>], iteration_bounds = array<i64: 2, 6>, scalar_prefetch = 2 : i64, scratch_operands = 4 : i64, tpu.core_type = #tpu.core_type<tc>, window_params = [{transform_indices = @transform_0, window_bounds = array<i64: 1, 64, 128>}, {transform_indices = @transform_1, window_bounds = array<i64: 1, 4, 64, 32>}, {transform_indices = @transform_2, window_bounds = array<i64: 1, 4, 64, 32>}, {pipeline_mode = #tpu.pipeline_mode<synchronous>, transform_indices = @transform_3, window_bounds = array<i64: 1, 128>}, {pipeline_mode = #tpu.pipeline_mode<synchronous>, transform_indices = @transform_4, window_bounds = array<i64: 1, 128>}, {pipeline_mode = #tpu.pipeline_mode<synchronous>, transform_indices = @transform_5, window_bounds = array<i64: 128, 128>}, {pipeline_mode = #tpu.pipeline_mode<synchronous>, transform_indices = @transform_6, window_bounds = array<i64: 128, 128>}, {pipeline_mode = #tpu.pipeline_mode<synchronous>, transform_indices = @transform_7, window_bounds = array<i64: 1, 128>}, {pipeline_mode = #tpu.pipeline_mode<synchronous>, transform_indices = @transform_8, window_bounds = array<i64: 1, 128>}, {pipeline_mode = #tpu.pipeline_mode<synchronous>, transform_indices = @transform_9, window_bounds = array<i64: 1, 128>}, {pipeline_mode = #tpu.pipeline_mode<synchronous>, transform_indices = @transform_10, window_bounds = array<i64: 128, 512>}, {pipeline_mode = #tpu.pipeline_mode<synchronous>, transform_indices = @transform_11, window_bounds = array<i64: 1, 512>}, {pipeline_mode = #tpu.pipeline_mode<synchronous>, transform_indices = @transform_12, window_bounds = array<i64: 512, 128>}, {pipeline_mode = #tpu.pipeline_mode<synchronous>, transform_indices = @transform_13, window_bounds = array<i64: 1, 128>}, {transform_indices = @transform_14, window_bounds = array<i64: 1, 64, 128>}]} {
    %0 = arith.index_cast %arg1 : i32 to index
    %1 = memref.load %arg2[%0] : memref<6xi32, #tpu.memory_space<smem>>
    %2 = arith.index_cast %arg1 : i32 to index
    %3 = memref.load %arg3[%2] : memref<6xi32, #tpu.memory_space<smem>>
    %c0_i32 = arith.constant 0 : i32
    %4 = arith.cmpi eq, %3, %c0_i32 : i32
    %5 = arith.extui %4 : i1 to i32
    %c0_i32_0 = arith.constant 0 : i32
    %6 = arith.cmpi ne, %5, %c0_i32_0 : i32
    scf.if %6 {
      %c0 = arith.constant 0 : index
      %c0_3 = arith.constant 0 : index
      %c0_4 = arith.constant 0 : index
      %13 = vector.load %arg4[%c0, %c0_3, %c0_4] : memref<1x64x128xf32, #tpu.memory_space<vmem>>, vector<1x64x128xf32>
      %14 = vector.shape_cast %13 : vector<1x64x128xf32> to vector<64x128xf32>
      %c0_5 = arith.constant 0 : index
      %c0_6 = arith.constant 0 : index
      %15 = vector.load %arg7[%c0_5, %c0_6] : memref<1x128xf32, #tpu.memory_space<vmem>>, vector<1x128xf32>
      %c0_7 = arith.constant 0 : index
      %c0_8 = arith.constant 0 : index
      %16 = vector.load %arg8[%c0_7, %c0_8] : memref<1x128xf32, #tpu.memory_space<vmem>>, vector<1x128xf32>
      %cst = arith.constant dense<0.000000e+00> : vector<64xf32>
      %17 = vector.multi_reduction <add>, %14, %cst [1] : vector<64x128xf32> to vector<64xf32>
      %18 = vector.shape_cast %17 : vector<64xf32> to vector<64x1xf32>
      %cst_9 = arith.constant 1.280000e+02 : f32
      %19 = vector.broadcast %cst_9 : f32 to vector<64x1xf32>
      %20 = arith.divf %18, %19 : vector<64x1xf32>
      %21 = vector.broadcast %20 : vector<64x1xf32> to vector<64x128xf32>
      %22 = arith.subf %14, %21 : vector<64x128xf32>
      %23 = arith.mulf %22, %22 : vector<64x128xf32>
      %cst_10 = arith.constant dense<0.000000e+00> : vector<64xf32>
      %24 = vector.multi_reduction <add>, %23, %cst_10 [1] : vector<64x128xf32> to vector<64xf32>
      %25 = vector.shape_cast %24 : vector<64xf32> to vector<64x1xf32>
      %cst_11 = arith.constant 1.280000e+02 : f32
      %26 = vector.broadcast %cst_11 : f32 to vector<64x1xf32>
      %27 = arith.divf %25, %26 : vector<64x1xf32>
      %28 = vector.broadcast %20 : vector<64x1xf32> to vector<64x128xf32>
      %29 = arith.subf %14, %28 : vector<64x128xf32>
      %cst_12 = arith.constant 9.99999974E-6 : f32
      %30 = vector.broadcast %cst_12 : f32 to vector<64x1xf32>
      %31 = arith.addf %27, %30 : vector<64x1xf32>
      %32 = math.rsqrt %31 : vector<64x1xf32>
      %33 = vector.broadcast %32 : vector<64x1xf32> to vector<64x128xf32>
      %34 = arith.mulf %29, %33 : vector<64x128xf32>
      %35 = vector.broadcast %15 : vector<1x128xf32> to vector<64x128xf32>
      %36 = arith.mulf %34, %35 : vector<64x128xf32>
      %37 = vector.broadcast %16 : vector<1x128xf32> to vector<64x128xf32>
      %38 = arith.addf %36, %37 : vector<64x128xf32>
      %39 = arith.truncf %38 : vector<64x128xf32> to vector<64x128xbf16>
      %c0_13 = arith.constant 0 : index
      %c0_14 = arith.constant 0 : index
      %40 = vector.load %arg9[%c0_13, %c0_14] : memref<128x128xbf16, #tpu.memory_space<vmem>>, vector<128x128xbf16>
      %cst_15 = arith.constant dense<0.000000e+00> : vector<64x128xf32>
      %41 = tpu.matmul %39, %40, %cst_15 {dimension_numbers = #tpu.dot_dimension_numbers<[1], [0], [0], [1], [0, 0, 1, 1], [], []>} : vector<64x128xbf16>, vector<128x128xbf16>, vector<64x128xf32> -> vector<64x128xf32>
      %42 = vector.shape_cast %41 : vector<64x128xf32> to vector<64x4x32xf32>
      %43 = tpu.transpose %42, [1, 0, 2] : vector<64x4x32xf32> -> vector<4x64x32xf32>
      %44 = arith.truncf %43 : vector<4x64x32xf32> to vector<4x64x32xbf16>
      %c0_16 = arith.constant 0 : index
      %c0_17 = arith.constant 0 : index
      %c0_18 = arith.constant 0 : index
      %45 = vector.load %arg19[%c0_16, %c0_17, %c0_18] : memref<4x64x32xbf16, #tpu.memory_space<vmem>>, vector<4x64x32xbf16>
      tpu.vector_store %arg19[%c0_16, %c0_17, %c0_18], %44 {strides = array<i32>} : memref<4x64x32xbf16, #tpu.memory_space<vmem>>, vector<4x64x32xbf16>,
      %cst_19 = arith.constant 0xFF800000 : f32
      %46 = vector.broadcast %cst_19 : f32 to vector<4x64x1xf32>
      %c0_20 = arith.constant 0 : index
      %c0_21 = arith.constant 0 : index
      %c0_22 = arith.constant 0 : index
      %47 = vector.load %arg20[%c0_20, %c0_21, %c0_22] : memref<4x64x1xf32, #tpu.memory_space<vmem>>, vector<4x64x1xf32>
      tpu.vector_store %arg20[%c0_20, %c0_21, %c0_22], %46 {strides = array<i32>} : memref<4x64x1xf32, #tpu.memory_space<vmem>>, vector<4x64x1xf32>,
      %cst_23 = arith.constant 0.000000e+00 : f32
      %48 = vector.broadcast %cst_23 : f32 to vector<4x64x1xf32>
      %c0_24 = arith.constant 0 : index
      %c0_25 = arith.constant 0 : index
      %c0_26 = arith.constant 0 : index
      %49 = vector.load %arg21[%c0_24, %c0_25, %c0_26] : memref<4x64x1xf32, #tpu.memory_space<vmem>>, vector<4x64x1xf32>
      tpu.vector_store %arg21[%c0_24, %c0_25, %c0_26], %48 {strides = array<i32>} : memref<4x64x1xf32, #tpu.memory_space<vmem>>, vector<4x64x1xf32>,
      %cst_27 = arith.constant 0.000000e+00 : f32
      %50 = vector.broadcast %cst_27 : f32 to vector<4x64x32xf32>
      %c0_28 = arith.constant 0 : index
      %c0_29 = arith.constant 0 : index
      %c0_30 = arith.constant 0 : index
      %51 = vector.load %arg22[%c0_28, %c0_29, %c0_30] : memref<4x64x32xf32, #tpu.memory_space<vmem>>, vector<4x64x32xf32>
      tpu.vector_store %arg22[%c0_28, %c0_29, %c0_30], %50 {strides = array<i32>} : memref<4x64x32xf32, #tpu.memory_space<vmem>>, vector<4x64x32xf32>,
    } else {
    }
    %7 = arith.cmpi slt, %3, %1 : i32
    %8 = arith.extui %7 : i1 to i32
    %c0_i32_1 = arith.constant 0 : i32
    %9 = arith.cmpi ne, %8, %c0_i32_1 : i32
    scf.if %9 {
      %c0 = arith.constant 0 : index
      %c0_3 = arith.constant 0 : index
      %c0_4 = arith.constant 0 : index
      %13 = vector.load %arg19[%c0, %c0_3, %c0_4] : memref<4x64x32xbf16, #tpu.memory_space<vmem>>, vector<4x64x32xbf16>
      %c0_5 = arith.constant 0 : index
      %c0_6 = arith.constant 0 : index
      %c0_7 = arith.constant 0 : index
      %c0_8 = arith.constant 0 : index
      %14 = vector.load %arg5[%c0_5, %c0_6, %c0_7, %c0_8] : memref<1x4x64x32xbf16, #tpu.memory_space<vmem>>, vector<1x4x64x32xbf16>
      %15 = vector.shape_cast %14 : vector<1x4x64x32xbf16> to vector<4x64x32xbf16>
      "tpu.trace_start"() <{level = 10 : i32, message = "hqd,hkd->hqk"}> : () -> ()
      %cst = arith.constant dense<0.000000e+00> : vector<4x64x64xf32>
      %16 = tpu.matmul %13, %15, %cst {dimension_numbers = #tpu.dot_dimension_numbers<[2], [2], [1], [1], [0, 0, 0, 1, 1, 1], [0], [0]>} : vector<4x64x32xbf16>, vector<4x64x32xbf16>, vector<4x64x64xf32> -> vector<4x64x64xf32>
      "tpu.trace_stop"() : () -> ()
      %c0_9 = arith.constant 0 : index
      %c0_10 = arith.constant 0 : index
      %c0_11 = arith.constant 0 : index
      %17 = vector.load %arg20[%c0_9, %c0_10, %c0_11] : memref<4x64x1xf32, #tpu.memory_space<vmem>>, vector<4x64x1xf32>
      %cst_12 = arith.constant dense<0xFF800000> : vector<4x64xf32>
      %18 = vector.multi_reduction <maximumf>, %16, %cst_12 [2] : vector<4x64x64xf32> to vector<4x64xf32>
      %19 = vector.shape_cast %18 : vector<4x64xf32> to vector<4x64x1xf32>
      %20 = arith.maximumf %17, %19 : vector<4x64x1xf32>
      %21 = arith.subf %17, %20 : vector<4x64x1xf32>
      %22 = math.exp %21 : vector<4x64x1xf32>
      %23 = vector.broadcast %20 : vector<4x64x1xf32> to vector<4x64x64xf32>
      %24 = arith.subf %16, %23 : vector<4x64x64xf32>
      %25 = math.exp %24 : vector<4x64x64xf32>
      %c0_13 = arith.constant 0 : index
      %c0_14 = arith.constant 0 : index
      %c0_15 = arith.constant 0 : index
      %26 = vector.load %arg21[%c0_13, %c0_14, %c0_15] : memref<4x64x1xf32, #tpu.memory_space<vmem>>, vector<4x64x1xf32>
      %27 = arith.mulf %22, %26 : vector<4x64x1xf32>
      %cst_16 = arith.constant dense<0.000000e+00> : vector<4x64xf32>
      %28 = vector.multi_reduction <add>, %25, %cst_16 [2] : vector<4x64x64xf32> to vector<4x64xf32>
      %29 = vector.shape_cast %28 : vector<4x64xf32> to vector<4x64x1xf32>
      %30 = arith.addf %27, %29 : vector<4x64x1xf32>
      %c0_17 = arith.constant 0 : index
      %c0_18 = arith.constant 0 : index
      %c0_19 = arith.constant 0 : index
      %31 = vector.load %arg21[%c0_17, %c0_18, %c0_19] : memref<4x64x1xf32, #tpu.memory_space<vmem>>, vector<4x64x1xf32>
      tpu.vector_store %arg21[%c0_17, %c0_18, %c0_19], %30 {strides = array<i32>} : memref<4x64x1xf32, #tpu.memory_space<vmem>>, vector<4x64x1xf32>,
      %c0_20 = arith.constant 0 : index
      %c0_21 = arith.constant 0 : index
      %c0_22 = arith.constant 0 : index
      %32 = vector.load %arg22[%c0_20, %c0_21, %c0_22] : memref<4x64x32xf32, #tpu.memory_space<vmem>>, vector<4x64x32xf32>
      %33 = vector.broadcast %22 : vector<4x64x1xf32> to vector<4x64x32xf32>
      %34 = arith.mulf %33, %32 : vector<4x64x32xf32>
      %35 = arith.truncf %25 : vector<4x64x64xf32> to vector<4x64x64xbf16>
      %c0_23 = arith.constant 0 : index
      %c0_24 = arith.constant 0 : index
      %c0_25 = arith.constant 0 : index
      %c0_26 = arith.constant 0 : index
      %36 = vector.load %arg6[%c0_23, %c0_24, %c0_25, %c0_26] : memref<1x4x64x32xbf16, #tpu.memory_space<vmem>>, vector<1x4x64x32xbf16>
      %37 = vector.shape_cast %36 : vector<1x4x64x32xbf16> to vector<4x64x32xbf16>
      "tpu.trace_start"() <{level = 10 : i32, message = "hqk,hkd->hqd"}> : () -> ()
      %cst_27 = arith.constant dense<0.000000e+00> : vector<4x64x32xf32>
      %38 = tpu.matmul %35, %37, %cst_27 {dimension_numbers = #tpu.dot_dimension_numbers<[2], [1], [1], [2], [0, 0, 0, 1, 1, 2], [0], [0]>} : vector<4x64x64xbf16>, vector<4x64x32xbf16>, vector<4x64x32xf32> -> vector<4x64x32xf32>
      "tpu.trace_stop"() : () -> ()
      %39 = arith.addf %34, %38 : vector<4x64x32xf32>
      %c0_28 = arith.constant 0 : index
      %c0_29 = arith.constant 0 : index
      %c0_30 = arith.constant 0 : index
      %40 = vector.load %arg22[%c0_28, %c0_29, %c0_30] : memref<4x64x32xf32, #tpu.memory_space<vmem>>, vector<4x64x32xf32>
      tpu.vector_store %arg22[%c0_28, %c0_29, %c0_30], %39 {strides = array<i32>} : memref<4x64x32xf32, #tpu.memory_space<vmem>>, vector<4x64x32xf32>,
      %c0_31 = arith.constant 0 : index
      %c0_32 = arith.constant 0 : index
      %c0_33 = arith.constant 0 : index
      %41 = vector.load %arg20[%c0_31, %c0_32, %c0_33] : memref<4x64x1xf32, #tpu.memory_space<vmem>>, vector<4x64x1xf32>
      tpu.vector_store %arg20[%c0_31, %c0_32, %c0_33], %20 {strides = array<i32>} : memref<4x64x1xf32, #tpu.memory_space<vmem>>, vector<4x64x1xf32>,
    } else {
    }
    %10 = arith.cmpi eq, %3, %1 : i32
    %11 = arith.extui %10 : i1 to i32
    %c0_i32_2 = arith.constant 0 : i32
    %12 = arith.cmpi ne, %11, %c0_i32_2 : i32
    scf.if %12 {
      %c0 = arith.constant 0 : index
      %c0_3 = arith.constant 0 : index
      %c0_4 = arith.constant 0 : index
      %13 = vector.load %arg19[%c0, %c0_3, %c0_4] : memref<4x64x32xbf16, #tpu.memory_space<vmem>>, vector<4x64x32xbf16>
      %c0_5 = arith.constant 0 : index
      %c0_6 = arith.constant 0 : index
      %c0_7 = arith.constant 0 : index
      %c0_8 = arith.constant 0 : index
      %14 = vector.load %arg5[%c0_5, %c0_6, %c0_7, %c0_8] : memref<1x4x64x32xbf16, #tpu.memory_space<vmem>>, vector<1x4x64x32xbf16>
      %15 = vector.shape_cast %14 : vector<1x4x64x32xbf16> to vector<4x64x32xbf16>
      "tpu.trace_start"() <{level = 10 : i32, message = "hqd,hkd->hqk"}> : () -> ()
      %cst = arith.constant dense<0.000000e+00> : vector<4x64x64xf32>
      %16 = tpu.matmul %13, %15, %cst {dimension_numbers = #tpu.dot_dimension_numbers<[2], [2], [1], [1], [0, 0, 0, 1, 1, 1], [0], [0]>} : vector<4x64x32xbf16>, vector<4x64x32xbf16>, vector<4x64x64xf32> -> vector<4x64x64xf32>
      "tpu.trace_stop"() : () -> ()
      %17 = tpu.iota {dimensions = array<i32: 0>} : vector<64x64xi32>
      %18 = tpu.iota {dimensions = array<i32: 1>} : vector<64x64xi32>
      %19 = arith.cmpi sge, %17, %18 : vector<64x64xi32>
      %20 = vector.shape_cast %19 : vector<64x64xi1> to vector<1x64x64xi1>
      %cst_9 = arith.constant -1.000000e+30 : f32
      %21 = vector.shape_cast %20 : vector<1x64x64xi1> to vector<1x64x64xi1>
      %22 = vector.broadcast %21 : vector<1x64x64xi1> to vector<4x64x64xi1>
      %23 = vector.broadcast %cst_9 : f32 to vector<4x64x64xf32>
      %24 = arith.select %22, %16, %23 : vector<4x64x64xi1>, vector<4x64x64xf32>
      %c0_10 = arith.constant 0 : index
      %c0_11 = arith.constant 0 : index
      %c0_12 = arith.constant 0 : index
      %25 = vector.load %arg20[%c0_10, %c0_11, %c0_12] : memref<4x64x1xf32, #tpu.memory_space<vmem>>, vector<4x64x1xf32>
      %cst_13 = arith.constant dense<0xFF800000> : vector<4x64xf32>
      %26 = vector.multi_reduction <maximumf>, %24, %cst_13 [2] : vector<4x64x64xf32> to vector<4x64xf32>
      %27 = vector.shape_cast %26 : vector<4x64xf32> to vector<4x64x1xf32>
      %28 = arith.maximumf %25, %27 : vector<4x64x1xf32>
      %29 = arith.subf %25, %28 : vector<4x64x1xf32>
      %30 = math.exp %29 : vector<4x64x1xf32>
      %31 = vector.broadcast %28 : vector<4x64x1xf32> to vector<4x64x64xf32>
      %32 = arith.subf %24, %31 : vector<4x64x64xf32>
      %33 = math.exp %32 : vector<4x64x64xf32>
      %c0_14 = arith.constant 0 : index
      %c0_15 = arith.constant 0 : index
      %c0_16 = arith.constant 0 : index
      %34 = vector.load %arg21[%c0_14, %c0_15, %c0_16] : memref<4x64x1xf32, #tpu.memory_space<vmem>>, vector<4x64x1xf32>
      %35 = arith.mulf %30, %34 : vector<4x64x1xf32>
      %cst_17 = arith.constant dense<0.000000e+00> : vector<4x64xf32>
      %36 = vector.multi_reduction <add>, %33, %cst_17 [2] : vector<4x64x64xf32> to vector<4x64xf32>
      %37 = vector.shape_cast %36 : vector<4x64xf32> to vector<4x64x1xf32>
      %38 = arith.addf %35, %37 : vector<4x64x1xf32>
      %c0_18 = arith.constant 0 : index
      %c0_19 = arith.constant 0 : index
      %c0_20 = arith.constant 0 : index
      %39 = vector.load %arg21[%c0_18, %c0_19, %c0_20] : memref<4x64x1xf32, #tpu.memory_space<vmem>>, vector<4x64x1xf32>
      tpu.vector_store %arg21[%c0_18, %c0_19, %c0_20], %38 {strides = array<i32>} : memref<4x64x1xf32, #tpu.memory_space<vmem>>, vector<4x64x1xf32>,
      %c0_21 = arith.constant 0 : index
      %c0_22 = arith.constant 0 : index
      %c0_23 = arith.constant 0 : index
      %40 = vector.load %arg22[%c0_21, %c0_22, %c0_23] : memref<4x64x32xf32, #tpu.memory_space<vmem>>, vector<4x64x32xf32>
      %41 = vector.broadcast %30 : vector<4x64x1xf32> to vector<4x64x32xf32>
      %42 = arith.mulf %41, %40 : vector<4x64x32xf32>
      %43 = arith.truncf %33 : vector<4x64x64xf32> to vector<4x64x64xbf16>
      %c0_24 = arith.constant 0 : index
      %c0_25 = arith.constant 0 : index
      %c0_26 = arith.constant 0 : index
      %c0_27 = arith.constant 0 : index
      %44 = vector.load %arg6[%c0_24, %c0_25, %c0_26, %c0_27] : memref<1x4x64x32xbf16, #tpu.memory_space<vmem>>, vector<1x4x64x32xbf16>
      %45 = vector.shape_cast %44 : vector<1x4x64x32xbf16> to vector<4x64x32xbf16>
      "tpu.trace_start"() <{level = 10 : i32, message = "hqk,hkd->hqd"}> : () -> ()
      %cst_28 = arith.constant dense<0.000000e+00> : vector<4x64x32xf32>
      %46 = tpu.matmul %43, %45, %cst_28 {dimension_numbers = #tpu.dot_dimension_numbers<[2], [1], [1], [2], [0, 0, 0, 1, 1, 2], [0], [0]>} : vector<4x64x64xbf16>, vector<4x64x32xbf16>, vector<4x64x32xf32> -> vector<4x64x32xf32>
      "tpu.trace_stop"() : () -> ()
      %47 = arith.addf %42, %46 : vector<4x64x32xf32>
      %c0_29 = arith.constant 0 : index
      %c0_30 = arith.constant 0 : index
      %c0_31 = arith.constant 0 : index
      %48 = vector.load %arg22[%c0_29, %c0_30, %c0_31] : memref<4x64x32xf32, #tpu.memory_space<vmem>>, vector<4x64x32xf32>
      tpu.vector_store %arg22[%c0_29, %c0_30, %c0_31], %47 {strides = array<i32>} : memref<4x64x32xf32, #tpu.memory_space<vmem>>, vector<4x64x32xf32>,
      %c0_32 = arith.constant 0 : index
      %c0_33 = arith.constant 0 : index
      %c0_34 = arith.constant 0 : index
      %49 = vector.load %arg20[%c0_32, %c0_33, %c0_34] : memref<4x64x1xf32, #tpu.memory_space<vmem>>, vector<4x64x1xf32>
      tpu.vector_store %arg20[%c0_32, %c0_33, %c0_34], %28 {strides = array<i32>} : memref<4x64x1xf32, #tpu.memory_space<vmem>>, vector<4x64x1xf32>,
      %c0_35 = arith.constant 0 : index
      %c0_36 = arith.constant 0 : index
      %c0_37 = arith.constant 0 : index
      %50 = vector.load %arg21[%c0_35, %c0_36, %c0_37] : memref<4x64x1xf32, #tpu.memory_space<vmem>>, vector<4x64x1xf32>
      %51 = tpu.reciprocal %50 {approx = true} : vector<4x64x1xf32> -> vector<4x64x1xf32>
      %c0_38 = arith.constant 0 : index
      %c0_39 = arith.constant 0 : index
      %c0_40 = arith.constant 0 : index
      %52 = vector.load %arg22[%c0_38, %c0_39, %c0_40] : memref<4x64x32xf32, #tpu.memory_space<vmem>>, vector<4x64x32xf32>
      %53 = vector.broadcast %51 : vector<4x64x1xf32> to vector<4x64x32xf32>
      %54 = arith.mulf %52, %53 : vector<4x64x32xf32>
      %55 = tpu.transpose %54, [1, 0, 2] : vector<4x64x32xf32> -> vector<64x4x32xf32>
      %56 = vector.shape_cast %55 : vector<64x4x32xf32> to vector<64x128xf32>
      %57 = arith.truncf %56 : vector<64x128xf32> to vector<64x128xbf16>
      %c0_41 = arith.constant 0 : index
      %c0_42 = arith.constant 0 : index
      %58 = vector.load %arg10[%c0_41, %c0_42] : memref<128x128xbf16, #tpu.memory_space<vmem>>, vector<128x128xbf16>
      %cst_43 = arith.constant dense<0.000000e+00> : vector<64x128xf32>
      %59 = tpu.matmul %57, %58, %cst_43 {dimension_numbers = #tpu.dot_dimension_numbers<[1], [0], [0], [1], [0, 0, 1, 1], [], []>} : vector<64x128xbf16>, vector<128x128xbf16>, vector<64x128xf32> -> vector<64x128xf32>
      %c0_44 = arith.constant 0 : index
      %c0_45 = arith.constant 0 : index
      %60 = vector.load %arg11[%c0_44, %c0_45] : memref<1x128xf32, #tpu.memory_space<vmem>>, vector<1x128xf32>
      %61 = vector.broadcast %60 : vector<1x128xf32> to vector<64x128xf32>
      %62 = arith.addf %59, %61 : vector<64x128xf32>
      %c0_46 = arith.constant 0 : index
      %c0_47 = arith.constant 0 : index
      %c0_48 = arith.constant 0 : index
      %63 = vector.load %arg4[%c0_46, %c0_47, %c0_48] : memref<1x64x128xf32, #tpu.memory_space<vmem>>, vector<1x64x128xf32>
      %64 = vector.shape_cast %63 : vector<1x64x128xf32> to vector<64x128xf32>
      %65 = arith.addf %64, %62 : vector<64x128xf32>
      %c0_49 = arith.constant 0 : index
      %c0_50 = arith.constant 0 : index
      %66 = vector.load %arg12[%c0_49, %c0_50] : memref<1x128xf32, #tpu.memory_space<vmem>>, vector<1x128xf32>
      %c0_51 = arith.constant 0 : index
      %c0_52 = arith.constant 0 : index
      %67 = vector.load %arg13[%c0_51, %c0_52] : memref<1x128xf32, #tpu.memory_space<vmem>>, vector<1x128xf32>
      %cst_53 = arith.constant dense<0.000000e+00> : vector<64xf32>
      %68 = vector.multi_reduction <add>, %65, %cst_53 [1] : vector<64x128xf32> to vector<64xf32>
      %69 = vector.shape_cast %68 : vector<64xf32> to vector<64x1xf32>
      %cst_54 = arith.constant 1.280000e+02 : f32
      %70 = vector.broadcast %cst_54 : f32 to vector<64x1xf32>
      %71 = arith.divf %69, %70 : vector<64x1xf32>
      %72 = vector.broadcast %71 : vector<64x1xf32> to vector<64x128xf32>
      %73 = arith.subf %65, %72 : vector<64x128xf32>
      %74 = arith.mulf %73, %73 : vector<64x128xf32>
      %cst_55 = arith.constant dense<0.000000e+00> : vector<64xf32>
      %75 = vector.multi_reduction <add>, %74, %cst_55 [1] : vector<64x128xf32> to vector<64xf32>
      %76 = vector.shape_cast %75 : vector<64xf32> to vector<64x1xf32>
      %cst_56 = arith.constant 1.280000e+02 : f32
      %77 = vector.broadcast %cst_56 : f32 to vector<64x1xf32>
      %78 = arith.divf %76, %77 : vector<64x1xf32>
      %79 = vector.broadcast %71 : vector<64x1xf32> to vector<64x128xf32>
      %80 = arith.subf %65, %79 : vector<64x128xf32>
      %cst_57 = arith.constant 9.99999974E-6 : f32
      %81 = vector.broadcast %cst_57 : f32 to vector<64x1xf32>
      %82 = arith.addf %78, %81 : vector<64x1xf32>
      %83 = math.rsqrt %82 : vector<64x1xf32>
      %84 = vector.broadcast %83 : vector<64x1xf32> to vector<64x128xf32>
      %85 = arith.mulf %80, %84 : vector<64x128xf32>
      %86 = vector.broadcast %66 : vector<1x128xf32> to vector<64x128xf32>
      %87 = arith.mulf %85, %86 : vector<64x128xf32>
      %88 = vector.broadcast %67 : vector<1x128xf32> to vector<64x128xf32>
      %89 = arith.addf %87, %88 : vector<64x128xf32>
      %90 = arith.truncf %89 : vector<64x128xf32> to vector<64x128xbf16>
      %c0_58 = arith.constant 0 : index
      %c0_59 = arith.constant 0 : index
      %91 = vector.load %arg14[%c0_58, %c0_59] : memref<128x512xbf16, #tpu.memory_space<vmem>>, vector<128x512xbf16>
      %cst_60 = arith.constant dense<0.000000e+00> : vector<64x512xf32>
      %92 = tpu.matmul %90, %91, %cst_60 {dimension_numbers = #tpu.dot_dimension_numbers<[1], [0], [0], [1], [0, 0, 1, 1], [], []>} : vector<64x128xbf16>, vector<128x512xbf16>, vector<64x512xf32> -> vector<64x512xf32>
      %c0_61 = arith.constant 0 : index
      %c0_62 = arith.constant 0 : index
      %93 = vector.load %arg15[%c0_61, %c0_62] : memref<1x512xf32, #tpu.memory_space<vmem>>, vector<1x512xf32>
      %94 = vector.broadcast %93 : vector<1x512xf32> to vector<64x512xf32>
      %95 = arith.addf %92, %94 : vector<64x512xf32>
      %cst_63 = arith.constant 0.000000e+00 : f32
      %96 = vector.broadcast %cst_63 : f32 to vector<64x512xf32>
      %97 = arith.maximumf %95, %96 : vector<64x512xf32>
      %98 = arith.truncf %97 : vector<64x512xf32> to vector<64x512xbf16>
      %c0_64 = arith.constant 0 : index
      %c0_65 = arith.constant 0 : index
      %99 = vector.load %arg16[%c0_64, %c0_65] : memref<512x128xbf16, #tpu.memory_space<vmem>>, vector<512x128xbf16>
      %cst_66 = arith.constant dense<0.000000e+00> : vector<64x128xf32>
      %100 = tpu.matmul %98, %99, %cst_66 {dimension_numbers = #tpu.dot_dimension_numbers<[1], [0], [0], [1], [0, 0, 1, 1], [], []>} : vector<64x512xbf16>, vector<512x128xbf16>, vector<64x128xf32> -> vector<64x128xf32>
      %c0_67 = arith.constant 0 : index
      %c0_68 = arith.constant 0 : index
      %101 = vector.load %arg17[%c0_67, %c0_68] : memref<1x128xf32, #tpu.memory_space<vmem>>, vector<1x128xf32>
      %102 = vector.broadcast %101 : vector<1x128xf32> to vector<64x128xf32>
      %103 = arith.addf %100, %102 : vector<64x128xf32>
      %104 = arith.addf %65, %103 : vector<64x128xf32>
      %c0_69 = arith.constant 0 : index
      %c0_70 = arith.constant 0 : index
      %c0_71 = arith.constant 0 : index
      %105 = vector.load %arg18[%c0_69, %c0_70, %c0_71] : memref<1x64x128xf32, #tpu.memory_space<vmem>>, vector<1x64x128xf32>
      %106 = vector.shape_cast %105 : vector<1x64x128xf32> to vector<64x128xf32>
      %107 = vector.shape_cast %104 : vector<64x128xf32> to vector<1x64x128xf32>
      tpu.vector_store %arg18[%c0_69, %c0_70, %c0_71], %107 {strides = array<i32>} : memref<1x64x128xf32, #tpu.memory_space<vmem>>, vector<1x64x128xf32>,
    } else {
    }
    return
  }
  func.func @transform_0(%arg0: i32, %arg1: i32, %arg2: memref<6xi32, #tpu.memory_space<smem>>, %arg3: memref<6xi32, #tpu.memory_space<smem>>) -> (i32, i32, i32) {
    %0 = arith.index_cast %arg1 : i32 to index
    %1 = memref.load %arg2[%0] : memref<6xi32, #tpu.memory_space<smem>>
    %c0_i32 = arith.constant 0 : i32
    %c0_i32_0 = arith.constant 0 : i32
    return %arg0, %1, %c0_i32 : i32, i32, i32
  }
  func.func @transform_1(%arg0: i32, %arg1: i32, %arg2: memref<6xi32, #tpu.memory_space<smem>>, %arg3: memref<6xi32, #tpu.memory_space<smem>>) -> (i32, i32, i32, i32) {
    %0 = arith.index_cast %arg1 : i32 to index
    %1 = memref.load %arg3[%0] : memref<6xi32, #tpu.memory_space<smem>>
    %c0_i32 = arith.constant 0 : i32
    %c0_i32_0 = arith.constant 0 : i32
    %c0_i32_1 = arith.constant 0 : i32
    return %arg0, %c0_i32, %1, %c0_i32_0 : i32, i32, i32, i32
  }
  func.func @transform_2(%arg0: i32, %arg1: i32, %arg2: memref<6xi32, #tpu.memory_space<smem>>, %arg3: memref<6xi32, #tpu.memory_space<smem>>) -> (i32, i32, i32, i32) {
    %0 = arith.index_cast %arg1 : i32 to index
    %1 = memref.load %arg3[%0] : memref<6xi32, #tpu.memory_space<smem>>
    %c0_i32 = arith.constant 0 : i32
    %c0_i32_0 = arith.constant 0 : i32
    %c0_i32_1 = arith.constant 0 : i32
    return %arg0, %c0_i32, %1, %c0_i32_0 : i32, i32, i32, i32
  }
  func.func @transform_3(%arg0: i32, %arg1: i32, %arg2: memref<6xi32, #tpu.memory_space<smem>>, %arg3: memref<6xi32, #tpu.memory_space<smem>>) -> (i32, i32) {
    %c0_i32 = arith.constant 0 : i32
    %c0_i32_0 = arith.constant 0 : i32
    %c0_i32_1 = arith.constant 0 : i32
    return %c0_i32, %c0_i32_0 : i32, i32
  }
  func.func @transform_4(%arg0: i32, %arg1: i32, %arg2: memref<6xi32, #tpu.memory_space<smem>>, %arg3: memref<6xi32, #tpu.memory_space<smem>>) -> (i32, i32) {
    %c0_i32 = arith.constant 0 : i32
    %c0_i32_0 = arith.constant 0 : i32
    %c0_i32_1 = arith.constant 0 : i32
    return %c0_i32, %c0_i32_0 : i32, i32
  }
  func.func @transform_5(%arg0: i32, %arg1: i32, %arg2: memref<6xi32, #tpu.memory_space<smem>>, %arg3: memref<6xi32, #tpu.memory_space<smem>>) -> (i32, i32) {
    %c0_i32 = arith.constant 0 : i32
    %c0_i32_0 = arith.constant 0 : i32
    %c0_i32_1 = arith.constant 0 : i32
    return %c0_i32, %c0_i32_0 : i32, i32
  }
  func.func @transform_6(%arg0: i32, %arg1: i32, %arg2: memref<6xi32, #tpu.memory_space<smem>>, %arg3: memref<6xi32, #tpu.memory_space<smem>>) -> (i32, i32) {
    %c0_i32 = arith.constant 0 : i32
    %c0_i32_0 = arith.constant 0 : i32
    %c0_i32_1 = arith.constant 0 : i32
    return %c0_i32, %c0_i32_0 : i32, i32
  }
  func.func @transform_7(%arg0: i32, %arg1: i32, %arg2: memref<6xi32, #tpu.memory_space<smem>>, %arg3: memref<6xi32, #tpu.memory_space<smem>>) -> (i32, i32) {
    %c0_i32 = arith.constant 0 : i32
    %c0_i32_0 = arith.constant 0 : i32
    %c0_i32_1 = arith.constant 0 : i32
    return %c0_i32, %c0_i32_0 : i32, i32
  }
  func.func @transform_8(%arg0: i32, %arg1: i32, %arg2: memref<6xi32, #tpu.memory_space<smem>>, %arg3: memref<6xi32, #tpu.memory_space<smem>>) -> (i32, i32) {
    %c0_i32 = arith.constant 0 : i32
    %c0_i32_0 = arith.constant 0 : i32
    %c0_i32_1 = arith.constant 0 : i32
    return %c0_i32, %c0_i32_0 : i32, i32
  }
  func.func @transform_9(%arg0: i32, %arg1: i32, %arg2: memref<6xi32, #tpu.memory_space<smem>>, %arg3: memref<6xi32, #tpu.memory_space<smem>>) -> (i32, i32) {
    %c0_i32 = arith.constant 0 : i32
    %c0_i32_0 = arith.constant 0 : i32
    %c0_i32_1 = arith.constant 0 : i32
    return %c0_i32, %c0_i32_0 : i32, i32
  }
  func.func @transform_10(%arg0: i32, %arg1: i32, %arg2: memref<6xi32, #tpu.memory_space<smem>>, %arg3: memref<6xi32, #tpu.memory_space<smem>>) -> (i32, i32) {
    %c0_i32 = arith.constant 0 : i32
    %c0_i32_0 = arith.constant 0 : i32
    %c0_i32_1 = arith.constant 0 : i32
    return %c0_i32, %c0_i32_0 : i32, i32
  }
  func.func @transform_11(%arg0: i32, %arg1: i32, %arg2: memref<6xi32, #tpu.memory_space<smem>>, %arg3: memref<6xi32, #tpu.memory_space<smem>>) -> (i32, i32) {
    %c0_i32 = arith.constant 0 : i32
    %c0_i32_0 = arith.constant 0 : i32
    %c0_i32_1 = arith.constant 0 : i32
    return %c0_i32, %c0_i32_0 : i32, i32
  }
  func.func @transform_12(%arg0: i32, %arg1: i32, %arg2: memref<6xi32, #tpu.memory_space<smem>>, %arg3: memref<6xi32, #tpu.memory_space<smem>>) -> (i32, i32) {
    %c0_i32 = arith.constant 0 : i32
    %c0_i32_0 = arith.constant 0 : i32
    %c0_i32_1 = arith.constant 0 : i32
    return %c0_i32, %c0_i32_0 : i32, i32
  }
  func.func @transform_13(%arg0: i32, %arg1: i32, %arg2: memref<6xi32, #tpu.memory_space<smem>>, %arg3: memref<6xi32, #tpu.memory_space<smem>>) -> (i32, i32) {
    %c0_i32 = arith.constant 0 : i32
    %c0_i32_0 = arith.constant 0 : i32
    %c0_i32_1 = arith.constant 0 : i32
    return %c0_i32, %c0_i32_0 : i32, i32
  }
  func.func @transform_14(%arg0: i32, %arg1: i32, %arg2: memref<6xi32, #tpu.memory_space<smem>>, %arg3: memref<6xi32, #tpu.memory_space<smem>>) -> (i32, i32, i32) {
    %0 = arith.index_cast %arg1 : i32 to index
    %1 = memref.load %arg2[%0] : memref<6xi32, #tpu.memory_space<smem>>
    %c0_i32 = arith.constant 0 : i32
    %c0_i32_0 = arith.constant 0 : i32
    return %arg0, %1, %c0_i32 : i32, i32, i32
  }
}

</mosaic_0001>

<bundles_post_ra>
// kernel: _lambda_.1
= control target key start
LH: loop header
LB: loop body
LE: loop exit
PB: predicated region body
PF: predicated region fallthrough
CT: control target
= control target key end

     0   :  { %s10498_s27 = smov [#allocation7]   ;;  %s10499_s28 = smov [#allocation8]   ;;  %s15023_s0 = inlined_call_operand.vmem [shape: s32[6], index: 0, kind: input, shape index: {}]   ;;  %s15024_s2 = inlined_call_operand.vmem [shape: f32[2,192,128], index: 2, kind: input, shape index: {}]   ;;  %s15025_s3 = inlined_call_operand.vmem [shape: bf16[2,4,192,32], index: 3, kind: input, shape index: {}]   ;;  %s15026_s4 = inlined_call_operand.vmem [shape: bf16[2,4,192,32], index: 4, kind: input, shape index: {}]   ;;  %s15027_s5 = inlined_call_operand.vmem [shape: f32[1,128], index: 5, kind: input, shape index: {}]   ;;  %s15028_s6 = inlined_call_operand.vmem [shape: f32[1,128], index: 6, kind: input, shape index: {}]   ;;  %s15029_s7 = inlined_call_operand.vmem [shape: bf16[128,128], index: 7, kind: input, shape index: {}]   ;;  %s15030_s8 = inlined_call_operand.vmem [shape: bf16[128,128], index: 8, kind: input, shape index: {}]   ;;  %s15031_s9 = inlined_call_operand.vmem [shape: f32[1,128], index: 9, kind: input, shape index: {}]   ;;  %s15032_s10 = inlined_call_operand.vmem [shape: f32[1,128], index: 10, kind: input, shape index: {}]   ;;  %s15033_s11 = inlined_call_operand.vmem [shape: f32[1,128], index: 11, kind: input, shape index: {}]   ;;  %s15034_s12 = inlined_call_operand.vmem [shape: bf16[128,512], index: 12, kind: input, shape index: {}]   ;;  %s15035_s13 = inlined_call_operand.vmem [shape: f32[1,512], index: 13, kind: input, shape index: {}]   ;;  %s15036_s14 = inlined_call_operand.vmem [shape: bf16[512,128], index: 14, kind: input, shape index: {}]   ;;  %s15037_s15 = inlined_call_operand.vmem [shape: f32[1,128], index: 15, kind: input, shape index: {}]   ;;  %s15038_s16 = inlined_call_operand.hbm [shape: f32[2,192,128], index: 16, kind: output, shape index: {}]   ;;  %s15039_s1 = inlined_call_operand.vmem [shape: s32[6], index: 1, kind: input, shape index: {}]  }
   0x1   :  { %15130 = sst [smem:[#allocation99_spill]] %s15023_s0  ;;  %s27_s26 = sshll.u32 %s15039_s1, 4  ;;  %s28_s26 = int_to_ptr.vmem [resolvable:$true] %s27_s26 }
   0x2   :  { %15131 = sst [smem:[#allocation100_spill]] %s15024_s2 }
   0x3   :  { %15132 = sst [smem:[#allocation101_spill]] %s15025_s3 }
   0x4   :  { %15133 = sst [smem:[#allocation102_spill]] %s15026_s4 }
   0x5   :  { %15134 = sst [smem:[#allocation103_spill]] %s15027_s5 }
   0x6   :  { %15135 = sst [smem:[#allocation104_spill]] %s15028_s6 }
   0x7   :  { %15136 = sst [smem:[#allocation105_spill]] %s15029_s7 }
   0x8   :  { %15137 = sst [smem:[#allocation106_spill]] %s15030_s8 }
   0x9   :  { %15138 = sst [smem:[#allocation107_spill]] %s15031_s9 }
   0xa   :  { %15139 = sst [smem:[#allocation108_spill]] %s15032_s10 }
   0xb   :  { %15140 = sst [smem:[#allocation109_spill]] %s15033_s11 }
   0xc   :  { %15141 = sst [smem:[#allocation110_spill]] %s15034_s12 }
   0xd   :  { %15142 = sst [smem:[#allocation111_spill]] %s15035_s13 }
   0xe   :  { %15143 = sst [smem:[#allocation112_spill]] %s15036_s14 }
   0xf   :  { %15144 = sst [smem:[#allocation113_spill]] %s15037_s15 }
  0x10   :  { %15145 = sst [smem:[#allocation114_spill]] %s15038_s16 }
  0x11   :  { %s15146_s23 = sld [smem:[#allocation99_spill]] }
  0x17   :  { %s22_s11 = sshll.u32 %s15146_s23, 4  ;;  %s23_s11 = int_to_ptr.vmem [resolvable:$true] %s22_s11 }
  0x18   :  { %25 = dma.vmem_to_smem %s23_s11, 16, %s10498_s27, [#allocation6] }
  0x19   :  { %30 = dma.vmem_to_smem %s28_s26, 16, %s10499_s28, [#allocation6] }
  0x1a   :  { %10444 = dma.done.wait [#allocation6], 32 }
  0x1b   :  { %10445 = vsyncadd [#allocation6], 4294967264 }
  0x1c   :  { %33 = sfence }
  0x1d   :  { %34 = vsyncpa [#allocation12], 0 }
  0x1e   :  { %36 = vsyncpa [#allocation12 + $0x1], 0  ;;  %s10609_s29 = smov 0   ;;  %s10611_s30 = smov 0  }
  0x1f   :  { %s10613_s0 = smov 0   ;;  %s10615_s17 = smov 0  }
  0x20   :  { %s10617_s1 = smov 0   ;;  %s10619_s18 = smov 0  }
  0x21   :  { %s10621_s11 = smov 0   ;;  %s10623_s19 = smov 0  }
  0x22   :  { %s10625_s20 = smov 0   ;;  %s10627_s21 = smov 0  }
  0x23   :  { %s10629_s22 = smov 0   ;;  %s10631_s23 = smov 0  }
  0x24 LB: > { %15147 = sst [smem:[#allocation16_spill]] %s10464_s17  ;;  %s51_s26 = sadd.s32 1, %s10488_s21  ;;  %s10496_s23 = sphi %s10631_s23, %s42_s23   ;;  %s10492_s22 = sphi %s10629_s22, %s15383_s22   ;;  %s10488_s21 = sphi %s10627_s21, %s15392_s21   ;;  %s10484_s20 = sphi %s10625_s20, %s15381_s20   ;;  %s10480_s19 = sphi %s10623_s19, %s15391_s19   ;;  %s10476_s11 = sphi %s10621_s11, %s15390_s11   ;;  %s10472_s18 = sphi %s10619_s18, %s15389_s18   ;;  %s10468_s1 = sphi %s10617_s1, %s15388_s1   ;;  %s10464_s17 = sphi %s10615_s17, %s15387_s17   ;;  %s10460_s0 = sphi %s10613_s0, %s15386_s0   ;;  %s10456_s30 = sphi %s10611_s30, %s15385_s30   ;;  %s10452_s29 = sphi %s10609_s29, %s15384_s29  }
  0x25   : > { %15148 = sst [smem:[#allocation17_spill]] %s10480_s19  ;;  %s54_s27 = sadd.s32 1, %s10492_s22 }
  0x26   : > { %15149 = sst [smem:[#allocation18_spill]] %s10484_s20  ;;  %p52_p0 = scmp.ge.s32.totalorder %s51_s26, 6 }
  0x27   : > { %15150 = sst [smem:[#allocation19_spill]] %s10488_s21  ;;  %s95_s16 = sadd.s32 1, %s10476_s11 }
  0x28   : > { %15151 = sst [smem:[#allocation20_spill]] %s10492_s22  ;;  %p102_p1 = scmp.ne.s32.totalorder %s10476_s11, %s10472_s18 }
  0x29   : > { %s88_s28 = sld [smem:[#allocation8 + %s10488_s21]]  ;;  %s15394_s26 = smov (%p52_p0, %s51_s26), 0 }
  0x2a   : > { %15152 = sst [smem:[#allocation21_spill]] %s15394_s26  ;;  %s15396_s27 = smov (!%p52_p0, %s54_s27), %s10492_s22 }
  0x2b   : > { %s89_s15 = sld [smem:[#allocation8 + %s15394_s26]]  ;;  %p103_p2 = scmp.eq.s32.totalorder %s10496_s23, 0 }
  0x2c   : > { %p56_p3 = scmp.ge.s32.totalorder %s15396_s27, 2  ;;  %s118_s25 = sld [smem:[#allocation8 + %s10488_s21]] }
  0x2d   : > { %p10683_p4 = por %p103_p2, %p102_p1  ;;  %s119_s13 = sld [smem:[#allocation8 + %s15394_s26]] }
  0x2e   : > { %s15398_s27 = smov (%p56_p3, %s15396_s27), 0  ;;  %s125_s14 = sadd.s32 1, %s10468_s1 }
  0x2f   : > { %15154 = sst [smem:[#allocation22_spill]] %s15398_s27  ;;  %p132_p5 = scmp.ne.s32.totalorder %s10468_s1, %s10464_s17 }
  0x30   : > { %s90_s10 = ssub.s32 %s10492_s22, %s15398_s27  ;;  %s379_s12 = sld [smem:[#allocation7 + %s10488_s21]] }
  0x31   : > { %s91_s9 = ssub.s32 %s88_s28, %s89_s15  ;;  %p10696_p6 = por %p132_p5, %p103_p2 }
  0x32   : > { %s92_s6 = sor.u32 %s91_s9, %s90_s10  ;;  %s380_s5 = sld [smem:[#allocation7 + %s15394_s26]] }
  0x33   : > { %p93_p7 = scmp.eq.s32.totalorder %s92_s6, 0  ;;  %s121_s7 = ssub.s32 %s118_s25, %s119_s13 }
  0x34   : > { %s122_s2 = sor.u32 %s121_s7, %s90_s10  ;;  %s386_s20 = sadd.s32 1, %s10460_s0 }
  0x35   : > { %s10703_s19 = scalar_select %p93_p7, %s10476_s11, %s95_s16  }
  0x36   : > { %p123_p8 = scmp.eq.s32.totalorder %s122_s2, 0  ;;  %p396_p9 = scmp.ne.s32.totalorder %s10460_s0, %s10456_s30 }
  0x37   : > { %s15156_s17 = sadd.s32 4294967295, %s10496_s23   ;;  %p402_p11 = scmp.ne.s32.totalorder %s10456_s30, %s10452_s29 }
  0x38   : > { %p397_p10 = scmp.eq.s32.totalorder %s15156_s17, 11  ;;  %s382_s28 = ssub.s32 %s379_s12, %s380_s5 }
  0x39   : > { %s10712_s15 = scalar_select %p123_p8, %s10468_s1, %s125_s14  }
  0x3a   : > { %p10714_p12 = por %p397_p10, %p396_p9  ;;  %s383_s9 = sor.u32 %s382_s28, %s90_s10 }
  0x3b   : > { %s15158_s6 = sadd.s32 4294967294, %s10496_s23   ;;  %p384_p0 = scmp.eq.s32.totalorder %s383_s9, 0 }
  0x3c   : > { %p403_p13 = scmp.eq.s32.totalorder %s15158_s6, 11  ;;  %p8722_p2 = scmp.ge.s32.totalorder %s10496_s23, 12 }
  0x3d   : > { %s10725_s2 = scalar_select %p384_p0, %s10460_s0, %s386_s20  }
  0x3e   : > { %p10720_p1 = por %p403_p13, %p402_p11  ;;  %452 = sbr.rel (%p8722_p2) target bundleno = 121 (0x79), region = 60 }
  0x43   : > { %470 = sbr.rel (!%p10683_p4) target bundleno = 94 (0x5e), region = 68  ;;  %s475_s5 = sld [smem:[#allocation8 + %s10488_s21]] (%p10683_p4) }
  0x44   : > { %s472_s10 = sand.u32 (%p10683_p4), 1, %s10476_s11   ;;  %s9727_s12 = smul.u32 (%p10683_p4), 96, %s10492_s22 }
  0x45   : > { %s8723_s13 = sshll.u32 (%p10683_p4), %s472_s10, 7  ;;  %s15160_s3 = sld [smem:[#allocation101_spill]] (%p10683_p4) }
  0x46   : > { %s474_s24 = scalar_lea.vmem (%p10683_p4), [#allocation9], %s8723_s13 }
  0x49   : > { %s8724_s14 = sshll.u32 %s475_s5, 3 }
  0x4a   : > { %s478_s16 = sadd.s32 %s9727_s12, %s8724_s14 }
  0x4b   : > { %s8725_s17 = sshll.u32 %s478_s16, 2 }
  0x4c   : > { %s10736_s20 = scalar_lea.vmem %s15160_s3, %s8725_s17 }
  0x4d   : > { %v497_v0 = vld [vmem:[%s10736_s20] sm:$0xff]   ;;  %v501_v1 = vld [vmem:[%s10736_s20 + $0x8] sm:$0xff]   ;;  %v505_v2 = vld [vmem:[%s10736_s20 + $0x10] sm:$0xff]  }
  0x4e   : > { %498 = vst [vmem:[%s474_s24] sm:$0xff] %v497_v0   ;;  %v509_v3 = vld [vmem:[%s10736_s20 + $0x18] sm:$0xff]   ;;  %v513_v4 = vld [vmem:[%s10736_s20 + $0x60] sm:$0xff]   ;;  %v517_v5 = vld [vmem:[%s10736_s20 + $0x68] sm:$0xff]  }
  0x4f   : > { %502 = vst [vmem:[%s474_s24 + $0x8] sm:$0xff] %v501_v1   ;;  %v521_v6 = vld [vmem:[%s10736_s20 + $0x70] sm:$0xff]   ;;  %v525_v7 = vld [vmem:[%s10736_s20 + $0x78] sm:$0xff]   ;;  %v529_v8 = vld [vmem:[%s10736_s20 + $0xc0] sm:$0xff]  }
  0x50   : > { %506 = vst [vmem:[%s474_s24 + $0x10] sm:$0xff] %v505_v2   ;;  %v533_v9 = vld [vmem:[%s10736_s20 + $0xc8] sm:$0xff]   ;;  %v537_v10 = vld [vmem:[%s10736_s20 + $0xd0] sm:$0xff]   ;;  %v541_v11 = vld [vmem:[%s10736_s20 + $0xd8] sm:$0xff]  }
  0x51   : > { %510 = vst [vmem:[%s474_s24 + $0x18] sm:$0xff] %v509_v3   ;;  %v545_v12 = vld [vmem:[%s10736_s20 + $0x120] sm:$0xff]   ;;  %v549_v13 = vld [vmem:[%s10736_s20 + $0x128] sm:$0xff]   ;;  %v553_v14 = vld [vmem:[%s10736_s20 + $0x130] sm:$0xff]  }
  0x52   : > { %514 = vst [vmem:[%s474_s24 + $0x20] sm:$0xff] %v513_v4   ;;  %v557_v15 = vld [vmem:[%s10736_s20 + $0x138] sm:$0xff]  }
  0x53   : > { %518 = vst [vmem:[%s474_s24 + $0x28] sm:$0xff] %v517_v5  }
  0x54   : > { %522 = vst [vmem:[%s474_s24 + $0x30] sm:$0xff] %v521_v6  }
  0x55   : > { %526 = vst [vmem:[%s474_s24 + $0x38] sm:$0xff] %v525_v7  }
  0x56   : > { %530 = vst [vmem:[%s474_s24 + $0x40] sm:$0xff] %v529_v8  }
  0x57   : > { %534 = vst [vmem:[%s474_s24 + $0x48] sm:$0xff] %v533_v9  }
  0x58   : > { %538 = vst [vmem:[%s474_s24 + $0x50] sm:$0xff] %v537_v10  }
  0x59   : > { %542 = vst [vmem:[%s474_s24 + $0x58] sm:$0xff] %v541_v11  }
  0x5a   : > { %546 = vst [vmem:[%s474_s24 + $0x60] sm:$0xff] %v545_v12  }
  0x5b   : > { %550 = vst [vmem:[%s474_s24 + $0x68] sm:$0xff] %v549_v13  }
  0x5c   : > { %554 = vst [vmem:[%s474_s24 + $0x70] sm:$0xff] %v553_v14  }
  0x5d   : > { %558 = vst [vmem:[%s474_s24 + $0x78] sm:$0xff] %v557_v15  }
  0x5e PF: > { %648 = sbr.rel (!%p10696_p6) target bundleno = 121 (0x79), region = 109  ;;  %s653_s9 = sld [smem:[#allocation8 + %s10488_s21]] (%p10696_p6) }
  0x5f   : > { %s650_s6 = sand.u32 (%p10696_p6), 1, %s10468_s1   ;;  %s9728_s5 = smul.u32 (%p10696_p6), 96, %s10492_s22 }
  0x60   : > { %s8726_s10 = sshll.u32 (%p10696_p6), %s650_s6, 7  ;;  %s15161_s4 = sld [smem:[#allocation102_spill]] (%p10696_p6) }
  0x61   : > { %s652_s8 = scalar_lea.vmem (%p10696_p6), [#allocation10], %s8726_s10 }
  0x64   : > { %s8727_s12 = sshll.u32 %s653_s9, 3 }
  0x65   : > { %s656_s13 = sadd.s32 %s9728_s5, %s8727_s12 }
  0x66   : > { %s8728_s14 = sshll.u32 %s656_s13, 2 }
  0x67   : > { %s10762_s25 = scalar_lea.vmem %s15161_s4, %s8728_s14 }
  0x68   : > { %v675_v16 = vld [vmem:[%s10762_s25] sm:$0xff]   ;;  %v679_v17 = vld [vmem:[%s10762_s25 + $0x8] sm:$0xff]   ;;  %v683_v18 = vld [vmem:[%s10762_s25 + $0x10] sm:$0xff]  }
  0x69   : > { %676 = vst [vmem:[%s652_s8] sm:$0xff] %v675_v16   ;;  %v687_v19 = vld [vmem:[%s10762_s25 + $0x18] sm:$0xff]   ;;  %v691_v20 = vld [vmem:[%s10762_s25 + $0x60] sm:$0xff]   ;;  %v695_v21 = vld [vmem:[%s10762_s25 + $0x68] sm:$0xff]  }
  0x6a   : > { %680 = vst [vmem:[%s652_s8 + $0x8] sm:$0xff] %v679_v17   ;;  %v699_v22 = vld [vmem:[%s10762_s25 + $0x70] sm:$0xff]   ;;  %v703_v23 = vld [vmem:[%s10762_s25 + $0x78] sm:$0xff]   ;;  %v707_v24 = vld [vmem:[%s10762_s25 + $0xc0] sm:$0xff]  }
  0x6b   : > { %684 = vst [vmem:[%s652_s8 + $0x10] sm:$0xff] %v683_v18   ;;  %v711_v25 = vld [vmem:[%s10762_s25 + $0xc8] sm:$0xff]   ;;  %v715_v26 = vld [vmem:[%s10762_s25 + $0xd0] sm:$0xff]   ;;  %v719_v27 = vld [vmem:[%s10762_s25 + $0xd8] sm:$0xff]  }
  0x6c   : > { %688 = vst [vmem:[%s652_s8 + $0x18] sm:$0xff] %v687_v19   ;;  %v723_v28 = vld [vmem:[%s10762_s25 + $0x120] sm:$0xff]   ;;  %v727_v29 = vld [vmem:[%s10762_s25 + $0x128] sm:$0xff]   ;;  %v731_v30 = vld [vmem:[%s10762_s25 + $0x130] sm:$0xff]  }
  0x6d   : > { %692 = vst [vmem:[%s652_s8 + $0x20] sm:$0xff] %v691_v20   ;;  %v735_v31 = vld [vmem:[%s10762_s25 + $0x138] sm:$0xff]  }
  0x6e   : > { %696 = vst [vmem:[%s652_s8 + $0x28] sm:$0xff] %v695_v21  }
  0x6f   : > { %700 = vst [vmem:[%s652_s8 + $0x30] sm:$0xff] %v699_v22  }
  0x70   : > { %704 = vst [vmem:[%s652_s8 + $0x38] sm:$0xff] %v703_v23  }
  0x71   : > { %708 = vst [vmem:[%s652_s8 + $0x40] sm:$0xff] %v707_v24  }
  0x72   : > { %712 = vst [vmem:[%s652_s8 + $0x48] sm:$0xff] %v711_v25  }
  0x73   : > { %716 = vst [vmem:[%s652_s8 + $0x50] sm:$0xff] %v715_v26  }
  0x74   : > { %720 = vst [vmem:[%s652_s8 + $0x58] sm:$0xff] %v719_v27  }
  0x75   : > { %724 = vst [vmem:[%s652_s8 + $0x60] sm:$0xff] %v723_v28  }
  0x76   : > { %728 = vst [vmem:[%s652_s8 + $0x68] sm:$0xff] %v727_v29  }
  0x77   : > { %732 = vst [vmem:[%s652_s8 + $0x70] sm:$0xff] %v731_v30  }
  0x78   : > { %736 = vst [vmem:[%s652_s8 + $0x78] sm:$0xff] %v735_v31  }
  0x79 PF: > { %p8729_p3 = scmp.ge.s32.totalorder %s10496_s23, 1  ;;  %p825_p4 = scmp.lt.s32.totalorder %s10496_s23, 13 }
  0x7b   : > { %p826_p5 = pnand %p8729_p3, %p825_p4 }
  0x7c   : > { %s15162_s28 = sld [smem:[#allocation16_spill]] (!%p826_p5)  ;;  %s832_s9 = sand.u32 (!%p826_p5), 1, %s10472_s18  }
  0x7d   : > { %829 = sbr.rel (%p826_p5) target bundleno = 3444 (0xd74), region = 150  ;;  %s15163_s20 = sld [smem:[#allocation17_spill]] (!%p826_p5) }
  0x7e   : > { %s15164_s24 = sld [smem:[#allocation18_spill]] (!%p826_p5)  ;;  %s8730_s5 = sshll.u32 (!%p826_p5), %s832_s9, 7 }
  0x7f   : > { %s15050_s12 = sand.u32 (!%p826_p5), 1, %s10456_s30   ;;  %s15165_s9 = sld [smem:[#allocation100_spill]] (!%p826_p5) }
  0x80   : > { %s8732_s14 = sshll.u32 (!%p826_p5), %s15050_s12, 6  ;;  %s10801_s26 = scalar_lea.vmem (!%p826_p5), [#allocation9], %s8730_s5 }
  0x81   : > { %s10805_s22 = scalar_lea.vmem (!%p826_p5), [#allocation11], %s8732_s14 }
  0x82   : > { %s839_s6 = sand.u32 1, %s15162_s28  }
  0x83   : > { %s8731_s10 = sshll.u32 %s839_s6, 7  ;;  %s898_s13 = sld [smem:[#allocation7 + %s15163_s20]] }
  0x84   : > { %p900_p6 = scmp.lt.s32.totalorder %s15164_s24, 1  ;;  %s10790_s16 = sld [smem:[#allocation7 + %s15163_s20]] }
  0x85   : > { %s10794_s17 = sld [smem:[#allocation8 + %s15163_s20]]  ;;  %s10803_s12 = scalar_lea.vmem [#allocation10], %s8731_s10 }
  0x86   : > { %s15400_s24 = smov (!%p900_p6, %s15164_s24), 1 }
  0x87   : > { %s9729_s8 = smul.u32 24, %s15400_s24 }
  0x89   : > { %s8733_s25 = sshll.u32 %s898_s13, 3 }
  0x8a   : > { %p902_p7 = scmp.lt.s32.totalorder %s8733_s25, 23 }
  0x8b   : > { %p8735_p8 = scmp.ne.s32.totalorder %s10794_s17, 0 }
  0x8c   : > { %s15402_s25 = smov (!%p902_p7, %s8733_s25), 23  ;;  %s15166_s20 = sld [smem:[#allocation105_spill]] (!%p8735_p8) }
  0x8d   : > { %s905_s3 = sadd.s32 %s9729_s8, %s15402_s25  ;;  %922 = sbr.rel (%p8735_p8) target bundleno = 899 (0x383), region = 162 }
  0x8e   : > { %s8734_s4 = sshll.u32 %s905_s3, 3  ;;  %s15174_s25 = sld [smem:[#allocation103_spill]] (!%p8735_p8) }
  0x8f   : > { %s10799_s6 = scalar_lea.vmem %s15165_s9, %s8734_s4  ;;  %s15175_s28 = sld [smem:[#allocation104_spill]] (!%p8735_p8) }
  0x90   : > { %s10501_s9 = smov (!%p8735_p8), 64   ;;  %s10502_s3 = smov (!%p8735_p8), 96  }
  0x91   : > { %s10503_s4 = smov (!%p8735_p8), 32  }
  0x92   : > { %v929_v32 = vld [vmem:[%s10799_s6 + $0x30] sm:$0xff]  ;;  %v927_v33 = vld [vmem:[%s10799_s6 + $0x20] sm:$0xff]  ;;  %v930_v35 = vld [vmem:[%s10799_s6 + $0x38] sm:$0xff]  ;;  %v10500_v40 = vmov 128.0   ;;  %s15167_s24 = smov %s15166_s20 }
  0x93   : > { %v923_v34 = vld [vmem:[%s10799_s6] sm:$0xff]  ;;  %945 = vadd.xlane.f32.xlu1 %v929_v32  ;;  %941 = vadd.xlane.f32.xlu0 %v927_v33  ;;  %v928_v36 = vld [vmem:[%s10799_s6 + $0x28] sm:$0xff]  ;;  %v925_v38 = vld [vmem:[%s10799_s6 + $0x10] sm:$0xff]  ;;  %9918 = vrcp.f32 %v10500_v40 }
  0x94   : > { %933 = vadd.xlane.f32.xlu2 %v923_v34  ;;  %v924_v37 = vld [vmem:[%s10799_s6 + $0x8] sm:$0xff]  ;;  %v926_v39 = vld [vmem:[%s10799_s6 + $0x18] sm:$0xff]  ;;  %v9517_v16 = vld [vmem:[%s15167_s24 + $0x30] sm:$0xff] }
  0x95   : > { %v9518_v15 = vld [vmem:[%s15166_s20 + $0x38] sm:$0xff]  ;;  %v9516_v17 = vld [vmem:[%s15167_s24 + $0x28] sm:$0xff]  ;;  %v9515_v18 = vld [vmem:[%s15167_s24 + $0x20] sm:$0xff] }
  0x96   : > { %9688 = vmatpush.bf16.msra.mxu2 %v9518_v15  ;;  %9689 = vmatpush.bf16.msra.mxu3 %v9518_v15  ;;  %v9514_v19 = vld [vmem:[%s15167_s24 + $0x18] sm:$0xff]  ;;  %v9513_v20 = vld [vmem:[%s15167_s24 + $0x10] sm:$0xff]  ;;  %v9512_v23 = vld [vmem:[%s15167_s24 + $0x8] sm:$0xff] }
  0x97   : > { %1190 = vmatpush.bf16.msra.mxu0 %v9518_v15  ;;  %9687 = vmatpush.bf16.msra.mxu1 %v9518_v15  ;;  %v9511_v28 = vld [vmem:[%s15167_s24] sm:$0xff] }
  0x99   : > { %v9919_v41 = vpop.eup %9918 }
  0x9a   : > { %v950_v42 = vmul.f32 128.0, %v9919_v41  ;;  %vm954_vm0 = vweird.f32 %v9919_v41  ;;  %9691 = vmatpush.bf16.msra.mxu2 %v9517_v16  ;;  %9692 = vmatpush.bf16.msra.mxu3 %v9517_v16 }
  0x9b   : > { %947 = vadd.xlane.f32.xlu1 %v930_v35  ;;  %943 = vadd.xlane.f32.xlu0 %v928_v36 }
  0x9c   : > { %935 = vadd.xlane.f32.xlu2 %v924_v37  ;;  %v951_v43 = vsub.f32 1.0, %v950_v42  ;;  %1191 = vmatpush.bf16.msra.mxu0 %v9517_v16 }
  0x9d   : > { %9690 = vmatpush.bf16.msra.mxu1 %v9517_v16 }
  0x9e   : > { %v952_v44 = vmul.f32 %v9919_v41, %v951_v43  ;;  %9694 = vmatpush.bf16.msra.mxu2 %v9516_v17  ;;  %9695 = vmatpush.bf16.msra.mxu3 %v9516_v17 }
  0xa0   : > { %v953_v45 = vadd.f32 %v9919_v41, %v952_v44  ;;  %1192 = vmatpush.bf16.msra.mxu0 %v9516_v17 }
  0xa1   : > { %9693 = vmatpush.bf16.msra.mxu1 %v9516_v17 }
  0xa2   : > { %v10816_v46 = vsel %vm954_vm0, %v9919_v41, %v953_v45  ;;  %9697 = vmatpush.bf16.msra.mxu2 %v9515_v18  ;;  %9698 = vmatpush.bf16.msra.mxu3 %v9515_v18 }
  0xa3   : > { %937 = vadd.xlane.f32.xlu0 %v925_v38  ;;  %939 = vadd.xlane.f32.xlu1 %v926_v39 }
  0xa4   : > { %1193 = vmatpush.bf16.msra.mxu0 %v9515_v18 }
  0xa5   : > { %9696 = vmatpush.bf16.msra.mxu1 %v9515_v18 }
  0xa6   : > { %9700 = vmatpush.bf16.msra.mxu2 %v9514_v19  ;;  %9701 = vmatpush.bf16.msra.mxu3 %v9514_v19 }
  0xa8   : > { %1194 = vmatpush.bf16.msra.mxu0 %v9514_v19 }
  0xa9   : > { %9699 = vmatpush.bf16.msra.mxu1 %v9514_v19 }
  0xaa   : > { %9703 = vmatpush.bf16.msra.mxu2 %v9513_v20  ;;  %9704 = vmatpush.bf16.msra.mxu3 %v9513_v20 }
  0xac   : > { %1195 = vmatpush.bf16.msra.mxu0 %v9513_v20 }
  0xad   : > { %9702 = vmatpush.bf16.msra.mxu1 %v9513_v20 }
  0xae   : > { %9706 = vmatpush.bf16.msra.mxu2 %v9512_v23  ;;  %9707 = vmatpush.bf16.msra.mxu3 %v9512_v23 }
  0xb0   : > { %1196 = vmatpush.bf16.msra.mxu0 %v9512_v23 }
  0xb1   : > { %9705 = vmatpush.bf16.msra.mxu1 %v9512_v23 }
  0xb2   : > { %9709 = vmatpush.bf16.msra.mxu2 %v9511_v28  ;;  %9710 = vmatpush.bf16.msra.mxu3 %v9511_v28 }
  0xb4   : > { %1197 = vmatpush.bf16.msra.mxu0 %v9511_v28 }
  0xb5   : > { %9708 = vmatpush.bf16.msra.mxu1 %v9511_v28 }
 0x106   : > { %v946_v47 = vpop.xlane.xlu1 %945  ;;  %v942_v48 = vpop.xlane.xlu0 %941 }
 0x107   : > { %v962_v49 = vmul.f32 %v10816_v46, %v946_v47  ;;  %v960_v50 = vmul.f32 %v10816_v46, %v942_v48  ;;  %v934_v51 = vpop.xlane.xlu2 %933 }
 0x108   : > { %v956_v62 = vmul.f32 %v10816_v46, %v934_v51 }
 0x109   : > { %v10820_v52 = vsub.f32 %v929_v32, %v962_v49  ;;  %v10822_v53 = vsub.f32 %v927_v33, %v960_v50 }
 0x10a   : > { %v10844_v5 = vsub.f32 %v923_v34, %v956_v62 }
 0x10b   : > { %v978_v54 = vmul.f32 %v10820_v52, %v10820_v52  ;;  %v976_v55 = vmul.f32 %v10822_v53, %v10822_v53 }
 0x10c   : > { %v972_v10 = vmul.f32 %v10844_v5, %v10844_v5 }
 0x10d   : > { %992 = vadd.xlane.f32.xlu1 %v978_v54  ;;  %988 = vadd.xlane.f32.xlu2 %v976_v55 }
 0x10e   : > { %v948_v56 = vpop.xlane.xlu1 %947  ;;  %v944_v57 = vpop.xlane.xlu0 %943 }
 0x10f   : > { %v963_v58 = vmul.f32 %v10816_v46, %v948_v56  ;;  %v961_v59 = vmul.f32 %v10816_v46, %v944_v57  ;;  %v936_v60 = vpop.xlane.xlu2 %935 }
 0x110   : > { %v957_v61 = vmul.f32 %v10816_v46, %v936_v60 }
 0x111   : > { %v10832_v63 = vsub.f32 %v930_v35, %v963_v58  ;;  %v10834_v0 = vsub.f32 %v928_v36, %v961_v59 }
 0x112   : > { %v10836_v1 = vsub.f32 %v924_v37, %v957_v61 }
 0x113   : > { %v977_v2 = vmul.f32 %v10834_v0, %v10834_v0  ;;  %v979_v3 = vmul.f32 %v10832_v63, %v10832_v63 }
 0x114   : > { %v973_v4 = vmul.f32 %v10836_v1, %v10836_v1 }
 0x115   : > { %990 = vadd.xlane.f32.xlu0 %v977_v2  ;;  %994 = vadd.xlane.f32.xlu2 %v979_v3 }
 0x116   : > { %982 = vadd.xlane.f32.xlu1 %v973_v4  ;;  %v938_v6 = vpop.xlane.xlu0 %937  ;;  %v940_v7 = vpop.xlane.xlu1 %939 }
 0x117   : > { %v958_v8 = vmul.f32 %v10816_v46, %v938_v6  ;;  %v959_v11 = vmul.f32 %v10816_v46, %v940_v7 }
 0x119   : > { %v10847_v9 = vsub.f32 %v925_v38, %v958_v8  ;;  %v10854_v13 = vsub.f32 %v926_v39, %v959_v11 }
 0x11b   : > { %v974_v12 = vmul.f32 %v10847_v9, %v10847_v9  ;;  %v975_v14 = vmul.f32 %v10854_v13, %v10854_v13 }
 0x11d   : > { %984 = vadd.xlane.f32.xlu2 %v974_v12  ;;  %980 = vadd.xlane.f32.xlu0 %v972_v10 }
 0x125   : > { %986 = vadd.xlane.f32.xlu0 %v975_v14 }
 0x180   : > { %v993_v21 = vpop.xlane.xlu1 %992  ;;  %v989_v22 = vpop.xlane.xlu2 %988 }
 0x181   : > { %v1002_v24 = vmul.f32 %v993_v21, %v10816_v46  ;;  %v1000_v25 = vmul.f32 %v989_v22, %v10816_v46 }
 0x183   : > { %v1010_v26 = vadd.f32 1e-05, %v1002_v24  ;;  %v1008_v27 = vadd.f32 1e-05, %v1000_v25 }
 0x185   : > { %9920 = vrsqrt.f32 %v1010_v26  ;;  %vm1078_vm1 = vweird.f32 %v1010_v26  ;;  %vm1058_vm5 = vweird.f32 %v1008_v27 }
 0x186   : > { %9922 = vrsqrt.f32 %v1008_v27 }
 0x188   : > { %v991_v29 = vpop.xlane.xlu0 %990  ;;  %v995_v30 = vpop.xlane.xlu2 %994 }
 0x189   : > { %v1001_v31 = vmul.f32 %v991_v29, %v10816_v46  ;;  %v983_v32 = vpop.xlane.xlu1 %982  ;;  %v1003_v33 = vmul.f32 %v995_v30, %v10816_v46  ;;  %v9916_v29 = vld [vmem:[%s15174_s25] ss:$0 sm:$0xff] }
 0x18a   : > { %v997_v34 = vmul.f32 %v983_v32, %v10816_v46 }
 0x18b   : > { %v10887_v35 = vpop.eup %9920  ;;  %v10889_v36 = vadd.f32 1e-05, %v1001_v31  ;;  %v10891_v37 = vadd.f32 1e-05, %v1003_v33 }
 0x18c   : > { %v10893_v38 = vpop.eup %9922  ;;  %v1073_v39 = vmul.f32 %v10887_v35, %v1010_v26  ;;  %v1005_v40 = vadd.f32 1e-05, %v997_v34  ;;  %vm1079_vm2 = vweird.f32 %v10887_v35 }
 0x18d   : > { %v1053_v41 = vmul.f32 %v10893_v38, %v1008_v27  ;;  %9924 = vrsqrt.f32 %v10889_v36  ;;  %vm1059_vm3 = vweird.f32 %v10893_v38  ;;  %vm10919_vm4 = vmor %vm1078_vm1, %vm1079_vm2  ;;  %vm1068_vm6 = vweird.f32 %v10889_v36 }
 0x18e   : > { %v1074_v42 = vmul.f32 %v10887_v35, %v1073_v39  ;;  %9926 = vrsqrt.f32 %v1005_v40  ;;  %vm10926_vm7 = vmor %vm1058_vm5, %vm1059_vm3  ;;  %vm1028_vm8 = vweird.f32 %v1005_v40  ;;  %vm1088_vm11 = vweird.f32 %v10891_v37 }
 0x18f   : > { %v1054_v43 = vmul.f32 %v10893_v38, %v1053_v41  ;;  %9928 = vrsqrt.f32 %v10891_v37 }
 0x190   : > { %v1075_v44 = vmul.f32 0.5, %v1074_v42  ;;  %v981_v45 = vpop.xlane.xlu0 %980  ;;  %v985_v47 = vpop.xlane.xlu2 %984 }
 0x191   : > { %v1055_v48 = vmul.f32 0.5, %v1054_v43  ;;  %v996_v49 = vmul.f32 %v981_v45, %v10816_v46  ;;  %v998_v50 = vmul.f32 %v985_v47, %v10816_v46 }
 0x192   : > { %v1076_v51 = vsub.f32 1.5, %v1075_v44 }
 0x193   : > { %v9925_v54 = vpop.eup %9924  ;;  %v1056_v55 = vsub.f32 1.5, %v1055_v48  ;;  %v10903_v56 = vadd.f32 1e-05, %v996_v49  ;;  %v10905_v57 = vadd.f32 1e-05, %v998_v50 }
 0x194   : > { %v10907_v58 = vpop.eup %9926  ;;  %v1063_v59 = vmul.f32 %v9925_v54, %v10889_v36  ;;  %v1077_v62 = vmul.f32 %v10887_v35, %v1076_v51  ;;  %vm1069_vm10 = vweird.f32 %v9925_v54  ;;  %v9917_v36 = vld [vmem:[%s15175_s28] ss:$0 sm:$0xff] }
 0x195   : > { %v9929_v60 = vpop.eup %9928  ;;  %v1023_v61 = vmul.f32 %v10907_v58, %v1005_v40  ;;  %9930 = vrsqrt.f32 %v10903_v56  ;;  %v1057_v2 = vmul.f32 %v10893_v38, %v1056_v55  ;;  %vm1029_vm9 = vweird.f32 %v10907_v58  ;;  %vm1070_vm14 = vmor %vm1068_vm6, %vm1069_vm10 }
 0x196   : > { %v1064_v3 = vmul.f32 %v9925_v54, %v1063_v59  ;;  %v1083_v4 = vmul.f32 %v9929_v60, %v10891_v37  ;;  %9932 = vrsqrt.f32 %v10905_v57  ;;  %v1081_v19 = vsel %vm10919_vm4, %v10887_v35, %v1077_v62  ;;  %vm10941_vm12 = vmor %vm1028_vm8, %vm1029_vm9 }
 0x197   : > { %v1024_v6 = vmul.f32 %v10907_v58, %v1023_v61  ;;  %v1061_v18 = vsel %vm10926_vm7, %v10893_v38, %v1057_v2  ;;  %vm1089_vm13 = vweird.f32 %v9929_v60  ;;  %v1098_v30 = vmul.f32 %v1081_v19, %v10820_v52 }
 0x198   : > { %v1065_v8 = vmul.f32 0.5, %v1064_v3  ;;  %v1084_v10 = vmul.f32 %v9929_v60, %v1083_v4  ;;  %v987_v11 = vpop.xlane.xlu0 %986  ;;  %v1096_v28 = vmul.f32 %v1061_v18, %v10822_v53  ;;  %vm1090_vm15 = vmor %vm1088_vm11, %vm1089_vm13  ;;  %vm1018_vm1 = vweird.f32 %v10903_v56 }
 0x199   : > { %v1025_v14 = vmul.f32 0.5, %v1024_v6  ;;  %v999_v15 = vmul.f32 %v987_v11, %v10816_v46  ;;  %v1109_v42 = vmul.f32 %v9916_v29, %v1098_v30  ;;  %vm1038_vm2 = vweird.f32 %v10905_v57 }
 0x19a   : > { %v1066_v16 = vsub.f32 1.5, %v1065_v8  ;;  %v1085_v17 = vmul.f32 0.5, %v1084_v10  ;;  %v1107_v40 = vmul.f32 %v9916_v29, %v1096_v28  ;;  %vm1300_vm9 = vcmask 1047556  }
 0x19b   : > { %v9931_v20 = vpop.eup %9930  ;;  %v1026_v21 = vsub.f32 1.5, %v1025_v14  ;;  %v10939_v22 = vadd.f32 1e-05, %v999_v15  ;;  %vm2212_vm10 = vcmask 257024   ;;  %vm2245_vm11 = vcmask 7168  }
 0x19c   : > { %v1067_v23 = vmul.f32 %v9925_v54, %v1066_v16  ;;  %v1086_v24 = vsub.f32 1.5, %v1085_v17  ;;  %v1013_v25 = vmul.f32 %v9931_v20, %v10903_v56  ;;  %v9933_v26 = vpop.eup %9932  ;;  %vm1019_vm0 = vweird.f32 %v9931_v20 }
 0x19d   : > { %v1027_v27 = vmul.f32 %v10907_v58, %v1026_v21  ;;  %9934 = vrsqrt.f32 %v10939_v22  ;;  %v1033_v33 = vmul.f32 %v9933_v26, %v10905_v57  ;;  %vm1039_vm3 = vweird.f32 %v9933_v26  ;;  %vm1020_vm4 = vmor %vm1018_vm1, %vm1019_vm0 }
 0x19e   : > { %v1087_v31 = vmul.f32 %v9929_v60, %v1086_v24  ;;  %v1014_v32 = vmul.f32 %v9931_v20, %v1013_v25  ;;  %v1071_v34 = vsel %vm1070_vm14, %v9925_v54, %v1067_v23  ;;  %v1120_v54 = vadd.f32 %v9917_v36, %v1109_v42  ;;  %vm1040_vm5 = vmor %vm1038_vm2, %vm1039_vm3 }
 0x19f   : > { %v1031_v53 = vsel %vm10941_vm12, %v10907_v58, %v1027_v27  ;;  %v1034_v38 = vmul.f32 %v9933_v26, %v1033_v33  ;;  %v1097_v52 = vmul.f32 %v1071_v34, %v10834_v0  ;;  %vm1048_vm7 = vweird.f32 %v10939_v22 }
 0x1a0   : > { %v1015_v35 = vmul.f32 0.5, %v1014_v32  ;;  %v1091_v39 = vsel %vm1090_vm15, %v9929_v60, %v1087_v31  ;;  %v1093_v0 = vmul.f32 %v1031_v53, %v10836_v1  ;;  %v10504_v34 = vmov 1983009808  }
 0x1a1   : > { %v1099_v41 = vmul.f32 %v1091_v39, %v10832_v63  ;;  %v1035_v43 = vmul.f32 0.5, %v1034_v38  ;;  %v1108_v44 = vmul.f32 %v9916_v29, %v1097_v52  ;;  %v1118_v63 = vadd.f32 %v9917_v36, %v1107_v40 }
 0x1a2   : > { %v1016_v37 = vsub.f32 1.5, %v1015_v35  ;;  %v1104_v62 = vmul.f32 %v9916_v29, %v1093_v0  ;;  %v1305_v53 = vunpack.c.l.s4 %v10504_v34  ;;  %vm2310_vm12 = vcmask 261120  }
 0x1a3   : > { %v9935_v45 = vpop.eup %9934  ;;  %v1110_v47 = vmul.f32 %v9916_v29, %v1099_v41  ;;  %v1036_v49 = vsub.f32 1.5, %v1035_v43  ;;  %v1119_v51 = vadd.f32 %v9917_v36, %v1108_v44 }
 0x1a4   : > { %v1017_v48 = vmul.f32 %v9931_v20, %v1016_v37  ;;  %v1043_v50 = vmul.f32 %v9935_v45, %v10939_v22  ;;  %vm1049_vm6 = vweird.f32 %v9935_v45  ;;  %v1115_v8 = vadd.f32 %v9917_v36, %v1104_v62 }
 0x1a5   : > { %v1121_v55 = vadd.f32 %v9917_v36, %v1110_v47  ;;  %v1037_v58 = vmul.f32 %v9933_v26, %v1036_v49  ;;  %v1124_v56 = vpack.c.bf16 %v1119_v51, %v1118_v63  ;;  %vm1050_vm8 = vmor %vm1048_vm7, %vm1049_vm6  ;;  %v10989_v42 = vunpack.c.0.s8 %v1305_v53 }
 0x1a6   : > { %v1044_v59 = vmul.f32 %v9935_v45, %v1043_v50  ;;  %v1021_v60 = vsel %vm1020_vm4, %v9931_v20, %v1017_v48  ;;  %v10505_v62 = vmov 1934713408  }
 0x1a7   : > { %v1125_v61 = vpack.c.bf16 %v1121_v55, %v1120_v54  ;;  %v1092_v1 = vmul.f32 %v1021_v60, %v10844_v5  ;;  %v1041_v3 = vsel %vm1040_vm5, %v9933_v26, %v1037_v58  ;;  %1208 = vmatmul.bf16.vlgmr.msra.gmra.mxu2 %v1124_v56 }
 0x1a8   : > { %v1045_v2 = vmul.f32 0.5, %v1044_v59  ;;  %v1094_v10 = vmul.f32 %v1041_v3, %v10847_v9 }
 0x1a9   : > { %1213 = vmatmul.bf16.vlgmr.msra.gmra.mxu3 %v1125_v61  ;;  %v1103_v4 = vmul.f32 %v9916_v29, %v1092_v1 }
 0x1aa   : > { %v1046_v6 = vsub.f32 1.5, %v1045_v2  ;;  %v1105_v14 = vmul.f32 %v9916_v29, %v1094_v10  ;;  %v1329_v2 = vunpack.c.l.s4 %v10505_v62 }
 0x1ab   : > { %v1114_v7 = vadd.f32 %v9917_v36, %v1103_v4 }
 0x1ac   : > { %v1047_v11 = vmul.f32 %v9935_v45, %v1046_v6  ;;  %v1116_v16 = vadd.f32 %v9917_v36, %v1105_v14 }
 0x1ad   : > { %v1122_v57 = vpack.c.bf16 %v1115_v8, %v1114_v7 }
 0x1ae   : > { %v1051_v12 = vsel %vm1050_vm8, %v9935_v45, %v1047_v11 }
 0x1af   : > { %1198 = vmatmul.bf16.vlgmr.msra.gmra.mxu0 %v1122_v57  ;;  %v1095_v5 = vmul.f32 %v1051_v12, %v10854_v13 }
 0x1b1   : > { %v1106_v15 = vmul.f32 %v9916_v29, %v1095_v5 }
 0x1b3   : > { %v1117_v17 = vadd.f32 %v9917_v36, %v1106_v15 }
 0x1b5   : > { %v1123_v18 = vpack.c.bf16 %v1117_v17, %v1116_v16  ;;  %v11039_v17 = vunpack.c.0.s8 %v1329_v2 }
 0x1b7   : > { %1203 = vmatmul.bf16.vlgmr.msra.gmra.mxu1 %v1123_v18 }
 0x22a   : > { %v1209_v20 = vpop.f32.mrf.mxu2 }
 0x22b   : > { %v1526_v37 = vrot.slane %v1209_v20, 4 }
 0x22c   : > { %v1199_v19 = vpop.f32.mrf.mxu0  ;;  %v10977_v21 = vpop.f32.mrf.mxu3 }
 0x22d   : > { %v1302_v36 = vrot.slane %v1199_v19, 4  ;;  %v1638_v3 = vrot.slane %v10977_v21, 4 }
 0x232   : > { %v1211_v46 = vpop.f32.mrf.mxu2 }
 0x233   : > { %v9881_v25 = vpack.i.bf16 %v1211_v46, %v1209_v20  ;;  %v1582_v41 = vrot.slane %v1211_v46, 4 }
 0x234   : > { %v1201_v9 = vpop.f32.mrf.mxu0  ;;  %v10979_v23 = vpop.f32.mrf.mxu1 }
 0x235   : > { %v9861_v22 = vpack.i.bf16 %v1201_v9, %v1199_v19  ;;  %v10981_v13 = vpop.f32.mrf.mxu3  ;;  %v1358_v52 = vrot.slane %v1201_v9, 4  ;;  %v1414_v6 = vrot.slane %v10979_v23, 4 }
 0x236   : > { %v9886_v26 = vpack.i.bf16 %v10981_v13, %v10977_v21  ;;  %v1694_v4 = vrot.slane %v10981_v13, 4 }
 0x237   : > { %9862 = vrot.lane.b32.xlu2 %v9861_v22, %s10501_s9  ;;  %9857 = vrot.lane.b32.xlu1 %v9861_v22, %s10502_s3 }
 0x23c   : > { %v10983_v24 = vpop.f32.mrf.mxu1 }
 0x23d   : > { %v9866_v27 = vpack.i.bf16 %v10983_v24, %v10979_v23  ;;  %v1470_v7 = vrot.slane %v10983_v24, 4 }
 0x23f   : > { %9882 = vrot.lane.b32.xlu2 %v9881_v25, %s10501_s9  ;;  %9887 = vrot.lane.b32.xlu1 %v9886_v26, %s10501_s9 }
 0x240   : > { %9867 = vrot.lane.b32.xlu0 %v9866_v27, %s10501_s9 }
 0x247   : > { %9892 = vrot.lane.b32.xlu2 %v9881_v25, %s10502_s3  ;;  %9897 = vrot.lane.b32.xlu1 %v9886_v26, %s10502_s3 }
 0x248   : > { %9872 = vrot.lane.b32.xlu0 %v9866_v27, %s10502_s3 }
 0x24f   : > { %9907 = vrot.lane.b32.xlu1 %v9881_v25, %s10503_s4  ;;  %9902 = vrot.lane.b32.xlu2 %v9866_v27, %s10503_s4 }
 0x250   : > { %9877 = vrot.lane.b32.xlu0 %v9861_v22, %s10503_s4 }
 0x258   : > { %9912 = vrot.lane.b32.xlu0 %v9886_v26, %s10503_s4 }
 0x291   : > { %v9863_v28 = vpop.permute.xlu2 %9862 }
 0x292   : > { %v9865_v30 = vunpack.i.h.bf16 %v9863_v28  ;;  %v9864_v31 = vunpack.i.l.bf16 %v9863_v28 }
 0x294   : > { %v1356_v35 = vrot.slane %v9865_v30, 4  ;;  %v1299_v38 = vrot.slane %v9864_v31, 4  ;;  %v1359_v43 = vsel %vm1300_vm9, %v9865_v30, %v1358_v52  ;;  %v1303_v0 = vsel %vm1300_vm9, %v9864_v31, %v1302_v36 }
 0x295   : > { %v11004_v54 = vperm.slane %v1359_v43, %v10989_v42  ;;  %v11013_v59 = vperm.slane %v1303_v0, %v10989_v42 }
 0x296   : > { %v1357_v45 = vsel %vm1300_vm9, %v1356_v35, %v1201_v9  ;;  %v1301_v47 = vsel %vm1300_vm9, %v1299_v38, %v1199_v19 }
 0x297   : > { %v11007_v55 = vperm.slane %v1357_v45, %v10989_v42  ;;  %v11010_v58 = vperm.slane %v1301_v47, %v10989_v42  ;;  %v1394_v8 = vrot.slane %v11004_v54, 4  ;;  %v1338_v57 = vrot.slane %v11013_v59, 4 }
 0x299   : > { %v9883_v29 = vpop.permute.xlu2 %9882  ;;  %v1382_v10 = vrot.slane %v11007_v55, 4  ;;  %v1326_v11 = vrot.slane %v11010_v58, 4 }
 0x29a   : > { %v9885_v32 = vunpack.i.h.bf16 %v9883_v29  ;;  %v9884_v33 = vunpack.i.l.bf16 %v9883_v29 }
 0x29c   : > { %v1580_v39 = vrot.slane %v9885_v32, 4  ;;  %v1524_v40 = vrot.slane %v9884_v33, 4  ;;  %v1583_v48 = vsel %vm1300_vm9, %v9885_v32, %v1582_v41  ;;  %v1527_v51 = vsel %vm1300_vm9, %v9884_v33, %v1526_v37 }
 0x29d   : > { %v11016_v60 = vperm.slane %v1583_v48, %v10989_v42  ;;  %v11025_v1 = vperm.slane %v1527_v51, %v10989_v42 }
 0x29e   : > { %v1581_v50 = vsel %vm1300_vm9, %v1580_v39, %v1211_v46  ;;  %v1525_v63 = vsel %vm1300_vm9, %v1524_v40, %v1209_v20 }
 0x29f   : > { %v11019_v56 = vperm.slane %v1581_v50, %v10989_v42  ;;  %v11022_v61 = vperm.slane %v1525_v63, %v10989_v42  ;;  %v1618_v12 = vrot.slane %v11016_v60, 4  ;;  %v1562_v15 = vrot.slane %v11025_v1, 4 }
 0x2a1   : > { %v10992_v44 = vpop.permute.xlu2 %9892  ;;  %v1606_v5 = vrot.slane %v11019_v56, 4  ;;  %v1550_v14 = vrot.slane %v11022_v61, 4 }
 0x2a2   : > { %v9895_v18 = vunpack.i.h.bf16 %v10992_v44  ;;  %v9894_v19 = vunpack.i.l.bf16 %v10992_v44 }
 0x2a4   : > { %v11049_v38 = vrot.slane %v9895_v18, 4  ;;  %v11059_v36 = vrot.slane %v9894_v19, 4 }
 0x2a9   : > { %v10998_v49 = vpop.permute.xlu1 %9857  ;;  %v9903_v20 = vpop.permute.xlu2 %9902 }
 0x2aa   : > { %v9860_v25 = vunpack.i.h.bf16 %v10998_v49  ;;  %v9859_v26 = vunpack.i.l.bf16 %v10998_v49  ;;  %v9905_v33 = vunpack.i.h.bf16 %v9903_v20  ;;  %v9904_v34 = vunpack.i.l.bf16 %v9903_v20 }
 0x2ac   : > { %v11077_v48 = vrot.slane %v9860_v25, 4  ;;  %v1480_v50 = vrot.slane %v9905_v33, 4  ;;  %v1424_v63 = vrot.slane %v9904_v34, 4 }
 0x2b1   : > { %v9888_v16 = vpop.permute.xlu1 %9887 }
 0x2b2   : > { %v9890_v9 = vunpack.i.h.bf16 %v9888_v16  ;;  %v9889_v22 = vunpack.i.l.bf16 %v9888_v16  ;;  %v9868_v46 = vpop.permute.xlu0 %9867 }
 0x2b3   : > { %v9870_v27 = vunpack.i.h.bf16 %v9868_v46  ;;  %v9869_v28 = vunpack.i.l.bf16 %v9868_v46 }
 0x2b4   : > { %v1692_v29 = vrot.slane %v9890_v9, 4  ;;  %v1636_v30 = vrot.slane %v9889_v22, 4  ;;  %v1639_v31 = vsel %vm1300_vm9, %v9889_v22, %v1638_v3  ;;  %v1695_v32 = vsel %vm1300_vm9, %v9890_v9, %v1694_v4 }
 0x2b5   : > { %v1468_v53 = vrot.slane %v9870_v27, 4  ;;  %v1412_v35 = vrot.slane %v9869_v28, 4  ;;  %v11054_v39 = vperm.slane %v1639_v31, %v10989_v42  ;;  %v1415_v40 = vsel %vm1300_vm9, %v9869_v28, %v1414_v6 }
 0x2b6   : > { %v1693_v52 = vsel %vm1300_vm9, %v1692_v29, %v10981_v13  ;;  %v1637_v41 = vsel %vm1300_vm9, %v1636_v30, %v10977_v21  ;;  %v11064_v37 = vperm.slane %v1695_v32, %v10989_v42  ;;  %v1471_v43 = vsel %vm1300_vm9, %v9870_v27, %v1470_v7 }
 0x2b7   : > { %v11068_v45 = vperm.slane %v1693_v52, %v10989_v42  ;;  %v1469_v13 = vsel %vm1300_vm9, %v1468_v53, %v10983_v24  ;;  %v1413_v47 = vsel %vm1300_vm9, %v1412_v35, %v10979_v23  ;;  %v1423_v0 = vperm.slane %v1415_v40, %v10989_v42 }
 0x2b8   : > { %v11081_v21 = vrot.slane %v9859_v26, 4  ;;  %v11086_v62 = vperm.slane %v1637_v41, %v10989_v42  ;;  %v1419_v23 = vperm.slane %v1413_v47, %v10989_v42  ;;  %v1479_v2 = vperm.slane %v1471_v43, %v10989_v42 }
 0x2b9   : > { %v11083_v51 = vpop.permute.xlu1 %9897  ;;  %v1475_v4 = vperm.slane %v1469_v13, %v10989_v42  ;;  %v1730_v9 = vrot.slane %v11064_v37, 4  ;;  %v1450_v22 = vrot.slane %v1423_v0, 4 }
 0x2ba   : > { %v9873_v3 = vpop.permute.xlu0 %9872  ;;  %v9900_v6 = vunpack.i.h.bf16 %v11083_v51  ;;  %v15052_v46 = vunpack.i.l.bf16 %v11083_v51  ;;  %v1438_v31 = vrot.slane %v1419_v23, 4  ;;  %v1506_v32 = vrot.slane %v1479_v2, 4 }
 0x2bb   : > { %v9875_v7 = vunpack.i.h.bf16 %v9873_v3  ;;  %v9874_v16 = vunpack.i.l.bf16 %v9873_v3  ;;  %v1494_v52 = vrot.slane %v1475_v4, 4 }
 0x2bc   : > { %v11102_v40 = vrot.slane %v9900_v6, 4  ;;  %v11111_v3 = vrot.slane %v15052_v46, 4 }
 0x2bd   : > { %v1482_v27 = vrot.slane %v9875_v7, 4  ;;  %v1425_v28 = vsel %vm1300_vm9, %v1424_v63, %v9874_v16  ;;  %v1426_v29 = vrot.slane %v9874_v16, 4  ;;  %v1481_v30 = vsel %vm1300_vm9, %v1480_v50, %v9875_v7 }
 0x2be   : > { %v1431_v53 = vperm.slane %v1425_v28, %v10989_v42  ;;  %v1487_v35 = vperm.slane %v1481_v30, %v10989_v42 }
 0x2bf   : > { %v1427_v41 = vsel %vm1300_vm9, %v9904_v34, %v1426_v29  ;;  %v1483_v43 = vsel %vm1300_vm9, %v9905_v33, %v1482_v27 }
 0x2c0   : > { %v1435_v13 = vperm.slane %v1427_v41, %v10989_v42  ;;  %v1436_v47 = vrot.slane %v1431_v53, 4  ;;  %v1439_v50 = vsel %vm1300_vm9, %v1431_v53, %v1438_v31  ;;  %v1491_v63 = vperm.slane %v1483_v43, %v10989_v42 }
 0x2c1   : > { %v1447_v7 = vperm.slane %v1439_v50, %v11039_v17  ;;  %v1492_v16 = vrot.slane %v1487_v35, 4  ;;  %v1495_v28 = vsel %vm1300_vm9, %v1487_v35, %v1494_v52 }
 0x2c2   : > { %v1437_v34 = vsel %vm1300_vm9, %v1436_v47, %v1419_v23  ;;  %v1448_v29 = vrot.slane %v1435_v13, 4  ;;  %v1451_v33 = vsel %vm1300_vm9, %v1435_v13, %v1450_v22  ;;  %v1503_v27 = vperm.slane %v1495_v28, %v11039_v17 }
 0x2c3   : > { %v1443_v30 = vperm.slane %v1437_v34, %v11039_v17  ;;  %v1459_v31 = vperm.slane %v1451_v33, %v11039_v17  ;;  %v1462_v53 = vrot.slane %v1447_v7, 4  ;;  %v1493_v41 = vsel %vm1300_vm9, %v1492_v16, %v1475_v4 }
 0x2c4   : > { %v1449_v43 = vsel %vm1300_vm9, %v1448_v29, %v1423_v0  ;;  %v1499_v50 = vperm.slane %v1493_v41, %v11039_v17  ;;  %v1504_v24 = vrot.slane %v1491_v63, 4  ;;  %v1507_v35 = vsel %vm1300_vm9, %v1491_v63, %v1506_v32 }
 0x2c5   : > { %v1455_v23 = vperm.slane %v1449_v43, %v11039_v17  ;;  %v1460_v52 = vrot.slane %v1443_v30, 4  ;;  %v1463_v22 = vsel %vm1300_vm9, 0.0, %v1462_v53  ;;  %v1466_v13 = vrot.slane %v1459_v31, 4 }
 0x2c6   : > { %v1505_v47 = vsel %vm1300_vm9, %v1504_v24, %v1479_v2  ;;  %v1515_v28 = vperm.slane %v1507_v35, %v11039_v17  ;;  %v1516_v7 = vrot.slane %v1499_v50, 4  ;;  %v1518_v34 = vrot.slane %v1503_v27, 4 }
 0x2c7   : > { %v1461_v4 = vsel %vm1300_vm9, 0.0, %v1460_v52  ;;  %v1464_v0 = vrot.slane %v1455_v23, 4  ;;  %v1467_v16 = vsel %vm1300_vm9, 0.0, %v1466_v13  ;;  %v1511_v29 = vperm.slane %v1505_v47, %v11039_v17 }
 0x2c8   : > { %v1517_v32 = vsel %vm1300_vm9, 0.0, %v1516_v7  ;;  %v1519_v63 = vsel %vm1300_vm9, 0.0, %v1518_v34  ;;  %v1522_v33 = vrot.slane %v1515_v28, 4  ;;  %v1856_v31 = vsel %vm1300_vm9, %v1462_v53, %v1443_v30 }
 0x2c9   : > { %v1465_v24 = vsel %vm1300_vm9, 0.0, %v1464_v0  ;;  %v1520_v2 = vrot.slane %v1511_v29, 4  ;;  %v1860_v41 = vperm.slane %v1856_v31, %v10989_v42  ;;  %v1861_v27 = vrot.slane %v1463_v22, 4 }
 0x2ca   : > { %v1523_v43 = vsel %vm1300_vm9, 0.0, %v1522_v33  ;;  %v1867_v35 = vsel %vm1300_vm9, %v1466_v13, %v1455_v23  ;;  %v1872_v52 = vrot.slane %v1467_v16, 4  ;;  %v1910_v47 = vsel %vm1300_vm9, %v1518_v34, %v1499_v50 }
 0x2cb   : > { %v1521_v7 = vsel %vm1300_vm9, 0.0, %v1520_v2  ;;  %v1862_v46 = vsel %vm1300_vm9, %v1861_v27, %v1461_v4  ;;  %v1871_v28 = vperm.slane %v1867_v35, %v10989_v42  ;;  %v1880_v30 = vrot.slane %v1860_v41, 4 }
 0x2cc   : > { %v1866_v53 = vperm.slane %v1862_v46, %v10989_v42  ;;  %v1873_v0 = vsel %vm1300_vm9, %v1872_v52, %v1465_v24  ;;  %v1914_v22 = vperm.slane %v1910_v47, %v10989_v42  ;;  %v1915_v31 = vrot.slane %v1519_v63, 4 }
 0x2cd   : > { %v1877_v20 = vperm.slane %v1873_v0, %v10989_v42  ;;  %v1892_v23 = vrot.slane %v1871_v28, 4  ;;  %v1921_v13 = vsel %vm1300_vm9, %v1522_v33, %v1511_v29  ;;  %v1926_v50 = vrot.slane %v1523_v43, 4 }
 0x2ce   : > { %v1878_v34 = vrot.slane %v1866_v53, 4  ;;  %v1881_v16 = vsel %vm1300_vm9, %v1866_v53, %v1880_v30  ;;  %v1916_v4 = vsel %vm1300_vm9, %v1915_v31, %v1517_v32  ;;  %v1925_v2 = vperm.slane %v1921_v13, %v10989_v42 }
 0x2cf   : > { %v1889_v46 = vperm.slane %v1881_v16, %v11039_v17  ;;  %v1890_v24 = vrot.slane %v1877_v20, 4  ;;  %v1893_v27 = vsel %vm1300_vm9, %v1877_v20, %v1892_v23  ;;  %v1920_v63 = vperm.slane %v1916_v4, %v10989_v42 }
 0x2d0   : > { %v1879_v35 = vsel %vm1300_vm9, %v1878_v34, %v1860_v41  ;;  %v1901_v29 = vperm.slane %v1893_v27, %v11039_v17  ;;  %v1927_v33 = vsel %vm1300_vm9, %v1926_v50, %v1521_v7  ;;  %v1934_v43 = vrot.slane %v1914_v22, 4 }
 0x2d1   : > { %v1885_v52 = vperm.slane %v1879_v35, %v11039_v17  ;;  %v1891_v32 = vsel %vm1300_vm9, %v1890_v24, %v1871_v28  ;;  %v1908_v47 = vrot.slane %v1889_v46, 4  ;;  %v1931_v30 = vperm.slane %v1927_v33, %v10989_v42 }
 0x2d2   : > { %v1897_v53 = vperm.slane %v1891_v32, %v11039_v17  ;;  %v1906_v0 = vrot.slane %v1901_v29, 4  ;;  %v1932_v20 = vrot.slane %v1920_v63, 4  ;;  %v1935_v31 = vsel %vm1300_vm9, %v1920_v63, %v1934_v43  ;;  %v9908_v63 = vpop.permute.xlu1 %9907 }
 0x2d3   : > { %v1904_v23 = vrot.slane %v1885_v52, 4  ;;  %v1909_v41 = vsel %vm1300_vm9, %v1901_v29, %v1908_v47  ;;  %v1943_v13 = vperm.slane %v1935_v31, %v11039_v17  ;;  %v1944_v7 = vrot.slane %v1931_v30, 4  ;;  %v11171_v47 = vpop.permute.xlu0 %9877 }
 0x2d4   : > { %v1902_v50 = vrot.slane %v1897_v53, 4  ;;  %v1907_v34 = vsel %vm1300_vm9, %v1906_v0, %v1889_v46  ;;  %v1933_v28 = vsel %vm1300_vm9, %v1932_v20, %v1914_v22  ;;  %v1946_v16 = vrot.slane %v1925_v2, 4 }
 0x2d5   : > { %v1905_v4 = vsel %vm1300_vm9, %v1897_v53, %v1904_v23  ;;  %v1939_v24 = vperm.slane %v1933_v28, %v11039_v17  ;;  %v1945_v27 = vsel %vm1300_vm9, %v1944_v7, %v1925_v2  ;;  %v1962_v35 = vrot.slane %v1943_v13, 4 }
 0x2d6   : > { %v1903_v33 = vsel %vm1300_vm9, %v1902_v50, %v1885_v52  ;;  %v1947_v29 = vsel %vm1300_vm9, %v1931_v30, %v1946_v16  ;;  %v1951_v43 = vperm.slane %v1945_v27, %v11039_v17  ;;  %v2190_v32 = vpack.c.bf16 %v1905_v4, %v1905_v4 }
 0x2d7   : > { %v1955_v22 = vperm.slane %v1947_v29, %v11039_v17  ;;  %v1958_v46 = vrot.slane %v1939_v24, 4  ;;  %v2182_v0 = vpack.c.bf16 %v1903_v33, %v1903_v33  ;;  %v2198_v53 = vpack.c.bf16 %v1907_v34, %v1907_v34 }
 0x2d8   : > { %v1956_v20 = vrot.slane %v1951_v43, 4  ;;  %v2206_v31 = vpack.c.bf16 %v1909_v41, %v1909_v41  ;;  %2223 = vst.msk [vmem:[#allocation2 + $0x28] sm:$0xf] %vm2212_vm10, %v2190_v32  ;;  %v9910_v2 = vunpack.i.h.bf16 %v9908_v63  ;;  %v9909_v23 = vunpack.i.l.bf16 %v9908_v63 }
 0x2d9   : > { %v1959_v52 = vsel %vm1300_vm9, %v1951_v43, %v1958_v46  ;;  %v1960_v7 = vrot.slane %v1955_v22, 4  ;;  %v1963_v30 = vsel %vm1300_vm9, %v1955_v22, %v1962_v35  ;;  %2215 = vst.msk [vmem:[#allocation2 + $0x8] sm:$0xf] %vm2212_vm10, %v2182_v0  ;;  %v9880_v50 = vunpack.i.h.bf16 %v11171_v47 }
 0x2da   : > { %v1957_v28 = vsel %vm1300_vm9, %v1956_v20, %v1939_v24  ;;  %v2191_v16 = vpack.c.bf16 %v1959_v52, %v1959_v52  ;;  %v2207_v4 = vpack.c.bf16 %v1963_v30, %v1963_v30  ;;  %2231 = vst.msk [vmem:[#allocation2 + $0x48] sm:$0xf] %vm2212_vm10, %v2198_v53  ;;  %v1592_v41 = vrot.slane %v9910_v2, 4 }
 0x2db   : > { %v1961_v34 = vsel %vm1300_vm9, %v1960_v7, %v1943_v13  ;;  %v2183_v27 = vpack.c.bf16 %v1957_v28, %v1957_v28  ;;  %2239 = vst.msk [vmem:[#allocation2 + $0x68] sm:$0xf] %vm2212_vm10, %v2206_v31  ;;  %v1536_v63 = vrot.slane %v9909_v23, 4  ;;  %v1539_v35 = vsel %vm1300_vm9, %v9909_v23, %v11059_v36 }
 0x2dc   : > { %v2199_v33 = vpack.c.bf16 %v1961_v34, %v1961_v34  ;;  %2224 = vst.msk [vmem:[#allocation2 + $0x2c] sm:$0xf] %vm2212_vm10, %v2191_v16  ;;  %v1547_v29 = vperm.slane %v1539_v35, %v10989_v42  ;;  %v1593_v24 = vsel %vm1300_vm9, %v1592_v41, %v9895_v18  ;;  %v1595_v43 = vsel %vm1300_vm9, %v9910_v2, %v11049_v38 }
 0x2dd   : > { %2216 = vst.msk [vmem:[#allocation2 + $0xc] sm:$0xf] %vm2212_vm10, %v2183_v27  ;;  %v1537_v13 = vsel %vm1300_vm9, %v1536_v63, %v9894_v19  ;;  %v1599_v36 = vperm.slane %v1593_v24, %v10989_v42  ;;  %v1603_v32 = vperm.slane %v1595_v43, %v10989_v42  ;;  %v11198_v22 = vrot.slane %v9880_v50, 4 }
 0x2de   : > { %2232 = vst.msk [vmem:[#allocation2 + $0x4c] sm:$0xf] %vm2212_vm10, %v2199_v33  ;;  %v1543_v46 = vperm.slane %v1537_v13, %v10989_v42  ;;  %v1560_v18 = vrot.slane %v1547_v29, 4  ;;  %v1563_v38 = vsel %vm1300_vm9, %v1547_v29, %v1562_v15  ;;  %v11207_v44 = vsel %vm1300_vm9, %v9880_v50, %v11077_v48 }
 0x2df   : > { %2240 = vst.msk [vmem:[#allocation2 + $0x6c] sm:$0xf] %vm2212_vm10, %v2207_v4  ;;  %v1571_v19 = vperm.slane %v1563_v38, %v11039_v17  ;;  %v1604_v0 = vrot.slane %v1599_v36, 4  ;;  %v1607_v53 = vsel %vm1300_vm9, %v1599_v36, %v1606_v5  ;;  %v1616_v20 = vrot.slane %v1603_v32, 4 }
 0x2e0   : > { %v1548_v31 = vrot.slane %v1543_v46, 4  ;;  %v1551_v2 = vsel %vm1300_vm9, %v1543_v46, %v1550_v14  ;;  %v1561_v15 = vsel %vm1300_vm9, %v1560_v18, %v11025_v1  ;;  %v1615_v48 = vperm.slane %v1607_v53, %v11039_v17 }
 0x2e1   : > { %v1559_v23 = vperm.slane %v1551_v2, %v11039_v17  ;;  %v1567_v52 = vperm.slane %v1561_v15, %v11039_v17  ;;  %v1578_v7 = vrot.slane %v1571_v19, 4  ;;  %v1605_v30 = vsel %vm1300_vm9, %v1604_v0, %v11019_v56 }
 0x2e2   : > { %v1549_v5 = vsel %vm1300_vm9, %v1548_v31, %v11022_v61  ;;  %v1611_v50 = vperm.slane %v1605_v30, %v11039_v17  ;;  %v1617_v14 = vsel %vm1300_vm9, %v1616_v20, %v11016_v60  ;;  %v1619_v1 = vsel %vm1300_vm9, %v1603_v32, %v1618_v12 }
 0x2e3   : > { %v1555_v28 = vperm.slane %v1549_v5, %v11039_v17  ;;  %v1574_v16 = vrot.slane %v1559_v23, 4  ;;  %v1576_v4 = vrot.slane %v1567_v52, 4  ;;  %v1579_v41 = vsel %vm1300_vm9, 0.0, %v1578_v7 }
 0x2e4   : > { %v1623_v56 = vperm.slane %v1617_v14, %v11039_v17  ;;  %v1627_v34 = vperm.slane %v1619_v1, %v11039_v17  ;;  %v1628_v61 = vrot.slane %v1611_v50, 4  ;;  %v1630_v27 = vrot.slane %v1615_v48, 4 }
 0x2e5   : > { %v1572_v63 = vrot.slane %v1555_v28, 4  ;;  %v1575_v35 = vsel %vm1300_vm9, 0.0, %v1574_v16  ;;  %v1577_v33 = vsel %vm1300_vm9, 0.0, %v1576_v4  ;;  %v1964_v60 = vsel %vm1300_vm9, %v1574_v16, %v1555_v28 }
 0x2e6   : > { %v1629_v12 = vsel %vm1300_vm9, 0.0, %v1628_v61  ;;  %v1631_v29 = vsel %vm1300_vm9, 0.0, %v1630_v27  ;;  %v1632_v24 = vrot.slane %v1623_v56, 4  ;;  %v1634_v43 = vrot.slane %v1627_v34, 4 }
 0x2e7   : > { %v1573_v13 = vsel %vm1300_vm9, 0.0, %v1572_v63  ;;  %v1968_v36 = vperm.slane %v1964_v60, %v10989_v42  ;;  %v1969_v32 = vrot.slane %v1575_v35, 4  ;;  %v1975_v46 = vsel %vm1300_vm9, %v1578_v7, %v1567_v52 }
 0x2e8   : > { %v1633_v18 = vsel %vm1300_vm9, 0.0, %v1632_v24  ;;  %v1635_v38 = vsel %vm1300_vm9, 0.0, %v1634_v43  ;;  %v1979_v19 = vperm.slane %v1975_v46, %v10989_v42  ;;  %v1980_v0 = vrot.slane %v1579_v41, 4 }
 0x2e9   : > { %v1970_v53 = vsel %vm1300_vm9, %v1969_v32, %v1573_v13  ;;  %v1988_v20 = vrot.slane %v1968_v36, 4  ;;  %v2018_v31 = vsel %vm1300_vm9, %v1630_v27, %v1611_v50  ;;  %v2023_v2 = vrot.slane %v1631_v29, 4 }
 0x2ea   : > { %v1974_v15 = vperm.slane %v1970_v53, %v10989_v42  ;;  %v1981_v48 = vsel %vm1300_vm9, %v1980_v0, %v1577_v33  ;;  %v2000_v23 = vrot.slane %v1979_v19, 4  ;;  %v2022_v52 = vperm.slane %v2018_v31, %v10989_v42 }
 0x2eb   : > { %v1985_v7 = vperm.slane %v1981_v48, %v10989_v42  ;;  %v2024_v30 = vsel %vm1300_vm9, %v2023_v2, %v1629_v12  ;;  %v2029_v5 = vsel %vm1300_vm9, %v1634_v43, %v1623_v56  ;;  %v2034_v14 = vrot.slane %v1635_v38, 4 }
 0x2ec   : > { %v1986_v1 = vrot.slane %v1974_v15, 4  ;;  %v1989_v28 = vsel %vm1300_vm9, %v1974_v15, %v1988_v20  ;;  %v2028_v50 = vperm.slane %v2024_v30, %v10989_v42  ;;  %v2033_v16 = vperm.slane %v2029_v5, %v10989_v42 }
 0x2ed   : > { %v1997_v4 = vperm.slane %v1989_v28, %v11039_v17  ;;  %v1998_v41 = vrot.slane %v1985_v7, 4  ;;  %v2001_v34 = vsel %vm1300_vm9, %v1985_v7, %v2000_v23  ;;  %v2035_v61 = vsel %vm1300_vm9, %v2034_v14, %v1633_v18 }
 0x2ee   : > { %v1987_v27 = vsel %vm1300_vm9, %v1986_v1, %v1968_v36  ;;  %v2009_v63 = vperm.slane %v2001_v34, %v11039_v17  ;;  %v2039_v56 = vperm.slane %v2035_v61, %v10989_v42  ;;  %v2040_v35 = vrot.slane %v2028_v50, 4 }
 0x2ef   : > { %v1993_v33 = vperm.slane %v1987_v27, %v11039_v17  ;;  %v1999_v60 = vsel %vm1300_vm9, %v1998_v41, %v1979_v19  ;;  %v2016_v12 = vrot.slane %v1997_v4, 4  ;;  %v2042_v29 = vrot.slane %v2022_v52, 4 }
 0x2f0   : > { %v2005_v24 = vperm.slane %v1999_v60, %v11039_v17  ;;  %v2014_v43 = vrot.slane %v2009_v63, 4  ;;  %v2041_v13 = vsel %vm1300_vm9, %v2040_v35, %v2022_v52  ;;  %v2052_v32 = vrot.slane %v2039_v56, 4 }
 0x2f1   : > { %v2012_v46 = vrot.slane %v1993_v33, 4  ;;  %v2017_v36 = vsel %vm1300_vm9, %v2009_v63, %v2016_v12  ;;  %v2043_v18 = vsel %vm1300_vm9, %v2028_v50, %v2042_v29  ;;  %v2047_v38 = vperm.slane %v2041_v13, %v11039_v17  ;;  %v11279_v50 = vpop.permute.xlu0 %9912 }
 0x2f2   : > { %v2010_v0 = vrot.slane %v2005_v24, 4  ;;  %v2015_v53 = vsel %vm1300_vm9, %v2014_v43, %v1997_v4  ;;  %v2051_v19 = vperm.slane %v2043_v18, %v11039_v17  ;;  %v2053_v20 = vsel %vm1300_vm9, %v2052_v32, %v2033_v16 }
 0x2f3   : > { %v2013_v31 = vsel %vm1300_vm9, %v2005_v24, %v2012_v46  ;;  %v2054_v2 = vrot.slane %v2033_v16, 4  ;;  %v2059_v15 = vperm.slane %v2053_v20, %v11039_v17  ;;  %v2066_v48 = vrot.slane %v2047_v38, 4 }
 0x2f4   : > { %v2011_v23 = vsel %vm1300_vm9, %v2010_v0, %v1993_v33  ;;  %v2070_v52 = vrot.slane %v2051_v19, 4  ;;  %v2192_v7 = vpack.c.bf16 %v2013_v31, %v2013_v31  ;;  %v2200_v30 = vpack.c.bf16 %v2015_v53, %v2015_v53 }
 0x2f5   : > { %v2055_v5 = vsel %vm1300_vm9, %v2039_v56, %v2054_v2  ;;  %v2064_v14 = vrot.slane %v2059_v15, 4  ;;  %v2067_v1 = vsel %vm1300_vm9, %v2059_v15, %v2066_v48  ;;  %v2184_v28 = vpack.c.bf16 %v2011_v23, %v2011_v23 }
 0x2f6   : > { %v2063_v4 = vperm.slane %v2055_v5, %v11039_v17  ;;  %v2193_v41 = vpack.c.bf16 %v2067_v1, %v2067_v1  ;;  %v2208_v16 = vpack.c.bf16 %v2017_v36, %v2017_v36  ;;  %2225 = vst.msk [vmem:[#allocation2 + $0x30] sm:$0xf] %vm2212_vm10, %v2192_v7  ;;  %v1369_v34 = vsel %vm1300_vm9, %v11198_v22, %v9860_v25 }
 0x2f7   : > { %v2065_v61 = vsel %vm1300_vm9, %v2064_v14, %v2047_v38  ;;  %2217 = vst.msk [vmem:[#allocation2 + $0x10] sm:$0xf] %vm2212_vm10, %v2184_v28  ;;  %v1375_v27 = vperm.slane %v1369_v34, %v10989_v42  ;;  %v1379_v63 = vperm.slane %v11207_v44, %v10989_v42  ;;  %v9879_v56 = vunpack.i.l.bf16 %v11171_v47 }
 0x2f8   : > { %v2068_v35 = vrot.slane %v2063_v4, 4  ;;  %v2071_v33 = vsel %vm1300_vm9, %v2063_v4, %v2070_v52  ;;  %v2185_v60 = vpack.c.bf16 %v2065_v61, %v2065_v61  ;;  %2226 = vst.msk [vmem:[#allocation2 + $0x34] sm:$0xf] %vm2212_vm10, %v2193_v41  ;;  %v9915_v12 = vunpack.i.h.bf16 %v11279_v50 }
 0x2f9   : > { %v2209_v25 = vpack.c.bf16 %v2071_v33, %v2071_v33  ;;  %2233 = vst.msk [vmem:[#allocation2 + $0x50] sm:$0xf] %vm2212_vm10, %v2200_v30  ;;  %v1380_v22 = vrot.slane %v1375_v27, 4  ;;  %v1392_v29 = vrot.slane %v1379_v63, 4  ;;  %v1312_v24 = vrot.slane %v9879_v56, 4 }
 0x2fa   : > { %v2069_v43 = vsel %vm1300_vm9, %v2068_v35, %v2051_v19  ;;  %2218 = vst.msk [vmem:[#allocation2 + $0x14] sm:$0xf] %vm2212_vm10, %v2185_v60  ;;  %v1315_v47 = vsel %vm1300_vm9, %v9879_v56, %v11081_v21  ;;  %v1383_v44 = vsel %vm1300_vm9, %v1375_v27, %v1382_v10  ;;  %v1395_v13 = vsel %vm1300_vm9, %v1379_v63, %v1394_v8 }
 0x2fb   : > { %v2201_v32 = vpack.c.bf16 %v2069_v43, %v2069_v43  ;;  %2241 = vst.msk [vmem:[#allocation2 + $0x70] sm:$0xf] %vm2212_vm10, %v2208_v16  ;;  %v1313_v46 = vsel %vm1300_vm9, %v1312_v24, %v9859_v26  ;;  %v1323_v36 = vperm.slane %v1315_v47, %v10989_v42  ;;  %v1381_v21 = vsel %vm1300_vm9, %v1380_v22, %v11007_v55 }
 0x2fc   : > { %2242 = vst.msk [vmem:[#allocation2 + $0x74] sm:$0xf] %vm2212_vm10, %v2209_v25  ;;  %v1319_v10 = vperm.slane %v1313_v46, %v10989_v42  ;;  %v1387_v18 = vperm.slane %v1381_v21, %v11039_v17  ;;  %v1391_v8 = vperm.slane %v1383_v44, %v11039_v17  ;;  %v1393_v38 = vsel %vm1300_vm9, %v1392_v29, %v11004_v54 }
 0x2fd   : > { %2234 = vst.msk [vmem:[#allocation2 + $0x54] sm:$0xf] %vm2212_vm10, %v2201_v32  ;;  %v1336_v49 = vrot.slane %v1323_v36, 4  ;;  %v1339_v26 = vsel %vm1300_vm9, %v1323_v36, %v1338_v57  ;;  %v1399_v55 = vperm.slane %v1393_v38, %v11039_v17  ;;  %v1403_v0 = vperm.slane %v1395_v13, %v11039_v17 }
 0x2fe   : > { %v1324_v53 = vrot.slane %v1319_v10, 4  ;;  %v1327_v19 = vsel %vm1300_vm9, %v1319_v10, %v1326_v11  ;;  %v1347_v20 = vperm.slane %v1339_v26, %v11039_v17  ;;  %v1404_v31 = vrot.slane %v1387_v18, 4 }
 0x2ff   : > { %v1335_v54 = vperm.slane %v1327_v19, %v11039_v17  ;;  %v1337_v2 = vsel %vm1300_vm9, %v1336_v49, %v11013_v59  ;;  %v1406_v15 = vrot.slane %v1391_v8, 4  ;;  %v1408_v48 = vrot.slane %v1399_v55, 4 }
 0x300   : > { %v1325_v57 = vsel %vm1300_vm9, %v1324_v53, %v11010_v58  ;;  %v1343_v23 = vperm.slane %v1337_v2, %v11039_v17  ;;  %v1354_v52 = vrot.slane %v1347_v20, 4  ;;  %v1405_v7 = vsel %vm1300_vm9, 0.0, %v1404_v31 }
 0x301   : > { %v1331_v11 = vperm.slane %v1325_v57, %v11039_v17  ;;  %v1350_v30 = vrot.slane %v1335_v54, 4  ;;  %v1407_v5 = vsel %vm1300_vm9, 0.0, %v1406_v15  ;;  %v1409_v14 = vsel %vm1300_vm9, 0.0, %v1408_v48 }
 0x302   : > { %v1352_v1 = vrot.slane %v1343_v23, 4  ;;  %v1355_v59 = vsel %vm1300_vm9, 0.0, %v1354_v52  ;;  %v1410_v28 = vrot.slane %v1403_v0, 4  ;;  %v1759_v4 = vsel %vm1300_vm9, %v1354_v52, %v1343_v23 }
 0x303   : > { %v1348_v41 = vrot.slane %v1331_v11, 4  ;;  %v1351_v58 = vsel %vm1300_vm9, 0.0, %v1350_v30  ;;  %v1748_v16 = vsel %vm1300_vm9, %v1350_v30, %v1331_v11  ;;  %v1763_v34 = vperm.slane %v1759_v4, %v10989_v42 }
 0x304   : > { %v1353_v61 = vsel %vm1300_vm9, 0.0, %v1352_v1  ;;  %v1411_v27 = vsel %vm1300_vm9, 0.0, %v1410_v28  ;;  %v1752_v63 = vperm.slane %v1748_v16, %v10989_v42  ;;  %v1753_v56 = vrot.slane %v1351_v58, 4 }
 0x305   : > { %v1349_v35 = vsel %vm1300_vm9, 0.0, %v1348_v41  ;;  %v1764_v33 = vrot.slane %v1355_v59, 4  ;;  %v1784_v60 = vrot.slane %v1763_v34, 4  ;;  %v1802_v25 = vsel %vm1300_vm9, %v1406_v15, %v1387_v18 }
 0x306   : > { %v1754_v22 = vsel %vm1300_vm9, %v1753_v56, %v1349_v35  ;;  %v1772_v29 = vrot.slane %v1752_v63, 4  ;;  %v1806_v24 = vperm.slane %v1802_v25, %v10989_v42  ;;  %v1807_v43 = vrot.slane %v1407_v5, 4 }
 0x307   : > { %v1758_v47 = vperm.slane %v1754_v22, %v10989_v42  ;;  %v1765_v44 = vsel %vm1300_vm9, %v1764_v33, %v1353_v61  ;;  %v1813_v13 = vsel %vm1300_vm9, %v1410_v28, %v1399_v55  ;;  %v1818_v32 = vrot.slane %v1411_v27, 4 }
 0x308   : > { %v1769_v46 = vperm.slane %v1765_v44, %v10989_v42  ;;  %v1808_v36 = vsel %vm1300_vm9, %v1807_v43, %v1405_v7  ;;  %v1817_v21 = vperm.slane %v1813_v13, %v10989_v42  ;;  %v1826_v10 = vrot.slane %v1806_v24, 4 }
 0x309   : > { %v1770_v18 = vrot.slane %v1758_v47, 4  ;;  %v1773_v8 = vsel %vm1300_vm9, %v1758_v47, %v1772_v29  ;;  %v1812_v38 = vperm.slane %v1808_v36, %v10989_v42  ;;  %v1819_v49 = vsel %vm1300_vm9, %v1818_v32, %v1409_v14 }
 0x30a   : > { %v1781_v26 = vperm.slane %v1773_v8, %v11039_v17  ;;  %v1782_v0 = vrot.slane %v1769_v46, 4  ;;  %v1785_v55 = vsel %vm1300_vm9, %v1769_v46, %v1784_v60  ;;  %v1823_v53 = vperm.slane %v1819_v49, %v10989_v42 }
 0x30b   : > { %v1771_v19 = vsel %vm1300_vm9, %v1770_v18, %v1752_v63  ;;  %v1793_v20 = vperm.slane %v1785_v55, %v11039_v17  ;;  %v1824_v31 = vrot.slane %v1812_v38, 4  ;;  %v1827_v54 = vsel %vm1300_vm9, %v1812_v38, %v1826_v10 }
 0x30c   : > { %v1777_v2 = vperm.slane %v1771_v19, %v11039_v17  ;;  %v1783_v15 = vsel %vm1300_vm9, %v1782_v0, %v1763_v34  ;;  %v1800_v48 = vrot.slane %v1781_v26, 4  ;;  %v1835_v57 = vperm.slane %v1827_v54, %v11039_v17 }
 0x30d   : > { %v1789_v23 = vperm.slane %v1783_v15, %v11039_v17  ;;  %v1798_v52 = vrot.slane %v1793_v20, 4  ;;  %v1825_v7 = vsel %vm1300_vm9, %v1824_v31, %v1806_v24  ;;  %v1836_v11 = vrot.slane %v1823_v53, 4 }
 0x30e   : > { %v1796_v30 = vrot.slane %v1777_v2, 4  ;;  %v1801_v5 = vsel %vm1300_vm9, %v1793_v20, %v1800_v48  ;;  %v1831_v14 = vperm.slane %v1825_v7, %v11039_v17  ;;  %v1838_v1 = vrot.slane %v1817_v21, 4 }
 0x30f   : > { %v1794_v59 = vrot.slane %v1789_v23, 4  ;;  %v1799_v28 = vsel %vm1300_vm9, %v1798_v52, %v1781_v26  ;;  %v1837_v4 = vsel %vm1300_vm9, %v1836_v11, %v1817_v21  ;;  %v1854_v41 = vrot.slane %v1835_v57, 4 }
 0x310   : > { %v1797_v58 = vsel %vm1300_vm9, %v1789_v23, %v1796_v30  ;;  %v1839_v16 = vsel %vm1300_vm9, %v1823_v53, %v1838_v1  ;;  %v1843_v34 = vperm.slane %v1837_v4, %v11039_v17  ;;  %v1850_v61 = vrot.slane %v1831_v14, 4 }
 0x311   : > { %v1795_v27 = vsel %vm1300_vm9, %v1794_v59, %v1777_v2  ;;  %v1847_v63 = vperm.slane %v1839_v16, %v11039_v17  ;;  %v2188_v56 = vpack.c.bf16 %v1797_v58, %v1797_v58  ;;  %v2196_v35 = vpack.c.bf16 %v1799_v28, %v1799_v28 }
 0x312   : > { %v1848_v33 = vrot.slane %v1843_v34, 4  ;;  %v1851_v60 = vsel %vm1300_vm9, %v1843_v34, %v1850_v61  ;;  %v2180_v25 = vpack.c.bf16 %v1795_v27, %v1795_v27  ;;  %v2204_v22 = vpack.c.bf16 %v1801_v5, %v1801_v5 }
 0x313   : > { %v1852_v29 = vrot.slane %v1847_v63, 4  ;;  %v1855_v24 = vsel %vm1300_vm9, %v1847_v63, %v1854_v41  ;;  %v2189_v43 = vpack.c.bf16 %v1851_v60, %v1851_v60  ;;  %2221 = vst.msk [vmem:[#allocation2 + $0x20] sm:$0xf] %vm2212_vm10, %v2188_v56  ;;  %v1704_v47 = vrot.slane %v9915_v12, 4 }
 0x314   : > { %v1849_v44 = vsel %vm1300_vm9, %v1848_v33, %v1831_v14  ;;  %v2205_v13 = vpack.c.bf16 %v1855_v24, %v1855_v24  ;;  %2213 = vst.msk [vmem:[#allocation2] sm:$0xf] %vm2212_vm10, %v2180_v25  ;;  %v1707_v32 = vsel %vm1300_vm9, %v9915_v12, %v11102_v40  ;;  %v9914_v46 = vunpack.i.l.bf16 %v11279_v50 }
 0x315   : > { %v1853_v36 = vsel %vm1300_vm9, %v1852_v29, %v1835_v57  ;;  %v2181_v21 = vpack.c.bf16 %v1849_v44, %v1849_v44  ;;  %2222 = vst.msk [vmem:[#allocation2 + $0x24] sm:$0xf] %vm2212_vm10, %v2189_v43  ;;  %v1705_v10 = vsel %vm1300_vm9, %v1704_v47, %v9900_v6  ;;  %v1715_v18 = vperm.slane %v1707_v32, %v10989_v42 }
 0x316   : > { %v2197_v8 = vpack.c.bf16 %v1853_v36, %v1853_v36  ;;  %2229 = vst.msk [vmem:[#allocation2 + $0x40] sm:$0xf] %vm2212_vm10, %v2196_v35  ;;  %v1711_v38 = vperm.slane %v1705_v10, %v10989_v42  ;;  %v1648_v49 = vrot.slane %v9914_v46, 4  ;;  %v1651_v40 = vsel %vm1300_vm9, %v9914_v46, %v11111_v3 }
 0x317   : > { %v1662_v50 = vrot.slane %v11086_v62, 4  ;;  %2214 = vst.msk [vmem:[#allocation2 + $0x4] sm:$0xf] %vm2212_vm10, %v2181_v21  ;;  %v1728_v12 = vrot.slane %v1715_v18, 4  ;;  %v1731_v6 = vsel %vm1300_vm9, %v1715_v18, %v1730_v9  ;;  %v1659_v26 = vperm.slane %v1651_v40, %v10989_v42 }
 0x318   : > { %2230 = vst.msk [vmem:[#allocation2 + $0x44] sm:$0xf] %vm2212_vm10, %v2197_v8  ;;  %v1716_v0 = vrot.slane %v1711_v38, 4  ;;  %v15176_v55 = vrot.slane %v11068_v45, 4  ;;  %v1739_v3 = vperm.slane %v1731_v6, %v11039_v17  ;;  %v15177_v19 = vunpack.i.l.bf16 %v11083_v51 }
 0x319   : > { %2237 = vst.msk [vmem:[#allocation2 + $0x60] sm:$0xf] %vm2212_vm10, %v2204_v22  ;;  %v1729_v9 = vsel %vm1300_vm9, %v1728_v12, %v11064_v37  ;;  %v1672_v2 = vrot.slane %v1659_v26, 4  ;;  %v15178_v57 = vrot.slane %v11054_v39, 4  ;;  %v10506_v46 = vmov -inf  }
 0x31a   : > { %v1719_v53 = vsel %vm1300_vm9, %v1711_v38, %v15176_v55  ;;  %v1649_v20 = vsel %vm1300_vm9, %v1648_v49, %v15177_v19  ;;  %2238 = vst.msk [vmem:[#allocation2 + $0x64] sm:$0xf] %vm2212_vm10, %v2205_v13  ;;  %v1717_v15 = vsel %vm1300_vm9, %v1716_v0, %v11068_v45  ;;  %v1735_v48 = vperm.slane %v1729_v9, %v11039_v17 }
 0x31b   : > { %v1727_v31 = vperm.slane %v1719_v53, %v11039_v17  ;;  %v1655_v54 = vperm.slane %v1649_v20, %v10989_v42  ;;  %v1746_v51 = vrot.slane %v1739_v3, 4  ;;  %v1675_v23 = vsel %vm1300_vm9, %v1659_v26, %v15178_v57  ;;  %2246 = vst.msk [vmem:[#allocation3] sm:$0xff] %vm2245_vm11, %v10506_v46 }
 0x31c   : > { %v1723_v52 = vperm.slane %v1717_v15, %v11039_v17  ;;  %v1744_v30 = vrot.slane %v1735_v48, 4  ;;  %v1673_v56 = vsel %vm1300_vm9, %v1672_v2, %v11054_v39  ;;  %v1683_v43 = vperm.slane %v1675_v23, %v11039_v17  ;;  %2247 = vst.msk [vmem:[#allocation3 + $0x8] sm:$0xff] %vm2245_vm11, %v10506_v46 }
 0x31d   : > { %v1742_v7 = vrot.slane %v1727_v31, 4  ;;  %v1660_v11 = vrot.slane %v1655_v54, 4  ;;  %v1663_v37 = vsel %vm1300_vm9, %v1655_v54, %v1662_v50  ;;  %v1747_v5 = vsel %vm1300_vm9, 0.0, %v1746_v51  ;;  %2248 = vst.msk [vmem:[#allocation3 + $0x10] sm:$0xff] %vm2245_vm11, %v10506_v46 }
 0x31e   : > { %v2137_v14 = vsel %vm1300_vm9, %v1746_v51, %v1735_v48  ;;  %v1671_v45 = vperm.slane %v1663_v37, %v11039_v17  ;;  %v1740_v1 = vrot.slane %v1723_v52, 4  ;;  %v1745_v41 = vsel %vm1300_vm9, 0.0, %v1744_v30  ;;  %2249 = vst.msk [vmem:[#allocation3 + $0x18] sm:$0xff] %vm2245_vm11, %v10506_v46 }
 0x31f   : > { %v1743_v59 = vsel %vm1300_vm9, 0.0, %v1742_v7  ;;  %v2126_v28 = vsel %vm1300_vm9, %v1742_v7, %v1723_v52  ;;  %v2141_v4 = vperm.slane %v2137_v14, %v10989_v42  ;;  %v2142_v34 = vrot.slane %v1747_v5, 4  ;;  %2250 = vst.msk [vmem:[#allocation3 + $0x20] sm:$0xff] %vm2245_vm11, %v10506_v46 }
 0x320   : > { %v2130_v58 = vperm.slane %v2126_v28, %v10989_v42  ;;  %v2131_v16 = vrot.slane %v1743_v59, 4  ;;  %v1741_v61 = vsel %vm1300_vm9, 0.0, %v1740_v1  ;;  %v1661_v63 = vsel %vm1300_vm9, %v1660_v11, %v11086_v62  ;;  %2251 = vst.msk [vmem:[#allocation3 + $0x28] sm:$0xff] %vm2245_vm11, %v10506_v46 }
 0x321   : > { %v2162_v27 = vrot.slane %v2141_v4, 4  ;;  %v2143_v33 = vsel %vm1300_vm9, %v2142_v34, %v1745_v41  ;;  %v1667_v25 = vperm.slane %v1661_v63, %v11039_v17  ;;  %v1679_v24 = vperm.slane %v1673_v56, %v11039_v17  ;;  %2252 = vst.msk [vmem:[#allocation3 + $0x30] sm:$0xff] %vm2245_vm11, %v10506_v46 }
 0x322   : > { %v2132_v35 = vsel %vm1300_vm9, %v2131_v16, %v1741_v61  ;;  %v2150_v60 = vrot.slane %v2130_v58, 4  ;;  %v2147_v29 = vperm.slane %v2143_v33, %v10989_v42  ;;  %v1686_v62 = vrot.slane %v1671_v45, 4  ;;  %2253 = vst.msk [vmem:[#allocation3 + $0x38] sm:$0xff] %vm2245_vm11, %v10506_v46 }
 0x323   : > { %v2136_v22 = vperm.slane %v2132_v35, %v10989_v42  ;;  %v1684_v47 = vrot.slane %v1667_v25, 4  ;;  %v1688_v49 = vrot.slane %v1679_v24, 4  ;;  %v1690_v40 = vrot.slane %v1683_v43, 4  ;;  %2254 = vst.msk [vmem:[#allocation3 + $0x40] sm:$0xff] %vm2245_vm11, %v10506_v46 }
 0x324   : > { %v2160_v13 = vrot.slane %v2147_v29, 4  ;;  %v2163_v32 = vsel %vm1300_vm9, %v2147_v29, %v2162_v27  ;;  %v1687_v18 = vsel %vm1300_vm9, 0.0, %v1686_v62  ;;  %v2072_v53 = vsel %vm1300_vm9, %v1686_v62, %v1667_v25  ;;  %2255 = vst.msk [vmem:[#allocation3 + $0x48] sm:$0xff] %vm2245_vm11, %v10506_v46 }
 0x325   : > { %v2148_v44 = vrot.slane %v2136_v22, 4  ;;  %v2151_v39 = vsel %vm1300_vm9, %v2136_v22, %v2150_v60  ;;  %v2171_v21 = vperm.slane %v2163_v32, %v11039_v17  ;;  %v1685_v10 = vsel %vm1300_vm9, 0.0, %v1684_v47  ;;  %2256 = vst.msk [vmem:[#allocation3 + $0x50] sm:$0xff] %vm2245_vm11, %v10506_v46 }
 0x326   : > { %v2159_v36 = vperm.slane %v2151_v39, %v11039_v17  ;;  %v2161_v38 = vsel %vm1300_vm9, %v2160_v13, %v2141_v4  ;;  %v1689_v0 = vsel %vm1300_vm9, 0.0, %v1688_v49  ;;  %v1691_v55 = vsel %vm1300_vm9, 0.0, %v1690_v40  ;;  %2257 = vst.msk [vmem:[#allocation3 + $0x58] sm:$0xff] %vm2245_vm11, %v10506_v46 }
 0x327   : > { %v2149_v8 = vsel %vm1300_vm9, %v2148_v44, %v2130_v58  ;;  %v2167_v12 = vperm.slane %v2161_v38, %v11039_v17  ;;  %v2176_v6 = vrot.slane %v2171_v21, 4  ;;  %v2077_v3 = vrot.slane %v1687_v18, 4  ;;  %2258 = vst.msk [vmem:[#allocation3 + $0x60] sm:$0xff] %vm2245_vm11, %v10506_v46 }
 0x328   : > { %v2155_v50 = vperm.slane %v2149_v8, %v11039_v17  ;;  %v2178_v26 = vrot.slane %v2159_v36, 4  ;;  %v2076_v15 = vperm.slane %v2072_v53, %v10989_v42  ;;  %v2083_v52 = vsel %vm1300_vm9, %v1690_v40, %v1679_v24  ;;  %2259 = vst.msk [vmem:[#allocation3 + $0x68] sm:$0xff] %vm2245_vm11, %v10506_v46 }
 0x329   : > { %v2172_v19 = vrot.slane %v2167_v12, 4  ;;  %v2177_v31 = vsel %vm1300_vm9, %v2176_v6, %v2159_v36  ;;  %v2078_v48 = vsel %vm1300_vm9, %v2077_v3, %v1685_v10  ;;  %v2087_v37 = vperm.slane %v2083_v52, %v10989_v42  ;;  %2260 = vst.msk [vmem:[#allocation3 + $0x70] sm:$0xff] %vm2245_vm11, %v10506_v46 }
 0x32a   : > { %v2174_v20 = vrot.slane %v2155_v50, 4  ;;  %v2179_v9 = vsel %vm1300_vm9, %v2171_v21, %v2178_v26  ;;  %v2203_v54 = vpack.c.bf16 %v2177_v31, %v2177_v31  ;;  %v2082_v23 = vperm.slane %v2078_v48, %v10989_v42  ;;  %2261 = vst.msk [vmem:[#allocation3 + $0x78] sm:$0xff] %vm2245_vm11, %v10506_v46 }
 0x32b   : > { %v2211_v2 = vpack.c.bf16 %v2179_v9, %v2179_v9  ;;  %v2173_v51 = vsel %vm1300_vm9, %v2172_v19, %v2155_v50  ;;  %v2088_v30 = vrot.slane %v1691_v55, 4  ;;  %v2096_v14 = vrot.slane %v2076_v15, 4  ;;  %2262 = vst.msk [vmem:[#allocation3 + $0x80] sm:$0xff] %vm2245_vm11, %v10506_v46 }
 0x32c   : > { %v2175_v57 = vsel %vm1300_vm9, %v2167_v12, %v2174_v20  ;;  %v2187_v7 = vpack.c.bf16 %v2173_v51, %v2173_v51  ;;  %2236 = vst.msk [vmem:[#allocation2 + $0x5c] sm:$0xf] %vm2212_vm10, %v2203_v54  ;;  %v2094_v5 = vrot.slane %v2082_v23, 4  ;;  %v2108_v1 = vrot.slane %v2087_v37, 4 }
 0x32d   : > { %v2195_v11 = vpack.c.bf16 %v2175_v57, %v2175_v57  ;;  %2244 = vst.msk [vmem:[#allocation2 + $0x7c] sm:$0xf] %vm2212_vm10, %v2211_v2  ;;  %v2089_v45 = vsel %vm1300_vm9, %v2088_v30, %v1689_v0  ;;  %v2097_v4 = vsel %vm1300_vm9, %v2082_v23, %v2096_v14  ;;  %v10507_v62 = vmov 0.0  }
 0x32e   : > { %2220 = vst.msk [vmem:[#allocation2 + $0x1c] sm:$0xf] %vm2212_vm10, %v2187_v7  ;;  %v2093_v59 = vperm.slane %v2089_v45, %v10989_v42  ;;  %v2095_v28 = vsel %vm1300_vm9, %v2094_v5, %v2076_v15  ;;  %v2105_v58 = vperm.slane %v2097_v4, %v11039_v17 }
 0x32f   : > { %2228 = vst.msk [vmem:[#allocation2 + $0x3c] sm:$0xf] %vm2212_vm10, %v2195_v11  ;;  %v2101_v41 = vperm.slane %v2095_v28, %v11039_v17 }
 0x330   : > { %v2106_v16 = vrot.slane %v2093_v59, 4  ;;  %v2109_v34 = vsel %vm1300_vm9, %v2093_v59, %v2108_v1  ;;  %v2124_v27 = vrot.slane %v2105_v58, 4  ;;  %2263 = vst.msk [vmem:[#allocation3 + $0x88] sm:$0xff] %vm2245_vm11, %v10506_v46 }
 0x331   : > { %v2117_v61 = vperm.slane %v2109_v34, %v11039_v17  ;;  %v2120_v42 = vrot.slane %v2101_v41, 4  ;;  %2264 = vst.msk [vmem:[#allocation3 + $0x90] sm:$0xff] %vm2245_vm11, %v10506_v46 }
 0x332   : > { %v2107_v63 = vsel %vm1300_vm9, %v2106_v16, %v2087_v37  ;;  %2265 = vst.msk [vmem:[#allocation3 + $0x98] sm:$0xff] %vm2245_vm11, %v10506_v46 }
 0x333   : > { %v2113_v56 = vperm.slane %v2107_v63, %v11039_v17  ;;  %v2122_v35 = vrot.slane %v2117_v61, 4  ;;  %v2125_v33 = vsel %vm1300_vm9, %v2117_v61, %v2124_v27  ;;  %2266 = vst.msk [vmem:[#allocation3 + $0xa0] sm:$0xff] %vm2245_vm11, %v10506_v46 }
 0x334   : > { %v2210_v60 = vpack.c.bf16 %v2125_v33, %v2125_v33  ;;  %2267 = vst.msk [vmem:[#allocation3 + $0xa8] sm:$0xff] %vm2245_vm11, %v10506_v46 }
 0x335   : > { %v2118_v25 = vrot.slane %v2113_v56, 4  ;;  %v2121_v22 = vsel %vm1300_vm9, %v2113_v56, %v2120_v42  ;;  %v2123_v29 = vsel %vm1300_vm9, %v2122_v35, %v2105_v58  ;;  %2268 = vst.msk [vmem:[#allocation3 + $0xb0] sm:$0xff] %vm2245_vm11, %v10506_v46 }
 0x336   : > { %v2194_v24 = vpack.c.bf16 %v2121_v22, %v2121_v22  ;;  %v2202_v17 = vpack.c.bf16 %v2123_v29, %v2123_v29  ;;  %2243 = vst.msk [vmem:[#allocation2 + $0x78] sm:$0xf] %vm2212_vm10, %v2210_v60 }
 0x337   : > { %v2119_v43 = vsel %vm1300_vm9, %v2118_v25, %v2101_v41  ;;  %2269 = vst.msk [vmem:[#allocation3 + $0xb8] sm:$0xff] %vm2245_vm11, %v10506_v46 }
 0x338   : > { %v2186_v47 = vpack.c.bf16 %v2119_v43, %v2119_v43  ;;  %2227 = vst.msk [vmem:[#allocation2 + $0x38] sm:$0xf] %vm2212_vm10, %v2194_v24 }
 0x339   : > { %2235 = vst.msk [vmem:[#allocation2 + $0x58] sm:$0xf] %vm2212_vm10, %v2202_v17 }
 0x33a   : > { %2219 = vst.msk [vmem:[#allocation2 + $0x18] sm:$0xf] %vm2212_vm10, %v2186_v47 }
 0x33b   : > { %2270 = vst.msk [vmem:[#allocation3 + $0xc0] sm:$0xff] %vm2245_vm11, %v10506_v46 }
 0x33c   : > { %2271 = vst.msk [vmem:[#allocation3 + $0xc8] sm:$0xff] %vm2245_vm11, %v10506_v46 }
 0x33d   : > { %2272 = vst.msk [vmem:[#allocation3 + $0xd0] sm:$0xff] %vm2245_vm11, %v10506_v46 }
 0x33e   : > { %2273 = vst.msk [vmem:[#allocation3 + $0xd8] sm:$0xff] %vm2245_vm11, %v10506_v46 }
 0x33f   : > { %2274 = vst.msk [vmem:[#allocation3 + $0xe0] sm:$0xff] %vm2245_vm11, %v10506_v46 }
 0x340   : > { %2275 = vst.msk [vmem:[#allocation3 + $0xe8] sm:$0xff] %vm2245_vm11, %v10506_v46 }
 0x341   : > { %2276 = vst.msk [vmem:[#allocation3 + $0xf0] sm:$0xff] %vm2245_vm11, %v10506_v46 }
 0x342   : > { %2277 = vst.msk [vmem:[#allocation3 + $0xf8] sm:$0xff] %vm2245_vm11, %v10506_v46 }
 0x343   : > { %2278 = vst.msk [vmem:[#allocation4] sm:$0xff] %vm2245_vm11, %v10507_v62 }
 0x344   : > { %2279 = vst.msk [vmem:[#allocation4 + $0x8] sm:$0xff] %vm2245_vm11, %v10507_v62 }
 0x345   : > { %2280 = vst.msk [vmem:[#allocation4 + $0x10] sm:$0xff] %vm2245_vm11, %v10507_v62 }
 0x346   : > { %2281 = vst.msk [vmem:[#allocation4 + $0x18] sm:$0xff] %vm2245_vm11, %v10507_v62 }
 0x347   : > { %2282 = vst.msk [vmem:[#allocation4 + $0x20] sm:$0xff] %vm2245_vm11, %v10507_v62 }
 0x348   : > { %2283 = vst.msk [vmem:[#allocation4 + $0x28] sm:$0xff] %vm2245_vm11, %v10507_v62 }
 0x349   : > { %2284 = vst.msk [vmem:[#allocation4 + $0x30] sm:$0xff] %vm2245_vm11, %v10507_v62 }
 0x34a   : > { %2285 = vst.msk [vmem:[#allocation4 + $0x38] sm:$0xff] %vm2245_vm11, %v10507_v62 }
 0x34b   : > { %2286 = vst.msk [vmem:[#allocation4 + $0x40] sm:$0xff] %vm2245_vm11, %v10507_v62 }
 0x34c   : > { %2287 = vst.msk [vmem:[#allocation4 + $0x48] sm:$0xff] %vm2245_vm11, %v10507_v62 }
 0x34d   : > { %2288 = vst.msk [vmem:[#allocation4 + $0x50] sm:$0xff] %vm2245_vm11, %v10507_v62 }
 0x34e   : > { %2289 = vst.msk [vmem:[#allocation4 + $0x58] sm:$0xff] %vm2245_vm11, %v10507_v62 }
 0x34f   : > { %2290 = vst.msk [vmem:[#allocation4 + $0x60] sm:$0xff] %vm2245_vm11, %v10507_v62 }
 0x350   : > { %2291 = vst.msk [vmem:[#allocation4 + $0x68] sm:$0xff] %vm2245_vm11, %v10507_v62 }
 0x351   : > { %2292 = vst.msk [vmem:[#allocation4 + $0x70] sm:$0xff] %vm2245_vm11, %v10507_v62 }
 0x352   : > { %2293 = vst.msk [vmem:[#allocation4 + $0x78] sm:$0xff] %vm2245_vm11, %v10507_v62 }
 0x353   : > { %2294 = vst.msk [vmem:[#allocation4 + $0x80] sm:$0xff] %vm2245_vm11, %v10507_v62 }
 0x354   : > { %2295 = vst.msk [vmem:[#allocation4 + $0x88] sm:$0xff] %vm2245_vm11, %v10507_v62 }
 0x355   : > { %2296 = vst.msk [vmem:[#allocation4 + $0x90] sm:$0xff] %vm2245_vm11, %v10507_v62 }
 0x356   : > { %2297 = vst.msk [vmem:[#allocation4 + $0x98] sm:$0xff] %vm2245_vm11, %v10507_v62 }
 0x357   : > { %2298 = vst.msk [vmem:[#allocation4 + $0xa0] sm:$0xff] %vm2245_vm11, %v10507_v62 }
 0x358   : > { %2299 = vst.msk [vmem:[#allocation4 + $0xa8] sm:$0xff] %vm2245_vm11, %v10507_v62 }
 0x359   : > { %2300 = vst.msk [vmem:[#allocation4 + $0xb0] sm:$0xff] %vm2245_vm11, %v10507_v62 }
 0x35a   : > { %2301 = vst.msk [vmem:[#allocation4 + $0xb8] sm:$0xff] %vm2245_vm11, %v10507_v62 }
 0x35b   : > { %2302 = vst.msk [vmem:[#allocation4 + $0xc0] sm:$0xff] %vm2245_vm11, %v10507_v62 }
 0x35c   : > { %2303 = vst.msk [vmem:[#allocation4 + $0xc8] sm:$0xff] %vm2245_vm11, %v10507_v62 }
 0x35d   : > { %2304 = vst.msk [vmem:[#allocation4 + $0xd0] sm:$0xff] %vm2245_vm11, %v10507_v62 }
 0x35e   : > { %2305 = vst.msk [vmem:[#allocation4 + $0xd8] sm:$0xff] %vm2245_vm11, %v10507_v62 }
 0x35f   : > { %2306 = vst.msk [vmem:[#allocation4 + $0xe0] sm:$0xff] %vm2245_vm11, %v10507_v62 }
 0x360   : > { %2307 = vst.msk [vmem:[#allocation4 + $0xe8] sm:$0xff] %vm2245_vm11, %v10507_v62 }
 0x361   : > { %2308 = vst.msk [vmem:[#allocation4 + $0xf0] sm:$0xff] %vm2245_vm11, %v10507_v62 }
 0x362   : > { %2309 = vst.msk [vmem:[#allocation4 + $0xf8] sm:$0xff] %vm2245_vm11, %v10507_v62 }
 0x363   : > { %2311 = vst.msk [vmem:[#allocation5] sm:$0xff] %vm2310_vm12, %v10507_v62 }
 0x364   : > { %2312 = vst.msk [vmem:[#allocation5 + $0x8] sm:$0xff] %vm2310_vm12, %v10507_v62 }
 0x365   : > { %2313 = vst.msk [vmem:[#allocation5 + $0x10] sm:$0xff] %vm2310_vm12, %v10507_v62 }
 0x366   : > { %2314 = vst.msk [vmem:[#allocation5 + $0x18] sm:$0xff] %vm2310_vm12, %v10507_v62 }
 0x367   : > { %2315 = vst.msk [vmem:[#allocation5 + $0x20] sm:$0xff] %vm2310_vm12, %v10507_v62 }
 0x368   : > { %2316 = vst.msk [vmem:[#allocation5 + $0x28] sm:$0xff] %vm2310_vm12, %v10507_v62 }
 0x369   : > { %2317 = vst.msk [vmem:[#allocation5 + $0x30] sm:$0xff] %vm2310_vm12, %v10507_v62 }
 0x36a   : > { %2318 = vst.msk [vmem:[#allocation5 + $0x38] sm:$0xff] %vm2310_vm12, %v10507_v62 }
 0x36b   : > { %2319 = vst.msk [vmem:[#allocation5 + $0x40] sm:$0xff] %vm2310_vm12, %v10507_v62 }
 0x36c   : > { %2320 = vst.msk [vmem:[#allocation5 + $0x48] sm:$0xff] %vm2310_vm12, %v10507_v62 }
 0x36d   : > { %2321 = vst.msk [vmem:[#allocation5 + $0x50] sm:$0xff] %vm2310_vm12, %v10507_v62 }
 0x36e   : > { %2322 = vst.msk [vmem:[#allocation5 + $0x58] sm:$0xff] %vm2310_vm12, %v10507_v62 }
 0x36f   : > { %2323 = vst.msk [vmem:[#allocation5 + $0x60] sm:$0xff] %vm2310_vm12, %v10507_v62 }
 0x370   : > { %2324 = vst.msk [vmem:[#allocation5 + $0x68] sm:$0xff] %vm2310_vm12, %v10507_v62 }
 0x371   : > { %2325 = vst.msk [vmem:[#allocation5 + $0x70] sm:$0xff] %vm2310_vm12, %v10507_v62 }
 0x372   : > { %2326 = vst.msk [vmem:[#allocation5 + $0x78] sm:$0xff] %vm2310_vm12, %v10507_v62 }
 0x373   : > { %2327 = vst.msk [vmem:[#allocation5 + $0x80] sm:$0xff] %vm2310_vm12, %v10507_v62 }
 0x374   : > { %2328 = vst.msk [vmem:[#allocation5 + $0x88] sm:$0xff] %vm2310_vm12, %v10507_v62 }
 0x375   : > { %2329 = vst.msk [vmem:[#allocation5 + $0x90] sm:$0xff] %vm2310_vm12, %v10507_v62 }
 0x376   : > { %2330 = vst.msk [vmem:[#allocation5 + $0x98] sm:$0xff] %vm2310_vm12, %v10507_v62 }
 0x377   : > { %2331 = vst.msk [vmem:[#allocation5 + $0xa0] sm:$0xff] %vm2310_vm12, %v10507_v62 }
 0x378   : > { %2332 = vst.msk [vmem:[#allocation5 + $0xa8] sm:$0xff] %vm2310_vm12, %v10507_v62 }
 0x379   : > { %2333 = vst.msk [vmem:[#allocation5 + $0xb0] sm:$0xff] %vm2310_vm12, %v10507_v62 }
 0x37a   : > { %2334 = vst.msk [vmem:[#allocation5 + $0xb8] sm:$0xff] %vm2310_vm12, %v10507_v62 }
 0x37b   : > { %2335 = vst.msk [vmem:[#allocation5 + $0xc0] sm:$0xff] %vm2310_vm12, %v10507_v62 }
 0x37c   : > { %2336 = vst.msk [vmem:[#allocation5 + $0xc8] sm:$0xff] %vm2310_vm12, %v10507_v62 }
 0x37d   : > { %2337 = vst.msk [vmem:[#allocation5 + $0xd0] sm:$0xff] %vm2310_vm12, %v10507_v62 }
 0x37e   : > { %2338 = vst.msk [vmem:[#allocation5 + $0xd8] sm:$0xff] %vm2310_vm12, %v10507_v62 }
 0x37f   : > { %2339 = vst.msk [vmem:[#allocation5 + $0xe0] sm:$0xff] %vm2310_vm12, %v10507_v62 }
 0x380   : > { %2340 = vst.msk [vmem:[#allocation5 + $0xe8] sm:$0xff] %vm2310_vm12, %v10507_v62 }
 0x381   : > { %2341 = vst.msk [vmem:[#allocation5 + $0xf0] sm:$0xff] %vm2310_vm12, %v10507_v62 }
 0x382   : > { %2342 = vst.msk [vmem:[#allocation5 + $0xf8] sm:$0xff] %vm2310_vm12, %v10507_v62 }
 0x383 PF: > { %p8768_p9 = scmp.ge.s32.totalorder %s10794_s17, %s10790_s16 }
 0x385   : > { %2346 = sbr.rel (%p8768_p9) target bundleno = 1612 (0x64c), region = 166 }
 0x38a   : > { %v9538_v44 = vld [vmem:[%s10801_s26 + $0x18] sm:$0xff]  ;;  %vm2451_vm13 = vcmask 261120   ;;  %v9537_v18 = vld [vmem:[%s10801_s26 + $0x10] sm:$0xff]  ;;  %v9536_v26 = vld [vmem:[%s10801_s26 + $0x8] sm:$0xff]  ;;  %vm2816_vm14 = vcmask 523264   ;;  %vm3489_vm15 = vcmask 7168  }
 0x38b   : > { %v9542_v39 = vld [vmem:[%s10801_s26 + $0x38] sm:$0xff]  ;;  %v2474_v46 = vsel %vm2451_vm13, %v9538_v44, 0  ;;  %v9541_v8 = vld [vmem:[%s10801_s26 + $0x30] sm:$0xff]  ;;  %v2471_v40 = vsel %vm2451_vm13, %v9537_v18, 0  ;;  %v9540_v0 = vld [vmem:[%s10801_s26 + $0x28] sm:$0xff]  ;;  %v2468_v3 = vsel %vm2451_vm13, %v9536_v26, 0 }
 0x38c   : > { %v9546_v13 = vld [vmem:[%s10801_s26 + $0x58] sm:$0xff]  ;;  %v2567_v36 = vsel %vm2451_vm13, %v9542_v39, 0  ;;  %2480 = vmatpush.bf16.xpose.msra.mxu0 %v2474_v46  ;;  %v9545_v38 = vld [vmem:[%s10801_s26 + $0x50] sm:$0xff]  ;;  %v2564_v50 = vsel %vm2451_vm13, %v9541_v8, 0  ;;  %v9544_v55 = vld [vmem:[%s10801_s26 + $0x48] sm:$0xff]  ;;  %v2561_v19 = vsel %vm2451_vm13, %v9540_v0, 0 }
 0x38d   : > { %v9550_v32 = vld [vmem:[%s10801_s26 + $0x78] sm:$0xff]  ;;  %v2660_v21 = vsel %vm2451_vm13, %v9546_v13, 0  ;;  %2573 = vmatpush.bf16.xpose.msra.mxu1 %v2567_v36  ;;  %v9549_v49 = vld [vmem:[%s10801_s26 + $0x70] sm:$0xff]  ;;  %v2657_v12 = vsel %vm2451_vm13, %v9545_v38, 0  ;;  %v9548_v53 = vld [vmem:[%s10801_s26 + $0x68] sm:$0xff]  ;;  %v2654_v20 = vsel %vm2451_vm13, %v9544_v55, 0 }
 0x38e   : > { %v2753_v10 = vsel %vm2451_vm13, %v9550_v32, 0  ;;  %2666 = vmatpush.bf16.xpose.msra.mxu2 %v2660_v21  ;;  %v2750_v6 = vsel %vm2451_vm13, %v9549_v49, 0  ;;  %v2747_v31 = vsel %vm2451_vm13, %v9548_v53, 0  ;;  %v9535_v9 = vld [vmem:[%s10801_s26] sm:$0xff]  ;;  %v9520_v30 = vld [vmem:[#allocation2 + $0x8] sm:$0xff]  ;;  %v9521_v1 = vld [vmem:[#allocation2 + $0x10] sm:$0xff] }
 0x38f   : > { %2759 = vmatpush.bf16.xpose.msra.mxu3 %v2753_v10  ;;  %v9539_v54 = vld [vmem:[%s10801_s26 + $0x20] sm:$0xff]  ;;  %v2465_v48 = vsel %vm2451_vm13, %v9535_v9, 0  ;;  %v9524_v5 = vld [vmem:[#allocation2 + $0x28] sm:$0xff]  ;;  %v9525_v59 = vld [vmem:[#allocation2 + $0x30] sm:$0xff] }
 0x390   : > { %v9543_v2 = vld [vmem:[%s10801_s26 + $0x40] sm:$0xff]  ;;  %v2558_v51 = vsel %vm2451_vm13, %v9539_v54, 0  ;;  %v9532_v14 = vld [vmem:[#allocation2 + $0x68] sm:$0xff]  ;;  %v9529_v28 = vld [vmem:[#allocation2 + $0x50] sm:$0xff] }
 0x391   : > { %v9547_v15 = vld [vmem:[%s10801_s26 + $0x60] sm:$0xff]  ;;  %v2651_v57 = vsel %vm2451_vm13, %v9543_v2, 0  ;;  %v9528_v45 = vld [vmem:[#allocation2 + $0x48] sm:$0xff]  ;;  %v9533_v4 = vld [vmem:[#allocation2 + $0x70] sm:$0xff] }
 0x392   : > { %v2744_v23 = vsel %vm2451_vm13, %v9547_v15, 0  ;;  %v9519_v52 = vld [vmem:[#allocation2] sm:$0xff]  ;;  %v9522_v41 = vld [vmem:[#allocation2 + $0x18] sm:$0xff] }
 0x393   : > { %v9523_v7 = vld [vmem:[#allocation2 + $0x20] sm:$0xff]  ;;  %v9526_v58 = vld [vmem:[#allocation2 + $0x38] sm:$0xff] }
 0x394   : > { %2481 = vmatpush.bf16.xpose.msra.mxu0 %v2471_v40  ;;  %v9527_v11 = vld [vmem:[#allocation2 + $0x40] sm:$0xff]  ;;  %v9530_v16 = vld [vmem:[#allocation2 + $0x58] sm:$0xff] }
 0x395   : > { %2574 = vmatpush.bf16.xpose.msra.mxu1 %v2564_v50  ;;  %v9531_v37 = vld [vmem:[#allocation2 + $0x60] sm:$0xff]  ;;  %v9534_v34 = vld [vmem:[#allocation2 + $0x78] sm:$0xff] }
 0x396   : > { %2667 = vmatpush.bf16.xpose.msra.mxu2 %v2657_v12 }
 0x397   : > { %2760 = vmatpush.bf16.xpose.msra.mxu3 %v2750_v6 }
 0x39c   : > { %2482 = vmatpush.bf16.xpose.msra.mxu0 %v2468_v3 }
 0x39d   : > { %2575 = vmatpush.bf16.xpose.msra.mxu1 %v2561_v19 }
 0x39e   : > { %2668 = vmatpush.bf16.xpose.msra.mxu2 %v2654_v20 }
 0x39f   : > { %2761 = vmatpush.bf16.xpose.msra.mxu3 %v2747_v31 }
 0x3a4   : > { %2483 = vmatpush.bf16.xpose.msra.mxu0 %v2465_v48 }
 0x3a5   : > { %2576 = vmatpush.bf16.xpose.msra.mxu1 %v2558_v51 }
 0x3a6   : > { %2669 = vmatpush.bf16.xpose.msra.mxu2 %v2651_v57 }
 0x3a7   : > { %2762 = vmatpush.bf16.xpose.msra.mxu3 %v2744_v23 }
 0x3ab   : > { %8801 = vmatmul.msk.bf16.vlgmr.msra.gmra.mxu0 %vm2451_vm13, %v9519_v52 }
 0x3ac   : > { %8837 = vmatmul.msk.bf16.vlgmr.msra.gmra.mxu1 %vm2451_vm13, %v9523_v7 }
 0x3ad   : > { %8873 = vmatmul.msk.bf16.vlgmr.msra.gmra.mxu2 %vm2451_vm13, %v9527_v11 }
 0x3ae   : > { %8909 = vmatmul.msk.bf16.vlgmr.msra.gmra.mxu3 %vm2451_vm13, %v9531_v37 }
 0x3bb   : > { %8802 = vmatmul.msk.bf16.gmra.mxu0 %vm2451_vm13, %v9520_v30 }
 0x3bc   : > { %8838 = vmatmul.msk.bf16.gmra.mxu1 %vm2451_vm13, %v9524_v5 }
 0x3bd   : > { %8874 = vmatmul.msk.bf16.gmra.mxu2 %vm2451_vm13, %v9528_v45 }
 0x3be   : > { %8910 = vmatmul.msk.bf16.gmra.mxu3 %vm2451_vm13, %v9532_v14 }
 0x3cb   : > { %8803 = vmatmul.msk.bf16.gmra.mxu0 %vm2451_vm13, %v9521_v1 }
 0x3cc   : > { %8839 = vmatmul.msk.bf16.gmra.mxu1 %vm2451_vm13, %v9525_v59 }
 0x3cd   : > { %8875 = vmatmul.msk.bf16.gmra.mxu2 %vm2451_vm13, %v9529_v28 }
 0x3ce   : > { %8911 = vmatmul.msk.bf16.gmra.mxu3 %vm2451_vm13, %v9533_v4 }
 0x3db   : > { %8804 = vmatmul.msk.bf16.gmra.mxu0 %vm2451_vm13, %v9522_v41 }
 0x3dc   : > { %8840 = vmatmul.msk.bf16.gmra.mxu1 %vm2451_vm13, %v9526_v58 }
 0x3dd   : > { %8876 = vmatmul.msk.bf16.gmra.mxu2 %vm2451_vm13, %v9530_v16 }
 0x3de   : > { %8912 = vmatmul.msk.bf16.gmra.mxu3 %vm2451_vm13, %v9534_v34 }
 0x428   : > { %v11737_v61 = vpop.f32.mrf.mxu0 }
 0x429   : > { %v11739_v42 = vpop.f32.mrf.mxu1  ;;  %v2817_v63 = vsel %vm2816_vm14, %v11737_v61, -inf }
 0x42a   : > { %v2841_v27 = vsel %vm2816_vm14, %v11739_v42, -inf  ;;  %2818 = vmax.xlane.f32.xlu0 %v2817_v63  ;;  %v2792_v63 = vld [vmem:[#allocation3 + $0x40] sm:$0xff] }
 0x42b   : > { %2842 = vmax.xlane.f32.xlu2 %v2841_v27  ;;  %v10508_v27 = vmov 0  }
 0x42c   : > { %9937 = vset.pattern.permute.xlu0 %v10508_v27  ;;  %9936 = vset.pattern.permute.xlu2 %v10508_v27 }
 0x42d   : > { %9938 = vset.pattern.permute.xlu1 %v10508_v27 }
 0x430   : > { %v11745_v56 = vpop.f32.mrf.mxu2  ;;  %v11755_v22 = vpop.f32.mrf.mxu0 }
 0x431   : > { %v11747_v35 = vpop.f32.mrf.mxu3  ;;  %v2865_v33 = vsel %vm2816_vm14, %v11745_v56, -inf  ;;  %v11753_v25 = vpop.f32.mrf.mxu1  ;;  %v2820_v47 = vsel %vm2816_vm14, %v11755_v22, -inf }
 0x432   : > { %v2889_v60 = vsel %vm2816_vm14, %v11747_v35, -inf  ;;  %2866 = vmax.xlane.f32.xlu1 %v2865_v33  ;;  %v2844_v36 = vsel %vm2816_vm14, %v11753_v25, -inf  ;;  %v2784_v33 = vld [vmem:[#allocation3] sm:$0xff] }
 0x433   : > { %2890 = vmax.xlane.f32.xlu0 %v2889_v60 }
 0x438   : > { %v11757_v29 = vpop.f32.mrf.mxu2  ;;  %v11767_v62 = vpop.f32.mrf.mxu0 }
 0x439   : > { %v11759_v24 = vpop.f32.mrf.mxu3  ;;  %v2868_v43 = vsel %vm2816_vm14, %v11757_v29, -inf  ;;  %v11769_v44 = vpop.f32.mrf.mxu1  ;;  %v2823_v39 = vsel %vm2816_vm14, %v11767_v62, -inf }
 0x43a   : > { %v2892_v17 = vsel %vm2816_vm14, %v11759_v24, -inf  ;;  %2869 = vmax.xlane.f32.xlu2 %v2868_v43  ;;  %v2847_v18 = vsel %vm2816_vm14, %v11769_v44, -inf }
 0x43b   : > { %2893 = vmax.xlane.f32.xlu1 %v2892_v17  ;;  %2821 = vmax.xlane.f32.xlu0 %v2820_v47 }
 0x440   : > { %v11775_v32 = vpop.f32.mrf.mxu2  ;;  %v11781_v21 = vpop.f32.mrf.mxu0 }
 0x441   : > { %v11773_v13 = vpop.f32.mrf.mxu3  ;;  %v11783_v10 = vpop.f32.mrf.mxu1  ;;  %v2871_v38 = vsel %vm2816_vm14, %v11775_v32, -inf  ;;  %v2826_v26 = vsel %vm2816_vm14, %v11781_v21, -inf }
 0x442   : > { %v2895_v46 = vsel %vm2816_vm14, %v11773_v13, -inf  ;;  %v2850_v8 = vsel %vm2816_vm14, %v11783_v10, -inf }
 0x443   : > { %2824 = vmax.xlane.f32.xlu1 %v2823_v39  ;;  %2896 = vmax.xlane.f32.xlu2 %v2895_v46 }
 0x444   : > { %2845 = vmax.xlane.f32.xlu0 %v2844_v36  ;;  %v2800_v36 = vld [vmem:[#allocation3 + $0x80] sm:$0xff] }
 0x448   : > { %v11791_v49 = vpop.f32.mrf.mxu2  ;;  %v11793_v40 = vpop.f32.mrf.mxu0 }
 0x449   : > { %v11795_v50 = vpop.f32.mrf.mxu3  ;;  %v2829_v12 = vsel %vm2816_vm14, %v11793_v40, -inf  ;;  %v11805_v55 = vpop.f32.mrf.mxu1  ;;  %v2874_v53 = vsel %vm2816_vm14, %v11791_v49, -inf }
 0x44a   : > { %v2898_v6 = vsel %vm2816_vm14, %v11795_v50, -inf  ;;  %v2853_v19 = vsel %vm2816_vm14, %v11805_v55, -inf }
 0x44b   : > { %2848 = vmax.xlane.f32.xlu1 %v2847_v18  ;;  %2851 = vmax.xlane.f32.xlu2 %v2850_v8  ;;  %v11867_v18 = vld [vmem:[#allocation3 + $0xc0] sm:$0xff] }
 0x44c   : > { %2872 = vmax.xlane.f32.xlu0 %v2871_v38 }
 0x450   : > { %v11803_v0 = vpop.f32.mrf.mxu2  ;;  %v11815_v31 = vpop.f32.mrf.mxu0 }
 0x451   : > { %v2877_v3 = vsel %vm2816_vm14, %v11803_v0, -inf  ;;  %v11813_v20 = vpop.f32.mrf.mxu3  ;;  %v2832_v2 = vsel %vm2816_vm14, %v11815_v31, -inf  ;;  %v11825_v48 = vpop.f32.mrf.mxu1 }
 0x452   : > { %v2901_v54 = vsel %vm2816_vm14, %v11813_v20, -inf  ;;  %15179 = vst [vmem:[#allocation23_spill] sm:$0xff] %v11825_v48  ;;  %v2856_v57 = vsel %vm2816_vm14, %v11825_v48, -inf }
 0x453   : > { %2827 = vmax.xlane.f32.xlu1 %v2826_v26  ;;  %2830 = vmax.xlane.f32.xlu2 %v2829_v12  ;;  %v11876_v26 = vld [vmem:[#allocation3 + $0xc8] sm:$0xff] }
 0x454   : > { %2899 = vmax.xlane.f32.xlu0 %v2898_v6 }
 0x458   : > { %v11817_v9 = vpop.f32.mrf.mxu2  ;;  %v11833_v52 = vpop.f32.mrf.mxu0 }
 0x459   : > { %v2880_v15 = vsel %vm2816_vm14, %v11817_v9, -inf  ;;  %v11827_v51 = vpop.f32.mrf.mxu3  ;;  %15181 = vst [vmem:[#allocation25_spill] sm:$0xff] %v11833_v52  ;;  %v2835_v7 = vsel %vm2816_vm14, %v11833_v52, -inf  ;;  %v11839_v37 = vpop.f32.mrf.mxu1 }
 0x45a   : > { %15180 = vst [vmem:[#allocation24_spill] sm:$0xff] %v11827_v51  ;;  %v2904_v23 = vsel %vm2816_vm14, %v11827_v51, -inf  ;;  %v2859_v5 = vsel %vm2816_vm14, %v11839_v37, -inf }
 0x45b   : > { %2875 = vmax.xlane.f32.xlu1 %v2874_v53  ;;  %2878 = vmax.xlane.f32.xlu2 %v2877_v3  ;;  %15183 = vst [vmem:[#allocation27_spill] sm:$0xff] %v11839_v37  ;;  %v11878_v53 = vld [vmem:[#allocation3 + $0x88] sm:$0xff] }
 0x45c   : > { %2854 = vmax.xlane.f32.xlu0 %v2853_v19  ;;  %v2785_v3 = vld [vmem:[#allocation3 + $0x8] sm:$0xff] }
 0x460   : > { %v11837_v11 = vpop.f32.mrf.mxu2  ;;  %v11849_v1 = vpop.f32.mrf.mxu0 }
 0x461   : > { %15182 = vst [vmem:[#allocation26_spill] sm:$0xff] %v11837_v11  ;;  %v2883_v30 = vsel %vm2816_vm14, %v11837_v11, -inf  ;;  %v11845_v14 = vpop.f32.mrf.mxu3  ;;  %v11853_v28 = vpop.f32.mrf.mxu1  ;;  %v2838_v41 = vsel %vm2816_vm14, %v11849_v1, -inf }
 0x462   : > { %15184 = vst [vmem:[#allocation28_spill] sm:$0xff] %v11845_v14  ;;  %v2907_v45 = vsel %vm2816_vm14, %v11845_v14, -inf  ;;  %v2862_v58 = vsel %vm2816_vm14, %v11853_v28, -inf }
 0x463   : > { %2902 = vmax.xlane.f32.xlu1 %v2901_v54  ;;  %2833 = vmax.xlane.f32.xlu2 %v2832_v2  ;;  %15185 = vst [vmem:[#allocation29_spill] sm:$0xff] %v11849_v1 }
 0x464   : > { %2881 = vmax.xlane.f32.xlu0 %v2880_v15  ;;  %15187 = vst [vmem:[#allocation31_spill] sm:$0xff] %v11853_v28 }
 0x468   : > { %v11851_v59 = vpop.f32.mrf.mxu2 }
 0x469   : > { %15186 = vst [vmem:[#allocation30_spill] sm:$0xff] %v11851_v59  ;;  %v2886_v4 = vsel %vm2816_vm14, %v11851_v59, -inf  ;;  %v11861_v16 = vpop.f32.mrf.mxu3 }
 0x46a   : > { %15188 = vst [vmem:[#allocation32_spill] sm:$0xff] %v11861_v16  ;;  %v2910_v34 = vsel %vm2816_vm14, %v11861_v16, -inf }
 0x46b   : > { %2857 = vmax.xlane.f32.xlu1 %v2856_v57  ;;  %2905 = vmax.xlane.f32.xlu2 %v2904_v23 }
 0x46c   : > { %2836 = vmax.xlane.f32.xlu0 %v2835_v7 }
 0x473   : > { %2884 = vmax.xlane.f32.xlu1 %v2883_v30  ;;  %2860 = vmax.xlane.f32.xlu2 %v2859_v5 }
 0x474   : > { %2908 = vmax.xlane.f32.xlu0 %v2907_v45  ;;  %v11894_v45 = vld [vmem:[#allocation3 + $0x10] sm:$0xff] }
 0x47b   : > { %2887 = vmax.xlane.f32.xlu2 %v2886_v4  ;;  %2839 = vmax.xlane.f32.xlu1 %v2838_v41  ;;  %v11896_v4 = vld [vmem:[#allocation3 + $0x48] sm:$0xff] }
 0x47c   : > { %2863 = vmax.xlane.f32.xlu0 %v2862_v58 }
 0x483   : > { %2911 = vmax.xlane.f32.xlu1 %v2910_v34  ;;  %v11898_v34 = vld [vmem:[#allocation3 + $0xd0] sm:$0xff] }
 0x49d   : > { %v2819_v17 = vpop.xlane.xlu0 %2818 }
 0x49e   : > { %v2843_v60 = vpop.xlane.xlu2 %2842  ;;  %v2913_v47 = vmax.f32 %v2784_v33, %v2819_v17 }
 0x49f   : > { %v2921_v43 = vmax.f32 %v2792_v63, %v2843_v60 }
 0x4a0   : > { %v2945_v39 = vsub.f32 %v2784_v33, %v2913_v47  ;;  %3043 = vperm.xlu2 %9936, %v2913_v47   ;;  %4214 = vst.msk [vmem:[#allocation3] sm:$0xff] %vm3489_vm15, %v2913_v47 }
 0x4a1   : > { %4222 = vst.msk [vmem:[#allocation3 + $0x40] sm:$0xff] %vm3489_vm15, %v2921_v43  ;;  %3083 = vperm.xlu0 %9937, %v2921_v43   ;;  %v2953_v30 = vsub.f32 %v2792_v63, %v2921_v43 }
 0x4a2   : > { %v2977_v46 = vmul.f32 1.442695, %v2945_v39  ;;  %v11914_v39 = vld [vmem:[#allocation3 + $0x50] sm:$0xff] }
 0x4a3   : > { %v2993_v41 = vmul.f32 1.442695, %v2953_v30 }
 0x4a4   : > { %9939 = vpow2.f32 %v2977_v46  ;;  %v11916_v46 = vld [vmem:[#allocation3 + $0x58] sm:$0xff] }
 0x4a5   : > { %v2867_v8 = vpop.xlane.xlu1 %2866  ;;  %9941 = vpow2.f32 %v2993_v41  ;;  %v11944_v41 = vld [vmem:[#allocation3 + $0x18] sm:$0xff] }
 0x4a6   : > { %v2929_v38 = vmax.f32 %v2800_v36, %v2867_v8  ;;  %v2891_v12 = vpop.xlane.xlu0 %2890 }
 0x4a7   : > { %v11870_v6 = vmax.f32 %v11867_v18, %v2891_v12 }
 0x4a8   : > { %4230 = vst.msk [vmem:[#allocation3 + $0x80] sm:$0xff] %vm3489_vm15, %v2929_v38  ;;  %3123 = vperm.xlu1 %9938, %v2929_v38   ;;  %v2961_v5 = vsub.f32 %v2800_v36, %v2929_v38  ;;  %v11918_v38 = vld [vmem:[#allocation3 + $0x90] sm:$0xff] }
 0x4a9   : > { %4238 = vst.msk [vmem:[#allocation3 + $0xc0] sm:$0xff] %vm3489_vm15, %v11870_v6  ;;  %3163 = vperm.xlu2 %9936, %v11870_v6  }
 0x4aa   : > { %v11880_v19 = vpop.eup %9939  ;;  %v3009_v33 = vmul.f32 1.442695, %v2961_v5  ;;  %v2969_v5 = vsub.f32 %v11867_v18, %v11870_v6 }
 0x4ab   : > { %15189 = vst [vmem:[#allocation33_spill] sm:$0xff] %v11880_v19 }
 0x4ac   : > { %9943 = vpow2.f32 %v3009_v33  ;;  %v3025_v33 = vmul.f32 1.442695, %v2969_v5 }
 0x4ad   : > { %v2870_v2 = vpop.xlane.xlu2 %2869 }
 0x4ae   : > { %v2894_v54 = vpop.xlane.xlu1 %2893  ;;  %v11886_v57 = vmax.f32 %v11878_v53, %v2870_v2  ;;  %v2822_v23 = vpop.xlane.xlu0 %2821 }
 0x4af   : > { %v11883_v15 = vmax.f32 %v11876_v26, %v2894_v54  ;;  %v2914_v7 = vmax.f32 %v2785_v3, %v2822_v23 }
 0x4b0   : > { %3556 = vperm.xlu1 %9938, %v11880_v19   ;;  %4231 = vst.msk [vmem:[#allocation3 + $0x88] sm:$0xff] %vm3489_vm15, %v11886_v57 }
 0x4b1   : > { %4239 = vst.msk [vmem:[#allocation3 + $0xc8] sm:$0xff] %vm3489_vm15, %v11883_v15  ;;  %3048 = vperm.xlu0 %9937, %v2914_v7   ;;  %v2946_v47 = vsub.f32 %v2785_v3, %v2914_v7  ;;  %v11926_v3 = vpop.eup %9941 }
 0x4b2   : > { %4215 = vst.msk [vmem:[#allocation3 + $0x8] sm:$0xff] %vm3489_vm15, %v2914_v7  ;;  %v11928_v7 = vpop.eup %9943 }
 0x4b3   : > { %v2979_v12 = vmul.f32 1.442695, %v2946_v47  ;;  %15190 = vst [vmem:[#allocation34_spill] sm:$0xff] %v11926_v3 }
 0x4b4   : > { %15191 = vst [vmem:[#allocation35_spill] sm:$0xff] %v11928_v7 }
 0x4b5   : > { %9945 = vpow2.f32 %v2979_v12 }
 0x4b6   : > { %v2825_v58 = vpop.xlane.xlu1 %2824  ;;  %v2897_v27 = vpop.xlane.xlu2 %2896  ;;  %9947 = vpow2.f32 %v3025_v33  ;;  %v11977_v33 = vld [vmem:[#allocation3 + $0xa0] sm:$0xff] }
 0x4b7   : > { %v11901_v60 = vmax.f32 %v11894_v45, %v2825_v58  ;;  %v2846_v63 = vpop.xlane.xlu0 %2845  ;;  %v11908_v43 = vmax.f32 %v11898_v34, %v2897_v27  ;;  %v11946_v58 = vld [vmem:[#allocation3 + $0x20] sm:$0xff]  ;;  %v11948_v27 = vld [vmem:[#allocation3 + $0xd8] sm:$0xff] }
 0x4b8   : > { %v2922_v17 = vmax.f32 %v11896_v4, %v2846_v63  ;;  %3168 = vperm.xlu1 %9938, %v11883_v15  }
 0x4b9   : > { %4216 = vst.msk [vmem:[#allocation3 + $0x10] sm:$0xff] %vm3489_vm15, %v11901_v60  ;;  %3128 = vperm.xlu0 %9937, %v11886_v57  }
 0x4ba   : > { %4223 = vst.msk [vmem:[#allocation3 + $0x48] sm:$0xff] %vm3489_vm15, %v2922_v17  ;;  %3088 = vperm.xlu2 %9936, %v2922_v17  }
 0x4bb   : > { %4240 = vst.msk [vmem:[#allocation3 + $0xd0] sm:$0xff] %vm3489_vm15, %v11908_v43  ;;  %v11959_v12 = vpop.eup %9945 }
 0x4bc   : > { %15192 = vst [vmem:[#allocation36_spill] sm:$0xff] %v11959_v12 }
 0x4be   : > { %v2849_v36 = vpop.xlane.xlu1 %2848  ;;  %v2852_v8 = vpop.xlane.xlu2 %2851 }
 0x4bf   : > { %v11921_v54 = vmax.f32 %v11914_v39, %v2849_v36  ;;  %v11924_v2 = vmax.f32 %v11916_v46, %v2852_v8  ;;  %v2873_v23 = vpop.xlane.xlu0 %2872 }
 0x4c0   : > { %3053 = vperm.xlu1 %9938, %v11901_v60   ;;  %v11934_v30 = vmax.f32 %v11918_v38, %v2873_v23  ;;  %v2954_v23 = vsub.f32 %v11896_v4, %v2922_v17  ;;  %v11979_v4 = vld [vmem:[#allocation3 + $0x60] sm:$0xff] }
 0x4c1   : > { %4224 = vst.msk [vmem:[#allocation3 + $0x50] sm:$0xff] %vm3489_vm15, %v11921_v54  ;;  %3636 = vperm.xlu0 %9937, %v11928_v7  }
 0x4c2   : > { %4225 = vst.msk [vmem:[#allocation3 + $0x58] sm:$0xff] %vm3489_vm15, %v11924_v2  ;;  %3596 = vperm.xlu2 %9936, %v11926_v3   ;;  %v2995_v17 = vmul.f32 1.442695, %v2954_v23 }
 0x4c3   : > { %4232 = vst.msk [vmem:[#allocation3 + $0x90] sm:$0xff] %vm3489_vm15, %v11934_v30 }
 0x4c4   : > { %9949 = vpow2.f32 %v2995_v17 }
 0x4c6   : > { %v2828_v63 = vpop.xlane.xlu1 %2827  ;;  %v2831_v18 = vpop.xlane.xlu2 %2830 }
 0x4c7   : > { %v11951_v6 = vmax.f32 %v11944_v41, %v2828_v63  ;;  %v11954_v47 = vmax.f32 %v11946_v58, %v2831_v18  ;;  %v2900_v36 = vpop.xlane.xlu0 %2899  ;;  %v2970_v63 = vsub.f32 %v11876_v26, %v11883_v15  ;;  %v11975_v18 = vld [vmem:[#allocation3 + $0x98] sm:$0xff]  ;;  %v11987_v15 = vpop.eup %9947 }
 0x4c8   : > { %v11957_v8 = vmax.f32 %v11948_v27, %v2900_v36  ;;  %3093 = vperm.xlu1 %9938, %v11921_v54   ;;  %15193 = vst [vmem:[#allocation37_spill] sm:$0xff] %v11987_v15 }
 0x4c9   : > { %4217 = vst.msk [vmem:[#allocation3 + $0x18] sm:$0xff] %vm3489_vm15, %v11951_v6  ;;  %3173 = vperm.xlu0 %9937, %v11908_v43   ;;  %v3027_v3 = vmul.f32 1.442695, %v2970_v63  ;;  %v2962_v63 = vsub.f32 %v11878_v53, %v11886_v57  ;;  %v12011_v53 = vld [vmem:[#allocation3 + $0xa8] sm:$0xff] }
 0x4ca   : > { %4218 = vst.msk [vmem:[#allocation3 + $0x20] sm:$0xff] %vm3489_vm15, %v11954_v47  ;;  %3561 = vperm.xlu2 %9936, %v11959_v12  }
 0x4cb   : > { %4241 = vst.msk [vmem:[#allocation3 + $0xd8] sm:$0xff] %vm3489_vm15, %v11957_v8  ;;  %9951 = vpow2.f32 %v3027_v3  ;;  %v3011_v57 = vmul.f32 1.442695, %v2962_v63 }
 0x4cd   : > { %9953 = vpow2.f32 %v3011_v57  ;;  %v12045_v57 = vld [vmem:[#allocation3 + $0x68] sm:$0xff] }
 0x4ce   : > { %v2876_v36 = vpop.xlane.xlu1 %2875  ;;  %v2879_v12 = vpop.xlane.xlu2 %2878 }
 0x4cf   : > { %v11982_v7 = vmax.f32 %v11975_v18, %v2876_v36  ;;  %v11985_v5 = vmax.f32 %v11977_v33, %v2879_v12  ;;  %v2855_v26 = vpop.xlane.xlu0 %2854  ;;  %v2947_v12 = vsub.f32 %v11894_v45, %v11901_v60  ;;  %v12007_v36 = vld [vmem:[#allocation3 + $0xe0] sm:$0xff]  ;;  %v12019_v60 = vpop.eup %9949 }
 0x4d0   : > { %v11990_v19 = vmax.f32 %v11979_v4, %v2855_v26  ;;  %3676 = vperm.xlu1 %9938, %v11987_v15   ;;  %v12009_v26 = vld [vmem:[#allocation3 + $0x28] sm:$0xff]  ;;  %15194 = vst [vmem:[#allocation38_spill] sm:$0xff] %v12019_v60 }
 0x4d1   : > { %4233 = vst.msk [vmem:[#allocation3 + $0x98] sm:$0xff] %vm3489_vm15, %v11982_v7  ;;  %3098 = vperm.xlu0 %9937, %v11924_v2   ;;  %v2981_v15 = vmul.f32 1.442695, %v2947_v12  ;;  %v12024_v59 = vpop.eup %9951  ;;  %v2963_v12 = vsub.f32 %v11918_v38, %v11934_v30  ;;  %v12047_v38 = vld [vmem:[#allocation3 + $0xe8] sm:$0xff] }
 0x4d2   : > { %4234 = vst.msk [vmem:[#allocation3 + $0xa0] sm:$0xff] %vm3489_vm15, %v11985_v5  ;;  %3133 = vperm.xlu2 %9936, %v11934_v30   ;;  %v12049_v30 = vld [vmem:[#allocation3 + $0x30] sm:$0xff] }
 0x4d3   : > { %4226 = vst.msk [vmem:[#allocation3 + $0x60] sm:$0xff] %vm3489_vm15, %v11990_v19  ;;  %9955 = vpow2.f32 %v2981_v15 }
 0x4d4   : > { %15195 = vst [vmem:[#allocation39_spill] sm:$0xff] %v12024_v59 }
 0x4d5   : > { %15196 = vst [vmem:[#allocation40_spill] sm:$0xff] %v12047_v38 }
 0x4d6   : > { %v2903_v17 = vpop.xlane.xlu1 %2902  ;;  %v2834_v23 = vpop.xlane.xlu2 %2833 }
 0x4d7   : > { %v12014_v16 = vmax.f32 %v12007_v36, %v2903_v17  ;;  %v12017_v3 = vmax.f32 %v12009_v26, %v2834_v23  ;;  %v2882_v45 = vpop.xlane.xlu0 %2881  ;;  %v3013_v23 = vmul.f32 1.442695, %v2963_v12 }
 0x4d8   : > { %v12022_v14 = vmax.f32 %v12011_v53, %v2882_v45  ;;  %3601 = vperm.xlu1 %9938, %v12019_v60   ;;  %v2955_v45 = vsub.f32 %v11914_v39, %v11921_v54  ;;  %v12057_v54 = vpop.eup %9953 }
 0x4d9   : > { %4242 = vst.msk [vmem:[#allocation3 + $0xe0] sm:$0xff] %vm3489_vm15, %v12014_v16  ;;  %3681 = vperm.xlu0 %9937, %v12024_v59   ;;  %v12062_v1 = vpop.eup %9955  ;;  %9957 = vpow2.f32 %v3013_v23 }
 0x4da   : > { %3058 = vperm.xlu2 %9936, %v11951_v6   ;;  %4219 = vst.msk [vmem:[#allocation3 + $0x28] sm:$0xff] %vm3489_vm15, %v12017_v3  ;;  %v2997_v59 = vmul.f32 1.442695, %v2955_v45  ;;  %v12079_v45 = vld [vmem:[#allocation3 + $0xb0] sm:$0xff] }
 0x4db   : > { %4235 = vst.msk [vmem:[#allocation3 + $0xa8] sm:$0xff] %vm3489_vm15, %v12022_v14 }
 0x4dc   : > { %15197 = vst [vmem:[#allocation41_spill] sm:$0xff] %v12057_v54  ;;  %9959 = vpow2.f32 %v2997_v59 }
 0x4dd   : > { %15198 = vst [vmem:[#allocation42_spill] sm:$0xff] %v12062_v1 }
 0x4de   : > { %v2858_v63 = vpop.xlane.xlu1 %2857  ;;  %v2906_v60 = vpop.xlane.xlu2 %2905 }
 0x4df   : > { %v12052_v28 = vmax.f32 %v12045_v57, %v2858_v63  ;;  %v12055_v15 = vmax.f32 %v12047_v38, %v2906_v60  ;;  %v2837_v39 = vpop.xlane.xlu0 %2836  ;;  %v2948_v60 = vsub.f32 %v11944_v41, %v11951_v6  ;;  %v12083_v41 = vld [vmem:[#allocation3 + $0xf0] sm:$0xff]  ;;  %v12091_v59 = vpop.eup %9957 }
 0x4e0   : > { %v12060_v17 = vmax.f32 %v12049_v30, %v2837_v39  ;;  %3138 = vperm.xlu1 %9938, %v11982_v7   ;;  %v12081_v39 = vld [vmem:[#allocation3 + $0x70] sm:$0xff]  ;;  %15199 = vst [vmem:[#allocation43_spill] sm:$0xff] %v12083_v41 }
 0x4e1   : > { %4227 = vst.msk [vmem:[#allocation3 + $0x68] sm:$0xff] %vm3489_vm15, %v12052_v28  ;;  %3566 = vperm.xlu0 %9937, %v12062_v1   ;;  %v2983_v6 = vmul.f32 1.442695, %v2948_v60 }
 0x4e2   : > { %3641 = vperm.xlu2 %9936, %v12057_v54   ;;  %4243 = vst.msk [vmem:[#allocation3 + $0xe8] sm:$0xff] %vm3489_vm15, %v12055_v15  ;;  %v12096_v11 = vpop.eup %9959 }
 0x4e3   : > { %4220 = vst.msk [vmem:[#allocation3 + $0x30] sm:$0xff] %vm3489_vm15, %v12060_v17  ;;  %9961 = vpow2.f32 %v2983_v6 }
 0x4e4   : > { %15200 = vst [vmem:[#allocation44_spill] sm:$0xff] %v12091_v59 }
 0x4e5   : > { %15201 = vst [vmem:[#allocation45_spill] sm:$0xff] %v12096_v11 }
 0x4e6   : > { %v2885_v23 = vpop.xlane.xlu1 %2884  ;;  %v2861_v63 = vpop.xlane.xlu2 %2860 }
 0x4e7   : > { %v12086_v54 = vmax.f32 %v12079_v45, %v2885_v23  ;;  %v12089_v1 = vmax.f32 %v12081_v39, %v2861_v63  ;;  %v2909_v12 = vpop.xlane.xlu0 %2908  ;;  %v2964_v63 = vsub.f32 %v11975_v18, %v11982_v7  ;;  %v12113_v23 = vld [vmem:[#allocation3 + $0x38] sm:$0xff] }
 0x4e8   : > { %v12094_v38 = vmax.f32 %v12083_v41, %v2909_v12  ;;  %3646 = vperm.xlu1 %9938, %v12091_v59   ;;  %v12111_v12 = vld [vmem:[#allocation3 + $0xb8] sm:$0xff] }
 0x4e9   : > { %4236 = vst.msk [vmem:[#allocation3 + $0xb0] sm:$0xff] %vm3489_vm15, %v12086_v54  ;;  %3606 = vperm.xlu0 %9937, %v12096_v11   ;;  %v12115_v59 = vld [vmem:[#allocation3 + $0x78] sm:$0xff]  ;;  %v3015_v41 = vmul.f32 1.442695, %v2964_v63  ;;  %v12123_v7 = vpop.eup %9961  ;;  %v2971_v63 = vsub.f32 %v11898_v34, %v11908_v43 }
 0x4ea   : > { %3178 = vperm.xlu2 %9936, %v11957_v8   ;;  %4228 = vst.msk [vmem:[#allocation3 + $0x70] sm:$0xff] %vm3489_vm15, %v12089_v1 }
 0x4eb   : > { %4244 = vst.msk [vmem:[#allocation3 + $0xf0] sm:$0xff] %vm3489_vm15, %v12094_v38  ;;  %9963 = vpow2.f32 %v3015_v41 }
 0x4ec   : > { %15202 = vst [vmem:[#allocation46_spill] sm:$0xff] %v12123_v7 }
 0x4ee   : > { %v2888_v6 = vpop.xlane.xlu2 %2887  ;;  %v2840_v60 = vpop.xlane.xlu1 %2839 }
 0x4ef   : > { %v12118_v37 = vmax.f32 %v12111_v12, %v2888_v6  ;;  %v12121_v11 = vmax.f32 %v12113_v23, %v2840_v60  ;;  %v2864_v52 = vpop.xlane.xlu0 %2863  ;;  %v12143_v60 = vld [vmem:[#allocation3 + $0xf8] sm:$0xff]  ;;  %v3029_v6 = vmul.f32 1.442695, %v2971_v63  ;;  %v9556_v63 = vld [vmem:[%s10803_s12 + $0x28] sm:$0xff] }
 0x4f0   : > { %v12126_v18 = vmax.f32 %v12115_v59, %v2864_v52  ;;  %3571 = vperm.xlu1 %9938, %v12123_v7   ;;  %v2949_v52 = vsub.f32 %v11946_v58, %v11954_v47  ;;  %v9558_v7 = vld [vmem:[%s10803_s12 + $0x38] sm:$0xff] }
 0x4f1   : > { %4237 = vst.msk [vmem:[#allocation3 + $0xb8] sm:$0xff] %vm3489_vm15, %v12118_v37  ;;  %3143 = vperm.xlu0 %9937, %v11985_v5   ;;  %v12149_v48 = vpop.eup %9963  ;;  %3955 = vmatpush.bf16.msrb.mxu1 %v9558_v7  ;;  %9965 = vpow2.f32 %v3029_v6  ;;  %v2957_v7 = vsub.f32 %v11979_v4, %v11990_v19  ;;  %v9553_v4 = vld [vmem:[%s10803_s12 + $0x10] sm:$0xff] }
 0x4f2   : > { %3063 = vperm.xlu2 %9936, %v11954_v47   ;;  %4221 = vst.msk [vmem:[#allocation3 + $0x38] sm:$0xff] %vm3489_vm15, %v12121_v11  ;;  %v2985_v34 = vmul.f32 1.442695, %v2949_v52  ;;  %v9557_v47 = vld [vmem:[%s10803_s12 + $0x30] sm:$0xff] }
 0x4f3   : > { %4229 = vst.msk [vmem:[#allocation3 + $0x78] sm:$0xff] %vm3489_vm15, %v12126_v18 }
 0x4f4   : > { %9967 = vpow2.f32 %v2985_v34  ;;  %v9554_v34 = vld [vmem:[%s10803_s12 + $0x18] sm:$0xff] }
 0x4f5   : > { %3956 = vmatpush.bf16.msrb.mxu1 %v9557_v47  ;;  %3870 = vmatpush.bf16.msrb.mxu0 %v9554_v34 }
 0x4f6   : > { %v2912_v51 = vpop.xlane.xlu1 %2911 }
 0x4f7   : > { %v12146_v43 = vmax.f32 %v12143_v60, %v2912_v51  ;;  %v2956_v51 = vsub.f32 %v11916_v46, %v11924_v2  ;;  %v12162_v52 = vpop.eup %9965  ;;  %v9555_v46 = vld [vmem:[%s10803_s12 + $0x20] sm:$0xff]  ;;  %v3001_v2 = vmul.f32 1.442695, %v2957_v7  ;;  %v9552_v7 = vld [vmem:[%s10803_s12 + $0x8] sm:$0xff] }
 0x4f8   : > { %3183 = vperm.xlu1 %9938, %v12014_v16   ;;  %15203 = vst [vmem:[#allocation47_spill] sm:$0xff] %v12162_v52 }
 0x4f9   : > { %4245 = vst.msk [vmem:[#allocation3 + $0xf8] sm:$0xff] %vm3489_vm15, %v12146_v43  ;;  %3651 = vperm.xlu0 %9937, %v12149_v48   ;;  %v2999_v41 = vmul.f32 1.442695, %v2956_v51  ;;  %3957 = vmatpush.bf16.msrb.mxu1 %v9556_v63 }
 0x4fa   : > { %3103 = vperm.xlu2 %9936, %v11990_v19   ;;  %v12164_v58 = vpop.eup %9967  ;;  %v12169_v6 = vpop.permute.xlu2 %3043  ;;  %v2958_v19 = vsub.f32 %v12045_v57, %v12052_v28  ;;  %3871 = vmatpush.bf16.msrb.mxu0 %v9553_v4  ;;  %v9561_v57 = vld [vmem:[%s10803_s12 + $0x50] sm:$0xff] }
 0x4fb   : > { %15204 = vst [vmem:[#allocation48_spill] sm:$0xff] %v12164_v58  ;;  %9969 = vpow2.f32 %v2999_v41  ;;  %v9566_v41 = vld [vmem:[%s10803_s12 + $0x78] sm:$0xff] }
 0x4fc   : > { %9971 = vpow2.f32 %v3001_v2  ;;  %v3003_v63 = vmul.f32 1.442695, %v2958_v19  ;;  %4125 = vmatpush.bf16.msrb.mxu3 %v9566_v41  ;;  %v9565_v2 = vld [vmem:[%s10803_s12 + $0x70] sm:$0xff] }
 0x4fd   : > { %3958 = vmatpush.bf16.msrb.mxu1 %v9555_v46  ;;  %v9562_v46 = vld [vmem:[%s10803_s12 + $0x58] sm:$0xff] }
 0x4fe   : > { %3872 = vmatpush.bf16.msrb.mxu0 %v9552_v7  ;;  %9973 = vpow2.f32 %v3003_v63  ;;  %4040 = vmatpush.bf16.msrb.mxu2 %v9562_v46  ;;  %v9564_v7 = vld [vmem:[%s10803_s12 + $0x68] sm:$0xff] }
 0x4ff   : > { %v9560_v46 = vld [vmem:[%s10803_s12 + $0x48] sm:$0xff] }
 0x500   : > { %3068 = vperm.xlu1 %9938, %v12017_v3   ;;  %4126 = vmatpush.bf16.msrb.mxu3 %v9565_v2 }
 0x501   : > { %3576 = vperm.xlu0 %9937, %v12164_v58   ;;  %v12175_v51 = vpop.eup %9969 }
 0x502   : > { %3686 = vperm.xlu2 %9936, %v12162_v52   ;;  %15205 = vst [vmem:[#allocation49_spill] sm:$0xff] %v12175_v51  ;;  %v12188_v34 = vpop.eup %9971  ;;  %4041 = vmatpush.bf16.msrb.mxu2 %v9561_v57 }
 0x503   : > { %v12183_v47 = vpop.permute.xlu2 %3163  ;;  %15206 = vst [vmem:[#allocation50_spill] sm:$0xff] %v12188_v34 }
 0x504   : > { %4127 = vmatpush.bf16.msrb.mxu3 %v9564_v7  ;;  %v12203_v2 = vpop.eup %9973  ;;  %v3225_v7 = vsub.f32 %v11747_v35, %v12183_v47 }
 0x506   : > { %4042 = vmatpush.bf16.msrb.mxu2 %v9560_v46  ;;  %v3281_v47 = vmul.f32 1.442695, %v3225_v7 }
 0x508   : > { %3108 = vperm.xlu1 %9938, %v12052_v28   ;;  %v9551_v28 = vld [vmem:[%s10803_s12] sm:$0xff] }
 0x509   : > { %3188 = vperm.xlu0 %9937, %v12055_v15   ;;  %3873 = vmatpush.bf16.msrb.mxu0 %v9551_v28  ;;  %v15209_v28 = vsub.f32 %v12011_v53, %v12022_v14 }
 0x50a   : > { %3611 = vperm.xlu2 %9936, %v12175_v51  }
 0x50b   : > { %v3019_v57 = vmul.f32 1.442695, %v15209_v28 }
 0x510   : > { %3616 = vperm.xlu1 %9938, %v12188_v34   ;;  %v15207_v34 = vsub.f32 %v11977_v33, %v11985_v5  ;;  %v9559_v5 = vld [vmem:[%s10803_s12 + $0x40] sm:$0xff] }
 0x511   : > { %3113 = vperm.xlu0 %9937, %v12089_v1   ;;  %4043 = vmatpush.bf16.msrb.mxu2 %v9559_v5 }
 0x512   : > { %3148 = vperm.xlu2 %9936, %v12022_v14   ;;  %v3017_v58 = vmul.f32 1.442695, %v15207_v34 }
 0x513   : > { %v3084_v4 = vpop.permute.xlu0 %3083 }
 0x514   : > { %v3089_v19 = vpop.permute.xlu2 %3088  ;;  %v3209_v51 = vsub.f32 %v11739_v42, %v3084_v4 }
 0x515   : > { %v3210_v41 = vsub.f32 %v11753_v25, %v3089_v19  ;;  %v9563_v25 = vld [vmem:[%s10803_s12 + $0x60] sm:$0xff] }
 0x516   : > { %v3249_v63 = vmul.f32 1.442695, %v3209_v51  ;;  %4128 = vmatpush.bf16.msrb.mxu3 %v9563_v25  ;;  %v15208_v51 = vsub.f32 %v12007_v36, %v12014_v16 }
 0x517   : > { %v3251_v52 = vmul.f32 1.442695, %v3210_v41 }
 0x518   : > { %3153 = vperm.xlu1 %9938, %v12086_v54   ;;  %v3033_v34 = vmul.f32 1.442695, %v15208_v51  ;;  %v15211_v51 = vsub.f32 %v12049_v30, %v12060_v17 }
 0x519   : > { %9975 = vpow2.f32 %v3251_v52  ;;  %3621 = vperm.xlu0 %9937, %v12203_v2   ;;  %v3201_v52 = vsub.f32 %v11737_v61, %v12169_v6 }
 0x51a   : > { %9977 = vpow2.f32 %v3249_v63  ;;  %3073 = vperm.xlu2 %9936, %v12060_v17   ;;  %v3124_v42 = vpop.permute.xlu1 %3123  ;;  %v2952_v17 = vsub.f32 %v12113_v23, %v12121_v11 }
 0x51b   : > { %9979 = vpow2.f32 %v3017_v58  ;;  %v15210_v58 = vsub.f32 %v12009_v26, %v12017_v3  ;;  %v3233_v61 = vmul.f32 1.442695, %v3201_v52  ;;  %v2967_v26 = vsub.f32 %v12079_v45, %v12086_v54 }
 0x51c   : > { %v12210_v33 = vpop.permute.xlu2 %3596  ;;  %9981 = vpow2.f32 %v3033_v34  ;;  %v2989_v34 = vmul.f32 1.442695, %v15211_v51  ;;  %v3217_v52 = vsub.f32 %v11745_v56, %v3124_v42 }
 0x51d   : > { %v2987_v4 = vmul.f32 1.442695, %v15210_v58  ;;  %9983 = vpow2.f32 %v3019_v57  ;;  %v3021_v45 = vmul.f32 1.442695, %v2967_v26  ;;  %v2991_v26 = vmul.f32 1.442695, %v2952_v17 }
 0x51e   : > { %v15213_v17 = vsub.f32 %v11948_v27, %v11957_v8 }
 0x51f   : > { %v12220_v19 = vpop.eup %9975  ;;  %9985 = vpow2.f32 %v2987_v4 }
 0x520   : > { %v12225_v41 = vpop.eup %9977  ;;  %v3755_v16 = vpack.c.bf16 %v12220_v19, %v12220_v19  ;;  %3078 = vperm.xlu1 %9938, %v12121_v11   ;;  %9987 = vpow2.f32 %v3233_v61 }
 0x521   : > { %v12229_v36 = vpop.eup %9979  ;;  %v3754_v14 = vpack.c.bf16 %v12225_v41, %v12225_v41  ;;  %3158 = vperm.xlu0 %9937, %v12118_v37  }
 0x522   : > { %v3904_v53 = vunpack.c.l.b16 %v3755_v16  ;;  %3656 = vperm.xlu2 %9936, %v12229_v36   ;;  %v12238_v6 = vpop.permute.xlu1 %3556  ;;  %v12249_v54 = vpop.eup %9981 }
 0x523   : > { %v3903_v3 = vunpack.c.l.b16 %v3754_v14  ;;  %v3049_v46 = vpop.permute.xlu0 %3048  ;;  %v12252_v35 = vpop.eup %9983 }
 0x524   : > { %v12242_v63 = vpop.permute.xlu2 %3561  ;;  %v3202_v25 = vsub.f32 %v11755_v22, %v3049_v46  ;;  %v3265_v22 = vmul.f32 1.442695, %v3217_v52 }
 0x525   : > { %v3911_v5 = vpack.c.b16 %v3904_v53, %v3903_v3  ;;  %v12254_v57 = vpop.eup %9985 }
 0x526   : > { %v3235_v28 = vmul.f32 1.442695, %v3202_v25  ;;  %v12259_v56 = vpop.eup %9987 }
 0x527   : > { %8949 = vmatmul.msk.bf16.vlgmr.msrb.gmra.mxu1 %vm2816_vm14, %v3911_v5  ;;  %v3746_v61 = vpack.c.bf16 %v12259_v56, %v12259_v56 }
 0x528   : > { %9989 = vpow2.f32 %v3235_v28  ;;  %3661 = vperm.xlu1 %9938, %v12252_v35  }
 0x529   : > { %9991 = vpow2.f32 %v2989_v34  ;;  %3696 = vperm.xlu0 %9937, %v12249_v54   ;;  %v3818_v23 = vunpack.c.l.b16 %v3746_v61 }
 0x52a   : > { %3581 = vperm.xlu2 %9936, %v12254_v57   ;;  %9993 = vpow2.f32 %v3021_v45  ;;  %v3169_v30 = vpop.permute.xlu1 %3168 }
 0x52b   : > { %9995 = vpow2.f32 %v3281_v47  ;;  %v3226_v42 = vsub.f32 %v11759_v24, %v3169_v30  ;;  %v3129_v4 = vpop.permute.xlu0 %3128  ;;  %v3031_v30 = vmul.f32 1.442695, %v15213_v17  ;;  %v15215_v17 = vsub.f32 %v12111_v12, %v12118_v37 }
 0x52c   : > { %v12264_v58 = vpop.permute.xlu2 %3133  ;;  %v3218_v16 = vsub.f32 %v11757_v29, %v3129_v4  ;;  %9997 = vpow2.f32 %v3265_v22 }
 0x52d   : > { %v3283_v14 = vmul.f32 1.442695, %v3226_v42 }
 0x52e   : > { %v12269_v53 = vpop.eup %9989  ;;  %v3267_v3 = vmul.f32 1.442695, %v3218_v16 }
 0x52f   : > { %v12271_v7 = vpop.eup %9991  ;;  %v3747_v11 = vpack.c.bf16 %v12269_v53, %v12269_v53  ;;  %9999 = vpow2.f32 %v3283_v14 }
 0x530   : > { %15212 = vst [vmem:[#allocation51_spill] sm:$0xff] %v12271_v7  ;;  %v12275_v24 = vpop.eup %9993  ;;  %3586 = vperm.xlu1 %9938, %v12271_v7   ;;  %10001 = vpow2.f32 %v3267_v3 }
 0x531   : > { %v12278_v29 = vpop.eup %9995  ;;  %v3819_v46 = vunpack.c.l.b16 %v3747_v11  ;;  %3666 = vperm.xlu0 %9937, %v12275_v24   ;;  %10003 = vpow2.f32 %v2991_v26 }
 0x532   : > { %3193 = vperm.xlu2 %9936, %v12094_v38   ;;  %v3054_v25 = vpop.permute.xlu1 %3053  ;;  %v12282_v5 = vpop.eup %9997  ;;  %v3770_v28 = vpack.c.bf16 %v12278_v29, %v12278_v29 }
 0x533   : > { %v3203_v51 = vsub.f32 %v11767_v62, %v3054_v25  ;;  %v12285_v52 = vpop.permute.xlu0 %3636  ;;  %v3826_v45 = vpack.c.b16 %v3819_v46, %v3818_v23  ;;  %v15214_v62 = vsub.f32 %v12081_v39, %v12089_v1  ;;  %v3762_v16 = vpack.c.bf16 %v12282_v5, %v12282_v5 }
 0x534   : > { %v3059_v34 = vpop.permute.xlu2 %3058  ;;  %v4073_v27 = vunpack.c.l.b16 %v3770_v28  ;;  %v2960_v1 = vsub.f32 %v12115_v59, %v12126_v18 }
 0x535   : > { %v3204_v47 = vsub.f32 %v11781_v21, %v3059_v34  ;;  %v12290_v22 = vpop.eup %9999  ;;  %v3237_v42 = vmul.f32 1.442695, %v3203_v51  ;;  %8929 = vmatmul.msk.bf16.vlgmr.msrb.gmra.mxu0 %vm2816_vm14, %v3826_v45  ;;  %v3005_v4 = vmul.f32 1.442695, %v15214_v62  ;;  %v3988_v39 = vunpack.c.l.b16 %v3762_v16 }
 0x536   : > { %v3771_v61 = vpack.c.bf16 %v12290_v22, %v12290_v22  ;;  %v12303_v14 = vpop.eup %10001  ;;  %v3007_v59 = vmul.f32 1.442695, %v2960_v1 }
 0x537   : > { %v3239_v21 = vmul.f32 1.442695, %v3204_v47  ;;  %10005 = vpow2.f32 %v3237_v42  ;;  %v12305_v26 = vpop.eup %10003  ;;  %v3763_v3 = vpack.c.bf16 %v12303_v14, %v12303_v14 }
 0x538   : > { %v4074_v8 = vunpack.c.l.b16 %v3771_v61  ;;  %3198 = vperm.xlu1 %9938, %v12146_v43  }
 0x539   : > { %10007 = vpow2.f32 %v3239_v21  ;;  %3591 = vperm.xlu0 %9937, %v12305_v26   ;;  %v3989_v11 = vunpack.c.l.b16 %v3763_v3 }
 0x53a   : > { %10009 = vpow2.f32 %v3031_v30  ;;  %3118 = vperm.xlu2 %9936, %v12126_v18   ;;  %v3094_v23 = vpop.permute.xlu1 %3093  ;;  %v4081_v46 = vpack.c.b16 %v4074_v8, %v4073_v27  ;;  %v3023_v30 = vmul.f32 1.442695, %v15215_v17 }
 0x53b   : > { %10011 = vpow2.f32 %v3005_v4  ;;  %v3174_v51 = vpop.permute.xlu0 %3173  ;;  %v3996_v45 = vpack.c.b16 %v3989_v11, %v3988_v39  ;;  %v3211_v18 = vsub.f32 %v11769_v44, %v3094_v23 }
 0x53c   : > { %v12314_v25 = vpop.permute.xlu2 %3641  ;;  %v3227_v34 = vsub.f32 %v11773_v13, %v3174_v51  ;;  %8989 = vmatmul.msk.bf16.vlgmr.msrb.gmra.mxu3 %vm2816_vm14, %v4081_v46  ;;  %10013 = vpow2.f32 %v3007_v59 }
 0x53d   : > { %v12318_v28 = vpop.eup %10005  ;;  %8969 = vmatmul.msk.bf16.vlgmr.msrb.gmra.mxu2 %vm2816_vm14, %v3996_v45  ;;  %v3253_v44 = vmul.f32 1.442695, %v3211_v18  ;;  %10015 = vpow2.f32 %v3023_v30 }
 0x53e   : > { %v3748_v42 = vpack.c.bf16 %v12318_v28, %v12318_v28  ;;  %v3285_v16 = vmul.f32 1.442695, %v3227_v34  ;;  %v3219_v34 = vsub.f32 %v11775_v32, %v12264_v58 }
 0x53f   : > { %v12321_v47 = vpop.eup %10007 }
 0x540   : > { %v12329_v13 = vpop.eup %10009  ;;  %v3749_v62 = vpack.c.bf16 %v12321_v47, %v12321_v47  ;;  %v3820_v37 = vunpack.c.l.b16 %v3748_v42  ;;  %10017 = vpow2.f32 %v3285_v16 }
 0x541   : > { %v12333_v4 = vpop.eup %10011  ;;  %3691 = vperm.xlu1 %9938, %v12329_v13   ;;  %10019 = vpow2.f32 %v3253_v44 }
 0x542   : > { %15216 = vst [vmem:[#allocation52_spill] sm:$0xff] %v12333_v4  ;;  %3626 = vperm.xlu2 %9936, %v12333_v4   ;;  %v3821_v12 = vunpack.c.l.b16 %v3749_v62  ;;  %v12337_v61 = vpop.permute.xlu1 %3676  ;;  %v12342_v23 = vpop.eup %10013  ;;  %v3269_v62 = vmul.f32 1.442695, %v3219_v34 }
 0x543   : > { %v3099_v27 = vpop.permute.xlu0 %3098  ;;  %15217 = vst [vmem:[#allocation53_spill] sm:$0xff] %v12342_v23  ;;  %v12344_v46 = vpop.eup %10015 }
 0x544   : > { %v3179_v21 = vpop.permute.xlu2 %3178  ;;  %v3827_v8 = vpack.c.b16 %v3821_v12, %v3820_v37  ;;  %v3212_v1 = vsub.f32 %v11783_v10, %v3099_v27  ;;  %15218 = vst [vmem:[#allocation54_spill] sm:$0xff] %v12344_v46 }
 0x545   : > { %v3228_v3 = vsub.f32 %v11795_v50, %v3179_v21 }
 0x546   : > { %8930 = vmatmul.msk.bf16.gmra.mxu0 %vm2816_vm14, %v3827_v8  ;;  %v3255_v11 = vmul.f32 1.442695, %v3212_v1  ;;  %v12348_v51 = vpop.eup %10017 }
 0x547   : > { %v3287_v39 = vmul.f32 1.442695, %v3228_v3  ;;  %v12352_v10 = vpop.eup %10019  ;;  %v3772_v18 = vpack.c.bf16 %v12348_v51, %v12348_v51 }
 0x548   : > { %v3756_v30 = vpack.c.bf16 %v12352_v10, %v12352_v10 }
 0x549   : > { %10021 = vpow2.f32 %v3287_v39  ;;  %3631 = vperm.xlu1 %9938, %v12342_v23   ;;  %v4075_v58 = vunpack.c.l.b16 %v3772_v18 }
 0x54a   : > { %10023 = vpow2.f32 %v3255_v11  ;;  %3671 = vperm.xlu2 %9936, %v12344_v46   ;;  %v12350_v50 = vpop.permute.xlu1 %3601  ;;  %v3905_v12 = vunpack.c.l.b16 %v3756_v30 }
 0x54b   : > { %v12356_v59 = vpop.permute.xlu0 %3681  ;;  %10025 = vpow2.f32 %v3269_v62 }
 0x54c   : > { %v3064_v45 = vpop.permute.xlu2 %3063 }
 0x54f   : > { %v12360_v17 = vpop.eup %10021 }
 0x550   : > { %v12364_v42 = vpop.eup %10023  ;;  %v3773_v16 = vpack.c.bf16 %v12360_v17, %v12360_v17 }
 0x551   : > { %v3757_v32 = vpack.c.bf16 %v12364_v42, %v12364_v42  ;;  %v12375_v34 = vpop.eup %10025 }
 0x552   : > { %v4076_v44 = vunpack.c.l.b16 %v3773_v16  ;;  %v3139_v37 = vpop.permute.xlu1 %3138 }
 0x553   : > { %v3906_v21 = vunpack.c.l.b16 %v3757_v32  ;;  %v3220_v27 = vsub.f32 %v11791_v49, %v3139_v37  ;;  %v12371_v3 = vpop.permute.xlu0 %3566  ;;  %v3764_v49 = vpack.c.bf16 %v12375_v34, %v12375_v34 }
 0x554   : > { %v3104_v8 = vpop.permute.xlu2 %3103  ;;  %v4082_v1 = vpack.c.b16 %v4076_v44, %v4075_v58 }
 0x555   : > { %v3912_v39 = vpack.c.b16 %v3906_v21, %v3905_v12  ;;  %v3271_v11 = vmul.f32 1.442695, %v3220_v27  ;;  %v3990_v58 = vunpack.c.l.b16 %v3764_v49  ;;  %v3361_v12 = vsel %vm2816_vm14, %v12259_v56, 0.0 }
 0x556   : > { %8990 = vmatmul.msk.bf16.gmra.mxu3 %vm2816_vm14, %v4082_v1  ;;  %v3409_v49 = vsel %vm2816_vm14, %v12282_v5, 0.0  ;;  %v3436_v5 = vsel %vm2816_vm14, %v12290_v22, 0.0 }
 0x557   : > { %8950 = vmatmul.msk.bf16.gmra.mxu1 %vm2816_vm14, %v3912_v39  ;;  %10027 = vpow2.f32 %v3271_v11 }
 0x55a   : > { %v12377_v18 = vpop.permute.xlu1 %3646 }
 0x55b   : > { %v12381_v62 = vpop.permute.xlu0 %3606 }
 0x55c   : > { %v12379_v30 = vpop.permute.xlu2 %3686 }
 0x55d   : > { %v12385_v16 = vpop.eup %10027 }
 0x55e   : > { %v3765_v32 = vpack.c.bf16 %v12385_v16, %v12385_v16 }
 0x560   : > { %v3991_v44 = vunpack.c.l.b16 %v3765_v32  ;;  %v3205_v32 = vsub.f32 %v11793_v40, %v3064_v45 }
 0x562   : > { %v12389_v37 = vpop.permute.xlu1 %3571  ;;  %v3997_v21 = vpack.c.b16 %v3991_v44, %v3990_v58  ;;  %v3241_v44 = vmul.f32 1.442695, %v3205_v32  ;;  %v3364_v32 = vsel %vm2816_vm14, %v12269_v53, 0.0 }
 0x563   : > { %v3144_v1 = vpop.permute.xlu0 %3143  ;;  %3362 = vadd.xlane.f32.xlu0 %v3361_v12  ;;  %v3433_v12 = vsel %vm2816_vm14, %v12278_v29, 0.0 }
 0x564   : > { %v12393_v27 = vpop.permute.xlu2 %3611  ;;  %v3221_v39 = vsub.f32 %v11803_v0, %v3144_v1  ;;  %8970 = vmatmul.msk.bf16.gmra.mxu2 %vm2816_vm14, %v3997_v21  ;;  %v3385_v0 = vsel %vm2816_vm14, %v12225_v41, 0.0 }
 0x566   : > { %v3273_v11 = vmul.f32 1.442695, %v3221_v39 }
 0x568   : > { %10029 = vpow2.f32 %v3273_v11 }
 0x56a   : > { %v3184_v23 = vpop.permute.xlu1 %3183 }
 0x56b   : > { %v12400_v7 = vpop.permute.xlu0 %3651  ;;  %3410 = vadd.xlane.f32.xlu0 %v3409_v49  ;;  %v3229_v41 = vsub.f32 %v11813_v20, %v3184_v23 }
 0x56c   : > { %v3149_v46 = vpop.permute.xlu2 %3148 }
 0x56d   : > { %v3222_v56 = vsub.f32 %v11817_v9, %v3149_v46  ;;  %v3213_v9 = vsub.f32 %v11805_v55, %v3104_v8  ;;  %v3289_v22 = vmul.f32 1.442695, %v3229_v41  ;;  %v3412_v8 = vsel %vm2816_vm14, %v12303_v14, 0.0  ;;  %v15220_v14 = vld [vmem:[#allocation24_spill] sm:$0xff] }
 0x56e   : > { %v12407_v21 = vpop.eup %10029 }
 0x56f   : > { %v3275_v58 = vmul.f32 1.442695, %v3222_v56  ;;  %v3766_v39 = vpack.c.bf16 %v12407_v21, %v12407_v21  ;;  %v3257_v49 = vmul.f32 1.442695, %v3213_v9 }
 0x571   : > { %10031 = vpow2.f32 %v3275_v58  ;;  %v3992_v20 = vunpack.c.l.b16 %v3766_v39  ;;  %v3391_v58 = vsel %vm2816_vm14, %v12352_v10, 0.0 }
 0x572   : > { %v3069_v40 = vpop.permute.xlu1 %3068  ;;  %10033 = vpow2.f32 %v3241_v44  ;;  %v15219_v44 = vld [vmem:[#allocation23_spill] sm:$0xff] }
 0x573   : > { %3386 = vadd.xlane.f32.xlu1 %v3385_v0  ;;  %3434 = vadd.xlane.f32.xlu2 %v3433_v12  ;;  %v3206_v46 = vsub.f32 %v11815_v31, %v3069_v40  ;;  %v12415_v1 = vpop.permute.xlu0 %3576 }
 0x574   : > { %v12413_v45 = vpop.permute.xlu2 %3073  ;;  %3437 = vadd.xlane.f32.xlu0 %v3436_v5 }
 0x575   : > { %v3243_v29 = vmul.f32 1.442695, %v3206_v46 }
 0x577   : > { %v12420_v11 = vpop.eup %10031  ;;  %10035 = vpow2.f32 %v3243_v29 }
 0x578   : > { %v3767_v55 = vpack.c.bf16 %v12420_v11, %v12420_v11  ;;  %v10034_v31 = vpop.eup %10033  ;;  %10037 = vpow2.f32 %v3257_v49 }
 0x579   : > { %10039 = vpow2.f32 %v3289_v22  ;;  %v3750_v53 = vpack.c.bf16 %v10034_v31, %v10034_v31  ;;  %v3367_v22 = vsel %vm2816_vm14, %v12318_v28, 0.0 }
 0x57a   : > { %v3993_v23 = vunpack.c.l.b16 %v3767_v55  ;;  %v3109_v56 = vpop.permute.xlu1 %3108 }
 0x57b   : > { %3413 = vadd.xlane.f32.xlu1 %v3412_v8  ;;  %3365 = vadd.xlane.f32.xlu2 %v3364_v32  ;;  %v3214_v0 = vsub.f32 %v15219_v44, %v3109_v56  ;;  %v3189_v40 = vpop.permute.xlu0 %3188  ;;  %v3822_v39 = vunpack.c.l.b16 %v3750_v53  ;;  %v3388_v8 = vsel %vm2816_vm14, %v12220_v19, 0.0  ;;  %v3439_v53 = vsel %vm2816_vm14, %v12348_v51, 0.0 }
 0x57c   : > { %v12431_v12 = vpop.permute.xlu2 %3656  ;;  %3392 = vadd.xlane.f32.xlu0 %v3391_v58  ;;  %v3998_v5 = vpack.c.b16 %v3993_v23, %v3992_v20  ;;  %v3230_v9 = vsub.f32 %v15220_v14, %v3189_v40  ;;  %v3418_v23 = vsel %vm2816_vm14, %v12385_v16, 0.0 }
 0x57d   : > { %v12434_v46 = vpop.eup %10035  ;;  %v3259_v41 = vmul.f32 1.442695, %v3214_v0 }
 0x57e   : > { %8971 = vmatmul.msk.bf16.gmra.mxu2 %vm2816_vm14, %v3998_v5  ;;  %v3291_v29 = vmul.f32 1.442695, %v3230_v9  ;;  %v3751_v10 = vpack.c.bf16 %v12434_v46, %v12434_v46  ;;  %v12439_v55 = vpop.eup %10037 }
 0x57f   : > { %10041 = vpow2.f32 %v3259_v41  ;;  %v10040_v32 = vpop.eup %10039  ;;  %v3758_v28 = vpack.c.bf16 %v12439_v55, %v12439_v55  ;;  %v3415_v41 = vsel %vm2816_vm14, %v12375_v34, 0.0  ;;  %v15223_v34 = vld [vmem:[#allocation26_spill] sm:$0xff] }
 0x580   : > { %10043 = vpow2.f32 %v3291_v29  ;;  %v3823_v49 = vunpack.c.l.b16 %v3751_v10  ;;  %v3774_v19 = vpack.c.bf16 %v10040_v32, %v10040_v32 }
 0x581   : > { %v3907_v9 = vunpack.c.l.b16 %v3758_v28 }
 0x582   : > { %v12445_v20 = vpop.permute.xlu1 %3616  ;;  %v3828_v56 = vpack.c.b16 %v3823_v49, %v3822_v39  ;;  %v4077_v29 = vunpack.c.l.b16 %v3774_v19  ;;  %v3373_v49 = vsel %vm2816_vm14, %v10034_v31, 0.0 }
 0x583   : > { %3368 = vadd.xlane.f32.xlu1 %v3367_v22  ;;  %3389 = vadd.xlane.f32.xlu2 %v3388_v8  ;;  %v3114_v44 = vpop.permute.xlu0 %3113  ;;  %v15221_v8 = vld [vmem:[#allocation25_spill] sm:$0xff] }
 0x584   : > { %v12449_v58 = vpop.permute.xlu2 %3581  ;;  %3419 = vadd.xlane.f32.xlu0 %v3418_v23  ;;  %8931 = vmatmul.msk.bf16.gmra.mxu0 %vm2816_vm14, %v3828_v56  ;;  %v3207_v23 = vsub.f32 %v15221_v8, %v12413_v45  ;;  %v3394_v45 = vsel %vm2816_vm14, %v12364_v42, 0.0 }
 0x585   : > { %v10042_v0 = vpop.eup %10041 }
 0x586   : > { %v12454_v40 = vpop.eup %10043  ;;  %v3759_v5 = vpack.c.bf16 %v10042_v0, %v10042_v0 }
 0x587   : > { %v3775_v14 = vpack.c.bf16 %v12454_v40, %v12454_v40 }
 0x588   : > { %v3908_v16 = vunpack.c.l.b16 %v3759_v5  ;;  %v15222_v5 = vld [vmem:[#allocation27_spill] sm:$0xff] }
 0x589   : > { %v4078_v10 = vunpack.c.l.b16 %v3775_v14  ;;  %v3215_v4 = vsub.f32 %v15222_v5, %v3114_v44  ;;  %v3245_v14 = vmul.f32 1.442695, %v3207_v23  ;;  %v3445_v44 = vsel %vm2816_vm14, %v10040_v32, 0.0 }
 0x58a   : > { %v3154_v39 = vpop.permute.xlu1 %3153  ;;  %v3913_v22 = vpack.c.b16 %v3908_v16, %v3907_v9  ;;  %v3370_v16 = vsel %vm2816_vm14, %v12321_v47, 0.0  ;;  %v3421_v32 = vsel %vm2816_vm14, %v12407_v21, 0.0  ;;  %v3442_v5 = vsel %vm2816_vm14, %v12360_v17, 0.0 }
 0x58b   : > { %3440 = vadd.xlane.f32.xlu1 %v3439_v53  ;;  %3416 = vadd.xlane.f32.xlu2 %v3415_v41  ;;  %v12467_v28 = vpop.permute.xlu0 %3621  ;;  %v4083_v51 = vpack.c.b16 %v4078_v10, %v4077_v29  ;;  %v3223_v19 = vsub.f32 %v15223_v34, %v3154_v39  ;;  %v3261_v31 = vmul.f32 1.442695, %v3215_v4  ;;  %10045 = vpow2.f32 %v3245_v14  ;;  %v15224_v41 = vld [vmem:[#allocation29_spill] sm:$0xff]  ;;  %v15225_v4 = vld [vmem:[#allocation31_spill] sm:$0xff] }
 0x58c   : > { %v12465_v56 = vpop.permute.xlu2 %3193  ;;  %3374 = vadd.xlane.f32.xlu0 %v3373_v49  ;;  %8951 = vmatmul.msk.bf16.gmra.mxu1 %vm2816_vm14, %v3913_v22  ;;  %v15226_v22 = vld [vmem:[#allocation30_spill] sm:$0xff]  ;;  %v3400_v14 = vsel %vm2816_vm14, %v10042_v0, 0.0 }
 0x58d   : > { %8991 = vmatmul.msk.bf16.gmra.mxu3 %vm2816_vm14, %v4083_v51  ;;  %v3277_v9 = vmul.f32 1.442695, %v3223_v19  ;;  %10047 = vpow2.f32 %v3261_v31 }
 0x58f   : > { %10049 = vpow2.f32 %v3277_v9 }
 0x591   : > { %v12481_v51 = vpop.eup %10045 }
 0x592   : > { %v3079_v53 = vpop.permute.xlu1 %3078  ;;  %v3752_v9 = vpack.c.bf16 %v12481_v51, %v12481_v51 }
 0x593   : > { %3395 = vadd.xlane.f32.xlu1 %v3394_v45  ;;  %3371 = vadd.xlane.f32.xlu2 %v3370_v16  ;;  %v3208_v29 = vsub.f32 %v15224_v41, %v3079_v53  ;;  %v3159_v39 = vpop.permute.xlu0 %3158  ;;  %v10048_v34 = vpop.eup %10047  ;;  %v3530_v16 = vld [vmem:[#allocation5 + $0x40] sm:$0xff] }
 0x594   : > { %v3119_v10 = vpop.permute.xlu2 %3118  ;;  %3446 = vadd.xlane.f32.xlu0 %v3445_v44  ;;  %v3224_v8 = vsub.f32 %v15226_v22, %v3159_v39  ;;  %v3760_v53 = vpack.c.bf16 %v10048_v34, %v10048_v34  ;;  %v3824_v0 = vunpack.c.l.b16 %v3752_v9  ;;  %v3397_v22 = vsel %vm2816_vm14, %v12439_v55, 0.0 }
 0x595   : > { %v3216_v49 = vsub.f32 %v15225_v4, %v3119_v10  ;;  %v3247_v42 = vmul.f32 1.442695, %v3208_v29  ;;  %v10050_v31 = vpop.eup %10049  ;;  %v3722_v10 = vmul.f32 %v12210_v33, %v3530_v16 }
 0x596   : > { %v3279_v47 = vmul.f32 1.442695, %v3224_v8  ;;  %v3768_v41 = vpack.c.bf16 %v10050_v31, %v10050_v31  ;;  %v3909_v8 = vunpack.c.l.b16 %v3760_v53 }
 0x597   : > { %v3263_v23 = vmul.f32 1.442695, %v3216_v49  ;;  %10051 = vpow2.f32 %v3247_v42  ;;  %v3376_v49 = vsel %vm2816_vm14, %v12434_v46, 0.0 }
 0x599   : > { %10053 = vpow2.f32 %v3263_v23 }
 0x59a   : > { %10055 = vpow2.f32 %v3279_v47  ;;  %v12487_v19 = vpop.permute.xlu1 %3661  ;;  %v3427_v47 = vsel %vm2816_vm14, %v10050_v31, 0.0  ;;  %v3531_v31 = vld [vmem:[#allocation5 + $0x48] sm:$0xff] }
 0x59b   : > { %3422 = vadd.xlane.f32.xlu1 %v3421_v32  ;;  %3443 = vadd.xlane.f32.xlu2 %v3442_v5  ;;  %v3994_v32 = vunpack.c.l.b16 %v3768_v41  ;;  %v3448_v41 = vsel %vm2816_vm14, %v12454_v40, 0.0 }
 0x59c   : > { %3401 = vadd.xlane.f32.xlu0 %v3400_v14  ;;  %v15227_v14 = vld [vmem:[#allocation28_spill] sm:$0xff] }
 0x59d   : > { %v10052_v45 = vpop.eup %10051  ;;  %v3231_v9 = vsub.f32 %v15227_v14, %v12465_v56  ;;  %v3424_v56 = vsel %vm2816_vm14, %v12420_v11, 0.0  ;;  %v3523_v14 = vld [vmem:[#allocation5 + $0x8] sm:$0xff] }
 0x59e   : > { %v3753_v21 = vpack.c.bf16 %v10052_v45, %v10052_v45 }
 0x59f   : > { %v12492_v44 = vpop.eup %10053  ;;  %v3293_v53 = vmul.f32 1.442695, %v3231_v9 }
 0x5a0   : > { %v12494_v17 = vpop.eup %10055  ;;  %v3761_v29 = vpack.c.bf16 %v12492_v44, %v12492_v44  ;;  %v3825_v39 = vunpack.c.l.b16 %v3753_v21 }
 0x5a1   : > { %v3769_v4 = vpack.c.bf16 %v12494_v17, %v12494_v17  ;;  %10057 = vpow2.f32 %v3293_v53 }
 0x5a2   : > { %v3910_v42 = vunpack.c.l.b16 %v3761_v29  ;;  %v12505_v23 = vpop.permute.xlu1 %3586  ;;  %v3829_v33 = vpack.c.b16 %v3825_v39, %v3824_v0  ;;  %v3723_v29 = vmul.f32 %v12350_v50, %v3531_v31  ;;  %v3382_v0 = vsel %vm2816_vm14, %v10052_v45, 0.0  ;;  %v15228_v39 = vld [vmem:[#allocation32_spill] sm:$0xff] }
 0x5a3   : > { %3377 = vadd.xlane.f32.xlu1 %v3376_v49  ;;  %3398 = vadd.xlane.f32.xlu2 %v3397_v22  ;;  %v3995_v5 = vunpack.c.l.b16 %v3769_v4  ;;  %v3403_v50 = vsel %vm2816_vm14, %v10048_v34, 0.0  ;;  %v3715_v34 = vmul.f32 %v12242_v63, %v3523_v14 }
 0x5a4   : > { %v3960_v16 = vpop.f32.mrf.mxu1  ;;  %3428 = vadd.xlane.f32.xlu0 %v3427_v47  ;;  %v3914_v46 = vpack.c.b16 %v3910_v42, %v3909_v8  ;;  %8932 = vmatmul.msk.bf16.gmra.mxu0 %vm2816_vm14, %v3829_v33  ;;  %v3522_v42 = vld [vmem:[#allocation5] sm:$0xff]  ;;  %v3379_v47 = vsel %vm2816_vm14, %v12481_v51, 0.0  ;;  %v3430_v51 = vsel %vm2816_vm14, %v12494_v17, 0.0  ;;  %v15229_v17 = vsub.f32 %v12143_v60, %v12146_v43 }
 0x5a5   : > { %v4158_v21 = vadd.f32 %v3960_v16, %v3722_v10  ;;  %v3999_v55 = vpack.c.b16 %v3995_v5, %v3994_v32  ;;  %v3714_v11 = vmul.f32 %v12238_v6, %v3522_v42  ;;  %v3406_v42 = vsel %vm2816_vm14, %v12492_v44, 0.0  ;;  %v3525_v44 = vld [vmem:[#allocation5 + $0x18] sm:$0xff] }
 0x5a6   : > { %8952 = vmatmul.msk.bf16.gmra.mxu1 %vm2816_vm14, %v3914_v46  ;;  %v3717_v14 = vmul.f32 %v12389_v37, %v3525_v44 }
 0x5a7   : > { %4190 = vst.msk [vmem:[#allocation5 + $0x40] sm:$0xff] %vm2451_vm13, %v4158_v21  ;;  %8972 = vmatmul.msk.bf16.gmra.mxu2 %vm2816_vm14, %v3999_v55  ;;  %v10058_v40 = vpop.eup %10057  ;;  %v12532_v55 = vpop.permute.xlu0 %3696 }
 0x5a8   : > { %v3776_v32 = vpack.c.bf16 %v10058_v40, %v10058_v40  ;;  %v3451_v21 = vsel %vm2816_vm14, %v10058_v40, 0.0 }
 0x5aa   : > { %v3199_v10 = vpop.permute.xlu1 %3198  ;;  %v4079_v46 = vunpack.c.l.b16 %v3776_v32 }
 0x5ab   : > { %3449 = vadd.xlane.f32.xlu1 %v3448_v41  ;;  %3425 = vadd.xlane.f32.xlu2 %v3424_v56  ;;  %v3232_v4 = vsub.f32 %v15228_v39, %v3199_v10  ;;  %v3546_v41 = vld [vmem:[#allocation5 + $0xc0] sm:$0xff]  ;;  %v3524_v10 = vld [vmem:[#allocation5 + $0x10] sm:$0xff]  ;;  %v3039_v39 = vmul.f32 1.442695, %v15229_v17 }
 0x5ac   : > { %v3962_v49 = vpop.f32.mrf.mxu1  ;;  %3383 = vadd.xlane.f32.xlu0 %v3382_v0  ;;  %v3738_v63 = vmul.f32 %v12337_v61, %v3546_v41  ;;  %v3297_v41 = vld [vmem:[#allocation4] sm:$0xff] }
 0x5ad   : > { %v4159_v22 = vadd.f32 %v3962_v49, %v3723_v29  ;;  %v3295_v8 = vmul.f32 1.442695, %v3232_v4  ;;  %v3538_v29 = vld [vmem:[#allocation5 + $0x80] sm:$0xff] }
 0x5ae   : > { %v3730_v4 = vmul.f32 %v12285_v52, %v3538_v29  ;;  %v3539_v52 = vld [vmem:[#allocation5 + $0x88] sm:$0xff] }
 0x5af   : > { %4191 = vst.msk [vmem:[#allocation5 + $0x48] sm:$0xff] %vm2451_vm13, %v4159_v22  ;;  %10059 = vpow2.f32 %v3295_v8  ;;  %v3716_v22 = vmul.f32 %v12371_v3, %v3524_v10  ;;  %v12547_v43 = vpop.permute.xlu0 %3666  ;;  %v3731_v32 = vmul.f32 %v12314_v25, %v3539_v52  ;;  %v15231_v25 = vld [vmem:[#allocation40_spill] sm:$0xff] }
 0x5b0   : > { %10061 = vpow2.f32 %v3039_v39  ;;  %v15232_v37 = vsub.f32 %v15231_v25, %v12055_v15 }
 0x5b2   : > { %v3875_v45 = vpop.f32.mrf.mxu0 }
 0x5b3   : > { %3404 = vadd.xlane.f32.xlu1 %v3403_v50  ;;  %3380 = vadd.xlane.f32.xlu2 %v3379_v47  ;;  %v4150_v33 = vadd.f32 %v3875_v45, %v3714_v11  ;;  %v3547_v11 = vld [vmem:[#allocation5 + $0xc8] sm:$0xff]  ;;  %v15230_v47 = vld [vmem:[#allocation43_spill] sm:$0xff] }
 0x5b4   : > { %v2975_v60 = vsub.f32 %v15230_v47, %v12094_v38  ;;  %v3739_v3 = vmul.f32 %v12356_v59, %v3547_v11  ;;  %v3549_v11 = vld [vmem:[#allocation5 + $0xd8] sm:$0xff] }
 0x5b5   : > { %v10060_v5 = vpop.eup %10059  ;;  %4182 = vst.msk [vmem:[#allocation5] sm:$0xff] %vm2451_vm13, %v4150_v33 }
 0x5b6   : > { %v3454_v9 = vsel %vm2816_vm14, %v10060_v5, 0.0  ;;  %v3777_v16 = vpack.c.bf16 %v10060_v5, %v10060_v5  ;;  %v3037_v33 = vmul.f32 1.442695, %v2975_v60  ;;  %v12554_v38 = vpop.eup %10061  ;;  %v15234_v60 = vld [vmem:[#allocation35_spill] sm:$0xff] }
 0x5b7   : > { %3455 = vadd.xlane.f32.xlu0 %v3454_v9  ;;  %v12560_v59 = vpop.permute.xlu0 %3591 }
 0x5b8   : > { %v4080_v6 = vunpack.c.l.b16 %v3777_v16  ;;  %10063 = vpow2.f32 %v3037_v33 }
 0x5ba   : > { %v3877_v31 = vpop.f32.mrf.mxu0  ;;  %v4084_v53 = vpack.c.b16 %v4080_v6, %v4079_v46 }
 0x5bb   : > { %3431 = vadd.xlane.f32.xlu1 %v3430_v51  ;;  %3452 = vadd.xlane.f32.xlu2 %v3451_v21  ;;  %v4151_v56 = vadd.f32 %v3877_v31, %v3715_v34  ;;  %v3035_v34 = vmul.f32 1.442695, %v15232_v37  ;;  %v3532_v51 = vld [vmem:[#allocation5 + $0x50] sm:$0xff] }
 0x5bc   : > { %8992 = vmatmul.msk.bf16.gmra.mxu3 %vm2816_vm14, %v4084_v53  ;;  %v3724_v31 = vmul.f32 %v12381_v62, %v3532_v51  ;;  %v12568_v53 = vpop.permute.xlu2 %3626  ;;  %v15237_v51 = vld [vmem:[#allocation39_spill] sm:$0xff] }
 0x5bd   : > { %4183 = vst.msk [vmem:[#allocation5 + $0x8] sm:$0xff] %vm2451_vm13, %v4151_v56  ;;  %10065 = vpow2.f32 %v3035_v34  ;;  %v3692_v56 = vpop.permute.xlu1 %3691 }
 0x5be   : > { %v12565_v21 = vpop.eup %10063  ;;  %v3741_v44 = vmul.f32 %v3692_v56, %v3549_v11  ;;  %v15240_v11 = vld [vmem:[#allocation45_spill] sm:$0xff] }
 0x5bf   : > { %v4130_v0 = vpop.f32.mrf.mxu3 }
 0x5c0   : > { %v4174_v49 = vadd.f32 %v4130_v0, %v3738_v63  ;;  %v4045_v8 = vpop.f32.mrf.mxu2  ;;  %v3548_v63 = vld [vmem:[#allocation5 + $0xd0] sm:$0xff] }
 0x5c1   : > { %v4166_v40 = vadd.f32 %v4045_v8, %v3730_v4  ;;  %v15233_v0 = vld [vmem:[#allocation33_spill] sm:$0xff]  ;;  %v3740_v39 = vmul.f32 %v12379_v30, %v3548_v63  ;;  %v3533_v4 = vld [vmem:[#allocation5 + $0x58] sm:$0xff] }
 0x5c2   : > { %4206 = vst.msk [vmem:[#allocation5 + $0xc0] sm:$0xff] %vm2451_vm13, %v4174_v49  ;;  %v3329_v17 = vmul.f32 %v15233_v0, %v3297_v41 }
 0x5c3   : > { %3407 = vadd.xlane.f32.xlu2 %v3406_v42  ;;  %v3880_v61 = vpop.f32.mrf.mxu0  ;;  %4198 = vst.msk [vmem:[#allocation5 + $0x80] sm:$0xff] %vm2451_vm13, %v4166_v40  ;;  %v3725_v42 = vmul.f32 %v12393_v27, %v3533_v4  ;;  %v3313_v40 = vld [vmem:[#allocation4 + $0x80] sm:$0xff]  ;;  %v3307_v4 = vld [vmem:[#allocation4 + $0x50] sm:$0xff] }
 0x5c4   : > { %v4152_v50 = vadd.f32 %v3880_v61, %v3716_v22  ;;  %v12574_v22 = vpop.eup %10065  ;;  %v12580_v47 = vpop.permute.xlu2 %3671  ;;  %v3345_v52 = vmul.f32 %v15234_v60, %v3313_v40 }
 0x5c5   : > { %v12582_v30 = vpop.permute.xlu1 %3631 }
 0x5c6   : > { %4184 = vst.msk [vmem:[#allocation5 + $0x10] sm:$0xff] %vm2451_vm13, %v4152_v50 }
 0x5c7   : > { %v4132_v45 = vpop.f32.mrf.mxu3 }
 0x5c8   : > { %v4175_v5 = vadd.f32 %v4132_v45, %v3739_v3  ;;  %v4047_v9 = vpop.f32.mrf.mxu2 }
 0x5c9   : > { %v4167_v16 = vadd.f32 %v4047_v9, %v3731_v32  ;;  %v3305_v32 = vld [vmem:[#allocation4 + $0x40] sm:$0xff]  ;;  %v3540_v9 = vld [vmem:[#allocation5 + $0x90] sm:$0xff] }
 0x5ca   : > { %4207 = vst.msk [vmem:[#allocation5 + $0xc8] sm:$0xff] %vm2451_vm13, %v4175_v5  ;;  %v3321_v5 = vld [vmem:[#allocation4 + $0xc0] sm:$0xff]  ;;  %v3732_v41 = vmul.f32 %v12377_v18, %v3540_v9  ;;  %v15241_v9 = vld [vmem:[#allocation42_spill] sm:$0xff] }
 0x5cb   : > { %v3882_v46 = vpop.f32.mrf.mxu0  ;;  %3711 = vperm.xlu0 %9937, %v12554_v38   ;;  %4199 = vst.msk [vmem:[#allocation5 + $0x88] sm:$0xff] %vm2451_vm13, %v4167_v16  ;;  %v15235_v16 = vld [vmem:[#allocation34_spill] sm:$0xff] }
 0x5cc   : > { %v4153_v6 = vadd.f32 %v3882_v46, %v3717_v14  ;;  %v3322_v14 = vld [vmem:[#allocation4 + $0xc8] sm:$0xff]  ;;  %v3337_v46 = vmul.f32 %v15235_v16, %v3305_v32  ;;  %v3299_v32 = vld [vmem:[#allocation4 + $0x10] sm:$0xff] }
 0x5cd   : > { %v3331_v16 = vmul.f32 %v15241_v9, %v3299_v32  ;;  %v3543_v32 = vld [vmem:[#allocation5 + $0xa8] sm:$0xff]  ;;  %v3534_v9 = vld [vmem:[#allocation5 + $0x60] sm:$0xff] }
 0x5ce   : > { %4185 = vst.msk [vmem:[#allocation5 + $0x18] sm:$0xff] %vm2451_vm13, %v4153_v6  ;;  %v15236_v6 = vld [vmem:[#allocation37_spill] sm:$0xff] }
 0x5cf   : > { %v3353_v25 = vmul.f32 %v15236_v6, %v3321_v5  ;;  %v3306_v5 = vld [vmem:[#allocation4 + $0x48] sm:$0xff] }
 0x5d4   : > { %v3965_v29 = vpop.f32.mrf.mxu1  ;;  %3706 = vperm.xlu1 %9938, %v12565_v21  }
 0x5d5   : > { %v4160_v10 = vadd.f32 %v3965_v29, %v3724_v31  ;;  %v3354_v31 = vmul.f32 %v15237_v51, %v3322_v14  ;;  %v3316_v14 = vld [vmem:[#allocation4 + $0x98] sm:$0xff] }
 0x5d6   : > { %v3363_v15 = vpop.xlane.xlu0 %3362 }
 0x5d7   : > { %4192 = vst.msk [vmem:[#allocation5 + $0x50] sm:$0xff] %vm2451_vm13, %v4160_v10  ;;  %v3457_v49 = vadd.f32 %v3363_v15, %v3329_v17  ;;  %v3314_v15 = vld [vmem:[#allocation4 + $0x88] sm:$0xff] }
 0x5d9   : > { %v4135_v62 = vpop.f32.mrf.mxu3  ;;  %3490 = vst.msk [vmem:[#allocation4] sm:$0xff] %vm3489_vm15, %v3457_v49  ;;  %v3541_v49 = vld [vmem:[#allocation5 + $0x98] sm:$0xff] }
 0x5da   : > { %v4176_v8 = vadd.f32 %v4135_v62, %v3740_v39  ;;  %v3298_v39 = vld [vmem:[#allocation4 + $0x8] sm:$0xff]  ;;  %v15238_v62 = vld [vmem:[#allocation41_spill] sm:$0xff]  ;;  %v3733_v60 = vmul.f32 %v12400_v7, %v3541_v49  ;;  %v15242_v7 = vld [vmem:[#allocation38_spill] sm:$0xff] }
 0x5db   : > { %3701 = vperm.xlu2 %9936, %v12574_v22   ;;  %v3346_v18 = vmul.f32 %v15238_v62, %v3314_v15  ;;  %v15244_v15 = vld [vmem:[#allocation44_spill] sm:$0xff] }
 0x5dc   : > { %4208 = vst.msk [vmem:[#allocation5 + $0xd0] sm:$0xff] %vm2451_vm13, %v4176_v8  ;;  %v3967_v61 = vpop.f32.mrf.mxu1  ;;  %v15239_v8 = vld [vmem:[#allocation36_spill] sm:$0xff] }
 0x5dd   : > { %v4161_v50 = vadd.f32 %v3967_v61, %v3725_v42  ;;  %v3330_v42 = vmul.f32 %v15239_v8, %v3298_v39  ;;  %v15245_v62 = vld [vmem:[#allocation48_spill] sm:$0xff] }
 0x5de   : > { %v3411_v3 = vpop.xlane.xlu0 %3410 }
 0x5df   : > { %4193 = vst.msk [vmem:[#allocation5 + $0x58] sm:$0xff] %vm2451_vm13, %v4161_v50  ;;  %v3473_v45 = vadd.f32 %v3411_v3, %v3345_v52  ;;  %v3339_v50 = vmul.f32 %v15240_v11, %v3307_v4  ;;  %v3526_v4 = vld [vmem:[#allocation5 + $0x20] sm:$0xff] }
 0x5e1   : > { %v4137_v27 = vpop.f32.mrf.mxu3  ;;  %3506 = vst.msk [vmem:[#allocation4 + $0x80] sm:$0xff] %vm3489_vm15, %v3473_v45 }
 0x5e2   : > { %v4177_v33 = vadd.f32 %v4137_v27, %v3741_v44 }
 0x5e4   : > { %4209 = vst.msk [vmem:[#allocation5 + $0xd8] sm:$0xff] %vm2451_vm13, %v4177_v33 }
 0x5e6   : > { %v3387_v37 = vpop.xlane.xlu1 %3386  ;;  %v3435_v34 = vpop.xlane.xlu2 %3434 }
 0x5e7   : > { %v3465_v56 = vadd.f32 %v3387_v37, %v3337_v46  ;;  %v3481_v29 = vadd.f32 %v3435_v34, %v3353_v25  ;;  %v3438_v63 = vpop.xlane.xlu0 %3437  ;;  %v4050_v0 = vpop.f32.mrf.mxu2  ;;  %v3338_v46 = vmul.f32 %v15242_v7, %v3306_v5  ;;  %v3348_v37 = vmul.f32 %v12149_v48, %v3316_v14  ;;  %v15247_v5 = vld [vmem:[#allocation46_spill] sm:$0xff] }
 0x5e8   : > { %v3482_v10 = vadd.f32 %v3438_v63, %v3354_v31  ;;  %v4168_v17 = vadd.f32 %v4050_v0, %v3732_v41  ;;  %v3301_v63 = vld [vmem:[#allocation4 + $0x20] sm:$0xff] }
 0x5e9   : > { %3498 = vst.msk [vmem:[#allocation4 + $0x40] sm:$0xff] %vm3489_vm15, %v3465_v56  ;;  %v3323_v56 = vld [vmem:[#allocation4 + $0xd0] sm:$0xff]  ;;  %v15243_v0 = vld [vmem:[#allocation47_spill] sm:$0xff] }
 0x5ea   : > { %3514 = vst.msk [vmem:[#allocation4 + $0xc0] sm:$0xff] %vm3489_vm15, %v3481_v29  ;;  %v3315_v29 = vld [vmem:[#allocation4 + $0x90] sm:$0xff] }
 0x5eb   : > { %3515 = vst.msk [vmem:[#allocation4 + $0xc8] sm:$0xff] %vm3489_vm15, %v3482_v10  ;;  %v3542_v10 = vld [vmem:[#allocation5 + $0xa0] sm:$0xff]  ;;  %v3347_v39 = vmul.f32 %v15244_v15, %v3315_v29 }
 0x5ec   : > { %4200 = vst.msk [vmem:[#allocation5 + $0x90] sm:$0xff] %vm2451_vm13, %v4168_v17  ;;  %v3355_v17 = vmul.f32 %v15243_v0, %v3323_v56 }
 0x5ee   : > { %v3414_v40 = vpop.xlane.xlu1 %3413  ;;  %v3366_v61 = vpop.xlane.xlu2 %3365 }
 0x5ef   : > { %v3474_v52 = vadd.f32 %v3414_v40, %v3346_v18  ;;  %v3458_v3 = vadd.f32 %v3366_v61, %v3330_v42  ;;  %v3393_v44 = vpop.xlane.xlu0 %3392  ;;  %v4052_v27 = vpop.f32.mrf.mxu2  ;;  %v3333_v18 = vmul.f32 %v15245_v62, %v3301_v63  ;;  %v3734_v61 = vmul.f32 %v12431_v12, %v3542_v10  ;;  %v15246_v12 = vld [vmem:[#allocation49_spill] sm:$0xff] }
 0x5f0   : > { %v3467_v45 = vadd.f32 %v3393_v44, %v3339_v50  ;;  %v4169_v33 = vadd.f32 %v4052_v27, %v3733_v60  ;;  %v3718_v50 = vmul.f32 %v12415_v1, %v3526_v4  ;;  %v3308_v44 = vld [vmem:[#allocation4 + $0x58] sm:$0xff] }
 0x5f1   : > { %3507 = vst.msk [vmem:[#allocation4 + $0x88] sm:$0xff] %vm3489_vm15, %v3474_v52  ;;  %v3340_v1 = vmul.f32 %v15246_v12, %v3308_v44  ;;  %v3319_v44 = vld [vmem:[#allocation4 + $0xb0] sm:$0xff] }
 0x5f2   : > { %3491 = vst.msk [vmem:[#allocation4 + $0x8] sm:$0xff] %vm3489_vm15, %v3458_v3 }
 0x5f3   : > { %3500 = vst.msk [vmem:[#allocation4 + $0x50] sm:$0xff] %vm3489_vm15, %v3467_v45  ;;  %v3300_v45 = vld [vmem:[#allocation4 + $0x18] sm:$0xff] }
 0x5f4   : > { %4201 = vst.msk [vmem:[#allocation5 + $0x98] sm:$0xff] %vm2451_vm13, %v4169_v33  ;;  %v3325_v33 = vld [vmem:[#allocation4 + $0xe0] sm:$0xff]  ;;  %v3332_v14 = vmul.f32 %v15247_v5, %v3300_v45 }
 0x5f6   : > { %v3369_v6 = vpop.xlane.xlu1 %3368  ;;  %v3390_v25 = vpop.xlane.xlu2 %3389 }
 0x5f7   : > { %v3459_v34 = vadd.f32 %v3369_v6, %v3331_v16  ;;  %v3466_v51 = vadd.f32 %v3390_v25, %v3338_v46  ;;  %v3420_v31 = vpop.xlane.xlu0 %3419  ;;  %v3527_v16 = vld [vmem:[#allocation5 + $0x28] sm:$0xff]  ;;  %v3357_v6 = vmul.f32 %v12249_v54, %v3325_v33  ;;  %v3324_v54 = vld [vmem:[#allocation4 + $0xd8] sm:$0xff] }
 0x5f8   : > { %v3476_v41 = vadd.f32 %v3420_v31, %v3348_v37  ;;  %v3719_v56 = vmul.f32 %v12449_v58, %v3527_v16  ;;  %v3356_v4 = vmul.f32 %v12329_v13, %v3324_v54  ;;  %v3318_v16 = vld [vmem:[#allocation4 + $0xa8] sm:$0xff] }
 0x5f9   : > { %3492 = vst.msk [vmem:[#allocation4 + $0x10] sm:$0xff] %vm3489_vm15, %v3459_v34  ;;  %v15249_v54 = vld [vmem:[#allocation52_spill] sm:$0xff] }
 0x5fa   : > { %3499 = vst.msk [vmem:[#allocation4 + $0x48] sm:$0xff] %vm3489_vm15, %v3466_v51  ;;  %v3735_v51 = vmul.f32 %v12487_v19, %v3543_v32  ;;  %v3310_v19 = vld [vmem:[#allocation4 + $0x68] sm:$0xff]  ;;  %v3351_v32 = vmul.f32 %v12275_v24, %v3319_v44 }
 0x5fb   : > { %3509 = vst.msk [vmem:[#allocation4 + $0x98] sm:$0xff] %vm3489_vm15, %v3476_v41  ;;  %v3726_v41 = vmul.f32 %v12445_v20, %v3534_v9  ;;  %v3550_v20 = vld [vmem:[#allocation5 + $0xe0] sm:$0xff]  ;;  %v3326_v9 = vld [vmem:[#allocation4 + $0xe8] sm:$0xff] }
 0x5fe   : > { %v3441_v48 = vpop.xlane.xlu1 %3440  ;;  %v3417_v49 = vpop.xlane.xlu2 %3416 }
 0x5ff   : > { %v3483_v8 = vadd.f32 %v3441_v48, %v3355_v17  ;;  %v3475_v42 = vadd.f32 %v3417_v49, %v3347_v39  ;;  %v3375_v40 = vpop.xlane.xlu0 %3374  ;;  %v3317_v17 = vld [vmem:[#allocation4 + $0xa0] sm:$0xff]  ;;  %v3535_v48 = vld [vmem:[#allocation5 + $0x68] sm:$0xff] }
 0x600   : > { %v3461_v11 = vadd.f32 %v3375_v40, %v3333_v18  ;;  %v3349_v58 = vmul.f32 %v12229_v36, %v3317_v17  ;;  %v3342_v18 = vmul.f32 %v12203_v2, %v3310_v19  ;;  %v3544_v19 = vld [vmem:[#allocation5 + $0xb0] sm:$0xff] }
 0x601   : > { %3516 = vst.msk [vmem:[#allocation4 + $0xd0] sm:$0xff] %vm3489_vm15, %v3483_v8  ;;  %v4055_v60 = vpop.f32.mrf.mxu2  ;;  %v3885_v52 = vpop.f32.mrf.mxu0 }
 0x602   : > { %3508 = vst.msk [vmem:[#allocation4 + $0x90] sm:$0xff] %vm3489_vm15, %v3475_v42  ;;  %v4170_v3 = vadd.f32 %v4055_v60, %v3734_v61  ;;  %v4154_v27 = vadd.f32 %v3885_v52, %v3718_v50  ;;  %v3742_v61 = vmul.f32 %v12532_v55, %v3550_v20  ;;  %v3727_v50 = vmul.f32 %v12467_v28, %v3535_v48  ;;  %v3302_v52 = vld [vmem:[#allocation4 + $0x28] sm:$0xff]  ;;  %v15248_v28 = vld [vmem:[#allocation50_spill] sm:$0xff] }
 0x603   : > { %3494 = vst.msk [vmem:[#allocation4 + $0x20] sm:$0xff] %vm3489_vm15, %v3461_v11  ;;  %v3334_v55 = vmul.f32 %v12254_v57, %v3302_v52  ;;  %v3358_v57 = vmul.f32 %v12574_v22, %v3326_v9  ;;  %v3529_v20 = vld [vmem:[#allocation5 + $0x38] sm:$0xff] }
 0x604   : > { %4202 = vst.msk [vmem:[#allocation5 + $0xa0] sm:$0xff] %vm2451_vm13, %v4170_v3  ;;  %v3309_v3 = vld [vmem:[#allocation4 + $0x60] sm:$0xff] }
 0x605   : > { %4186 = vst.msk [vmem:[#allocation5 + $0x20] sm:$0xff] %vm2451_vm13, %v4154_v27  ;;  %v3341_v45 = vmul.f32 %v15248_v28, %v3309_v3 }
 0x606   : > { %v3396_v7 = vpop.xlane.xlu1 %3395  ;;  %v3372_v46 = vpop.xlane.xlu2 %3371 }
 0x607   : > { %v3468_v25 = vadd.f32 %v3396_v7, %v3340_v1  ;;  %v3460_v37 = vadd.f32 %v3372_v46, %v3332_v14  ;;  %v3447_v34 = vpop.xlane.xlu0 %3446  ;;  %v3304_v7 = vld [vmem:[#allocation4 + $0x38] sm:$0xff]  ;;  %v3350_v46 = vmul.f32 %v12252_v35, %v3318_v16  ;;  %v3311_v35 = vld [vmem:[#allocation4 + $0x70] sm:$0xff] }
 0x608   : > { %v3485_v31 = vadd.f32 %v3447_v34, %v3357_v6  ;;  %v3528_v6 = vld [vmem:[#allocation5 + $0x30] sm:$0xff] }
 0x609   : > { %3501 = vst.msk [vmem:[#allocation4 + $0x58] sm:$0xff] %vm3489_vm15, %v3468_v25  ;;  %v4057_v29 = vpop.f32.mrf.mxu2  ;;  %v3887_v63 = vpop.f32.mrf.mxu0  ;;  %v3536_v34 = vld [vmem:[#allocation5 + $0x70] sm:$0xff] }
 0x60a   : > { %3493 = vst.msk [vmem:[#allocation4 + $0x18] sm:$0xff] %vm3489_vm15, %v3460_v37  ;;  %v3970_v10 = vpop.f32.mrf.mxu1  ;;  %v4171_v0 = vadd.f32 %v4057_v29, %v3735_v51  ;;  %v4155_v15 = vadd.f32 %v3887_v63, %v3719_v56  ;;  %v3336_v37 = vmul.f32 %v12305_v26, %v3304_v7  ;;  %v3720_v29 = vmul.f32 %v12505_v23, %v3528_v6  ;;  %v3551_v7 = vld [vmem:[#allocation5 + $0xe8] sm:$0xff] }
 0x60b   : > { %3518 = vst.msk [vmem:[#allocation4 + $0xe0] sm:$0xff] %vm3489_vm15, %v3485_v31  ;;  %v4162_v39 = vadd.f32 %v3970_v10, %v3726_v41  ;;  %v3728_v63 = vmul.f32 %v12568_v53, %v3536_v34  ;;  %v3303_v10 = vld [vmem:[#allocation4 + $0x30] sm:$0xff] }
 0x60c   : > { %4203 = vst.msk [vmem:[#allocation5 + $0xa8] sm:$0xff] %vm2451_vm13, %v4171_v0 }
 0x60d   : > { %4187 = vst.msk [vmem:[#allocation5 + $0x28] sm:$0xff] %vm2451_vm13, %v4155_v15  ;;  %v3343_v15 = vmul.f32 %v15249_v54, %v3311_v35 }
 0x60e   : > { %4194 = vst.msk [vmem:[#allocation5 + $0x60] sm:$0xff] %vm2451_vm13, %v4162_v39  ;;  %v3423_v49 = vpop.xlane.xlu1 %3422  ;;  %v3444_v62 = vpop.xlane.xlu2 %3443  ;;  %v15250_v39 = vld [vmem:[#allocation51_spill] sm:$0xff] }
 0x60f   : > { %v3477_v8 = vadd.f32 %v3423_v49, %v3349_v58  ;;  %v3484_v42 = vadd.f32 %v3444_v62, %v3356_v4  ;;  %v3402_v40 = vpop.xlane.xlu0 %3401  ;;  %v3335_v23 = vmul.f32 %v15250_v39, %v3303_v10  ;;  %v3537_v4 = vld [vmem:[#allocation5 + $0x78] sm:$0xff] }
 0x610   : > { %v3470_v11 = vadd.f32 %v3402_v40, %v3342_v18  ;;  %v4140_v36 = vpop.f32.mrf.mxu3  ;;  %v3328_v62 = vld [vmem:[#allocation4 + $0xf8] sm:$0xff]  ;;  %v3736_v18 = vmul.f32 %v12547_v43, %v3544_v19 }
 0x611   : > { %3510 = vst.msk [vmem:[#allocation4 + $0xa0] sm:$0xff] %vm3489_vm15, %v3477_v8  ;;  %v4178_v60 = vadd.f32 %v4140_v36, %v3742_v61  ;;  %v3721_v8 = vmul.f32 %v12560_v59, %v3529_v20  ;;  %v3327_v36 = vld [vmem:[#allocation4 + $0xf0] sm:$0xff]  ;;  %v15251_v59 = vld [vmem:[#allocation54_spill] sm:$0xff] }
 0x612   : > { %3517 = vst.msk [vmem:[#allocation4 + $0xd8] sm:$0xff] %vm3489_vm15, %v3484_v42  ;;  %v3972_v13 = vpop.f32.mrf.mxu1  ;;  %v3729_v42 = vmul.f32 %v12582_v30, %v3537_v4  ;;  %v3359_v30 = vmul.f32 %v12565_v21, %v3327_v36 }
 0x613   : > { %3503 = vst.msk [vmem:[#allocation4 + $0x68] sm:$0xff] %vm3489_vm15, %v3470_v11  ;;  %v4163_v2 = vadd.f32 %v3972_v13, %v3727_v50  ;;  %v3360_v11 = vmul.f32 %v12554_v38, %v3328_v62  ;;  %v3320_v50 = vld [vmem:[#allocation4 + $0xb8] sm:$0xff] }
 0x614   : > { %4210 = vst.msk [vmem:[#allocation5 + $0xe0] sm:$0xff] %vm2451_vm13, %v4178_v60  ;;  %v3352_v44 = vmul.f32 %v15251_v59, %v3320_v50 }
 0x615   : > { %4195 = vst.msk [vmem:[#allocation5 + $0x68] sm:$0xff] %vm2451_vm13, %v4163_v2 }
 0x616   : > { %v3378_v27 = vpop.xlane.xlu1 %3377  ;;  %v3399_v33 = vpop.xlane.xlu2 %3398 }
 0x617   : > { %v3462_v12 = vadd.f32 %v3378_v27, %v3334_v55  ;;  %v3469_v1 = vadd.f32 %v3399_v33, %v3341_v45  ;;  %v3429_v5 = vpop.xlane.xlu0 %3428  ;;  %v3545_v55 = vld [vmem:[#allocation5 + $0xb8] sm:$0xff] }
 0x618   : > { %v3479_v14 = vadd.f32 %v3429_v5, %v3351_v32  ;;  %v3737_v33 = vmul.f32 %v12580_v47, %v3545_v55  ;;  %v4142_v16 = vpop.f32.mrf.mxu3 }
 0x619   : > { %3495 = vst.msk [vmem:[#allocation4 + $0x28] sm:$0xff] %vm3489_vm15, %v3462_v12  ;;  %v3312_v12 = vld [vmem:[#allocation4 + $0x78] sm:$0xff] }
 0x61a   : > { %3502 = vst.msk [vmem:[#allocation4 + $0x60] sm:$0xff] %vm3489_vm15, %v3469_v1  ;;  %v15252_v1 = vld [vmem:[#allocation53_spill] sm:$0xff] }
 0x61b   : > { %3512 = vst.msk [vmem:[#allocation4 + $0xb0] sm:$0xff] %vm3489_vm15, %v3479_v14  ;;  %v3344_v5 = vmul.f32 %v15252_v1, %v3312_v12 }
 0x61e   : > { %v3450_v25 = vpop.xlane.xlu1 %3449  ;;  %v3426_v24 = vpop.xlane.xlu2 %3425 }
 0x61f   : > { %v3486_v51 = vadd.f32 %v3450_v25, %v3358_v57  ;;  %v3478_v31 = vadd.f32 %v3426_v24, %v3350_v46  ;;  %v3384_v41 = vpop.xlane.xlu0 %3383  ;;  %v3553_v25 = vld [vmem:[#allocation5 + $0xf8] sm:$0xff] }
 0x620   : > { %v3464_v56 = vadd.f32 %v3384_v41, %v3336_v37  ;;  %v3552_v37 = vld [vmem:[#allocation5 + $0xf0] sm:$0xff] }
 0x621   : > { %3519 = vst.msk [vmem:[#allocation4 + $0xe8] sm:$0xff] %vm3489_vm15, %v3486_v51  ;;  %v3890_v22 = vpop.f32.mrf.mxu0 }
 0x622   : > { %3511 = vst.msk [vmem:[#allocation4 + $0xa8] sm:$0xff] %vm3489_vm15, %v3478_v31  ;;  %v4156_v0 = vadd.f32 %v3890_v22, %v3720_v29 }
 0x623   : > { %3497 = vst.msk [vmem:[#allocation4 + $0x38] sm:$0xff] %vm3489_vm15, %v3464_v56  ;;  %v3975_v26 = vpop.f32.mrf.mxu1 }
 0x624   : > { %v4164_v17 = vadd.f32 %v3975_v26, %v3728_v63  ;;  %4188 = vst.msk [vmem:[#allocation5 + $0x30] sm:$0xff] %vm2451_vm13, %v4156_v0 }
 0x626   : > { %4196 = vst.msk [vmem:[#allocation5 + $0x70] sm:$0xff] %vm2451_vm13, %v4164_v17  ;;  %v3405_v53 = vpop.xlane.xlu1 %3404  ;;  %v3381_v58 = vpop.xlane.xlu2 %3380 }
 0x627   : > { %v3471_v48 = vadd.f32 %v3405_v53, %v3343_v15  ;;  %v3463_v49 = vadd.f32 %v3381_v58, %v3335_v23 }
 0x629   : > { %3504 = vst.msk [vmem:[#allocation4 + $0x70] sm:$0xff] %vm3489_vm15, %v3471_v48  ;;  %v3892_v40 = vpop.f32.mrf.mxu0 }
 0x62a   : > { %3496 = vst.msk [vmem:[#allocation4 + $0x30] sm:$0xff] %vm3489_vm15, %v3463_v49  ;;  %v4060_v61 = vpop.f32.mrf.mxu2  ;;  %v4157_v13 = vadd.f32 %v3892_v40, %v3721_v8  ;;  %v3456_v52 = vpop.xlane.xlu0 %3455 }
 0x62b   : > { %v4172_v60 = vadd.f32 %v4060_v61, %v3736_v18  ;;  %v3977_v3 = vpop.f32.mrf.mxu1  ;;  %v3488_v2 = vadd.f32 %v3456_v52, %v3360_v11 }
 0x62c   : > { %v4165_v43 = vadd.f32 %v3977_v3, %v3729_v42  ;;  %4189 = vst.msk [vmem:[#allocation5 + $0x38] sm:$0xff] %vm2451_vm13, %v4157_v13 }
 0x62d   : > { %4204 = vst.msk [vmem:[#allocation5 + $0xb0] sm:$0xff] %vm2451_vm13, %v4172_v60 }
 0x62e   : > { %v3432_v28 = vpop.xlane.xlu1 %3431  ;;  %v3453_v45 = vpop.xlane.xlu2 %3452  ;;  %3521 = vst.msk [vmem:[#allocation4 + $0xf8] sm:$0xff] %vm3489_vm15, %v3488_v2 }
 0x62f   : > { %v3480_v38 = vadd.f32 %v3432_v28, %v3352_v44  ;;  %v3487_v27 = vadd.f32 %v3453_v45, %v3359_v30  ;;  %4197 = vst.msk [vmem:[#allocation5 + $0x78] sm:$0xff] %vm2451_vm13, %v4165_v43 }
 0x631   : > { %3513 = vst.msk [vmem:[#allocation4 + $0xb8] sm:$0xff] %vm3489_vm15, %v3480_v38 }
 0x632   : > { %3520 = vst.msk [vmem:[#allocation4 + $0xf0] sm:$0xff] %vm3489_vm15, %v3487_v27  ;;  %v4062_v32 = vpop.f32.mrf.mxu2 }
 0x633   : > { %v4173_v21 = vadd.f32 %v4062_v32, %v3737_v33 }
 0x635   : > { %4205 = vst.msk [vmem:[#allocation5 + $0xb8] sm:$0xff] %vm2451_vm13, %v4173_v21 }
 0x636   : > { %v3408_v14 = vpop.xlane.xlu2 %3407 }
 0x637   : > { %v3472_v9 = vadd.f32 %v3408_v14, %v3344_v5 }
 0x639   : > { %3505 = vst.msk [vmem:[#allocation4 + $0x78] sm:$0xff] %vm3489_vm15, %v3472_v9 }
 0x63d   : > { %v3712_v24 = vpop.permute.xlu0 %3711 }
 0x63e   : > { %v3702_v57 = vpop.permute.xlu2 %3701  ;;  %v3745_v51 = vmul.f32 %v3712_v24, %v3553_v25 }
 0x63f   : > { %v3743_v46 = vmul.f32 %v3702_v57, %v3551_v7  ;;  %v4145_v47 = vpop.f32.mrf.mxu3 }
 0x641   : > { %v4179_v6 = vadd.f32 %v4142_v16, %v3743_v46 }
 0x643   : > { %4211 = vst.msk [vmem:[#allocation5 + $0xe8] sm:$0xff] %vm2451_vm13, %v4179_v6 }
 0x646   : > { %v3707_v34 = vpop.permute.xlu1 %3706 }
 0x647   : > { %v3744_v31 = vmul.f32 %v3707_v34, %v3552_v37  ;;  %v4147_v41 = vpop.f32.mrf.mxu3 }
 0x648   : > { %v4181_v29 = vadd.f32 %v4147_v41, %v3745_v51 }
 0x649   : > { %v4180_v56 = vadd.f32 %v4145_v47, %v3744_v31 }
 0x64a   : > { %4213 = vst.msk [vmem:[#allocation5 + $0xf8] sm:$0xff] %vm2451_vm13, %v4181_v29 }
 0x64b   : > { %4212 = vst.msk [vmem:[#allocation5 + $0xf0] sm:$0xff] %vm2451_vm13, %v4180_v56 }
 0x64c PF: > { %p8993_p10 = scmp.ne.s32.totalorder %s10794_s17, %s10790_s16 }
 0x64e   : > { %4249 = sbr.rel (%p8993_p10) target bundleno = 3413 (0xd55), region = 170 }
 0x653   : > { %v9586_v63 = vld [vmem:[%s10801_s26 + $0x18] sm:$0xff]  ;;  %vm4354_vm0 = vcmask 261120   ;;  %v9585_v15 = vld [vmem:[%s10801_s26 + $0x10] sm:$0xff]  ;;  %v9584_v48 = vld [vmem:[%s10801_s26 + $0x8] sm:$0xff]  ;;  %v4687_v9 = vlaneseq  ;;  %vm4786_vm2 = vcmask 523264   ;;  %vm5459_vm10 = vcmask 7168  }
 0x654   : > { %v9590_v22 = vld [vmem:[%s10801_s26 + $0x38] sm:$0xff]  ;;  %v4377_v0 = vsel %vm4354_vm0, %v9586_v63, 0  ;;  %v9589_v39 = vld [vmem:[%s10801_s26 + $0x30] sm:$0xff]  ;;  %v4374_v20 = vsel %vm4354_vm0, %v9585_v15, 0  ;;  %v9588_v49 = vld [vmem:[%s10801_s26 + $0x28] sm:$0xff]  ;;  %v4371_v8 = vsel %vm4354_vm0, %v9584_v48, 0 }
 0x655   : > { %v9594_v35 = vld [vmem:[%s10801_s26 + $0x58] sm:$0xff]  ;;  %v4470_v26 = vsel %vm4354_vm0, %v9590_v22, 0  ;;  %4383 = vmatpush.bf16.xpose.msra.mxu0 %v4377_v0  ;;  %v9593_v23 = vld [vmem:[%s10801_s26 + $0x50] sm:$0xff]  ;;  %v4467_v53 = vsel %vm4354_vm0, %v9589_v39, 0  ;;  %v9592_v62 = vld [vmem:[%s10801_s26 + $0x48] sm:$0xff]  ;;  %v4464_v42 = vsel %vm4354_vm0, %v9588_v49, 0 }
 0x656   : > { %v9598_v10 = vld [vmem:[%s10801_s26 + $0x78] sm:$0xff]  ;;  %v4563_v17 = vsel %vm4354_vm0, %v9594_v35, 0  ;;  %4476 = vmatpush.bf16.xpose.msra.mxu1 %v4470_v26  ;;  %v9597_v19 = vld [vmem:[%s10801_s26 + $0x70] sm:$0xff]  ;;  %v4560_v58 = vsel %vm4354_vm0, %v9593_v23, 0  ;;  %v9596_v18 = vld [vmem:[%s10801_s26 + $0x68] sm:$0xff]  ;;  %v4557_v40 = vsel %vm4354_vm0, %v9592_v62, 0 }
 0x657   : > { %v4656_v54 = vsel %vm4354_vm0, %v9598_v10, 0  ;;  %4569 = vmatpush.bf16.xpose.msra.mxu2 %v4563_v17  ;;  %v4653_v4 = vsel %vm4354_vm0, %v9597_v19, 0  ;;  %v4650_v61 = vsel %vm4354_vm0, %v9596_v18, 0  ;;  %v9583_v11 = vld [vmem:[%s10801_s26] sm:$0xff]  ;;  %v9568_v55 = vld [vmem:[#allocation2 + $0x8] sm:$0xff]  ;;  %v9569_v27 = vld [vmem:[#allocation2 + $0x10] sm:$0xff] }
 0x658   : > { %4662 = vmatpush.bf16.xpose.msra.mxu3 %v4656_v54  ;;  %v9587_v50 = vld [vmem:[%s10801_s26 + $0x20] sm:$0xff]  ;;  %v4368_v60 = vsel %vm4354_vm0, %v9583_v11, 0  ;;  %v9572_v28 = vld [vmem:[#allocation2 + $0x28] sm:$0xff]  ;;  %v9573_v33 = vld [vmem:[#allocation2 + $0x30] sm:$0xff]  ;;  %v12731_v16 = vshrl.u32 %v4687_v9, 7  ;;  %v12733_v7 = vand.u32 127, %v4687_v9 }
 0x659   : > { %v9591_v36 = vld [vmem:[%s10801_s26 + $0x40] sm:$0xff]  ;;  %v4461_v52 = vsel %vm4354_vm0, %v9587_v50, 0  ;;  %v9576_v45 = vld [vmem:[#allocation2 + $0x48] sm:$0xff]  ;;  %v9577_v32 = vld [vmem:[#allocation2 + $0x50] sm:$0xff]  ;;  %vm6505_vm11 = vcmask 1047556   ;;  %s10514_s16 = smov 32  }
 0x65a   : > { %v9595_v13 = vld [vmem:[%s10801_s26 + $0x60] sm:$0xff]  ;;  %v4554_v3 = vsel %vm4354_vm0, %v9591_v36, 0  ;;  %v9580_v38 = vld [vmem:[#allocation2 + $0x68] sm:$0xff]  ;;  %v9581_v12 = vld [vmem:[#allocation2 + $0x70] sm:$0xff]  ;;  %vm4698_vm1 = vcmp.ge.s32.totalorder %v12731_v16, %v12733_v7  ;;  %v4689_v51 = vadd.s32 8, %v12731_v16  ;;  %v4690_v35 = vadd.s32 16, %v12731_v16 }
 0x65b   : > { %v4647_v2 = vsel %vm4354_vm0, %v9595_v13, 0  ;;  %v9567_v43 = vld [vmem:[#allocation2] sm:$0xff]  ;;  %v9574_v21 = vld [vmem:[#allocation2 + $0x38] sm:$0xff]  ;;  %v4694_v9 = vadd.s32 48, %v12731_v16  ;;  %s10512_s26 = smov 64   ;;  %s15365_s5 = sld [smem:[#allocation106_spill]] }
 0x65c   : > { %v9571_v59 = vld [vmem:[#allocation2 + $0x20] sm:$0xff]  ;;  %v9570_v1 = vld [vmem:[#allocation2 + $0x18] sm:$0xff]  ;;  %vm4699_vm3 = vcmp.ge.s32.totalorder %v4689_v51, %v12733_v7  ;;  %vm4700_vm4 = vcmp.ge.s32.totalorder %v4690_v35, %v12733_v7  ;;  %vm7497_vm12 = vcmask 785408   ;;  %s15366_s13 = sld [smem:[#allocation107_spill]] }
 0x65d   : > { %4384 = vmatpush.bf16.xpose.msra.mxu0 %v4374_v20  ;;  %v9575_v44 = vld [vmem:[#allocation2 + $0x40] sm:$0xff]  ;;  %v9578_v5 = vld [vmem:[#allocation2 + $0x58] sm:$0xff]  ;;  %vm4704_vm8 = vcmp.ge.s32.totalorder %v4694_v9, %v12733_v7  ;;  %s15367_s25 = sld [smem:[#allocation110_spill]] }
 0x65e   : > { %4477 = vmatpush.bf16.xpose.msra.mxu1 %v4467_v53  ;;  %v9579_v30 = vld [vmem:[#allocation2 + $0x60] sm:$0xff]  ;;  %v9582_v14 = vld [vmem:[#allocation2 + $0x78] sm:$0xff]  ;;  %s15371_s10 = sld [smem:[#allocation109_spill]] }
 0x65f   : > { %4570 = vmatpush.bf16.xpose.msra.mxu2 %v4560_v58  ;;  %s15372_s14 = sld [smem:[#allocation112_spill]] }
 0x660   : > { %4663 = vmatpush.bf16.xpose.msra.mxu3 %v4653_v4 }
 0x665   : > { %4385 = vmatpush.bf16.xpose.msra.mxu0 %v4371_v8  ;;  %v4691_v8 = vadd.s32 24, %v12731_v16 }
 0x666   : > { %4478 = vmatpush.bf16.xpose.msra.mxu1 %v4464_v42 }
 0x667   : > { %4571 = vmatpush.bf16.xpose.msra.mxu2 %v4557_v40  ;;  %vm4701_vm5 = vcmp.ge.s32.totalorder %v4691_v8, %v12733_v7 }
 0x668   : > { %4664 = vmatpush.bf16.xpose.msra.mxu3 %v4650_v61 }
 0x66d   : > { %4386 = vmatpush.bf16.xpose.msra.mxu0 %v4368_v60 }
 0x66e   : > { %4479 = vmatpush.bf16.xpose.msra.mxu1 %v4461_v52 }
 0x66f   : > { %4572 = vmatpush.bf16.xpose.msra.mxu2 %v4554_v3 }
 0x670   : > { %4665 = vmatpush.bf16.xpose.msra.mxu3 %v4647_v2 }
 0x674   : > { %9026 = vmatmul.msk.bf16.vlgmr.msra.gmra.mxu0 %vm4354_vm0, %v9567_v43 }
 0x675   : > { %9062 = vmatmul.msk.bf16.vlgmr.msra.gmra.mxu1 %vm4354_vm0, %v9571_v59 }
 0x676   : > { %9098 = vmatmul.msk.bf16.vlgmr.msra.gmra.mxu2 %vm4354_vm0, %v9575_v44 }
 0x677   : > { %9134 = vmatmul.msk.bf16.vlgmr.msra.gmra.mxu3 %vm4354_vm0, %v9579_v30  ;;  %v4692_v30 = vadd.s32 32, %v12731_v16 }
 0x679   : > { %vm4702_vm6 = vcmp.ge.s32.totalorder %v4692_v30, %v12733_v7 }
 0x684   : > { %9027 = vmatmul.msk.bf16.gmra.mxu0 %vm4354_vm0, %v9568_v55 }
 0x685   : > { %9063 = vmatmul.msk.bf16.gmra.mxu1 %vm4354_vm0, %v9572_v28 }
 0x686   : > { %9099 = vmatmul.msk.bf16.gmra.mxu2 %vm4354_vm0, %v9576_v45 }
 0x687   : > { %9135 = vmatmul.msk.bf16.gmra.mxu3 %vm4354_vm0, %v9580_v38 }
 0x694   : > { %9028 = vmatmul.msk.bf16.gmra.mxu0 %vm4354_vm0, %v9569_v27 }
 0x695   : > { %9064 = vmatmul.msk.bf16.gmra.mxu1 %vm4354_vm0, %v9573_v33 }
 0x696   : > { %9100 = vmatmul.msk.bf16.gmra.mxu2 %vm4354_vm0, %v9577_v32 }
 0x697   : > { %9136 = vmatmul.msk.bf16.gmra.mxu3 %vm4354_vm0, %v9581_v12 }
 0x6a4   : > { %9029 = vmatmul.msk.bf16.gmra.mxu0 %vm4354_vm0, %v9570_v1  ;;  %v4693_v1 = vadd.s32 40, %v12731_v16 }
 0x6a5   : > { %9065 = vmatmul.msk.bf16.gmra.mxu1 %vm4354_vm0, %v9574_v21 }
 0x6a6   : > { %9101 = vmatmul.msk.bf16.gmra.mxu2 %vm4354_vm0, %v9578_v5  ;;  %vm4703_vm7 = vcmp.ge.s32.totalorder %v4693_v1, %v12733_v7  ;;  %v4762_v1 = vld [vmem:[#allocation3 + $0x40] sm:$0xff] }
 0x6a7   : > { %9137 = vmatmul.msk.bf16.gmra.mxu3 %vm4354_vm0, %v9582_v14 }
 0x6f1   : > { %v4388_v57 = vpop.f32.mrf.mxu0 }
 0x6f2   : > { %v4481_v46 = vpop.f32.mrf.mxu1  ;;  %v12737_v47 = vsel %vm4698_vm1, %v4388_v57, -1e+30 }
 0x6f3   : > { %v12739_v6 = vsel %vm4698_vm1, %v4481_v46, -1e+30  ;;  %v4787_v25 = vsel %vm4786_vm2, %v12737_v47, -inf }
 0x6f4   : > { %v4811_v24 = vsel %vm4786_vm2, %v12739_v6, -inf  ;;  %4788 = vmax.xlane.f32.xlu2 %v4787_v25 }
 0x6f5   : > { %4812 = vmax.xlane.f32.xlu1 %v4811_v24 }
 0x6f9   : > { %v4574_v37 = vpop.f32.mrf.mxu2  ;;  %v4390_v56 = vpop.f32.mrf.mxu0 }
 0x6fa   : > { %v4667_v34 = vpop.f32.mrf.mxu3  ;;  %v12746_v31 = vsel %vm4698_vm1, %v4574_v37, -1e+30  ;;  %v4483_v29 = vpop.f32.mrf.mxu1  ;;  %v12758_v10 = vsel %vm4699_vm3, %v4390_v56, -1e+30 }
 0x6fb   : > { %v12748_v41 = vsel %vm4698_vm1, %v4667_v34, -1e+30  ;;  %v4835_v22 = vsel %vm4786_vm2, %v12746_v31, -inf  ;;  %v12762_v17 = vsel %vm4699_vm3, %v4483_v29, -1e+30  ;;  %v4790_v19 = vsel %vm4786_vm2, %v12758_v10, -inf }
 0x6fc   : > { %v4859_v63 = vsel %vm4786_vm2, %v12748_v41, -inf  ;;  %4836 = vmax.xlane.f32.xlu2 %v4835_v22  ;;  %v4814_v20 = vsel %vm4786_vm2, %v12762_v17, -inf  ;;  %v4695_v29 = vadd.s32 56, %v12731_v16 }
 0x6fd   : > { %4860 = vmax.xlane.f32.xlu0 %v4859_v63 }
 0x6fe   : > { %vm4705_vm9 = vcmp.ge.s32.totalorder %v4695_v29, %v12733_v7  ;;  %v12937_v7 = vld [vmem:[#allocation3 + $0x80] sm:$0xff] }
 0x701   : > { %v4576_v0 = vpop.f32.mrf.mxu2  ;;  %v4393_v54 = vpop.f32.mrf.mxu0 }
 0x702   : > { %v4669_v26 = vpop.f32.mrf.mxu3  ;;  %v4486_v15 = vpop.f32.mrf.mxu1  ;;  %v12777_v53 = vsel %vm4700_vm4, %v4393_v54, -1e+30  ;;  %v12789_v62 = vsel %vm4699_vm3, %v4576_v0, -1e+30 }
 0x703   : > { %v12766_v39 = vsel %vm4699_vm3, %v4669_v26, -1e+30  ;;  %v12781_v58 = vsel %vm4700_vm4, %v4486_v15, -1e+30  ;;  %v4793_v49 = vsel %vm4786_vm2, %v12777_v53, -inf  ;;  %v4838_v61 = vsel %vm4786_vm2, %v12789_v62, -inf }
 0x704   : > { %v4862_v23 = vsel %vm4786_vm2, %v12766_v39, -inf  ;;  %4815 = vmax.xlane.f32.xlu2 %v4814_v20  ;;  %v4817_v48 = vsel %vm4786_vm2, %v12781_v58, -inf }
 0x705   : > { %4863 = vmax.xlane.f32.xlu1 %v4862_v23  ;;  %4791 = vmax.xlane.f32.xlu0 %v4790_v19 }
 0x709   : > { %v4579_v4 = vpop.f32.mrf.mxu2  ;;  %v4395_v42 = vpop.f32.mrf.mxu0 }
 0x70a   : > { %v4672_v18 = vpop.f32.mrf.mxu3  ;;  %v4488_v40 = vpop.f32.mrf.mxu1  ;;  %v12797_v11 = vsel %vm4700_vm4, %v4579_v4, -1e+30  ;;  %v12824_v28 = vsel %vm4701_vm5, %v4395_v42, -1e+30 }
 0x70b   : > { %v12801_v50 = vsel %vm4700_vm4, %v4672_v18, -1e+30  ;;  %v12805_v36 = vsel %vm4701_vm5, %v4488_v40, -1e+30  ;;  %v4841_v60 = vsel %vm4786_vm2, %v12797_v11, -inf  ;;  %v4796_v21 = vsel %vm4786_vm2, %v12824_v28, -inf }
 0x70c   : > { %4839 = vmax.xlane.f32.xlu2 %v4838_v61  ;;  %v4865_v3 = vsel %vm4786_vm2, %v12801_v50, -inf  ;;  %v4820_v59 = vsel %vm4786_vm2, %v12805_v36, -inf }
 0x70d   : > { %4818 = vmax.xlane.f32.xlu0 %v4817_v48  ;;  %4794 = vmax.xlane.f32.xlu1 %v4793_v49 }
 0x711   : > { %v4581_v13 = vpop.f32.mrf.mxu2  ;;  %v4398_v2 = vpop.f32.mrf.mxu0 }
 0x712   : > { %v4674_v52 = vpop.f32.mrf.mxu3  ;;  %v4491_v43 = vpop.f32.mrf.mxu1  ;;  %v12820_v55 = vsel %vm4701_vm5, %v4581_v13, -1e+30  ;;  %v12836_v5 = vsel %vm4702_vm6, %v4398_v2, -1e+30 }
 0x713   : > { %v12815_v44 = vsel %vm4701_vm5, %v4674_v52, -1e+30  ;;  %v4844_v32 = vsel %vm4786_vm2, %v12820_v55, -inf  ;;  %v12840_v14 = vsel %vm4702_vm6, %v4491_v43, -1e+30  ;;  %v4799_v57 = vsel %vm4786_vm2, %v12836_v5, -inf }
 0x714   : > { %4866 = vmax.xlane.f32.xlu2 %v4865_v3  ;;  %v4868_v38 = vsel %vm4786_vm2, %v12815_v44, -inf  ;;  %v4823_v24 = vsel %vm4786_vm2, %v12840_v14, -inf  ;;  %v10509_v43 = vmov 0  }
 0x715   : > { %4842 = vmax.xlane.f32.xlu0 %v4841_v60  ;;  %4821 = vmax.xlane.f32.xlu1 %v4820_v59 }
 0x716   : > { %10067 = vset.pattern.permute.xlu0 %v10509_v43  ;;  %10068 = vset.pattern.permute.xlu2 %v10509_v43 }
 0x717   : > { %10069 = vset.pattern.permute.xlu1 %v10509_v43  ;;  %v12960_v43 = vld [vmem:[#allocation3 + $0x10] sm:$0xff] }
 0x719   : > { %v4584_v45 = vpop.f32.mrf.mxu2  ;;  %v4400_v12 = vpop.f32.mrf.mxu0 }
 0x71a   : > { %v4677_v27 = vpop.f32.mrf.mxu3  ;;  %v4493_v33 = vpop.f32.mrf.mxu1  ;;  %v12858_v63 = vsel %vm4702_vm6, %v4584_v45, -1e+30  ;;  %v12899_v40 = vsel %vm4703_vm7, %v4400_v12, -1e+30 }
 0x71b   : > { %v4847_v35 = vsel %vm4786_vm2, %v12858_v63, -inf  ;;  %v12877_v23 = vsel %vm4702_vm6, %v4677_v27, -1e+30  ;;  %v4802_v13 = vsel %vm4786_vm2, %v12899_v40, -inf  ;;  %v12907_v60 = vsel %vm4703_vm7, %v4493_v33, -1e+30 }
 0x71c   : > { %4797 = vmax.xlane.f32.xlu2 %v4796_v21  ;;  %v4871_v20 = vsel %vm4786_vm2, %v12877_v23, -inf  ;;  %v4826_v52 = vsel %vm4786_vm2, %v12907_v60, -inf  ;;  %v4754_v21 = vld [vmem:[#allocation3] sm:$0xff] }
 0x71d   : > { %4845 = vmax.xlane.f32.xlu1 %v4844_v32  ;;  %4869 = vmax.xlane.f32.xlu0 %v4868_v38 }
 0x721   : > { %v4586_v46 = vpop.f32.mrf.mxu2  ;;  %v4403_v56 = vpop.f32.mrf.mxu0 }
 0x722   : > { %v4679_v25 = vpop.f32.mrf.mxu3  ;;  %v4496_v34 = vpop.f32.mrf.mxu1  ;;  %v12862_v22 = vsel %vm4704_vm8, %v4403_v56, -1e+30  ;;  %v12913_v3 = vsel %vm4703_vm7, %v4586_v46, -1e+30 }
 0x723   : > { %v12850_v37 = vsel %vm4703_vm7, %v4679_v25, -1e+30  ;;  %v4805_v0 = vsel %vm4786_vm2, %v12862_v22, -inf  ;;  %v12881_v19 = vsel %vm4704_vm8, %v4496_v34, -1e+30  ;;  %v4850_v2 = vsel %vm4786_vm2, %v12913_v3, -inf }
 0x724   : > { %v4874_v51 = vsel %vm4786_vm2, %v12850_v37, -inf  ;;  %v4829_v4 = vsel %vm4786_vm2, %v12881_v19, -inf }
 0x725   : > { %4800 = vmax.xlane.f32.xlu1 %v4799_v57  ;;  %4824 = vmax.xlane.f32.xlu0 %v4823_v24  ;;  %v4778_v24 = vld [vmem:[#allocation3 + $0xc0] sm:$0xff] }
 0x726   : > { %4875 = vmax.xlane.f32.xlu2 %v4874_v51 }
 0x729   : > { %v4589_v26 = vpop.f32.mrf.mxu2  ;;  %v4405_v8 = vpop.f32.mrf.mxu0 }
 0x72a   : > { %v4498_v54 = vpop.f32.mrf.mxu1  ;;  %v12895_v42 = vsel %vm4705_vm9, %v4405_v8, -1e+30  ;;  %v12919_v59 = vsel %vm4704_vm8, %v4589_v26, -1e+30  ;;  %v4682_v45 = vpop.f32.mrf.mxu3  ;;  %v12942_v26 = vld [vmem:[#allocation3 + $0xc8] sm:$0xff] }
 0x72b   : > { %v12871_v16 = vsel %vm4705_vm9, %v4498_v54, -1e+30  ;;  %v4808_v61 = vsel %vm4786_vm2, %v12895_v42, -inf  ;;  %v4853_v30 = vsel %vm4786_vm2, %v12919_v59, -inf  ;;  %v12925_v38 = vsel %vm4704_vm8, %v4682_v45, -1e+30 }
 0x72c   : > { %v4832_v15 = vsel %vm4786_vm2, %v12871_v16, -inf  ;;  %15253 = vst [vmem:[#allocation55_spill] sm:$0xff] %v12925_v38  ;;  %v4877_v27 = vsel %vm4786_vm2, %v12925_v38, -inf  ;;  %v12944_v54 = vld [vmem:[#allocation3 + $0x8] sm:$0xff] }
 0x72d   : > { %4848 = vmax.xlane.f32.xlu1 %v4847_v35  ;;  %4806 = vmax.xlane.f32.xlu0 %v4805_v0 }
 0x72e   : > { %4833 = vmax.xlane.f32.xlu2 %v4832_v15  ;;  %v4763_v15 = vld [vmem:[#allocation3 + $0x48] sm:$0xff] }
 0x731   : > { %v4591_v48 = vpop.f32.mrf.mxu2 }
 0x732   : > { %v12889_v49 = vsel %vm4705_vm9, %v4591_v48, -1e+30  ;;  %v4684_v33 = vpop.f32.mrf.mxu3 }
 0x733   : > { %v4856_v18 = vsel %vm4786_vm2, %v12889_v49, -inf  ;;  %v12931_v32 = vsel %vm4705_vm9, %v4684_v33, -1e+30 }
 0x734   : > { %v4880_v12 = vsel %vm4786_vm2, %v12931_v32, -inf }
 0x735   : > { %4872 = vmax.xlane.f32.xlu1 %v4871_v20  ;;  %4830 = vmax.xlane.f32.xlu0 %v4829_v4 }
 0x736   : > { %4857 = vmax.xlane.f32.xlu2 %v4856_v18 }
 0x73d   : > { %4803 = vmax.xlane.f32.xlu1 %v4802_v13  ;;  %4809 = vmax.xlane.f32.xlu0 %v4808_v61 }
 0x745   : > { %4827 = vmax.xlane.f32.xlu1 %v4826_v52 }
 0x74d   : > { %4851 = vmax.xlane.f32.xlu1 %v4850_v2  ;;  %v12958_v2 = vld [vmem:[#allocation3 + $0x50] sm:$0xff] }
 0x755   : > { %4854 = vmax.xlane.f32.xlu1 %v4853_v30  ;;  %v12962_v30 = vld [vmem:[#allocation3 + $0x88] sm:$0xff] }
 0x75d   : > { %4878 = vmax.xlane.f32.xlu1 %v4877_v27 }
 0x765   : > { %4881 = vmax.xlane.f32.xlu1 %v4880_v12 }
 0x767   : > { %v4789_v57 = vpop.xlane.xlu2 %4788 }
 0x768   : > { %v4813_v9 = vpop.xlane.xlu1 %4812  ;;  %v4883_v46 = vmax.f32 %v4754_v21, %v4789_v57 }
 0x769   : > { %v4891_v25 = vmax.f32 %v4762_v1, %v4813_v9 }
 0x76a   : > { %6184 = vst.msk [vmem:[#allocation3] sm:$0xff] %vm5459_vm10, %v4883_v46  ;;  %5013 = vperm.xlu0 %10067, %v4883_v46   ;;  %v4915_v35 = vsub.f32 %v4754_v21, %v4883_v46 }
 0x76b   : > { %6192 = vst.msk [vmem:[#allocation3 + $0x40] sm:$0xff] %vm5459_vm10, %v4891_v25  ;;  %v4923_v0 = vsub.f32 %v4762_v1, %v4891_v25 }
 0x76c   : > { %v4947_v20 = vmul.f32 1.442695, %v4915_v35  ;;  %v12990_v35 = vld [vmem:[#allocation3 + $0x90] sm:$0xff] }
 0x76d   : > { %v4963_v18 = vmul.f32 1.442695, %v4923_v0  ;;  %v12992_v0 = vld [vmem:[#allocation3 + $0x58] sm:$0xff] }
 0x76e   : > { %10134 = vpow2.f32 %v4947_v20  ;;  %15256 = vst [vmem:[#allocation58_spill] sm:$0xff] %v12992_v0 }
 0x76f   : > { %v4837_v56 = vpop.xlane.xlu2 %4836  ;;  %10136 = vpow2.f32 %v4963_v18 }
 0x770   : > { %v4861_v34 = vpop.xlane.xlu0 %4860  ;;  %v4899_v29 = vmax.f32 %v12937_v7, %v4837_v56 }
 0x771   : > { %v4907_v51 = vmax.f32 %v4778_v24, %v4861_v34 }
 0x772   : > { %6200 = vst.msk [vmem:[#allocation3 + $0x80] sm:$0xff] %vm5459_vm10, %v4899_v29  ;;  %5093 = vperm.xlu2 %10068, %v4899_v29   ;;  %5053 = vperm.xlu0 %10067, %v4891_v25   ;;  %v4931_v20 = vsub.f32 %v12937_v7, %v4899_v29  ;;  %v13063_v25 = vld [vmem:[#allocation3 + $0xe8] sm:$0xff] }
 0x773   : > { %6208 = vst.msk [vmem:[#allocation3 + $0xc0] sm:$0xff] %vm5459_vm10, %v4907_v51  ;;  %v4939_v34 = vsub.f32 %v4778_v24, %v4907_v51  ;;  %v12995_v24 = vld [vmem:[#allocation3 + $0xd0] sm:$0xff] }
 0x774   : > { %v12970_v1 = vpop.eup %10134  ;;  %15257 = vst [vmem:[#allocation59_spill] sm:$0xff] %v12995_v24 }
 0x775   : > { %v12975_v9 = vpop.eup %10136  ;;  %15263 = vst [vmem:[#allocation65_spill] sm:$0xff] %v13063_v25 }
 0x776   : > { %15255 = vst [vmem:[#allocation57_spill] sm:$0xff] %v12975_v9 }
 0x777   : > { %v4816_v13 = vpop.xlane.xlu2 %4815 }
 0x778   : > { %v4864_v4 = vpop.xlane.xlu1 %4863  ;;  %v4792_v48 = vpop.xlane.xlu0 %4791  ;;  %v4892_v52 = vmax.f32 %v4763_v15, %v4816_v13 }
 0x779   : > { %v12947_v8 = vmax.f32 %v12942_v26, %v4864_v4  ;;  %v12950_v61 = vmax.f32 %v12944_v54, %v4792_v48 }
 0x77a   : > { %5133 = vperm.xlu2 %10068, %v4907_v51   ;;  %5058 = vperm.xlu0 %10067, %v4892_v52   ;;  %6193 = vst.msk [vmem:[#allocation3 + $0x48] sm:$0xff] %vm5459_vm10, %v4892_v52  ;;  %v4924_v56 = vsub.f32 %v4763_v15, %v4892_v52  ;;  %v4995_v51 = vmul.f32 1.442695, %v4939_v34  ;;  %v13021_v34 = vld [vmem:[#allocation3 + $0xd8] sm:$0xff] }
 0x77b   : > { %6209 = vst.msk [vmem:[#allocation3 + $0xc8] sm:$0xff] %vm5459_vm10, %v12947_v8 }
 0x77c   : > { %6185 = vst.msk [vmem:[#allocation3 + $0x8] sm:$0xff] %vm5459_vm10, %v12950_v61  ;;  %v4965_v18 = vmul.f32 1.442695, %v4924_v56  ;;  %10138 = vpow2.f32 %v4995_v51  ;;  %v4916_v56 = vsub.f32 %v12944_v54, %v12950_v61 }
 0x77e   : > { %5018 = vperm.xlu1 %10069, %v12950_v61   ;;  %10140 = vpow2.f32 %v4965_v18  ;;  %v4949_v46 = vmul.f32 1.442695, %v4916_v56  ;;  %v13061_v61 = vld [vmem:[#allocation3 + $0x60] sm:$0xff] }
 0x77f   : > { %v4840_v21 = vpop.xlane.xlu2 %4839  ;;  %15262 = vst [vmem:[#allocation64_spill] sm:$0xff] %v13061_v61 }
 0x780   : > { %v4819_v45 = vpop.xlane.xlu0 %4818  ;;  %v4795_v27 = vpop.xlane.xlu1 %4794  ;;  %v12973_v57 = vmax.f32 %v12962_v30, %v4840_v21  ;;  %v13019_v21 = vld [vmem:[#allocation3 + $0x98] sm:$0xff] }
 0x781   : > { %v12965_v33 = vmax.f32 %v12958_v2, %v4819_v45  ;;  %v12968_v12 = vmax.f32 %v12960_v43, %v4795_v27  ;;  %v4979_v27 = vmul.f32 1.442695, %v4931_v20  ;;  %v13025_v20 = vld [vmem:[#allocation3 + $0x18] sm:$0xff] }
 0x782   : > { %5566 = vperm.xlu2 %10068, %v12975_v9   ;;  %5526 = vperm.xlu0 %10067, %v12970_v1   ;;  %6201 = vst.msk [vmem:[#allocation3 + $0x88] sm:$0xff] %vm5459_vm10, %v12973_v57  ;;  %v13033_v7 = vpop.eup %10138 }
 0x783   : > { %15254 = vst [vmem:[#allocation56_spill] sm:$0xff] %v12965_v33  ;;  %10142 = vpow2.f32 %v4979_v27 }
 0x784   : > { %6194 = vst.msk [vmem:[#allocation3 + $0x50] sm:$0xff] %vm5459_vm10, %v12965_v33  ;;  %v13038_v27 = vpop.eup %10140  ;;  %10144 = vpow2.f32 %v4949_v46  ;;  %v13097_v46 = vld [vmem:[#allocation3 + $0x78] sm:$0xff] }
 0x785   : > { %6186 = vst.msk [vmem:[#allocation3 + $0x10] sm:$0xff] %vm5459_vm10, %v12968_v12 }
 0x786   : > { %5023 = vperm.xlu1 %10069, %v12968_v12   ;;  %15259 = vst [vmem:[#allocation61_spill] sm:$0xff] %v13038_v27 }
 0x787   : > { %v4867_v52 = vpop.xlane.xlu2 %4866  ;;  %15269 = vst [vmem:[#allocation71_spill] sm:$0xff] %v13097_v46 }
 0x788   : > { %v4843_v4 = vpop.xlane.xlu0 %4842  ;;  %v4822_v48 = vpop.xlane.xlu1 %4821  ;;  %v13004_v45 = vmax.f32 %v12995_v24, %v4867_v52 }
 0x789   : > { %v12998_v13 = vmax.f32 %v12990_v35, %v4843_v4  ;;  %v13001_v15 = vmax.f32 %v12992_v0, %v4822_v48  ;;  %v13052_v56 = vpop.eup %10142 }
 0x78a   : > { %5098 = vperm.xlu2 %10068, %v12973_v57   ;;  %5138 = vperm.xlu0 %10067, %v12947_v8   ;;  %6210 = vst.msk [vmem:[#allocation3 + $0xd0] sm:$0xff] %vm5459_vm10, %v13004_v45 }
 0x78b   : > { %15258 = vst [vmem:[#allocation60_spill] sm:$0xff] %v13001_v15 }
 0x78c   : > { %6202 = vst.msk [vmem:[#allocation3 + $0x90] sm:$0xff] %vm5459_vm10, %v12998_v13 }
 0x78d   : > { %6195 = vst.msk [vmem:[#allocation3 + $0x58] sm:$0xff] %vm5459_vm10, %v13001_v15 }
 0x78e   : > { %5063 = vperm.xlu1 %10069, %v12965_v33   ;;  %15260 = vst [vmem:[#allocation62_spill] sm:$0xff] %v13052_v56 }
 0x78f   : > { %v4798_v18 = vpop.xlane.xlu2 %4797 }
 0x790   : > { %v4846_v51 = vpop.xlane.xlu1 %4845  ;;  %v4870_v4 = vpop.xlane.xlu0 %4869  ;;  %v13036_v29 = vmax.f32 %v13025_v20, %v4798_v18  ;;  %v13059_v18 = vld [vmem:[#allocation3 + $0x20] sm:$0xff] }
 0x791   : > { %v13028_v48 = vmax.f32 %v13019_v21, %v4846_v51  ;;  %v13031_v52 = vmax.f32 %v13021_v34, %v4870_v4  ;;  %v4932_v4 = vsub.f32 %v12962_v30, %v12973_v57  ;;  %15261 = vst [vmem:[#allocation63_spill] sm:$0xff] %v13059_v18 }
 0x792   : > { %6187 = vst.msk [vmem:[#allocation3 + $0x18] sm:$0xff] %vm5459_vm10, %v13036_v29  ;;  %5571 = vperm.xlu2 %10068, %v13038_v27   ;;  %5646 = vperm.xlu0 %10067, %v13033_v7  }
 0x793   : > { %6203 = vst.msk [vmem:[#allocation3 + $0x98] sm:$0xff] %vm5459_vm10, %v13028_v48  ;;  %v4981_v0 = vmul.f32 1.442695, %v4932_v4  ;;  %v13093_v4 = vld [vmem:[#allocation3 + $0xa0] sm:$0xff] }
 0x794   : > { %6211 = vst.msk [vmem:[#allocation3 + $0xd8] sm:$0xff] %vm5459_vm10, %v13031_v52 }
 0x795   : > { %10146 = vpow2.f32 %v4981_v0 }
 0x796   : > { %5606 = vperm.xlu1 %10069, %v13052_v56   ;;  %v13095_v56 = vld [vmem:[#allocation3 + $0x30] sm:$0xff] }
 0x797   : > { %15268 = vst [vmem:[#allocation70_spill] sm:$0xff] %v13095_v56 }
 0x798   : > { %v4801_v54 = vpop.xlane.xlu1 %4800  ;;  %v4825_v51 = vpop.xlane.xlu0 %4824 }
 0x799   : > { %v13066_v27 = vmax.f32 %v13059_v18, %v4801_v54  ;;  %v4876_v24 = vpop.xlane.xlu2 %4875  ;;  %v13069_v30 = vmax.f32 %v13061_v61, %v4825_v51  ;;  %v4940_v51 = vsub.f32 %v12942_v26, %v12947_v8 }
 0x79a   : > { %v13072_v57 = vmax.f32 %v13063_v25, %v4876_v24  ;;  %5028 = vperm.xlu2 %10068, %v13036_v29   ;;  %5068 = vperm.xlu0 %10067, %v13001_v15   ;;  %v13086_v24 = vpop.eup %10144  ;;  %v13128_v15 = vld [vmem:[#allocation3 + $0xb8] sm:$0xff] }
 0x79b   : > { %15264 = vst [vmem:[#allocation66_spill] sm:$0xff] %v13066_v27  ;;  %v4997_v18 = vmul.f32 1.442695, %v4940_v51 }
 0x79c   : > { %15265 = vst [vmem:[#allocation67_spill] sm:$0xff] %v13069_v30 }
 0x79d   : > { %15266 = vst [vmem:[#allocation68_spill] sm:$0xff] %v13072_v57  ;;  %10148 = vpow2.f32 %v4997_v18 }
 0x79e   : > { %6188 = vst.msk [vmem:[#allocation3 + $0x20] sm:$0xff] %vm5459_vm10, %v13066_v27  ;;  %5531 = vperm.xlu1 %10069, %v13086_v24  }
 0x79f   : > { %6213 = vst.msk [vmem:[#allocation3 + $0xe8] sm:$0xff] %vm5459_vm10, %v13072_v57 }
 0x7a0   : > { %15267 = vst [vmem:[#allocation69_spill] sm:$0xff] %v13086_v24  ;;  %v4849_v54 = vpop.xlane.xlu1 %4848  ;;  %v4807_v25 = vpop.xlane.xlu0 %4806 }
 0x7a1   : > { %6196 = vst.msk [vmem:[#allocation3 + $0x60] sm:$0xff] %vm5459_vm10, %v13069_v30  ;;  %v13100_v61 = vmax.f32 %v13093_v4, %v4849_v54  ;;  %v13103_v26 = vmax.f32 %v13095_v56, %v4807_v25  ;;  %v4834_v8 = vpop.xlane.xlu2 %4833  ;;  %v13108_v24 = vpop.eup %10146  ;;  %v13124_v54 = vld [vmem:[#allocation3 + $0xe0] sm:$0xff] }
 0x7a2   : > { %v13106_v0 = vmax.f32 %v13097_v46, %v4834_v8  ;;  %15272 = vst [vmem:[#allocation74_spill] sm:$0xff] %v13108_v24  ;;  %5611 = vperm.xlu2 %10068, %v13108_v24   ;;  %v13126_v8 = vld [vmem:[#allocation3 + $0x70] sm:$0xff] }
 0x7a3   : > { %15270 = vst [vmem:[#allocation72_spill] sm:$0xff] %v13103_v26  ;;  %v13139_v46 = vpop.eup %10148 }
 0x7a4   : > { %15271 = vst [vmem:[#allocation73_spill] sm:$0xff] %v13106_v0 }
 0x7a5   : > { %6204 = vst.msk [vmem:[#allocation3 + $0xa0] sm:$0xff] %vm5459_vm10, %v13100_v61 }
 0x7a6   : > { %6190 = vst.msk [vmem:[#allocation3 + $0x30] sm:$0xff] %vm5459_vm10, %v13103_v26  ;;  %5103 = vperm.xlu1 %10069, %v12998_v13  }
 0x7a7   : > { %6199 = vst.msk [vmem:[#allocation3 + $0x78] sm:$0xff] %vm5459_vm10, %v13106_v0 }
 0x7a8   : > { %15273 = vst [vmem:[#allocation75_spill] sm:$0xff] %v13124_v54  ;;  %v4873_v51 = vpop.xlane.xlu1 %4872  ;;  %v4831_v56 = vpop.xlane.xlu0 %4830 }
 0x7a9   : > { %15274 = vst [vmem:[#allocation76_spill] sm:$0xff] %v13126_v8  ;;  %v13131_v24 = vmax.f32 %v13124_v54, %v4873_v51  ;;  %v13134_v9 = vmax.f32 %v13126_v8, %v4831_v56  ;;  %v4858_v18 = vpop.xlane.xlu2 %4857  ;;  %v13155_v51 = vld [vmem:[#allocation3 + $0x28] sm:$0xff] }
 0x7aa   : > { %15275 = vst [vmem:[#allocation77_spill] sm:$0xff] %v13128_v15  ;;  %v13137_v25 = vmax.f32 %v13128_v15, %v4858_v18  ;;  %5651 = vperm.xlu2 %10068, %v13139_v46   ;;  %v13157_v18 = vld [vmem:[#allocation3 + $0x38] sm:$0xff]  ;;  %v13203_v15 = vld [vmem:[#allocation3 + $0xb0] sm:$0xff] }
 0x7ab   : > { %15276 = vst [vmem:[#allocation78_spill] sm:$0xff] %v13134_v9 }
 0x7ac   : > { %15277 = vst [vmem:[#allocation79_spill] sm:$0xff] %v13137_v25 }
 0x7ad   : > { %6212 = vst.msk [vmem:[#allocation3 + $0xe0] sm:$0xff] %vm5459_vm10, %v13131_v24 }
 0x7ae   : > { %6198 = vst.msk [vmem:[#allocation3 + $0x70] sm:$0xff] %vm5459_vm10, %v13134_v9  ;;  %5143 = vperm.xlu1 %10069, %v13004_v45  }
 0x7af   : > { %6207 = vst.msk [vmem:[#allocation3 + $0xb8] sm:$0xff] %vm5459_vm10, %v13137_v25 }
 0x7b0   : > { %15278 = vst [vmem:[#allocation80_spill] sm:$0xff] %v13155_v51  ;;  %v4804_v38 = vpop.xlane.xlu1 %4803  ;;  %v4810_v54 = vpop.xlane.xlu0 %4809 }
 0x7b1   : > { %15279 = vst [vmem:[#allocation81_spill] sm:$0xff] %v13157_v18  ;;  %v13160_v33 = vmax.f32 %v13155_v51, %v4804_v38  ;;  %v13163_v8 = vmax.f32 %v13157_v18, %v4810_v54  ;;  %v13176_v38 = vld [vmem:[#allocation3 + $0x68] sm:$0xff]  ;;  %v4933_v54 = vsub.f32 %v12990_v35, %v12998_v13 }
 0x7b2   : > { %5108 = vperm.xlu2 %10068, %v13028_v48   ;;  %15282 = vst [vmem:[#allocation84_spill] sm:$0xff] %v13176_v38  ;;  %v13190_v18 = vld [vmem:[#allocation3 + $0xa8] sm:$0xff] }
 0x7b3   : > { %15280 = vst [vmem:[#allocation82_spill] sm:$0xff] %v13160_v33  ;;  %5038 = vperm.xlu0 %10067, %v13160_v33  }
 0x7b4   : > { %15281 = vst [vmem:[#allocation83_spill] sm:$0xff] %v13163_v8 }
 0x7b5   : > { %6189 = vst.msk [vmem:[#allocation3 + $0x28] sm:$0xff] %vm5459_vm10, %v13160_v33  ;;  %v4983_v33 = vmul.f32 1.442695, %v4933_v54 }
 0x7b6   : > { %6191 = vst.msk [vmem:[#allocation3 + $0x38] sm:$0xff] %vm5459_vm10, %v13163_v8  ;;  %5148 = vperm.xlu1 %10069, %v13031_v52  }
 0x7b7   : > { %15284 = vst [vmem:[#allocation86_spill] sm:$0xff] %v13190_v18  ;;  %10150 = vpow2.f32 %v4983_v33 }
 0x7b8   : > { %v4828_v56 = vpop.xlane.xlu1 %4827  ;;  %15287 = vst [vmem:[#allocation89_spill] sm:$0xff] %v13203_v15 }
 0x7b9   : > { %v13181_v51 = vmax.f32 %v13176_v38, %v4828_v56  ;;  %v9608_v56 = vld [vmem:[%s10803_s12 + $0x48] sm:$0xff] }
 0x7ba   : > { %5073 = vperm.xlu2 %10068, %v13069_v30  }
 0x7bb   : > { %15283 = vst [vmem:[#allocation85_spill] sm:$0xff] %v13181_v51  ;;  %5078 = vperm.xlu0 %10067, %v13181_v51  }
 0x7bc   : > { %6197 = vst.msk [vmem:[#allocation3 + $0x68] sm:$0xff] %vm5459_vm10, %v13181_v51 }
 0x7bd   : > { %v13200_v54 = vpop.eup %10150 }
 0x7be   : > { %5033 = vperm.xlu1 %10069, %v13066_v27   ;;  %15286 = vst [vmem:[#allocation88_spill] sm:$0xff] %v13200_v54  ;;  %v9610_v27 = vld [vmem:[%s10803_s12 + $0x58] sm:$0xff] }
 0x7bf   : > { %6010 = vmatpush.bf16.msrb.mxu2 %v9610_v27  ;;  %v9601_v27 = vld [vmem:[%s10803_s12 + $0x10] sm:$0xff] }
 0x7c0   : > { %v4852_v35 = vpop.xlane.xlu1 %4851 }
 0x7c1   : > { %v13193_v13 = vmax.f32 %v13190_v18, %v4852_v35  ;;  %v9609_v18 = vld [vmem:[%s10803_s12 + $0x50] sm:$0xff] }
 0x7c2   : > { %5113 = vperm.xlu2 %10068, %v13100_v61  }
 0x7c3   : > { %15285 = vst [vmem:[#allocation87_spill] sm:$0xff] %v13193_v13  ;;  %6011 = vmatpush.bf16.msrb.mxu2 %v9609_v18  ;;  %v9607_v18 = vld [vmem:[%s10803_s12 + $0x40] sm:$0xff] }
 0x7c4   : > { %6205 = vst.msk [vmem:[#allocation3 + $0xa8] sm:$0xff] %vm5459_vm10, %v13193_v13 }
 0x7c6   : > { %5616 = vperm.xlu1 %10069, %v13200_v54   ;;  %v13216_v54 = vld [vmem:[#allocation3 + $0xf0] sm:$0xff] }
 0x7c7   : > { %15289 = vst [vmem:[#allocation91_spill] sm:$0xff] %v13216_v54  ;;  %6012 = vmatpush.bf16.msrb.mxu2 %v9608_v56  ;;  %v9600_v56 = vld [vmem:[%s10803_s12 + $0x8] sm:$0xff] }
 0x7c8   : > { %v4855_v33 = vpop.xlane.xlu1 %4854 }
 0x7c9   : > { %v13206_v35 = vmax.f32 %v13203_v15, %v4855_v33  ;;  %v9602_v15 = vld [vmem:[%s10803_s12 + $0x18] sm:$0xff] }
 0x7ca   : > { %5153 = vperm.xlu2 %10068, %v13131_v24   ;;  %5840 = vmatpush.bf16.msrb.mxu0 %v9602_v15 }
 0x7cb   : > { %15288 = vst [vmem:[#allocation90_spill] sm:$0xff] %v13206_v35  ;;  %9711 = vmatpush.bf16.msrb.mxu1 %v9602_v15  ;;  %9712 = vmatpush.bf16.msrb.mxu3 %v9602_v15  ;;  %v9599_v15 = vld [vmem:[%s10803_s12] sm:$0xff] }
 0x7cc   : > { %6206 = vst.msk [vmem:[#allocation3 + $0xb0] sm:$0xff] %vm5459_vm10, %v13206_v35  ;;  %v5094_v30 = vpop.permute.xlu2 %5093  ;;  %6013 = vmatpush.bf16.msrb.mxu2 %v9607_v18 }
 0x7cd   : > { %v5187_v18 = vsub.f32 %v12746_v31, %v5094_v30 }
 0x7ce   : > { %5118 = vperm.xlu1 %10069, %v13193_v13   ;;  %v13231_v13 = vld [vmem:[#allocation3 + $0xf8] sm:$0xff]  ;;  %5841 = vmatpush.bf16.msrb.mxu0 %v9601_v27 }
 0x7cf   : > { %15291 = vst [vmem:[#allocation93_spill] sm:$0xff] %v13231_v13  ;;  %9713 = vmatpush.bf16.msrb.mxu1 %v9601_v27  ;;  %9714 = vmatpush.bf16.msrb.mxu3 %v9601_v27 }
 0x7d0   : > { %v4879_v33 = vpop.xlane.xlu1 %4878 }
 0x7d1   : > { %v13219_v51 = vmax.f32 %v13216_v54, %v4879_v33 }
 0x7d2   : > { %5043 = vperm.xlu2 %10068, %v13103_v26   ;;  %5842 = vmatpush.bf16.msrb.mxu0 %v9600_v56  ;;  %v5235_v26 = vmul.f32 1.442695, %v5187_v18 }
 0x7d3   : > { %15290 = vst [vmem:[#allocation92_spill] sm:$0xff] %v13219_v51  ;;  %5163 = vperm.xlu0 %10067, %v13219_v51   ;;  %9715 = vmatpush.bf16.msrb.mxu1 %v9600_v56 }
 0x7d4   : > { %6214 = vst.msk [vmem:[#allocation3 + $0xf0] sm:$0xff] %vm5459_vm10, %v13219_v51  ;;  %v5134_v33 = vpop.permute.xlu2 %5133  ;;  %9716 = vmatpush.bf16.msrb.mxu3 %v9600_v56  ;;  %10152 = vpow2.f32 %v5235_v26 }
 0x7d6   : > { %5158 = vperm.xlu1 %10069, %v13072_v57   ;;  %5843 = vmatpush.bf16.msrb.mxu0 %v9599_v15 }
 0x7d7   : > { %9717 = vmatpush.bf16.msrb.mxu1 %v9599_v15 }
 0x7d8   : > { %v4882_v54 = vpop.xlane.xlu1 %4881  ;;  %9718 = vmatpush.bf16.msrb.mxu3 %v9599_v15 }
 0x7d9   : > { %v13235_v51 = vmax.f32 %v13231_v13, %v4882_v54 }
 0x7da   : > { %5083 = vperm.xlu2 %10068, %v13134_v9   ;;  %v13254_v31 = vpop.eup %10152 }
 0x7db   : > { %15292 = vst [vmem:[#allocation94_spill] sm:$0xff] %v13235_v51  ;;  %5048 = vperm.xlu0 %10067, %v13163_v8  }
 0x7dc   : > { %6215 = vst.msk [vmem:[#allocation3 + $0xf8] sm:$0xff] %vm5459_vm10, %v13235_v51  ;;  %v13246_v54 = vpop.permute.xlu2 %5566  ;;  %v5014_v27 = vpop.permute.xlu0 %5013 }
 0x7dd   : > { %15293 = vst [vmem:[#allocation95_spill] sm:$0xff] %v13246_v54  ;;  %v5171_v54 = vsub.f32 %v12737_v47, %v5014_v27 }
 0x7de   : > { %5123 = vperm.xlu1 %10069, %v13206_v35  }
 0x7df   : > { %v5203_v30 = vmul.f32 1.442695, %v5171_v54  ;;  %v5195_v54 = vsub.f32 %v12748_v41, %v5134_v33 }
 0x7e2   : > { %5128 = vperm.xlu2 %10068, %v13137_v25  }
 0x7e3   : > { %5088 = vperm.xlu0 %10067, %v13106_v0   ;;  %v5732_v0 = vpack.c.bf16 %v13254_v31, %v13254_v31 }
 0x7e4   : > { %v5099_v9 = vpop.permute.xlu2 %5098  ;;  %v5054_v13 = vpop.permute.xlu0 %5053 }
 0x7e5   : > { %v5188_v56 = vsub.f32 %v12789_v62, %v5099_v9  ;;  %v5179_v33 = vsub.f32 %v12739_v6, %v5054_v13 }
 0x7e6   : > { %5168 = vperm.xlu1 %10069, %v13235_v51  }
 0x7e7   : > { %v5237_v8 = vmul.f32 1.442695, %v5188_v56 }
 0x7e9   : > { %10154 = vpow2.f32 %v5237_v8  ;;  %v5958_v8 = vunpack.c.l.b16 %v5732_v0 }
 0x7ea   : > { %10156 = vpow2.f32 %v5203_v30 }
 0x7ec   : > { %v13256_v15 = vpop.permute.xlu2 %5571  ;;  %v5059_v18 = vpop.permute.xlu0 %5058 }
 0x7ed   : > { %15294 = vst [vmem:[#allocation96_spill] sm:$0xff] %v13256_v15 }
 0x7ef   : > { %v13260_v51 = vpop.eup %10154 }
 0x7f0   : > { %v5019_v35 = vpop.permute.xlu1 %5018  ;;  %v5733_v47 = vpack.c.bf16 %v13260_v51, %v13260_v51  ;;  %v10157_v57 = vpop.eup %10156 }
 0x7f1   : > { %v5172_v26 = vsub.f32 %v12758_v10, %v5019_v35  ;;  %v5251_v10 = vmul.f32 1.442695, %v5195_v54  ;;  %v5716_v30 = vpack.c.bf16 %v10157_v57, %v10157_v57  ;;  %v5219_v54 = vmul.f32 1.442695, %v5179_v33 }
 0x7f2   : > { %v5959_v9 = vunpack.c.l.b16 %v5733_v47 }
 0x7f3   : > { %v5205_v62 = vmul.f32 1.442695, %v5172_v26 }
 0x7f4   : > { %v5029_v27 = vpop.permute.xlu2 %5028  ;;  %v13266_v56 = vpop.permute.xlu0 %5526  ;;  %v5966_v15 = vpack.c.b16 %v5959_v9, %v5958_v8  ;;  %v5788_v9 = vunpack.c.l.b16 %v5716_v30 }
 0x7f5   : > { %10158 = vpow2.f32 %v5205_v62  ;;  %v5174_v25 = vsub.f32 %v12824_v28, %v5029_v27 }
 0x7f6   : > { %9194 = vmatmul.msk.bf16.vlgmr.msrb.gmra.mxu2 %vm4786_vm2, %v5966_v15  ;;  %10160 = vpow2.f32 %v5251_v10  ;;  %v5180_v10 = vsub.f32 %v12762_v17, %v5059_v18 }
 0x7f7   : > { %v5209_v26 = vmul.f32 1.442695, %v5174_v25 }
 0x7f8   : > { %v5024_v38 = vpop.permute.xlu1 %5023 }
 0x7f9   : > { %v5173_v35 = vsub.f32 %v12777_v53, %v5024_v38  ;;  %10162 = vpow2.f32 %v5209_v26  ;;  %v5221_v26 = vmul.f32 1.442695, %v5180_v10 }
 0x7fb   : > { %v13271_v47 = vpop.eup %10158  ;;  %v5207_v0 = vmul.f32 1.442695, %v5173_v35 }
 0x7fc   : > { %v5717_v41 = vpack.c.bf16 %v13271_v47, %v13271_v47  ;;  %v13276_v62 = vpop.permute.xlu2 %5611  ;;  %v5139_v28 = vpop.permute.xlu0 %5138 }
 0x7fd   : > { %10164 = vpow2.f32 %v5207_v0  ;;  %v5196_v53 = vsub.f32 %v12766_v39, %v5139_v28  ;;  %v10161_v27 = vpop.eup %10160 }
 0x7fe   : > { %v5789_v15 = vunpack.c.l.b16 %v5717_v41  ;;  %v5740_v30 = vpack.c.bf16 %v10161_v27, %v10161_v27 }
 0x7ff   : > { %v5253_v8 = vmul.f32 1.442695, %v5196_v53  ;;  %v13281_v6 = vpop.eup %10162 }
 0x800   : > { %v5064_v38 = vpop.permute.xlu1 %5063  ;;  %v5796_v25 = vpack.c.b16 %v5789_v15, %v5788_v9  ;;  %v5719_v41 = vpack.c.bf16 %v13281_v6, %v13281_v6  ;;  %v13293_v18 = vunpack.c.l.b16 %v5740_v30  ;;  %v5403_v9 = vsel %vm4786_vm2, %v10161_v27, 0.0 }
 0x801   : > { %10166 = vpow2.f32 %v5253_v8  ;;  %v5181_v28 = vsub.f32 %v12781_v58, %v5064_v38 }
 0x802   : > { %9154 = vmatmul.msk.bf16.vlgmr.msrb.gmra.mxu0 %vm4786_vm2, %v5796_v25  ;;  %10168 = vpow2.f32 %v5219_v54  ;;  %v5331_v25 = vsel %vm4786_vm2, %v10157_v57, 0.0  ;;  %v5791_v54 = vunpack.c.l.b16 %v5719_v41 }
 0x803   : > { %v13283_v13 = vpop.eup %10164  ;;  %10170 = vpow2.f32 %v5221_v26 }
 0x804   : > { %v13285_v35 = vpop.permute.xlu2 %5651  ;;  %v5718_v0 = vpack.c.bf16 %v13283_v13, %v13283_v13 }
 0x805   : > { %15295 = vst [vmem:[#allocation97_spill] sm:$0xff] %v13285_v35  ;;  %v5223_v35 = vmul.f32 1.442695, %v5181_v28 }
 0x806   : > { %v5790_v8 = vunpack.c.l.b16 %v5718_v0  ;;  %v13312_v0 = vpop.permute.xlu0 %5646 }
 0x807   : > { %v10167_v33 = vpop.eup %10166  ;;  %10172 = vpow2.f32 %v5223_v35  ;;  %15296 = vst [vmem:[#allocation98_spill] sm:$0xff] %v13312_v0 }
 0x808   : > { %v13287_v39 = vpop.permute.xlu1 %5606  ;;  %v5741_v17 = vpack.c.bf16 %v10167_v33, %v10167_v33  ;;  %v13297_v15 = vpop.eup %10168  ;;  %v5797_v27 = vpack.c.b16 %v5791_v54, %v5790_v8  ;;  %v5406_v41 = vsel %vm4786_vm2, %v10167_v33, 0.0 }
 0x809   : > { %v5355_v58 = vsel %vm4786_vm2, %v13297_v15, 0.0  ;;  %v13308_v26 = vpop.eup %10170 }
 0x80a   : > { %v13299_v53 = vunpack.c.l.b16 %v5741_v17  ;;  %v5358_v17 = vsel %vm4786_vm2, %v13308_v26, 0.0 }
 0x80b   : > { %5404 = vadd.xlane.f32.xlu2 %v5403_v9 }
 0x80c   : > { %v5109_v30 = vpop.permute.xlu2 %5108 }
 0x80d   : > { %5332 = vadd.xlane.f32.xlu0 %v5331_v25  ;;  %v5190_v57 = vsub.f32 %v12820_v55, %v5109_v30  ;;  %v5379_v25 = vsel %vm4786_vm2, %v13254_v31, 0.0  ;;  %v13319_v55 = vpop.eup %10172  ;;  %v5382_v30 = vsel %vm4786_vm2, %v13260_v51, 0.0  ;;  %v9606_v51 = vld [vmem:[%s10803_s12 + $0x38] sm:$0xff] }
 0x80e   : > { %v5361_v33 = vsel %vm4786_vm2, %v13319_v55, 0.0  ;;  %5925 = vmatpush.bf16.msra.mxu1 %v9606_v51 }
 0x80f   : > { %v5241_v28 = vmul.f32 1.442695, %v5190_v57  ;;  %v5334_v57 = vsel %vm4786_vm2, %v13271_v47, 0.0 }
 0x810   : > { %v13306_v38 = vpop.permute.xlu1 %5531  ;;  %5356 = vadd.xlane.f32.xlu1 %v5355_v58  ;;  %v5069_v58 = vpop.permute.xlu0 %5068 }
 0x811   : > { %10174 = vpow2.f32 %v5241_v28 }
 0x812   : > { %9155 = vmatmul.msk.bf16.gmra.mxu0 %vm4786_vm2, %v5797_v27 }
 0x813   : > { %5359 = vadd.xlane.f32.xlu2 %v5358_v17 }
 0x814   : > { %v5074_v9 = vpop.permute.xlu2 %5073 }
 0x815   : > { %5407 = vadd.xlane.f32.xlu0 %v5406_v41 }
 0x817   : > { %v13328_v27 = vpop.eup %10174 }
 0x818   : > { %v5104_v8 = vpop.permute.xlu1 %5103  ;;  %5380 = vadd.xlane.f32.xlu1 %v5379_v25  ;;  %v5735_v17 = vpack.c.bf16 %v13328_v27, %v13328_v27 }
 0x819   : > { %v5189_v35 = vsub.f32 %v12797_v11, %v5104_v8  ;;  %v5182_v8 = vsub.f32 %v12805_v36, %v5069_v58 }
 0x81b   : > { %v5239_v54 = vmul.f32 1.442695, %v5189_v35  ;;  %5383 = vadd.xlane.f32.xlu2 %v5382_v30  ;;  %v5225_v10 = vmul.f32 1.442695, %v5182_v8  ;;  %v5340_v8 = vsel %vm4786_vm2, %v13281_v6, 0.0 }
 0x81c   : > { %v13326_v31 = vpop.permute.xlu2 %5113 }
 0x81d   : > { %10176 = vpow2.f32 %v5239_v54  ;;  %5362 = vadd.xlane.f32.xlu0 %v5361_v33  ;;  %v5337_v54 = vsel %vm4786_vm2, %v13283_v13, 0.0 }
 0x820   : > { %v5144_v41 = vpop.permute.xlu1 %5143  ;;  %5335 = vadd.xlane.f32.xlu1 %v5334_v57  ;;  %v5961_v57 = vunpack.c.l.b16 %v5735_v17 }
 0x821   : > { %v5197_v11 = vsub.f32 %v12801_v50, %v5144_v41  ;;  %v9605_v41 = vld [vmem:[%s10803_s12 + $0x30] sm:$0xff] }
 0x822   : > { %5926 = vmatpush.bf16.msra.mxu1 %v9605_v41 }
 0x823   : > { %v10177_v28 = vpop.eup %10176  ;;  %v5255_v25 = vmul.f32 1.442695, %v5197_v11  ;;  %5338 = vadd.xlane.f32.xlu2 %v5337_v54  ;;  %v9603_v54 = vld [vmem:[%s10803_s12 + $0x20] sm:$0xff] }
 0x824   : > { %v5385_v35 = vsel %vm4786_vm2, %v10177_v28, 0.0  ;;  %v5734_v33 = vpack.c.bf16 %v10177_v28, %v10177_v28  ;;  %v5154_v50 = vpop.permute.xlu2 %5153  ;;  %v5183_v28 = vsub.f32 %v12840_v14, %v5074_v9 }
 0x825   : > { %10178 = vpow2.f32 %v5255_v25  ;;  %5386 = vadd.xlane.f32.xlu0 %v5385_v35  ;;  %v5039_v47 = vpop.permute.xlu0 %5038  ;;  %v5199_v11 = vsub.f32 %v12877_v23, %v5154_v50  ;;  %v9604_v25 = vld [vmem:[%s10803_s12 + $0x28] sm:$0xff] }
 0x826   : > { %v5960_v30 = vunpack.c.l.b16 %v5734_v33  ;;  %v5176_v0 = vsub.f32 %v12899_v40, %v5039_v47  ;;  %5927 = vmatpush.bf16.msra.mxu1 %v9604_v25  ;;  %v5227_v14 = vmul.f32 1.442695, %v5183_v28 }
 0x827   : > { %v5259_v13 = vmul.f32 1.442695, %v5199_v11 }
 0x828   : > { %v5149_v36 = vpop.permute.xlu1 %5148  ;;  %v5967_v58 = vpack.c.b16 %v5961_v57, %v5960_v30  ;;  %v5213_v40 = vmul.f32 1.442695, %v5176_v0 }
 0x829   : > { %v5198_v51 = vsub.f32 %v12815_v44, %v5149_v36  ;;  %10180 = vpow2.f32 %v5259_v13 }
 0x82a   : > { %9195 = vmatmul.msk.bf16.gmra.mxu2 %vm4786_vm2, %v5967_v58  ;;  %10182 = vpow2.f32 %v5225_v10  ;;  %5928 = vmatpush.bf16.msra.mxu1 %v9603_v54  ;;  %v5388_v54 = vsel %vm4786_vm2, %v13328_v27, 0.0 }
 0x82b   : > { %v10179_v35 = vpop.eup %10178  ;;  %v5257_v17 = vmul.f32 1.442695, %v5198_v51 }
 0x82c   : > { %v5409_v23 = vsel %vm4786_vm2, %v10179_v35, 0.0  ;;  %v5044_v6 = vpop.permute.xlu2 %5043  ;;  %v5742_v57 = vpack.c.bf16 %v10179_v35, %v10179_v35 }
 0x82d   : > { %10184 = vpow2.f32 %v5257_v17  ;;  %5410 = vadd.xlane.f32.xlu1 %v5409_v23  ;;  %5341 = vadd.xlane.f32.xlu0 %v5340_v8  ;;  %v5079_v44 = vpop.permute.xlu0 %5078 }
 0x82e   : > { %v5184_v9 = vsub.f32 %v12907_v60, %v5079_v44  ;;  %10186 = vpow2.f32 %v5213_v40  ;;  %v5191_v60 = vsub.f32 %v12858_v63, %v13326_v31  ;;  %v13364_v13 = vunpack.c.l.b16 %v5742_v57 }
 0x82f   : > { %v13352_v50 = vpop.eup %10180  ;;  %10188 = vpow2.f32 %v5227_v14 }
 0x830   : > { %v5229_v33 = vmul.f32 1.442695, %v5184_v9  ;;  %v5034_v47 = vpop.permute.xlu1 %5033  ;;  %v13355_v30 = vpop.eup %10182  ;;  %v5415_v0 = vsel %vm4786_vm2, %v13352_v50, 0.0  ;;  %v5243_v25 = vmul.f32 1.442695, %v5191_v60 }
 0x831   : > { %v5175_v10 = vsub.f32 %v12836_v5, %v5034_v47  ;;  %v5364_v5 = vsel %vm4786_vm2, %v13355_v30, 0.0 }
 0x832   : > { %10190 = vpow2.f32 %v5229_v33 }
 0x833   : > { %v10185_v41 = vpop.eup %10184  ;;  %v5211_v11 = vmul.f32 1.442695, %v5175_v10  ;;  %v9614_v10 = vld [vmem:[%s10803_s12 + $0x78] sm:$0xff] }
 0x834   : > { %v5412_v36 = vsel %vm4786_vm2, %v10185_v41, 0.0  ;;  %v5743_v58 = vpack.c.bf16 %v10185_v41, %v10185_v41  ;;  %v10187_v28 = vpop.eup %10186  ;;  %v13376_v44 = vpop.permute.xlu2 %5083  ;;  %6095 = vmatpush.bf16.msra.mxu3 %v9614_v10 }
 0x835   : > { %10192 = vpow2.f32 %v5211_v11  ;;  %5413 = vadd.xlane.f32.xlu2 %v5412_v36  ;;  %5416 = vadd.xlane.f32.xlu0 %v5415_v0  ;;  %v13368_v35 = vpop.eup %10188  ;;  %v5721_v23 = vpack.c.bf16 %v10187_v28, %v10187_v28  ;;  %v9613_v11 = vld [vmem:[%s10803_s12 + $0x70] sm:$0xff]  ;;  %v5177_v36 = vsub.f32 %v12862_v22, %v5044_v6 }
 0x836   : > { %5365 = vadd.xlane.f32.xlu1 %v5364_v5  ;;  %v13366_v51 = vunpack.c.l.b16 %v5743_v58  ;;  %10194 = vpow2.f32 %v5243_v25  ;;  %v5367_v14 = vsel %vm4786_vm2, %v13368_v35, 0.0 }
 0x837   : > { %v5793_v33 = vunpack.c.l.b16 %v5721_v23  ;;  %v9612_v23 = vld [vmem:[%s10803_s12 + $0x68] sm:$0xff] }
 0x838   : > { %v13370_v63 = vpop.permute.xlu1 %5616  ;;  %v6052_v31 = vpack.c.b16 %v13366_v51, %v13364_v13  ;;  %v13374_v17 = vpop.eup %10190  ;;  %6096 = vmatpush.bf16.msra.mxu3 %v9613_v11  ;;  %v15306_v51 = vld [vmem:[#allocation75_spill] sm:$0xff] }
 0x839   : > { %v5370_v9 = vsel %vm4786_vm2, %v13374_v17, 0.0 }
 0x83b   : > { %v10193_v8 = vpop.eup %10192 }
 0x83c   : > { %v5720_v40 = vpack.c.bf16 %v10193_v8, %v10193_v8  ;;  %v10195_v41 = vpop.eup %10194  ;;  %v5343_v5 = vsel %vm4786_vm2, %v10193_v8, 0.0  ;;  %6097 = vmatpush.bf16.msra.mxu3 %v9612_v23 }
 0x83d   : > { %5368 = vadd.xlane.f32.xlu2 %v5367_v14  ;;  %5371 = vadd.xlane.f32.xlu0 %v5370_v9  ;;  %v5391_v27 = vsel %vm4786_vm2, %v10195_v41, 0.0  ;;  %v5725_v14 = vpack.c.bf16 %v13308_v26, %v13308_v26  ;;  %v5736_v8 = vpack.c.bf16 %v10195_v41, %v10195_v41 }
 0x83e   : > { %v5792_v47 = vunpack.c.l.b16 %v5720_v40  ;;  %5389 = vadd.xlane.f32.xlu1 %v5388_v54  ;;  %v5129_v40 = vpop.permute.xlu2 %5128  ;;  %v5724_v54 = vpack.c.bf16 %v13297_v15, %v13297_v15 }
 0x83f   : > { %v5194_v22 = vsub.f32 %v12889_v49, %v5129_v40  ;;  %v5962_v15 = vunpack.c.l.b16 %v5736_v8 }
 0x840   : > { %v5119_v0 = vpop.permute.xlu1 %5118  ;;  %v5798_v57 = vpack.c.b16 %v5793_v33, %v5792_v47  ;;  %v9611_v33 = vld [vmem:[%s10803_s12 + $0x60] sm:$0xff]  ;;  %v5873_v49 = vunpack.c.l.b16 %v5724_v54  ;;  %s10513_s12 = smov 96  }
 0x841   : > { %v5192_v60 = vsub.f32 %v12913_v3, %v5119_v0  ;;  %v5215_v3 = vmul.f32 1.442695, %v5177_v36  ;;  %v5874_v0 = vunpack.c.l.b16 %v5725_v14  ;;  %v5249_v11 = vmul.f32 1.442695, %v5194_v22  ;;  %6098 = vmatpush.bf16.msra.mxu3 %v9611_v33 }
 0x842   : > { %9156 = vmatmul.msk.bf16.vlgmr.msrb.gmra.mxu1 %vm4786_vm2, %v5798_v57  ;;  %v5346_v57 = vsel %vm4786_vm2, %v10187_v28, 0.0  ;;  %v15297_v22 = vsub.f32 %v13025_v20, %v13036_v29 }
 0x843   : > { %v5245_v58 = vmul.f32 1.442695, %v5192_v60 }
 0x845   : > { %10196 = vpow2.f32 %v5245_v58  ;;  %5392 = vadd.xlane.f32.xlu2 %v5391_v27  ;;  %v13391_v25 = vpop.permute.xlu0 %5163 }
 0x846   : > { %5344 = vadd.xlane.f32.xlu1 %v5343_v5  ;;  %10198 = vpow2.f32 %v5215_v3  ;;  %v5881_v5 = vpack.c.b16 %v5874_v0, %v5873_v49  ;;  %v5726_v0 = vpack.c.bf16 %v13319_v55, %v13319_v55 }
 0x848   : > { %v5159_v9 = vpop.permute.xlu1 %5158 }
 0x849   : > { %v5200_v6 = vsub.f32 %v12850_v37, %v5159_v9 }
 0x84b   : > { %v10197_v47 = vpop.eup %10196  ;;  %v5261_v10 = vmul.f32 1.442695, %v5200_v6 }
 0x84c   : > { %v5394_v60 = vsel %vm4786_vm2, %v10197_v47, 0.0  ;;  %v5737_v26 = vpack.c.bf16 %v10197_v47, %v10197_v47  ;;  %v10199_v40 = vpop.eup %10198  ;;  %v5727_v47 = vpack.c.bf16 %v13355_v30, %v13355_v30  ;;  %v5875_v30 = vunpack.c.l.b16 %v5726_v0 }
 0x84d   : > { %10200 = vpow2.f32 %v5261_v10  ;;  %5347 = vadd.xlane.f32.xlu2 %v5346_v57  ;;  %5395 = vadd.xlane.f32.xlu0 %v5394_v60  ;;  %v5049_v37 = vpop.permute.xlu0 %5048  ;;  %v5349_v9 = vsel %vm4786_vm2, %v10199_v40, 0.0  ;;  %v5722_v54 = vpack.c.bf16 %v10199_v40, %v10199_v40 }
 0x84e   : > { %v5178_v36 = vsub.f32 %v12895_v42, %v5049_v37  ;;  %v5963_v41 = vunpack.c.l.b16 %v5737_v26  ;;  %10202 = vpow2.f32 %v5249_v11  ;;  %v5876_v37 = vunpack.c.l.b16 %v5727_v47 }
 0x84f   : > { %v5794_v26 = vunpack.c.l.b16 %v5722_v54  ;;  %v5728_v54 = vpack.c.bf16 %v13368_v35, %v13368_v35  ;;  %v15301_v35 = vsub.f32 %v13021_v34, %v13031_v52 }
 0x850   : > { %v5217_v58 = vmul.f32 1.442695, %v5178_v36  ;;  %v5124_v27 = vpop.permute.xlu1 %5123  ;;  %v5968_v23 = vpack.c.b16 %v5963_v41, %v5962_v15 }
 0x851   : > { %v5193_v28 = vsub.f32 %v12919_v59, %v5124_v27  ;;  %v4953_v59 = vmul.f32 1.442695, %v15297_v22 }
 0x852   : > { %10204 = vpow2.f32 %v5217_v58  ;;  %9174 = vmatmul.msk.bf16.vlgmr.msra.gmra.mxu1 %vm4786_vm2, %v5881_v5  ;;  %9196 = vmatmul.msk.bf16.gmra.mxu2 %vm4786_vm2, %v5968_v23  ;;  %v5882_v5 = vpack.c.b16 %v5876_v37, %v5875_v30 }
 0x853   : > { %v13407_v3 = vpop.eup %10200  ;;  %v5247_v14 = vmul.f32 1.442695, %v5193_v28 }
 0x854   : > { %v5418_v42 = vsel %vm4786_vm2, %v13407_v3, 0.0  ;;  %v13415_v6 = vpop.eup %10202 }
 0x855   : > { %10206 = vpow2.f32 %v5247_v14  ;;  %5419 = vadd.xlane.f32.xlu1 %v5418_v42  ;;  %5350 = vadd.xlane.f32.xlu2 %v5349_v9  ;;  %v5089_v33 = vpop.permute.xlu0 %5088  ;;  %v5739_v57 = vpack.c.bf16 %v13415_v6, %v13415_v6  ;;  %v5729_v9 = vpack.c.bf16 %v13374_v17, %v13374_v17  ;;  %v5877_v17 = vunpack.c.l.b16 %v5728_v54 }
 0x856   : > { %10208 = vpow2.f32 %v4953_v59  ;;  %v5186_v20 = vsub.f32 %v12871_v16, %v5089_v33  ;;  %v15298_v16 = vsub.f32 %v13019_v21, %v13028_v48  ;;  %v5185_v21 = vsub.f32 %v12881_v19, %v13376_v44 }
 0x857   : > { %v5965_v41 = vunpack.c.l.b16 %v5739_v57  ;;  %v15299_v48 = vsub.f32 %v12960_v43, %v12968_v12  ;;  %v5878_v33 = vunpack.c.l.b16 %v5729_v9  ;;  %v15300_v19 = vpack.c.b16 %v13299_v53, %v13293_v18  ;;  %v5508_v53 = vld [vmem:[#allocation5 + $0x80] sm:$0xff] }
 0x858   : > { %v10205_v8 = vpop.eup %10204  ;;  %v5233_v58 = vmul.f32 1.442695, %v5186_v20  ;;  %v5169_v27 = vpop.permute.xlu1 %5168  ;;  %v4985_v40 = vmul.f32 1.442695, %v15298_v16  ;;  %v5231_v47 = vmul.f32 1.442695, %v5185_v21  ;;  %v5700_v52 = vmul.f32 %v13287_v39, %v5508_v53 }
 0x859   : > { %v5723_v10 = vpack.c.bf16 %v10205_v8, %v10205_v8  ;;  %v5202_v28 = vsub.f32 %v12931_v32, %v5169_v27  ;;  %v5352_v14 = vsel %vm4786_vm2, %v10205_v8, 0.0  ;;  %v4951_v59 = vmul.f32 1.442695, %v15299_v48  ;;  %v5275_v27 = vld [vmem:[#allocation4 + $0x40] sm:$0xff]  ;;  %v15308_v21 = vld [vmem:[#allocation57_spill] sm:$0xff] }
 0x85a   : > { %10210 = vpow2.f32 %v5233_v58  ;;  %v5883_v43 = vpack.c.b16 %v5878_v33, %v5877_v17  ;;  %v5001_v44 = vmul.f32 1.442695, %v15301_v35  ;;  %v5307_v48 = vmul.f32 %v15308_v21, %v5275_v27  ;;  %v5292_v17 = vld [vmem:[#allocation4 + $0xc8] sm:$0xff]  ;;  %v15311_v53 = vld [vmem:[#allocation61_spill] sm:$0xff] }
 0x85b   : > { %v10207_v60 = vpop.eup %10206  ;;  %v5795_v29 = vunpack.c.l.b16 %v5723_v10  ;;  %10212 = vpow2.f32 %v4985_v40  ;;  %v5265_v42 = vmul.f32 1.442695, %v5202_v28  ;;  %v15320_v21 = vld [vmem:[#allocation69_spill] sm:$0xff] }
 0x85c   : > { %v5397_v11 = vsel %vm4786_vm2, %v10207_v60, 0.0  ;;  %v5738_v49 = vpack.c.bf16 %v10207_v60, %v10207_v60  ;;  %v13426_v55 = vpop.eup %10208  ;;  %v15302_v60 = vsub.f32 %v13093_v4, %v13100_v61  ;;  %v5509_v4 = vld [vmem:[#allocation5 + $0x88] sm:$0xff] }
 0x85d   : > { %5398 = vadd.xlane.f32.xlu1 %v5397_v11  ;;  %v5799_v36 = vpack.c.b16 %v5795_v29, %v5794_v26  ;;  %10214 = vpow2.f32 %v5265_v42  ;;  %v5492_v29 = vld [vmem:[#allocation5] sm:$0xff] }
 0x85e   : > { %v5964_v15 = vunpack.c.l.b16 %v5738_v49  ;;  %10216 = vpow2.f32 %v4951_v59  ;;  %v4987_v34 = vmul.f32 1.442695, %v15302_v60  ;;  %v5267_v49 = vld [vmem:[#allocation4] sm:$0xff] }
 0x85f   : > { %9157 = vmatmul.msk.bf16.vlgmr.msrb.gmra.mxu3 %vm4786_vm2, %v5799_v36  ;;  %10218 = vpow2.f32 %v5231_v47  ;;  %v5291_v36 = vld [vmem:[#allocation4 + $0xc0] sm:$0xff] }
 0x860   : > { %v5969_v23 = vpack.c.b16 %v5965_v41, %v5964_v15  ;;  %v10211_v22 = vpop.eup %10210  ;;  %10220 = vpow2.f32 %v5001_v44  ;;  %v5684_v15 = vmul.f32 %v13266_v56, %v5492_v29  ;;  %v5299_v41 = vmul.f32 %v12970_v1, %v5267_v49  ;;  %v15303_v56 = vld [vmem:[#allocation56_spill] sm:$0xff]  ;;  %v15305_v42 = vld [vmem:[#allocation55_spill] sm:$0xff]  ;;  %v15313_v49 = vld [vmem:[#allocation85_spill] sm:$0xff] }
 0x861   : > { %5541 = vperm.xlu0 %10067, %v13426_v55   ;;  %v13445_v32 = vpop.eup %10212  ;;  %v5376_v8 = vsel %vm4786_vm2, %v10211_v22, 0.0  ;;  %v5731_v57 = vpack.c.bf16 %v10211_v22, %v10211_v22  ;;  %10222 = vpow2.f32 %v4987_v34  ;;  %v5323_v58 = vmul.f32 %v13033_v7, %v5291_v36  ;;  %v15309_v59 = vld [vmem:[#allocation59_spill] sm:$0xff] }
 0x862   : > { %9175 = vmatmul.msk.bf16.gmra.mxu1 %vm4786_vm2, %v5882_v5  ;;  %9197 = vmatmul.msk.bf16.gmra.mxu2 %vm4786_vm2, %v5969_v23  ;;  %v15304_v28 = vsub.f32 %v12958_v2, %v15303_v56  ;;  %v5201_v9 = vsub.f32 %v15305_v42, %v13391_v25  ;;  %v5701_v7 = vmul.f32 %v13276_v62, %v5509_v4  ;;  %v5283_v60 = vld [vmem:[#allocation4 + $0x80] sm:$0xff]  ;;  %v5284_v56 = vld [vmem:[#allocation4 + $0x88] sm:$0xff] }
 0x863   : > { %v13453_v12 = vpop.eup %10214  ;;  %v5880_v30 = vunpack.c.l.b16 %v5731_v57  ;;  %v15310_v2 = vsub.f32 %v15309_v59, %v13004_v45  ;;  %v5745_v45 = vpack.c.bf16 %v13407_v3, %v13407_v3  ;;  %v5744_v34 = vpack.c.bf16 %v13352_v50, %v13352_v50  ;;  %v15316_v50 = vld [vmem:[#allocation58_spill] sm:$0xff] }
 0x864   : > { %v13459_v10 = vpop.eup %10216  ;;  %v5424_v0 = vsel %vm4786_vm2, %v13453_v12, 0.0 }
 0x865   : > { %5353 = vadd.xlane.f32.xlu1 %v5352_v14  ;;  %v13464_v18 = vpop.eup %10218  ;;  %v4967_v14 = vmul.f32 1.442695, %v15304_v28  ;;  %v4999_v54 = vmul.f32 1.442695, %v15310_v2  ;;  %v15321_v2 = vld [vmem:[#allocation80_spill] sm:$0xff] }
 0x866   : > { %v5730_v26 = vpack.c.bf16 %v13464_v18, %v13464_v18  ;;  %v13472_v11 = vpop.eup %10220 }
 0x867   : > { %v13499_v47 = vpop.eup %10222  ;;  %10224 = vpow2.f32 %v4967_v14 }
 0x868   : > { %v5879_v61 = vunpack.c.l.b16 %v5730_v26 }
 0x86a   : > { %v5884_v40 = vpack.c.b16 %v5880_v30, %v5879_v61  ;;  %v5373_v61 = vsel %vm4786_vm2, %v13464_v18, 0.0 }
 0x86d   : > { %5621 = vperm.xlu2 %10068, %v13445_v32   ;;  %5377 = vadd.xlane.f32.xlu1 %v5376_v8  ;;  %v5493_v8 = vld [vmem:[#allocation5 + $0x8] sm:$0xff]  ;;  %v13519_v4 = vpop.eup %10224 }
 0x86e   : > { %v5685_v35 = vmul.f32 %v13306_v38, %v5493_v8 }
 0x86f   : > { %9214 = vmatmul.msk.bf16.vlgmr.msra.gmra.mxu3 %vm4786_vm2, %v15300_v19  ;;  %v5276_v19 = vld [vmem:[#allocation4 + $0x48] sm:$0xff] }
 0x870   : > { %v5308_v57 = vmul.f32 %v15311_v53, %v5276_v19  ;;  %v5285_v19 = vld [vmem:[#allocation4 + $0x90] sm:$0xff] }
 0x872   : > { %9176 = vmatmul.msk.bf16.gmra.mxu1 %vm4786_vm2, %v5883_v43  ;;  %v5263_v43 = vmul.f32 1.442695, %v5201_v9  ;;  %v15319_v9 = vld [vmem:[#allocation74_spill] sm:$0xff] }
 0x875   : > { %5536 = vperm.xlu2 %10068, %v13459_v10   ;;  %5425 = vadd.xlane.f32.xlu1 %v5424_v0  ;;  %v5324_v0 = vmul.f32 %v13139_v46, %v5292_v17  ;;  %v15315_v46 = vld [vmem:[#allocation62_spill] sm:$0xff] }
 0x879   : > { %v6015_v20 = vpop.f32.mrf.mxu2 }
 0x87a   : > { %v6136_v37 = vadd.f32 %v6015_v20, %v5700_v52  ;;  %v6048_v20 = vunpack.c.l.b16 %v5745_v45 }
 0x87c   : > { %6168 = vst.msk [vmem:[#allocation5 + $0x80] sm:$0xff] %vm4354_vm0, %v6136_v37  ;;  %v15312_v37 = vld [vmem:[#allocation84_spill] sm:$0xff] }
 0x87d   : > { %5661 = vperm.xlu2 %10068, %v13472_v11   ;;  %v15314_v36 = vsub.f32 %v15312_v37, %v15313_v49 }
 0x87e   : > { %v5405_v16 = vpop.xlane.xlu2 %5404 }
 0x87f   : > { %v5845_v39 = vpop.f32.mrf.mxu0  ;;  %9215 = vmatmul.msk.bf16.gmra.mxu3 %vm4786_vm2, %v6052_v31  ;;  %v5451_v13 = vadd.f32 %v5405_v16, %v5323_v58  ;;  %v15307_v31 = vsub.f32 %v15306_v51, %v13131_v24  ;;  %v4973_v30 = vmul.f32 1.442695, %v15314_v36 }
 0x880   : > { %v6120_v5 = vadd.f32 %v5845_v39, %v5684_v15  ;;  %v5333_v23 = vpop.xlane.xlu0 %5332  ;;  %v5315_v15 = vmul.f32 %v15315_v46, %v5283_v60  ;;  %v15317_v39 = vld [vmem:[#allocation60_spill] sm:$0xff]  ;;  %v5270_v46 = vld [vmem:[#allocation4 + $0x18] sm:$0xff] }
 0x881   : > { %v5427_v22 = vadd.f32 %v5333_v23, %v5299_v41  ;;  %v5003_v1 = vmul.f32 1.442695, %v15307_v31  ;;  %v6017_v33 = vpop.f32.mrf.mxu2  ;;  %5484 = vst.msk [vmem:[#allocation4 + $0xc0] sm:$0xff] %vm5459_vm10, %v5451_v13  ;;  %v15318_v41 = vsub.f32 %v15316_v50, %v15317_v39  ;;  %v5268_v13 = vld [vmem:[#allocation4 + $0x8] sm:$0xff]  ;;  %v5302_v50 = vmul.f32 %v13426_v55, %v5270_v46  ;;  %v5271_v46 = vld [vmem:[#allocation4 + $0x20] sm:$0xff] }
 0x882   : > { %6152 = vst.msk [vmem:[#allocation5] sm:$0xff] %vm4354_vm0, %v6120_v5  ;;  %9177 = vmatmul.msk.bf16.gmra.mxu1 %vm4786_vm2, %v5884_v40  ;;  %v6137_v62 = vadd.f32 %v6017_v33, %v5701_v7  ;;  %v6047_v5 = vunpack.c.l.b16 %v5744_v34  ;;  %v5277_v40 = vld [vmem:[#allocation4 + $0x50] sm:$0xff] }
 0x883   : > { %5460 = vst.msk [vmem:[#allocation4] sm:$0xff] %vm5459_vm10, %v5427_v22  ;;  %v5357_v25 = vpop.xlane.xlu1 %5356  ;;  %10226 = vpow2.f32 %v5003_v1  ;;  %v4969_v58 = vmul.f32 1.442695, %v15318_v41  ;;  %v5309_v42 = vmul.f32 %v13519_v4, %v5277_v40  ;;  %v5316_v22 = vmul.f32 %v15319_v9, %v5284_v56  ;;  %v5295_v9 = vld [vmem:[#allocation4 + $0xe0] sm:$0xff] }
 0x884   : > { %v5435_v24 = vadd.f32 %v5357_v25, %v5307_v48  ;;  %10228 = vpow2.f32 %v4999_v54  ;;  %6169 = vst.msk [vmem:[#allocation5 + $0x88] sm:$0xff] %vm4354_vm0, %v6137_v62  ;;  %v6053_v18 = vpack.c.b16 %v6048_v20, %v6047_v5  ;;  %v5300_v48 = vmul.f32 %v15320_v21, %v5268_v13  ;;  %v15322_v54 = vld [vmem:[#allocation82_spill] sm:$0xff]  ;;  %v15328_v5 = vld [vmem:[#allocation77_spill] sm:$0xff] }
 0x885   : > { %5626 = vperm.xlu2 %10068, %v13499_v47   ;;  %10230 = vpow2.f32 %v5263_v43  ;;  %v15323_v8 = vsub.f32 %v15321_v2, %v15322_v54  ;;  %v5269_v43 = vld [vmem:[#allocation4 + $0x10] sm:$0xff]  ;;  %v15332_v21 = vld [vmem:[#allocation66_spill] sm:$0xff] }
 0x886   : > { %5468 = vst.msk [vmem:[#allocation4 + $0x40] sm:$0xff] %vm5459_vm10, %v5435_v24  ;;  %v5360_v3 = vpop.xlane.xlu2 %5359  ;;  %10232 = vpow2.f32 %v4973_v30  ;;  %v5301_v53 = vmul.f32 %v13459_v10, %v5269_v43  ;;  %v5293_v10 = vld [vmem:[#allocation4 + $0xd0] sm:$0xff] }
 0x887   : > { %v5847_v44 = vpop.f32.mrf.mxu0  ;;  %v5436_v38 = vadd.f32 %v5360_v3, %v5308_v57  ;;  %10234 = vpow2.f32 %v4969_v58  ;;  %v4957_v25 = vmul.f32 1.442695, %v15323_v8  ;;  %v5510_v2 = vld [vmem:[#allocation5 + $0x90] sm:$0xff] }
 0x888   : > { %v6121_v52 = vadd.f32 %v5847_v44, %v5685_v35  ;;  %v5408_v26 = vpop.xlane.xlu0 %5407  ;;  %v6240_v24 = vld [vmem:[#allocation4 + $0xc0] sm:$0xff]  ;;  %v5747_v35 = vpack.c.bf16 %v13453_v12, %v13453_v12  ;;  %v15324_v44 = vld [vmem:[#allocation88_spill] sm:$0xff] }
 0x889   : > { %v5452_v29 = vadd.f32 %v5408_v26, %v5324_v0  ;;  %v13525_v23 = vpop.eup %10226  ;;  %5469 = vst.msk [vmem:[#allocation4 + $0x48] sm:$0xff] %vm5459_vm10, %v5436_v38  ;;  %10236 = vrcp.f32 %v6240_v24  ;;  %v5317_v0 = vmul.f32 %v15324_v44, %v5285_v19  ;;  %v15325_v38 = vld [vmem:[#allocation64_spill] sm:$0xff]  ;;  %v15326_v12 = vld [vmem:[#allocation67_spill] sm:$0xff]  ;;  %v15334_v19 = vld [vmem:[#allocation86_spill] sm:$0xff] }
 0x88a   : > { %6153 = vst.msk [vmem:[#allocation5 + $0x8] sm:$0xff] %vm4354_vm0, %v6121_v52  ;;  %v10229_v28 = vpop.eup %10228  ;;  %10238 = vpow2.f32 %v4957_v25  ;;  %v6050_v3 = vunpack.c.l.b16 %v5747_v35  ;;  %v15327_v20 = vsub.f32 %v15325_v38, %v15326_v12  ;;  %v5327_v13 = vmul.f32 %v13525_v23, %v5295_v9  ;;  %v5279_v35 = vld [vmem:[#allocation4 + $0x60] sm:$0xff]  ;;  %v5280_v44 = vld [vmem:[#allocation4 + $0x68] sm:$0xff] }
 0x88b   : > { %5485 = vst.msk [vmem:[#allocation4 + $0xc8] sm:$0xff] %vm5459_vm10, %v5452_v29  ;;  %v5381_v27 = vpop.xlane.xlu1 %5380  ;;  %5374 = vadd.xlane.f32.xlu0 %v5373_v61  ;;  %v10231_v14 = vpop.eup %10230  ;;  %v5400_v29 = vsel %vm4786_vm2, %v13415_v6, 0.0  ;;  %v5325_v6 = vmul.f32 %v10229_v28, %v5293_v10 }
 0x88c   : > { %v5443_v16 = vadd.f32 %v5381_v27, %v5315_v15  ;;  %v5421_v59 = vsel %vm4786_vm2, %v10231_v14, 0.0  ;;  %v13539_v62 = vpop.eup %10232  ;;  %v5746_v57 = vpack.c.bf16 %v10231_v14, %v10231_v14  ;;  %v4971_v37 = vmul.f32 1.442695, %v15327_v20 }
 0x88d   : > { %5666 = vperm.xlu2 %10068, %v13525_v23   ;;  %v10235_v45 = vpop.eup %10234 }
 0x88e   : > { %5476 = vst.msk [vmem:[#allocation4 + $0x80] sm:$0xff] %vm5459_vm10, %v5443_v16  ;;  %5656 = vperm.xlu1 %10069, %v10229_v28   ;;  %v5384_v31 = vpop.xlane.xlu2 %5383  ;;  %v6049_v49 = vunpack.c.l.b16 %v5746_v57  ;;  %v15329_v16 = vld [vmem:[#allocation79_spill] sm:$0xff]  ;;  %v5278_v28 = vld [vmem:[#allocation4 + $0x58] sm:$0xff] }
 0x88f   : > { %9216 = vmatmul.msk.bf16.gmra.mxu3 %vm4786_vm2, %v6053_v18  ;;  %v5444_v7 = vadd.f32 %v5384_v31, %v5316_v22  ;;  %v10237_v30 = vpop.eup %10236  ;;  %v15330_v40 = vsub.f32 %v15328_v5, %v15329_v16  ;;  %v5310_v31 = vmul.f32 %v10235_v45, %v5278_v28 }
 0x890   : > { %v5363_v51 = vpop.xlane.xlu0 %5362  ;;  %v13555_v15 = vpop.eup %10238  ;;  %v6054_v61 = vpack.c.b16 %v6050_v3, %v6049_v49 }
 0x891   : > { %v5437_v1 = vadd.f32 %v5363_v51, %v5309_v42  ;;  %5477 = vst.msk [vmem:[#allocation4 + $0x88] sm:$0xff] %vm5459_vm10, %v5444_v7  ;;  %v4993_v56 = vmul.f32 1.442695, %v15330_v40  ;;  %v5294_v42 = vld [vmem:[#allocation4 + $0xd8] sm:$0xff]  ;;  %v15331_v7 = vld [vmem:[#allocation63_spill] sm:$0xff] }
 0x892   : > { %v5326_v55 = vmul.f32 %v13472_v11, %v5294_v42  ;;  %v15335_v11 = vld [vmem:[#allocation87_spill] sm:$0xff]  ;;  %v15340_v40 = vld [vmem:[#allocation70_spill] sm:$0xff] }
 0x893   : > { %5470 = vst.msk [vmem:[#allocation4 + $0x50] sm:$0xff] %vm5459_vm10, %v5437_v1  ;;  %v5336_v33 = vpop.xlane.xlu1 %5335  ;;  %5422 = vadd.xlane.f32.xlu0 %v5421_v59  ;;  %v15336_v43 = vsub.f32 %v15334_v19, %v15335_v11 }
 0x894   : > { %v5428_v17 = vadd.f32 %v5336_v33, %v5300_v48  ;;  %v15333_v48 = vsub.f32 %v15331_v7, %v15332_v21 }
 0x895   : > { %5591 = vperm.xlu2 %10068, %v13539_v62   ;;  %v4989_v23 = vmul.f32 1.442695, %v15336_v43 }
 0x896   : > { %5461 = vst.msk [vmem:[#allocation4 + $0x8] sm:$0xff] %vm5459_vm10, %v5428_v17  ;;  %5581 = vperm.xlu1 %10069, %v10235_v45   ;;  %v5339_v34 = vpop.xlane.xlu2 %5338  ;;  %v4955_v59 = vmul.f32 1.442695, %v15333_v48  ;;  %v5702_v45 = vmul.f32 %v13370_v63, %v5510_v2  ;;  %v15344_v2 = vld [vmem:[#allocation90_spill] sm:$0xff] }
 0x897   : > { %v5429_v26 = vadd.f32 %v5339_v34, %v5301_v53 }
 0x898   : > { %v5387_v60 = vpop.xlane.xlu0 %5386  ;;  %v6233_v36 = vld [vmem:[#allocation4 + $0x88] sm:$0xff] }
 0x899   : > { %v5445_v52 = vadd.f32 %v5387_v60, %v5317_v0  ;;  %5462 = vst.msk [vmem:[#allocation4 + $0x10] sm:$0xff] %vm5459_vm10, %v5429_v26  ;;  %10240 = vrcp.f32 %v6233_v36  ;;  %v6216_v0 = vld [vmem:[#allocation4] sm:$0xff]  ;;  %v5286_v60 = vld [vmem:[#allocation4 + $0x98] sm:$0xff] }
 0x89a   : > { %10242 = vpow2.f32 %v4971_v37  ;;  %v5318_v3 = vmul.f32 %v13445_v32, %v5286_v60  ;;  %v6226_v19 = vld [vmem:[#allocation4 + $0x50] sm:$0xff] }
 0x89b   : > { %5478 = vst.msk [vmem:[#allocation4 + $0x90] sm:$0xff] %vm5459_vm10, %v5445_v52  ;;  %5401 = vadd.xlane.f32.xlu0 %v5400_v29  ;;  %v5312_v52 = vmul.f32 %v13539_v62, %v5280_v44  ;;  %v5287_v62 = vld [vmem:[#allocation4 + $0xa0] sm:$0xff] }
 0x89d   : > { %6434 = vperm.xlu2 %10068, %v10237_v30   ;;  %v6225_v30 = vld [vmem:[#allocation4 + $0x48] sm:$0xff] }
 0x89e   : > { %5551 = vperm.xlu1 %10069, %v13555_v15  }
 0x89f   : > { %9217 = vmatmul.msk.bf16.gmra.mxu3 %vm4786_vm2, %v6054_v61  ;;  %v10241_v14 = vpop.eup %10240  ;;  %v5319_v61 = vmul.f32 %v13499_v47, %v5287_v62  ;;  %v5272_v47 = vld [vmem:[#allocation4 + $0x28] sm:$0xff] }
 0x8a0   : > { %v5411_v39 = vpop.xlane.xlu1 %5410  ;;  %v5342_v41 = vpop.xlane.xlu0 %5341  ;;  %v6218_v28 = vld [vmem:[#allocation4 + $0x10] sm:$0xff] }
 0x8a1   : > { %v5453_v58 = vadd.f32 %v5411_v39, %v5325_v6  ;;  %v5430_v27 = vadd.f32 %v5342_v41, %v5302_v50  ;;  %v10243_v22 = vpop.eup %10242  ;;  %v15337_v39 = vld [vmem:[#allocation65_spill] sm:$0xff]  ;;  %v15338_v41 = vld [vmem:[#allocation68_spill] sm:$0xff] }
 0x8a2   : > { %v6234_v18 = vld [vmem:[#allocation4 + $0x90] sm:$0xff]  ;;  %v5311_v63 = vmul.f32 %v10243_v22, %v5279_v35 }
 0x8a3   : > { %5486 = vst.msk [vmem:[#allocation4 + $0xd0] sm:$0xff] %vm5459_vm10, %v5453_v58  ;;  %10244 = vrcp.f32 %v6234_v18  ;;  %v15339_v58 = vsub.f32 %v15337_v39, %v15338_v41  ;;  %v5495_v41 = vld [vmem:[#allocation5 + $0x18] sm:$0xff] }
 0x8a4   : > { %5463 = vst.msk [vmem:[#allocation4 + $0x18] sm:$0xff] %vm5459_vm10, %v5430_v27  ;;  %10246 = vpow2.f32 %v4993_v56  ;;  %v15341_v56 = vld [vmem:[#allocation72_spill] sm:$0xff] }
 0x8a5   : > { %6399 = vperm.xlu2 %10068, %v10241_v14   ;;  %10248 = vpow2.f32 %v4955_v59  ;;  %v5005_v27 = vmul.f32 1.442695, %v15339_v58  ;;  %v15342_v18 = vsub.f32 %v15340_v40, %v15341_v56  ;;  %v15343_v59 = vld [vmem:[#allocation89_spill] sm:$0xff] }
 0x8a6   : > { %5586 = vperm.xlu1 %10069, %v10243_v22   ;;  %v5288_v22 = vld [vmem:[#allocation4 + $0xa8] sm:$0xff] }
 0x8a7   : > { %v4959_v14 = vmul.f32 1.442695, %v15342_v18 }
 0x8a8   : > { %v5414_v51 = vpop.xlane.xlu2 %5413  ;;  %v5417_v1 = vpop.xlane.xlu0 %5416 }
 0x8a9   : > { %v5454_v54 = vadd.f32 %v5414_v51, %v5326_v55  ;;  %v5366_v8 = vpop.xlane.xlu1 %5365  ;;  %v5455_v25 = vadd.f32 %v5417_v1, %v5327_v13  ;;  %v10245_v17 = vpop.eup %10244  ;;  %v5304_v51 = vmul.f32 %v13555_v15, %v5272_v47  ;;  %v5273_v15 = vld [vmem:[#allocation4 + $0x30] sm:$0xff] }
 0x8aa   : > { %v5438_v33 = vadd.f32 %v5366_v8, %v5310_v31  ;;  %v13576_v53 = vpop.eup %10246 }
 0x8ab   : > { %5487 = vst.msk [vmem:[#allocation4 + $0xd8] sm:$0xff] %vm5459_vm10, %v5454_v54  ;;  %v6219_v24 = vld [vmem:[#allocation4 + $0x18] sm:$0xff]  ;;  %v10249_v49 = vpop.eup %10248  ;;  %v15345_v54 = vsub.f32 %v15343_v59, %v15344_v2  ;;  %v5494_v2 = vld [vmem:[#allocation5 + $0x10] sm:$0xff] }
 0x8ac   : > { %5471 = vst.msk [vmem:[#allocation4 + $0x58] sm:$0xff] %vm5459_vm10, %v5438_v33  ;;  %10250 = vrcp.f32 %v6219_v24  ;;  %v5303_v50 = vmul.f32 %v10249_v49, %v5271_v46 }
 0x8ad   : > { %5488 = vst.msk [vmem:[#allocation4 + $0xe0] sm:$0xff] %vm5459_vm10, %v5455_v25  ;;  %v6020_v57 = vpop.f32.mrf.mxu2  ;;  %6404 = vperm.xlu2 %10068, %v10245_v17   ;;  %10252 = vrcp.f32 %v6216_v0  ;;  %v4991_v8 = vmul.f32 1.442695, %v15345_v54  ;;  %v5296_v17 = vld [vmem:[#allocation4 + $0xe8] sm:$0xff] }
 0x8ae   : > { %v6138_v34 = vadd.f32 %v6020_v57, %v5702_v45  ;;  %5641 = vperm.xlu1 %10069, %v13576_v53   ;;  %10254 = vpow2.f32 %v4989_v23 }
 0x8af   : > { %5576 = vperm.xlu0 %10067, %v13519_v4  }
 0x8b0   : > { %6170 = vst.msk [vmem:[#allocation5 + $0x90] sm:$0xff] %vm4354_vm0, %v6138_v34  ;;  %v5369_v26 = vpop.xlane.xlu2 %5368  ;;  %v5372_v29 = vpop.xlane.xlu0 %5371 }
 0x8b1   : > { %v5439_v38 = vadd.f32 %v5369_v26, %v5311_v63  ;;  %v5390_v12 = vpop.xlane.xlu1 %5389  ;;  %v5440_v20 = vadd.f32 %v5372_v29, %v5312_v52  ;;  %v15346_v63 = vld [vmem:[#allocation81_spill] sm:$0xff]  ;;  %v15347_v52 = vld [vmem:[#allocation83_spill] sm:$0xff] }
 0x8b2   : > { %v5446_v37 = vadd.f32 %v5390_v12, %v5318_v3  ;;  %v10251_v4 = vpop.eup %10250  ;;  %v15348_v26 = vsub.f32 %v15346_v63, %v15347_v52  ;;  %v5500_v29 = vld [vmem:[#allocation5 + $0x40] sm:$0xff]  ;;  %v6217_v63 = vld [vmem:[#allocation4 + $0x8] sm:$0xff] }
 0x8b3   : > { %5472 = vst.msk [vmem:[#allocation4 + $0x60] sm:$0xff] %vm5459_vm10, %v5439_v38  ;;  %v6227_v36 = vld [vmem:[#allocation4 + $0x58] sm:$0xff]  ;;  %v10253_v10 = vpop.eup %10252  ;;  %v13612_v38 = vpop.f32.mrf.mxu0 }
 0x8b4   : > { %5479 = vst.msk [vmem:[#allocation4 + $0x98] sm:$0xff] %vm5459_vm10, %v5446_v37  ;;  %v10255_v32 = vpop.eup %10254  ;;  %10256 = vrcp.f32 %v6227_v36  ;;  %v4961_v3 = vmul.f32 1.442695, %v15348_v26  ;;  %v6243_v37 = vld [vmem:[#allocation4 + $0xd8] sm:$0xff]  ;;  %v6224_v36 = vld [vmem:[#allocation4 + $0x40] sm:$0xff] }
 0x8b5   : > { %5473 = vst.msk [vmem:[#allocation4 + $0x68] sm:$0xff] %vm5459_vm10, %v5440_v20  ;;  %6329 = vperm.xlu2 %10068, %v10251_v4   ;;  %10258 = vrcp.f32 %v6225_v30  ;;  %v5320_v31 = vmul.f32 %v10255_v32, %v5288_v22  ;;  %v5289_v20 = vld [vmem:[#allocation4 + $0xb0] sm:$0xff]  ;;  %v15349_v4 = vld [vmem:[#allocation95_spill] sm:$0xff]  ;;  %v5511_v30 = vld [vmem:[#allocation5 + $0x98] sm:$0xff]  ;;  %v6022_v56 = vpop.f32.mrf.mxu2 }
 0x8b6   : > { %6314 = vperm.xlu1 %10069, %v10253_v10   ;;  %10260 = vpow2.f32 %v5005_v27  ;;  %v5692_v62 = vmul.f32 %v15349_v4, %v5500_v29  ;;  %v15350_v27 = vld [vmem:[#allocation71_spill] sm:$0xff]  ;;  %v15357_v29 = vld [vmem:[#allocation76_spill] sm:$0xff] }
 0x8b7   : > { %5631 = vperm.xlu0 %10067, %v10255_v32   ;;  %10262 = vpow2.f32 %v4959_v14  ;;  %v5501_v14 = vld [vmem:[#allocation5 + $0x48] sm:$0xff] }
 0x8b8   : > { %v5393_v6 = vpop.xlane.xlu2 %5392  ;;  %10264 = vrcp.f32 %v6218_v28  ;;  %v5274_v28 = vld [vmem:[#allocation4 + $0x38] sm:$0xff] }
 0x8b9   : > { %v5447_v5 = vadd.f32 %v5393_v6, %v5319_v61  ;;  %v5345_v16 = vpop.xlane.xlu1 %5344 }
 0x8ba   : > { %v5431_v42 = vadd.f32 %v5345_v16, %v5303_v50  ;;  %v10257_v9 = vpop.eup %10256  ;;  %v6228_v60 = vld [vmem:[#allocation4 + $0x60] sm:$0xff] }
 0x8bb   : > { %5480 = vst.msk [vmem:[#allocation4 + $0xa0] sm:$0xff] %vm5459_vm10, %v5447_v5  ;;  %v10259_v55 = vpop.eup %10258  ;;  %v15351_v5 = vld [vmem:[#allocation73_spill] sm:$0xff] }
 0x8bc   : > { %5464 = vst.msk [vmem:[#allocation4 + $0x20] sm:$0xff] %vm5459_vm10, %v5431_v42  ;;  %v10261_v25 = vpop.eup %10260  ;;  %v15352_v16 = vsub.f32 %v15350_v27, %v15351_v5 }
 0x8bd   : > { %6369 = vperm.xlu2 %10068, %v10257_v9   ;;  %v13603_v24 = vpop.eup %10262  ;;  %v5328_v23 = vmul.f32 %v10261_v25, %v5296_v17 }
 0x8be   : > { %6359 = vperm.xlu1 %10069, %v10259_v55   ;;  %v10265_v11 = vpop.eup %10264  ;;  %v5305_v45 = vmul.f32 %v13603_v24, %v5273_v15  ;;  %v4977_v40 = vmul.f32 1.442695, %v15352_v16  ;;  %v6244_v55 = vld [vmem:[#allocation4 + $0xe0] sm:$0xff] }
 0x8bf   : > { %v13596_v13 = vpop.f32.mrf.mxu1  ;;  %5546 = vperm.xlu0 %10067, %v10249_v49  }
 0x8c0   : > { %v5348_v1 = vpop.xlane.xlu2 %5347  ;;  %v5396_v7 = vpop.xlane.xlu0 %5395 }
 0x8c1   : > { %v5432_v21 = vadd.f32 %v5348_v1, %v5304_v51  ;;  %v5448_v48 = vadd.f32 %v5396_v7, %v5320_v31  ;;  %v5852_v31 = vpop.f32.mrf.mxu0  ;;  %v6232_v1 = vld [vmem:[#allocation4 + $0x80] sm:$0xff] }
 0x8c3   : > { %5465 = vst.msk [vmem:[#allocation4 + $0x28] sm:$0xff] %vm5459_vm10, %v5432_v21  ;;  %v6220_v33 = vld [vmem:[#allocation4 + $0x20] sm:$0xff]  ;;  %v15353_v21 = vld [vmem:[#allocation96_spill] sm:$0xff] }
 0x8c4   : > { %5481 = vst.msk [vmem:[#allocation4 + $0xa8] sm:$0xff] %vm5459_vm10, %v5448_v48  ;;  %10266 = vrcp.f32 %v6220_v33  ;;  %v5693_v48 = vmul.f32 %v15353_v21, %v5501_v14  ;;  %v5517_v21 = vld [vmem:[#allocation5 + $0xc8] sm:$0xff] }
 0x8c5   : > { %10268 = vpow2.f32 %v4991_v8 }
 0x8c6   : > { %6324 = vperm.xlu1 %10069, %v10265_v11   ;;  %10270 = vrcp.f32 %v6226_v19 }
 0x8c7   : > { %v13606_v43 = vpop.f32.mrf.mxu1  ;;  %5671 = vperm.xlu0 %10067, %v10261_v25   ;;  %10272 = vrcp.f32 %v6228_v60  ;;  %v5282_v60 = vld [vmem:[#allocation4 + $0x78] sm:$0xff] }
 0x8c8   : > { %v5420_v35 = vpop.xlane.xlu1 %5419  ;;  %v5351_v44 = vpop.xlane.xlu2 %5350  ;;  %10274 = vpow2.f32 %v4961_v3 }
 0x8c9   : > { %v5456_v0 = vadd.f32 %v5420_v35, %v5328_v23  ;;  %v5433_v57 = vadd.f32 %v5351_v44, %v5305_v45  ;;  %10276 = vrcp.f32 %v6243_v37  ;;  %v15354_v23 = vld [vmem:[#allocation93_spill] sm:$0xff]  ;;  %v15355_v45 = vld [vmem:[#allocation94_spill] sm:$0xff] }
 0x8ca   : > { %v10267_v34 = vpop.eup %10266  ;;  %10278 = vrcp.f32 %v6224_v36  ;;  %v15356_v35 = vsub.f32 %v15354_v23, %v15355_v45  ;;  %v5281_v23 = vld [vmem:[#allocation4 + $0x70] sm:$0xff] }
 0x8cb   : > { %5489 = vst.msk [vmem:[#allocation4 + $0xe8] sm:$0xff] %vm5459_vm10, %v5456_v0  ;;  %6334 = vperm.xlu2 %10068, %v10267_v34   ;;  %v10269_v12 = vpop.eup %10268 }
 0x8cc   : > { %5466 = vst.msk [vmem:[#allocation4 + $0x30] sm:$0xff] %vm5459_vm10, %v5433_v57  ;;  %v10271_v49 = vpop.eup %10270  ;;  %v5321_v46 = vmul.f32 %v10269_v12, %v5289_v20  ;;  %v5009_v44 = vmul.f32 1.442695, %v15356_v35 }
 0x8cd   : > { %v10273_v58 = vpop.eup %10272 }
 0x8ce   : > { %6364 = vperm.xlu1 %10069, %v10271_v49   ;;  %v10275_v47 = vpop.eup %10274 }
 0x8cf   : > { %v5930_v10 = vpop.f32.mrf.mxu1  ;;  %5636 = vperm.xlu0 %10067, %v10269_v12   ;;  %v10277_v51 = vpop.eup %10276  ;;  %v5306_v8 = vmul.f32 %v10275_v47, %v5274_v28 }
 0x8d0   : > { %v6128_v32 = vadd.f32 %v5930_v10, %v5692_v62  ;;  %v5399_v61 = vpop.xlane.xlu1 %5398  ;;  %v5622_v6 = vpop.permute.xlu2 %5621  ;;  %v6237_v10 = vld [vmem:[#allocation4 + $0xa8] sm:$0xff] }
 0x8d1   : > { %v5449_v50 = vadd.f32 %v5399_v61, %v5321_v46  ;;  %v5703_v39 = vmul.f32 %v5622_v6, %v5511_v30  ;;  %v10279_v7 = vpop.eup %10278  ;;  %v5298_v30 = vld [vmem:[#allocation4 + $0xf8] sm:$0xff]  ;;  %v6241_v46 = vld [vmem:[#allocation4 + $0xc8] sm:$0xff]  ;;  %v5512_v61 = vld [vmem:[#allocation5 + $0xa0] sm:$0xff] }
 0x8d2   : > { %6160 = vst.msk [vmem:[#allocation5 + $0x40] sm:$0xff] %vm4354_vm0, %v6128_v32  ;;  %v6245_v18 = vld [vmem:[#allocation4 + $0xe8] sm:$0xff] }
 0x8d3   : > { %5482 = vst.msk [vmem:[#allocation4 + $0xb0] sm:$0xff] %vm5459_vm10, %v5449_v50  ;;  %v6139_v42 = vadd.f32 %v6022_v56, %v5703_v39  ;;  %6374 = vperm.xlu2 %10068, %v10273_v58   ;;  %v5542_v9 = vpop.permute.xlu0 %5541  ;;  %10280 = vrcp.f32 %v6245_v18  ;;  %v6242_v18 = vld [vmem:[#allocation4 + $0xd0] sm:$0xff] }
 0x8d4   : > { %v5687_v22 = vmul.f32 %v5542_v9, %v5495_v41  ;;  %10282 = vpow2.f32 %v4977_v40 }
 0x8d5   : > { %6171 = vst.msk [vmem:[#allocation5 + $0x98] sm:$0xff] %vm4354_vm0, %v6139_v42  ;;  %10284 = vrcp.f32 %v6244_v55  ;;  %v6025_v16 = vpop.f32.mrf.mxu2  ;;  %v5516_v42 = vld [vmem:[#allocation5 + $0xc0] sm:$0xff] }
 0x8d6   : > { %v6123_v59 = vadd.f32 %v5852_v31, %v5687_v22  ;;  %6449 = vperm.xlu1 %10069, %v10277_v51   ;;  %10286 = vrcp.f32 %v6232_v1  ;;  %v15360_v22 = vld [vmem:[#allocation98_spill] sm:$0xff] }
 0x8d7   : > { %v5932_v54 = vpop.f32.mrf.mxu1  ;;  %6354 = vperm.xlu0 %10067, %v10279_v7   ;;  %10288 = vpow2.f32 %v5009_v44  ;;  %v5708_v28 = vmul.f32 %v15360_v22, %v5516_v42  ;;  %v6235_v1 = vld [vmem:[#allocation4 + $0x98] sm:$0xff] }
 0x8d8   : > { %6155 = vst.msk [vmem:[#allocation5 + $0x18] sm:$0xff] %vm4354_vm0, %v6123_v59  ;;  %v6129_v25 = vadd.f32 %v5932_v54, %v5693_v48  ;;  %v5537_v33 = vpop.permute.xlu2 %5536  ;;  %v5354_v17 = vpop.xlane.xlu1 %5353  ;;  %10290 = vrcp.f32 %v6217_v63  ;;  %v5505_v48 = vld [vmem:[#allocation5 + $0x68] sm:$0xff]  ;;  %v15361_v59 = vld [vmem:[#allocation91_spill] sm:$0xff] }
 0x8d9   : > { %v10281_v15 = vpop.eup %10280  ;;  %v5686_v19 = vmul.f32 %v5537_v33, %v5494_v2  ;;  %v5434_v11 = vadd.f32 %v5354_v17, %v5306_v8  ;;  %v15362_v2 = vld [vmem:[#allocation92_spill] sm:$0xff]  ;;  %v15364_v33 = vld [vmem:[#allocation97_spill] sm:$0xff] }
 0x8da   : > { %6161 = vst.msk [vmem:[#allocation5 + $0x48] sm:$0xff] %vm4354_vm0, %v6129_v25  ;;  %v13631_v57 = vpop.eup %10282  ;;  %v6238_v31 = vld [vmem:[#allocation4 + $0xb0] sm:$0xff]  ;;  %v15363_v54 = vsub.f32 %v15361_v59, %v15362_v2  ;;  %v5709_v17 = vmul.f32 %v15364_v33, %v5517_v21 }
 0x8db   : > { %v6122_v0 = vadd.f32 %v13612_v38, %v5686_v19  ;;  %5467 = vst.msk [vmem:[#allocation4 + $0x38] sm:$0xff] %vm5459_vm10, %v5434_v11  ;;  %6459 = vperm.xlu2 %10068, %v10281_v15   ;;  %v10285_v34 = vpop.eup %10284  ;;  %v5314_v3 = vmul.f32 %v13631_v57, %v5282_v60  ;;  %v15358_v38 = vld [vmem:[#allocation78_spill] sm:$0xff] }
 0x8dc   : > { %v10287_v52 = vpop.eup %10286  ;;  %v15359_v12 = vsub.f32 %v15357_v29, %v15358_v38  ;;  %v5007_v8 = vmul.f32 1.442695, %v15363_v54 }
 0x8dd   : > { %6154 = vst.msk [vmem:[#allocation5 + $0x10] sm:$0xff] %vm4354_vm0, %v6122_v0  ;;  %v10289_v62 = vpop.eup %10288 }
 0x8de   : > { %6454 = vperm.xlu1 %10069, %v10285_v34   ;;  %v4975_v20 = vmul.f32 1.442695, %v15359_v12  ;;  %v10291_v32 = vpop.eup %10290  ;;  %v5330_v50 = vmul.f32 %v10289_v62, %v5298_v30  ;;  %v6236_v34 = vld [vmem:[#allocation4 + $0xa0] sm:$0xff] }
 0x8df   : > { %v13634_v26 = vpop.f32.mrf.mxu1  ;;  %6394 = vperm.xlu0 %10067, %v10287_v52  }
 0x8e0   : > { %v13640_v37 = vpop.permute.xlu2 %5661  ;;  %v5378_v49 = vpop.xlane.xlu1 %5377  ;;  %10292 = vpow2.f32 %v4975_v20 }
 0x8e1   : > { %v5442_v36 = vadd.f32 %v5378_v49, %v5314_v3  ;;  %10294 = vrcp.f32 %v6237_v10  ;;  %v5518_v3 = vld [vmem:[#allocation5 + $0xd0] sm:$0xff] }
 0x8e2   : > { %v13642_v4 = vpop.f32.mrf.mxu3  ;;  %10296 = vrcp.f32 %v6241_v46  ;;  %v6223_v44 = vld [vmem:[#allocation4 + $0x38] sm:$0xff] }
 0x8e3   : > { %5475 = vst.msk [vmem:[#allocation4 + $0x78] sm:$0xff] %vm5459_vm10, %v5442_v36  ;;  %5561 = vperm.xlu2 %10068, %v10275_v47   ;;  %10298 = vrcp.f32 %v6242_v18 }
 0x8e4   : > { %10300 = vrcp.f32 %v6238_v31 }
 0x8e5   : > { %10302 = vrcp.f32 %v6235_v1  ;;  %v5520_v1 = vld [vmem:[#allocation5 + $0xe0] sm:$0xff] }
 0x8e6   : > { %5556 = vperm.xlu1 %10069, %v13603_v24   ;;  %v10293_v5 = vpop.eup %10292  ;;  %10304 = vpow2.f32 %v5007_v8 }
 0x8e7   : > { %v13646_v6 = vpop.f32.mrf.mxu1  ;;  %6319 = vperm.xlu0 %10067, %v10291_v32   ;;  %v10295_v24 = vpop.eup %10294  ;;  %v5313_v60 = vmul.f32 %v10293_v5, %v5281_v23  ;;  %10306 = vrcp.f32 %v6223_v44  ;;  %v6221_v32 = vld [vmem:[#allocation4 + $0x28] sm:$0xff] }
 0x8e8   : > { %v5627_v39 = vpop.permute.xlu2 %5626  ;;  %v5426_v41 = vpop.xlane.xlu1 %5425  ;;  %10308 = vrcp.f32 %v6236_v34 }
 0x8e9   : > { %v5704_v58 = vmul.f32 %v5627_v39, %v5512_v61  ;;  %v5458_v27 = vadd.f32 %v5426_v41, %v5330_v50  ;;  %v10297_v14 = vpop.eup %10296  ;;  %v5519_v50 = vld [vmem:[#allocation5 + $0xd8] sm:$0xff]  ;;  %10310 = vrcp.f32 %v6221_v32 }
 0x8ea   : > { %v13648_v40 = vpop.f32.mrf.mxu3  ;;  %v10299_v7 = vpop.eup %10298  ;;  %v5503_v41 = vld [vmem:[#allocation5 + $0x58] sm:$0xff] }
 0x8eb   : > { %v6140_v56 = vadd.f32 %v6025_v16, %v5704_v58  ;;  %5491 = vst.msk [vmem:[#allocation4 + $0xf8] sm:$0xff] %vm5459_vm10, %v5458_v27  ;;  %5596 = vperm.xlu2 %10068, %v10293_v5   ;;  %v10301_v0 = vpop.eup %10300 }
 0x8ec   : > { %v10303_v63 = vpop.eup %10302 }
 0x8ed   : > { %6172 = vst.msk [vmem:[#allocation5 + $0xa0] sm:$0xff] %vm4354_vm0, %v6140_v56  ;;  %v13667_v49 = vpop.eup %10304  ;;  %v5711_v56 = vmul.f32 %v13640_v37, %v5519_v50 }
 0x8ee   : > { %6419 = vperm.xlu1 %10069, %v10295_v24   ;;  %v10307_v10 = vpop.eup %10306 }
 0x8ef   : > { %6439 = vperm.xlu0 %10067, %v10297_v14   ;;  %v13652_v9 = vpop.f32.mrf.mxu1  ;;  %v10309_v61 = vpop.eup %10308  ;;  %v5290_v14 = vld [vmem:[#allocation4 + $0xb8] sm:$0xff] }
 0x8f0   : > { %v13654_v47 = vpop.permute.xlu2 %5666  ;;  %v10311_v31 = vpop.eup %10310 }
 0x8f2   : > { %v6100_v55 = vpop.f32.mrf.mxu3 }
 0x8f3   : > { %v6144_v51 = vadd.f32 %v6100_v55, %v5708_v28  ;;  %v13676_v28 = vpop.f32.mrf.mxu2  ;;  %v5322_v55 = vmul.f32 %v13576_v53, %v5290_v14 }
 0x8f5   : > { %6176 = vst.msk [vmem:[#allocation5 + $0xc0] sm:$0xff] %vm4354_vm0, %v6144_v51  ;;  %v6229_v51 = vld [vmem:[#allocation4 + $0x68] sm:$0xff] }
 0x8f6   : > { %5681 = vperm.xlu1 %10069, %v10289_v62   ;;  %v5297_v62 = vld [vmem:[#allocation4 + $0xf0] sm:$0xff] }
 0x8f7   : > { %6444 = vperm.xlu0 %10067, %v10299_v7   ;;  %v5942_v19 = vpop.f32.mrf.mxu1  ;;  %v5329_v46 = vmul.f32 %v13667_v49, %v5297_v62  ;;  %v5497_v7 = vld [vmem:[#allocation5 + $0x28] sm:$0xff] }
 0x8f8   : > { %v5592_v25 = vpop.permute.xlu2 %5591  ;;  %v5513_v62 = vld [vmem:[#allocation5 + $0xa8] sm:$0xff] }
 0x8f9   : > { %v5697_v15 = vmul.f32 %v5592_v25, %v5505_v48 }
 0x8fa   : > { %v6102_v11 = vpop.f32.mrf.mxu3 }
 0x8fb   : > { %v6133_v45 = vadd.f32 %v5942_v19, %v5697_v15  ;;  %v6145_v35 = vadd.f32 %v6102_v11, %v5709_v17  ;;  %v5504_v17 = vld [vmem:[#allocation5 + $0x60] sm:$0xff]  ;;  %v13688_v15 = vpop.f32.mrf.mxu2 }
 0x8fd   : > { %6165 = vst.msk [vmem:[#allocation5 + $0x68] sm:$0xff] %vm4354_vm0, %v6133_v45 }
 0x8fe   : > { %6177 = vst.msk [vmem:[#allocation5 + $0xc8] sm:$0xff] %vm4354_vm0, %v6145_v35  ;;  %6424 = vperm.xlu1 %10069, %v10301_v0   ;;  %v5375_v52 = vpop.xlane.xlu0 %5374  ;;  %v5502_v0 = vld [vmem:[#allocation5 + $0x50] sm:$0xff] }
 0x8ff   : > { %v5441_v29 = vadd.f32 %v5375_v52, %v5313_v60  ;;  %6409 = vperm.xlu0 %10067, %v10303_v63  }
 0x900   : > { %v13664_v38 = vpop.permute.xlu2 %6434  ;;  %v5657_v12 = vpop.permute.xlu1 %5656 }
 0x901   : > { %5474 = vst.msk [vmem:[#allocation4 + $0x70] sm:$0xff] %vm5459_vm10, %v5441_v29  ;;  %v5710_v20 = vmul.f32 %v5657_v12, %v5518_v3 }
 0x902   : > { %v6105_v36 = vpop.f32.mrf.mxu3 }
 0x903   : > { %v6146_v30 = vadd.f32 %v6105_v36, %v5710_v20  ;;  %v6032_v3 = vpop.f32.mrf.mxu2  ;;  %v6222_v20 = vld [vmem:[#allocation4 + $0x30] sm:$0xff]  ;;  %v6231_v36 = vld [vmem:[#allocation4 + $0x78] sm:$0xff] }
 0x905   : > { %6178 = vst.msk [vmem:[#allocation5 + $0xd0] sm:$0xff] %vm4354_vm0, %v6146_v30 }
 0x906   : > { %6349 = vperm.xlu1 %10069, %v10307_v10   ;;  %v5423_v39 = vpop.xlane.xlu0 %5422 }
 0x907   : > { %v5457_v58 = vadd.f32 %v5423_v39, %v5329_v46  ;;  %6414 = vperm.xlu0 %10067, %v10309_v61   ;;  %v6247_v61 = vld [vmem:[#allocation4 + $0xf8] sm:$0xff] }
 0x908   : > { %v13671_v27 = vpop.permute.xlu2 %6399  ;;  %v5582_v5 = vpop.permute.xlu1 %5581  ;;  %v6230_v16 = vld [vmem:[#allocation4 + $0x70] sm:$0xff] }
 0x909   : > { %5490 = vst.msk [vmem:[#allocation4 + $0xf0] sm:$0xff] %vm5459_vm10, %v5457_v58  ;;  %v5695_v24 = vmul.f32 %v5582_v5, %v5503_v41  ;;  %10312 = vrcp.f32 %v6230_v16  ;;  %v5496_v41 = vld [vmem:[#allocation5 + $0x20] sm:$0xff] }
 0x90a   : > { %v6107_v18 = vpop.f32.mrf.mxu3  ;;  %10314 = vrcp.f32 %v6229_v51 }
 0x90b   : > { %v6131_v42 = vadd.f32 %v13646_v6, %v5695_v24  ;;  %v6147_v22 = vadd.f32 %v6107_v18, %v5711_v56  ;;  %v5712_v6 = vmul.f32 %v13654_v47, %v5520_v1  ;;  %v6298_v56 = vld [vmem:[#allocation5 + $0x90] sm:$0xff] }
 0x90d   : > { %6163 = vst.msk [vmem:[#allocation5 + $0x58] sm:$0xff] %vm4354_vm0, %v6131_v42  ;;  %v5521_v42 = vld [vmem:[#allocation5 + $0xe8] sm:$0xff] }
 0x90e   : > { %6179 = vst.msk [vmem:[#allocation5 + $0xd8] sm:$0xff] %vm4354_vm0, %v6147_v22  ;;  %v5402_v37 = vpop.xlane.xlu0 %5401  ;;  %v6282_v22 = vld [vmem:[#allocation5 + $0x10] sm:$0xff] }
 0x90f   : > { %v10313_v21 = vpop.eup %10312  ;;  %v5450_v48 = vadd.f32 %v5402_v37, %v5322_v55  ;;  %6339 = vperm.xlu0 %10067, %v10311_v31  }
 0x910   : > { %v5552_v59 = vpop.permute.xlu1 %5551  ;;  %v13681_v2 = vpop.permute.xlu2 %6404  ;;  %6384 = vperm.xlu1 %10069, %v10313_v21   ;;  %v6246_v35 = vld [vmem:[#allocation4 + $0xf0] sm:$0xff] }
 0x911   : > { %5483 = vst.msk [vmem:[#allocation4 + $0xb8] sm:$0xff] %vm5459_vm10, %v5450_v48  ;;  %v5689_v53 = vmul.f32 %v5552_v59, %v5497_v7  ;;  %v10315_v33 = vpop.eup %10314  ;;  %v6490_v18 = vmul.f32 %v13681_v2, %v6298_v56  ;;  %v5499_v2 = vld [vmem:[#allocation5 + $0x38] sm:$0xff] }
 0x912   : > { %v6110_v54 = vpop.f32.mrf.mxu3 }
 0x913   : > { %v6125_v8 = vadd.f32 %v13606_v43, %v5689_v53  ;;  %v6148_v25 = vadd.f32 %v6110_v54, %v5712_v6  ;;  %v5515_v43 = vld [vmem:[#allocation5 + $0xb8] sm:$0xff]  ;;  %v6617_v51 = vrot.slane %v6490_v18, 4  ;;  %v5514_v6 = vld [vmem:[#allocation5 + $0xb0] sm:$0xff] }
 0x915   : > { %6157 = vst.msk [vmem:[#allocation5 + $0x28] sm:$0xff] %vm4354_vm0, %v6125_v8 }
 0x916   : > { %6180 = vst.msk [vmem:[#allocation5 + $0xe0] sm:$0xff] %vm4354_vm0, %v6148_v25 }
 0x917   : > { %6379 = vperm.xlu0 %10067, %v10315_v33  }
 0x918   : > { %v5587_v19 = vpop.permute.xlu1 %5586  ;;  %v13690_v11 = vpop.permute.xlu2 %6329  ;;  %v6239_v47 = vld [vmem:[#allocation4 + $0xb8] sm:$0xff] }
 0x919   : > { %v5696_v23 = vmul.f32 %v5587_v19, %v5504_v17  ;;  %10316 = vrcp.f32 %v6239_v47  ;;  %v6291_v19 = vld [vmem:[#allocation5 + $0x58] sm:$0xff] }
 0x91a   : > { %10318 = vrcp.f32 %v6246_v35  ;;  %v6112_v7 = vpop.f32.mrf.mxu3 }
 0x91b   : > { %v6132_v45 = vadd.f32 %v13652_v9, %v5696_v23  ;;  %10320 = vrcp.f32 %v6222_v20  ;;  %v6297_v20 = vld [vmem:[#allocation5 + $0x88] sm:$0xff] }
 0x91c   : > { %10322 = vrcp.f32 %v6231_v36 }
 0x91d   : > { %6164 = vst.msk [vmem:[#allocation5 + $0x60] sm:$0xff] %vm4354_vm0, %v6132_v45  ;;  %10324 = vrcp.f32 %v6247_v61  ;;  %v5506_v45 = vld [vmem:[#allocation5 + $0x70] sm:$0xff]  ;;  %v6283_v61 = vld [vmem:[#allocation5 + $0x18] sm:$0xff] }
 0x91f   : > { %v10317_v44 = vpop.eup %10316  ;;  %5676 = vperm.xlu0 %10067, %v13667_v49  }
 0x920   : > { %v5642_v60 = vpop.permute.xlu1 %5641  ;;  %v13695_v34 = vpop.permute.xlu2 %6369  ;;  %6429 = vperm.xlu2 %10068, %v10317_v44  }
 0x921   : > { %v5707_v63 = vmul.f32 %v5642_v60, %v5515_v43  ;;  %v5577_v52 = vpop.permute.xlu0 %5576  ;;  %v10319_v49 = vpop.eup %10318  ;;  %v6483_v23 = vmul.f32 %v13695_v34, %v6291_v19  ;;  %v6307_v43 = vld [vmem:[#allocation5 + $0xd8] sm:$0xff] }
 0x922   : > { %v5694_v29 = vmul.f32 %v5577_v52, %v5502_v0  ;;  %v10321_v50 = vpop.eup %10320  ;;  %v6304_v0 = vld [vmem:[#allocation5 + $0xc0] sm:$0xff] }
 0x923   : > { %v6143_v12 = vadd.f32 %v6032_v3, %v5707_v63  ;;  %v10323_v39 = vpop.eup %10322  ;;  %v6687_v60 = vrot.slane %v6483_v23, 4  ;;  %v10510_v63 = vmov 1983009808  }
 0x924   : > { %v6130_v9 = vadd.f32 %v13634_v26, %v5694_v29  ;;  %v10325_v14 = vpop.eup %10324  ;;  %v6510_v52 = vunpack.c.l.s4 %v10510_v63 }
 0x925   : > { %6175 = vst.msk [vmem:[#allocation5 + $0xb8] sm:$0xff] %vm4354_vm0, %v6143_v12 }
 0x926   : > { %6162 = vst.msk [vmem:[#allocation5 + $0x50] sm:$0xff] %vm4354_vm0, %v6130_v9  ;;  %v5945_v9 = vpop.f32.mrf.mxu1 }
 0x927   : > { %5601 = vperm.xlu0 %10067, %v13631_v57  }
 0x928   : > { %v13701_v30 = vpop.permute.xlu1 %6314  ;;  %v13703_v10 = vpop.permute.xlu2 %6334  ;;  %6464 = vperm.xlu2 %10068, %v10319_v49  }
 0x929   : > { %v5632_v46 = vpop.permute.xlu0 %5631 }
 0x92a   : > { %v5705_v32 = vmul.f32 %v5632_v46, %v5513_v62  ;;  %v13731_v46 = vmul.f32 %v13671_v27, %v6297_v20  ;;  %v6289_v27 = vld [vmem:[#allocation5 + $0x48] sm:$0xff] }
 0x92c   : > { %v6141_v26 = vadd.f32 %v13676_v28, %v5705_v32  ;;  %v6292_v32 = vld [vmem:[#allocation5 + $0x60] sm:$0xff] }
 0x92e   : > { %6173 = vst.msk [vmem:[#allocation5 + $0xa8] sm:$0xff] %vm4354_vm0, %v6141_v26 }
 0x92f   : > { %6344 = vperm.xlu0 %10067, %v10321_v50   ;;  %v6280_v50 = vld [vmem:[#allocation5] sm:$0xff] }
 0x930   : > { %v13707_v57 = vpop.permute.xlu1 %6359  ;;  %v13709_v58 = vpop.permute.xlu2 %6374  ;;  %6389 = vperm.xlu2 %10068, %v10323_v39   ;;  %v6472_v56 = vmul.f32 %v13701_v30, %v6280_v50 }
 0x931   : > { %v5547_v5 = vpop.permute.xlu0 %5546  ;;  %v6484_v39 = vmul.f32 %v13709_v58, %v6292_v32  ;;  %v6561_v58 = vrot.slane %v13731_v46, 4 }
 0x932   : > { %v5688_v16 = vmul.f32 %v5547_v5, %v5496_v41  ;;  %v13734_v41 = vunpack.c.0.s8 %v6510_v52  ;;  %v5498_v52 = vld [vmem:[#allocation5 + $0x30] sm:$0xff] }
 0x934   : > { %v6124_v24 = vadd.f32 %v13596_v13, %v5688_v16  ;;  %v13739_v16 = vmul.f32 %v13690_v11, %v6283_v61 }
 0x936   : > { %6156 = vst.msk [vmem:[#allocation5 + $0x20] sm:$0xff] %vm4354_vm0, %v6124_v24 }
 0x937   : > { %6469 = vperm.xlu0 %10067, %v10325_v14  }
 0x938   : > { %v6325_v28 = vpop.permute.xlu1 %6324  ;;  %v13714_v55 = vpop.permute.xlu2 %6459 }
 0x939   : > { %v6474_v31 = vmul.f32 %v6325_v28, %v6282_v22  ;;  %v5672_v1 = vpop.permute.xlu0 %5671  ;;  %v10511_v28 = vmov 1934713408  }
 0x93a   : > { %v5713_v37 = vmul.f32 %v5672_v1, %v5521_v42  ;;  %v6308_v42 = vld [vmem:[#allocation5 + $0xe0] sm:$0xff] }
 0x93b   : > { %v6618_v21 = vsel %vm6505_vm11, %v6617_v51, %v6474_v31  ;;  %v6619_v13 = vrot.slane %v6474_v31, 4  ;;  %v6534_v51 = vunpack.c.l.s4 %v10511_v28  ;;  %v6743_v31 = vrot.slane %v6484_v39, 4 }
 0x93c   : > { %v6149_v48 = vadd.f32 %v6112_v7, %v5713_v37  ;;  %v13749_v11 = vperm.slane %v6618_v21, %v13734_v41  ;;  %v6296_v37 = vld [vmem:[#allocation5 + $0x80] sm:$0xff] }
 0x93d   : > { %v13718_v59 = vsel %vm6505_vm11, %v6490_v18, %v6619_v13  ;;  %v13744_v18 = vmul.f32 %v13707_v57, %v6289_v27  ;;  %v6284_v13 = vld [vmem:[#allocation5 + $0x20] sm:$0xff]  ;;  %v6675_v57 = vrot.slane %v13739_v16, 4 }
 0x93e   : > { %6181 = vst.msk [vmem:[#allocation5 + $0xe8] sm:$0xff] %vm4354_vm0, %v6149_v48  ;;  %v6507_v48 = vrot.slane %v6472_v56, 4 }
 0x940   : > { %v13721_v53 = vpop.permute.xlu1 %6364  ;;  %v5562_v54 = vpop.permute.xlu2 %5561 }
 0x941   : > { %v5691_v8 = vmul.f32 %v5562_v54, %v5499_v2  ;;  %v5637_v25 = vpop.permute.xlu0 %5636  ;;  %v13755_v2 = vperm.slane %v13718_v59, %v13734_v41  ;;  %v6575_v54 = vrot.slane %v13744_v18, 4  ;;  %v6643_v59 = vrot.slane %v13749_v11, 4 }
 0x942   : > { %v5706_v33 = vmul.f32 %v5637_v25, %v5514_v6 }
 0x943   : > { %v6127_v17 = vadd.f32 %v13648_v40, %v5691_v8  ;;  %v6288_v40 = vld [vmem:[#allocation5 + $0x40] sm:$0xff] }
 0x944   : > { %v6142_v47 = vadd.f32 %v13688_v15, %v5706_v33  ;;  %v6496_v15 = vmul.f32 %v13664_v38, %v6304_v0  ;;  %v6655_v0 = vrot.slane %v13755_v2, 4 }
 0x945   : > { %6159 = vst.msk [vmem:[#allocation5 + $0x38] sm:$0xff] %vm4354_vm0, %v6127_v17  ;;  %v6309_v33 = vld [vmem:[#allocation5 + $0xe8] sm:$0xff]  ;;  %v13760_v17 = vunpack.c.0.s8 %v6534_v51 }
 0x946   : > { %6174 = vst.msk [vmem:[#allocation5 + $0xb0] sm:$0xff] %vm4354_vm0, %v6142_v47  ;;  %v6517_v38 = vrot.slane %v6496_v15, 4 }
 0x948   : > { %v6450_v35 = vpop.permute.xlu1 %6449  ;;  %v5597_v44 = vpop.permute.xlu2 %5596 }
 0x949   : > { %v6499_v3 = vmul.f32 %v6450_v35, %v6307_v43  ;;  %v5698_v29 = vmul.f32 %v5597_v44, %v5506_v45  ;;  %v6355_v12 = vpop.permute.xlu0 %6354  ;;  %v6290_v45 = vld [vmem:[#allocation5 + $0x50] sm:$0xff] }
 0x94a   : > { %v6480_v34 = vmul.f32 %v6355_v12, %v6288_v40 }
 0x94b   : > { %v6685_v36 = vrot.slane %v6499_v3, 4  ;;  %v6688_v49 = vsel %vm6505_vm11, %v6499_v3, %v6687_v60  ;;  %v6134_v62 = vadd.f32 %v5945_v9, %v5698_v29  ;;  %v13771_v60 = vmul.f32 %v13721_v53, %v6290_v45 }
 0x94c   : > { %v6519_v26 = vrot.slane %v6480_v34, 4  ;;  %v6518_v14 = vsel %vm6505_vm11, %v6517_v38, %v6480_v34  ;;  %v13775_v3 = vmul.f32 %v13714_v55, %v6309_v33 }
 0x94d   : > { %v6686_v5 = vsel %vm6505_vm11, %v6685_v36, %v6483_v23  ;;  %6166 = vst.msk [vmem:[#allocation5 + $0x70] sm:$0xff] %vm4354_vm0, %v6134_v62  ;;  %v6524_v8 = vperm.slane %v6518_v14, %v13734_v41  ;;  %v13764_v23 = vmul.f32 %v13703_v10, %v6284_v13  ;;  %v6631_v50 = vrot.slane %v13771_v60, 4 }
 0x94e   : > { %v6520_v24 = vsel %vm6505_vm11, %v6496_v15, %v6519_v26  ;;  %v13780_v9 = vperm.slane %v6686_v5, %v13734_v41  ;;  %v13783_v15 = vperm.slane %v6688_v49, %v13734_v41  ;;  %v6281_v26 = vld [vmem:[#allocation5 + $0x8] sm:$0xff] }
 0x94f   : > { %v6528_v30 = vperm.slane %v6520_v24, %v13734_v41  ;;  %v6529_v10 = vrot.slane %v6524_v8, 4  ;;  %v6731_v20 = vrot.slane %v13764_v23, 4  ;;  %v6797_v24 = vrot.slane %v13775_v3, 4 }
 0x950   : > { %v6455_v22 = vpop.permute.xlu1 %6454  ;;  %v6697_v14 = vrot.slane %v13780_v9, 4 }
 0x951   : > { %v6500_v1 = vmul.f32 %v6455_v22, %v6308_v42  ;;  %v6395_v7 = vpop.permute.xlu0 %6394  ;;  %v6541_v43 = vrot.slane %v6528_v30, 4  ;;  %v6709_v42 = vrot.slane %v13783_v15, 4 }
 0x952   : > { %v6488_v6 = vmul.f32 %v6395_v7, %v6296_v37 }
 0x953   : > { %v6741_v21 = vrot.slane %v6500_v1, 4  ;;  %v6744_v25 = vsel %vm6505_vm11, %v6500_v1, %v6743_v31 }
 0x954   : > { %v6504_v19 = vrot.slane %v6488_v6, 4  ;;  %v6508_v47 = vsel %vm6505_vm11, %v6488_v6, %v6507_v48  ;;  %v13802_v31 = vperm.slane %v6744_v25, %v13734_v41  ;;  %v13814_v25 = vpop.f32.mrf.mxu3 }
 0x955   : > { %v6742_v35 = vsel %vm6505_vm11, %v6741_v21, %v6484_v39  ;;  %v6516_v44 = vperm.slane %v6508_v47, %v13734_v41 }
 0x956   : > { %v6506_v63 = vsel %vm6505_vm11, %v6504_v19, %v6472_v56  ;;  %v13799_v51 = vperm.slane %v6742_v35, %v13734_v41 }
 0x957   : > { %v6512_v29 = vperm.slane %v6506_v63, %v13734_v41  ;;  %v6542_v40 = vsel %vm6505_vm11, %v6541_v43, %v6516_v44  ;;  %v6543_v12 = vrot.slane %v6516_v44, 4 }
 0x958   : > { %v6548_v53 = vperm.slane %v6542_v40, %v13760_v17  ;;  %v5557_v34 = vpop.permute.xlu1 %5556 }
 0x959   : > { %v6530_v55 = vsel %vm6505_vm11, %v6529_v10, %v6512_v29  ;;  %v6531_v36 = vrot.slane %v6512_v29, 4  ;;  %v6544_v62 = vsel %vm6505_vm11, %v6528_v30, %v6543_v12  ;;  %v5690_v32 = vmul.f32 %v5557_v34, %v5498_v52  ;;  %v6320_v61 = vpop.permute.xlu0 %6319  ;;  %v6301_v52 = vld [vmem:[#allocation5 + $0xa8] sm:$0xff] }
 0x95a   : > { %v6536_v39 = vperm.slane %v6530_v55, %v13760_v17  ;;  %v6552_v49 = vperm.slane %v6544_v62, %v13760_v17  ;;  %v6473_v5 = vmul.f32 %v6320_v61, %v6281_v26  ;;  %v6557_v56 = vrot.slane %v6548_v53, 4 }
 0x95b   : > { %v6532_v38 = vsel %vm6505_vm11, %v6524_v8, %v6531_v36  ;;  %v6126_v27 = vadd.f32 %v13642_v4, %v5690_v32  ;;  %v6753_v34 = vrot.slane %v13799_v51, 4 }
 0x95c   : > { %v6540_v22 = vperm.slane %v6532_v38, %v13760_v17  ;;  %v6559_v28 = vrot.slane %v6552_v49, 4  ;;  %v6562_v4 = vsel %vm6505_vm11, %v6561_v58, %v6473_v5  ;;  %v6563_v30 = vrot.slane %v6473_v5, 4 }
 0x95d   : > { %6158 = vst.msk [vmem:[#allocation5 + $0x30] sm:$0xff] %vm4354_vm0, %v6126_v27  ;;  %v6553_v1 = vrot.slane %v6536_v39, 4  ;;  %v6558_v48 = vsel %vm6505_vm11, 0.0, %v6557_v56  ;;  %v6568_v19 = vperm.slane %v6562_v4, %v13734_v41 }
 0x95e   : > { %v6555_v37 = vrot.slane %v6540_v22, 4  ;;  %v6560_v7 = vsel %vm6505_vm11, 0.0, %v6559_v28  ;;  %v6964_v13 = vsel %vm6505_vm11, %v6559_v28, %v6548_v53  ;;  %v6564_v21 = vsel %vm6505_vm11, %v13731_v46, %v6563_v30  ;;  %v6305_v53 = vld [vmem:[#allocation5 + $0xc8] sm:$0xff]  ;;  %v5523_v28 = vld [vmem:[#allocation5 + $0xf8] sm:$0xff] }
 0x95f   : > { %v6968_v6 = vperm.slane %v6964_v13, %v13734_v41  ;;  %v6969_v8 = vrot.slane %v6560_v7, 4  ;;  %v6572_v47 = vperm.slane %v6564_v21, %v13734_v41  ;;  %v6765_v46 = vrot.slane %v13802_v31, 4 }
 0x960   : > { %v6556_v33 = vsel %vm6505_vm11, 0.0, %v6555_v37  ;;  %v6953_v58 = vsel %vm6505_vm11, %v6555_v37, %v6536_v39  ;;  %v6420_v45 = vpop.permute.xlu1 %6419  ;;  %v6554_v29 = vsel %vm6505_vm11, 0.0, %v6553_v1  ;;  %v6587_v32 = vrot.slane %v6568_v19, 4 }
 0x961   : > { %v6957_v43 = vperm.slane %v6953_v58, %v13734_v41  ;;  %v6958_v35 = vrot.slane %v6556_v33, 4  ;;  %v6970_v44 = vsel %vm6505_vm11, %v6969_v8, %v6558_v48  ;;  %v6989_v63 = vrot.slane %v6968_v6, 4  ;;  %v6440_v10 = vpop.permute.xlu0 %6439 }
 0x962   : > { %v6974_v40 = vperm.slane %v6970_v44, %v13734_v41  ;;  %v13825_v12 = vmul.f32 %v6420_v45, %v6301_v52  ;;  %v6497_v55 = vmul.f32 %v6440_v10, %v6305_v53  ;;  %v6599_v26 = vrot.slane %v6572_v47, 4 }
 0x963   : > { %v6959_v36 = vsel %vm6505_vm11, %v6958_v35, %v6554_v29  ;;  %v6977_v62 = vrot.slane %v6957_v43, 4  ;;  %v6306_v35 = vld [vmem:[#allocation5 + $0xd0] sm:$0xff] }
 0x964   : > { %v6963_v61 = vperm.slane %v6959_v36, %v13734_v41  ;;  %v6990_v39 = vsel %vm6505_vm11, %v6974_v40, %v6989_v63  ;;  %v6573_v49 = vrot.slane %v6497_v55, 4  ;;  %v6576_v5 = vsel %vm6505_vm11, %v6497_v55, %v6575_v54 }
 0x965   : > { %v6998_v38 = vperm.slane %v6990_v39, %v13760_v17  ;;  %v6987_v56 = vrot.slane %v6974_v40, 4  ;;  %v6785_v27 = vrot.slane %v13825_v12, 4  ;;  %v6584_v22 = vperm.slane %v6576_v5, %v13734_v41 }
 0x966   : > { %v6978_v4 = vsel %vm6505_vm11, %v6963_v61, %v6977_v62  ;;  %v6975_v30 = vrot.slane %v6963_v61, 4  ;;  %v6574_v1 = vsel %vm6505_vm11, %v6573_v49, %v13744_v18 }
 0x967   : > { %v6986_v37 = vperm.slane %v6978_v4, %v13760_v17  ;;  %v7003_v7 = vrot.slane %v6998_v38, 4  ;;  %v13842_v13 = vsel %vm6505_vm11, %v6987_v56, %v6968_v6  ;;  %v6580_v54 = vperm.slane %v6574_v1, %v13734_v41  ;;  %v6117_v6 = vpop.f32.mrf.mxu3 }
 0x968   : > { %v6597_v48 = vrot.slane %v6584_v22, 4  ;;  %v6600_v8 = vsel %vm6505_vm11, %v6584_v22, %v6599_v26  ;;  %v5682_v21 = vpop.permute.xlu1 %5681  ;;  %v13847_v33 = vsel %vm6505_vm11, %v6975_v30, %v6957_v43 }
 0x969   : > { %v6608_v58 = vperm.slane %v6600_v8, %v13760_v17  ;;  %v5715_v45 = vmul.f32 %v5682_v21, %v5523_v28  ;;  %v6445_v18 = vpop.permute.xlu0 %6444  ;;  %v13851_v44 = vsel %vm6505_vm11, %v7003_v7, %v6986_v37  ;;  %v7005_v63 = vrot.slane %v6986_v37, 4 }
 0x96a   : > { %v6585_v52 = vrot.slane %v6580_v54, 4  ;;  %v6588_v10 = vsel %vm6505_vm11, %v6580_v54, %v6587_v32  ;;  %v6598_v29 = vsel %vm6505_vm11, %v6597_v48, %v6572_v47  ;;  %v6498_v40 = vmul.f32 %v6445_v18, %v6306_v35  ;;  %v6299_v35 = vld [vmem:[#allocation5 + $0x98] sm:$0xff] }
 0x96b   : > { %v6596_v53 = vperm.slane %v6588_v10, %v13760_v17  ;;  %v6604_v43 = vperm.slane %v6598_v29, %v13760_v17  ;;  %v6615_v55 = vrot.slane %v6608_v58, 4  ;;  %v6151_v36 = vadd.f32 %v6117_v6, %v5715_v45  ;;  %v6302_v45 = vld [vmem:[#allocation5 + $0xb0] sm:$0xff] }
 0x96c   : > { %v6586_v62 = vsel %vm6505_vm11, %v6585_v52, %v6568_v19  ;;  %v6629_v26 = vrot.slane %v6498_v40, 4  ;;  %v6632_v61 = vsel %vm6505_vm11, %v6498_v40, %v6631_v50  ;;  %v13862_v39 = vsel %vm6505_vm11, %v6998_v38, %v7005_v63 }
 0x96d   : > { %v6592_v32 = vperm.slane %v6586_v62, %v13760_v17  ;;  %v6611_v47 = vrot.slane %v6596_v53, 4  ;;  %v6613_v49 = vrot.slane %v6604_v43, 4  ;;  %v6616_v5 = vsel %vm6505_vm11, 0.0, %v6615_v55  ;;  %6183 = vst.msk [vmem:[#allocation5 + $0xf8] sm:$0xff] %vm4354_vm0, %v6151_v36 }
 0x96e   : > { %v7018_v56 = vsel %vm6505_vm11, %v6615_v55, %v6604_v43  ;;  %v7023_v22 = vrot.slane %v6616_v5, 4  ;;  %v6630_v19 = vsel %vm6505_vm11, %v6629_v26, %v13771_v60  ;;  %v6640_v28 = vperm.slane %v6632_v61, %v13734_v41 }
 0x96f   : > { %v6609_v50 = vrot.slane %v6592_v32, 4  ;;  %v6612_v38 = vsel %vm6505_vm11, 0.0, %v6611_v47  ;;  %v6614_v4 = vsel %vm6505_vm11, 0.0, %v6613_v49  ;;  %v7007_v30 = vsel %vm6505_vm11, %v6611_v47, %v6592_v32 }
 0x970   : > { %v13875_v1 = vperm.slane %v7007_v30, %v13734_v41  ;;  %v7012_v37 = vrot.slane %v6612_v38, 4  ;;  %v13878_v7 = vperm.slane %v7018_v56, %v13734_v41  ;;  %v7024_v54 = vsel %vm6505_vm11, %v7023_v22, %v6614_v4  ;;  %v6425_v48 = vpop.permute.xlu1 %6424 }
 0x971   : > { %v6610_v60 = vsel %vm6505_vm11, 0.0, %v6609_v50  ;;  %v13883_v8 = vperm.slane %v7024_v54, %v13734_v41  ;;  %v6636_v21 = vperm.slane %v6630_v19, %v13734_v41  ;;  %v6653_v58 = vrot.slane %v6640_v28, 4  ;;  %v6410_v18 = vpop.permute.xlu0 %6409 }
 0x972   : > { %v7043_v63 = vrot.slane %v13878_v7, 4  ;;  %v6656_v6 = vsel %vm6505_vm11, %v6640_v28, %v6655_v0  ;;  %v13890_v52 = vmul.f32 %v6425_v48, %v6302_v45  ;;  %v6491_v10 = vmul.f32 %v6410_v18, %v6299_v35 }
 0x973   : > { %v6641_v29 = vrot.slane %v6636_v21, 4  ;;  %v6644_v40 = vsel %vm6505_vm11, %v6636_v21, %v6643_v59  ;;  %v6654_v53 = vsel %vm6505_vm11, %v6653_v58, %v13755_v2  ;;  %v6664_v43 = vperm.slane %v6656_v6, %v13760_v17 }
 0x974   : > { %v6652_v55 = vperm.slane %v6644_v40, %v13760_v17  ;;  %v6660_v36 = vperm.slane %v6654_v53, %v13760_v17  ;;  %v6841_v62 = vrot.slane %v13890_v52, 4  ;;  %v6673_v0 = vrot.slane %v6491_v10, 4 }
 0x975   : > { %v6642_v26 = vsel %vm6505_vm11, %v6641_v29, %v13749_v11  ;;  %v6671_v61 = vrot.slane %v6664_v43, 4  ;;  %v6676_v59 = vsel %vm6505_vm11, %v6491_v10, %v6675_v57  ;;  %v13907_v32 = vsel %vm6505_vm11, %v7012_v37, %v6610_v60  ;;  %v6287_v29 = vld [vmem:[#allocation5 + $0x38] sm:$0xff] }
 0x976   : > { %v6648_v2 = vperm.slane %v6642_v26, %v13760_v17  ;;  %v6667_v47 = vrot.slane %v6652_v55, 4  ;;  %v6669_v49 = vrot.slane %v6660_v36, 4  ;;  %v6674_v5 = vsel %vm6505_vm11, %v6673_v0, %v13739_v16 }
 0x977   : > { %v6672_v56 = vsel %vm6505_vm11, 0.0, %v6671_v61  ;;  %v7072_v22 = vsel %vm6505_vm11, %v6671_v61, %v6660_v36  ;;  %v6680_v11 = vperm.slane %v6674_v5, %v13734_v41  ;;  %v6684_v19 = vperm.slane %v6676_v59, %v13734_v41  ;;  %v6300_v36 = vld [vmem:[#allocation5 + $0xa0] sm:$0xff]  ;;  %v6303_v59 = vld [vmem:[#allocation5 + $0xb8] sm:$0xff] }
 0x978   : > { %v6665_v28 = vrot.slane %v6648_v2, 4  ;;  %v13917_v57 = vsel %vm6505_vm11, 0.0, %v6667_v47  ;;  %v6670_v50 = vsel %vm6505_vm11, 0.0, %v6669_v49  ;;  %v7061_v38 = vsel %vm6505_vm11, %v6667_v47, %v6648_v2  ;;  %v6350_v54 = vpop.permute.xlu1 %6349 }
 0x979   : > { %v13922_v4 = vperm.slane %v7061_v38, %v13734_v41  ;;  %v7066_v16 = vrot.slane %v13917_v57, 4  ;;  %v13926_v30 = vperm.slane %v7072_v22, %v13734_v41  ;;  %v7077_v37 = vrot.slane %v6672_v56, 4  ;;  %v6415_v48 = vpop.permute.xlu0 %6414 }
 0x97a   : > { %v13929_v60 = vsel %vm6505_vm11, 0.0, %v6665_v28  ;;  %v6698_v21 = vsel %vm6505_vm11, %v6697_v14, %v6680_v11  ;;  %v6699_v58 = vrot.slane %v6680_v11, 4  ;;  %v6710_v45 = vsel %vm6505_vm11, %v6709_v42, %v6684_v19  ;;  %v6430_v40 = vpop.permute.xlu2 %6429 }
 0x97b   : > { %v7078_v35 = vsel %vm6505_vm11, %v7077_v37, %v6670_v50  ;;  %v7097_v18 = vrot.slane %v13926_v30, 4  ;;  %v6704_v6 = vperm.slane %v6698_v21, %v13760_v17  ;;  %v6711_v10 = vrot.slane %v6684_v19, 4 }
 0x97c   : > { %v13941_v53 = vperm.slane %v7078_v35, %v13734_v41  ;;  %v6700_v14 = vsel %vm6505_vm11, %v13780_v9, %v6699_v58  ;;  %v6716_v43 = vperm.slane %v6710_v45, %v13760_v17  ;;  %v6479_v55 = vmul.f32 %v6350_v54, %v6287_v29 }
 0x97d   : > { %v6708_v42 = vperm.slane %v6700_v14, %v13760_v17  ;;  %v6712_v0 = vsel %vm6505_vm11, %v13783_v15, %v6711_v10  ;;  %v6721_v26 = vrot.slane %v6704_v6, 4  ;;  %v6492_v61 = vmul.f32 %v6415_v48, %v6300_v36 }
 0x97e   : > { %v6720_v2 = vperm.slane %v6712_v0, %v13760_v17  ;;  %v6725_v47 = vrot.slane %v6716_v43, 4  ;;  %v6899_v49 = vrot.slane %v6479_v55, 4  ;;  %v6495_v5 = vmul.f32 %v6430_v40, %v6303_v59 }
 0x97f   : > { %v13951_v56 = vsel %vm6505_vm11, 0.0, %v6721_v26  ;;  %v6723_v9 = vrot.slane %v6708_v42, 4  ;;  %v6729_v22 = vrot.slane %v6492_v61, 4  ;;  %v6732_v11 = vsel %vm6505_vm11, %v6492_v61, %v6731_v20 }
 0x980   : > { %v6726_v19 = vsel %vm6505_vm11, 0.0, %v6725_v47  ;;  %v6727_v15 = vrot.slane %v6720_v2, 4  ;;  %v6740_v28 = vperm.slane %v6732_v11, %v13734_v41  ;;  %v6897_v50 = vrot.slane %v6495_v5, 4 }
 0x981   : > { %v13959_v38 = vsel %vm6505_vm11, 0.0, %v6723_v9  ;;  %v7115_v37 = vsel %vm6505_vm11, %v6723_v9, %v6704_v6  ;;  %v6730_v54 = vsel %vm6505_vm11, %v6729_v22, %v13764_v23  ;;  %v6900_v48 = vsel %vm6505_vm11, %v6495_v5, %v6899_v49  ;;  %v6340_v21 = vpop.permute.xlu0 %6339 }
 0x982   : > { %v6728_v58 = vsel %vm6505_vm11, 0.0, %v6727_v15  ;;  %v13967_v20 = vperm.slane %v7115_v37, %v13734_v41  ;;  %v7120_v45 = vrot.slane %v13959_v38, 4  ;;  %v7126_v35 = vsel %vm6505_vm11, %v6727_v15, %v6716_v43 }
 0x983   : > { %v13972_v10 = vperm.slane %v7126_v35, %v13734_v41  ;;  %v7131_v29 = vrot.slane %v6728_v58, 4  ;;  %v6736_v6 = vperm.slane %v6730_v54, %v13734_v41  ;;  %v6766_v23 = vsel %vm6505_vm11, %v6765_v46, %v6740_v28 }
 0x984   : > { %v6767_v40 = vrot.slane %v6740_v28, 4  ;;  %v6772_v14 = vperm.slane %v6766_v23, %v13760_v17  ;;  %v6898_v36 = vsel %vm6505_vm11, %v6897_v50, %v6479_v55  ;;  %v13981_v42 = vperm.slane %v6900_v48, %v13734_v41 }
 0x985   : > { %v7132_v43 = vsel %vm6505_vm11, %v7131_v29, %v6726_v19  ;;  %v7151_v0 = vrot.slane %v13972_v10, 4  ;;  %v6754_v26 = vsel %vm6505_vm11, %v6753_v34, %v6736_v6  ;;  %v6755_v61 = vrot.slane %v6736_v6, 4 }
 0x986   : > { %v13989_v59 = vperm.slane %v7132_v43, %v13734_v41  ;;  %v6760_v46 = vperm.slane %v6754_v26, %v13760_v17  ;;  %v6768_v55 = vsel %vm6505_vm11, %v13802_v31, %v6767_v40  ;;  %v6781_v2 = vrot.slane %v6772_v14, 4 }
 0x987   : > { %v6756_v47 = vsel %vm6505_vm11, %v13799_v51, %v6755_v61  ;;  %v6776_v49 = vperm.slane %v6768_v55, %v13760_v17  ;;  %v13998_v5 = vperm.slane %v6898_v36, %v13734_v41  ;;  %v6935_v34 = vrot.slane %v13981_v42, 4 }
 0x988   : > { %v6764_v9 = vperm.slane %v6756_v47, %v13760_v17  ;;  %v6777_v22 = vrot.slane %v6760_v46, 4  ;;  %v6782_v11 = vsel %vm6505_vm11, 0.0, %v6781_v2  ;;  %v7017_v19 = vperm.slane %v13907_v32, %v13734_v41 }
 0x989   : > { %v6783_v31 = vrot.slane %v6776_v49, 4  ;;  %v6923_v15 = vrot.slane %v13998_v5, 4  ;;  %v7031_v51 = vrot.slane %v13875_v1, 4  ;;  %v7044_v28 = vsel %vm6505_vm11, %v13883_v8, %v7043_v63  ;;  %v6380_v50 = vpop.permute.xlu0 %6379 }
 0x98a   : > { %v6778_v37 = vsel %vm6505_vm11, 0.0, %v6777_v22  ;;  %v6779_v54 = vrot.slane %v6764_v9, 4  ;;  %v7052_v48 = vperm.slane %v7044_v28, %v13760_v17  ;;  %v14015_v58 = vperm.slane %v13847_v33, %v13760_v17 }
 0x98b   : > { %v6784_v32 = vsel %vm6505_vm11, 0.0, %v6783_v31  ;;  %v7180_v35 = vsel %vm6505_vm11, %v6783_v31, %v6772_v14  ;;  %v7032_v29 = vsel %vm6505_vm11, %v7017_v19, %v7031_v51  ;;  %v14022_v6 = vperm.slane %v13842_v13, %v13760_v17  ;;  %v6385_v31 = vpop.permute.xlu1 %6384 }
 0x98c   : > { %v6780_v63 = vsel %vm6505_vm11, 0.0, %v6779_v54  ;;  %v7169_v23 = vsel %vm6505_vm11, %v6779_v54, %v6760_v46  ;;  %v14027_v40 = vperm.slane %v7180_v35, %v13734_v41  ;;  %v7185_v36 = vrot.slane %v6784_v32, 4  ;;  %v6285_v46 = vld [vmem:[#allocation5 + $0x28] sm:$0xff] }
 0x98d   : > { %v14030_v33 = vperm.slane %v7169_v23, %v13734_v41  ;;  %v7174_v43 = vrot.slane %v6780_v63, 4  ;;  %v7040_v14 = vperm.slane %v7032_v29, %v13760_v17  ;;  %v7057_v26 = vrot.slane %v7052_v48, 4  ;;  %v6293_v29 = vld [vmem:[#allocation5 + $0x68] sm:$0xff] }
 0x98e   : > { %v14034_v61 = vsel %vm6505_vm11, %v7185_v36, %v6782_v11  ;;  %v7001_v13 = vrot.slane %v14015_v58, 4  ;;  %v7029_v55 = vrot.slane %v7017_v19, 4  ;;  %v7041_v2 = vrot.slane %v13883_v8, 4 }
 0x98f   : > { %v14039_v47 = vsel %vm6505_vm11, %v7174_v43, %v6778_v37  ;;  %v7058_v49 = vsel %vm6505_vm11, %v7057_v26, %v7040_v14  ;;  %v7059_v9 = vrot.slane %v7040_v14, 4  ;;  %v6477_v22 = vmul.f32 %v6340_v21, %v6285_v46  ;;  %v6294_v21 = vld [vmem:[#allocation5 + $0x70] sm:$0xff] }
 0x990   : > { %v10075_v51 = vpack.i.bf16 %v7058_v49, %v13851_v44  ;;  %v7002_v11 = vsel %vm6505_vm11, %v14022_v6, %v7001_v13  ;;  %v7030_v28 = vsel %vm6505_vm11, %v7029_v55, %v13875_v1  ;;  %v7042_v8 = vsel %vm6505_vm11, %v7041_v2, %v13878_v7 }
 0x991   : > { %v7060_v19 = vsel %vm6505_vm11, %v7052_v48, %v7059_v9  ;;  %v14051_v37 = vperm.slane %v7030_v28, %v13760_v17  ;;  %v14054_v54 = vperm.slane %v7042_v8, %v13760_v17  ;;  %v6786_v44 = vsel %vm6505_vm11, %v6785_v27, %v6477_v22  ;;  %v14059_v32 = vpop.permute.xlu0 %5676 }
 0x992   : > { %10076 = vrot.lane.b32.xlu1 %v10075_v51, %s10512_s26  ;;  %v10080_v1 = vpack.i.bf16 %v7060_v19, %v13862_v39  ;;  %v6787_v7 = vrot.slane %v6477_v22, 4  ;;  %v6792_v48 = vperm.slane %v6786_v44, %v13734_v41  ;;  %v14064_v35 = vmul.f32 %v6385_v31, %v6294_v21 }
 0x993   : > { %v7055_v63 = vrot.slane %v14051_v37, 4  ;;  %v6485_v23 = vmul.f32 %v6380_v50, %v6293_v29  ;;  %v7067_v27 = vsel %vm6505_vm11, %v7066_v16, %v13929_v60  ;;  %v7085_v36 = vrot.slane %v13922_v4, 4 }
 0x994   : > { %10081 = vrot.lane.b32.xlu2 %v10080_v1, %s10513_s12  ;;  %v6788_v39 = vsel %vm6505_vm11, %v13825_v12, %v6787_v7  ;;  %v6811_v43 = vrot.slane %v6792_v48, 4  ;;  %v6855_v14 = vrot.slane %v14064_v35, 4  ;;  %v14077_v26 = vperm.slane %v7067_v27, %v13734_v41 }
 0x995   : > { %v7056_v50 = vsel %vm6505_vm11, %v14054_v54, %v7055_v63  ;;  %v6796_v57 = vperm.slane %v6788_v39, %v13734_v41  ;;  %v6798_v16 = vsel %vm6505_vm11, %v6797_v24, %v6485_v23  ;;  %v6799_v60 = vrot.slane %v6485_v23, 4 }
 0x996   : > { %v10070_v13 = vpack.i.bf16 %v7056_v50, %v7002_v11  ;;  %v6804_v55 = vperm.slane %v6798_v16, %v13734_v41  ;;  %v7086_v12 = vsel %vm6505_vm11, %v14077_v26, %v7085_v36  ;;  %v7098_v2 = vsel %vm6505_vm11, %v13941_v53, %v7097_v18 }
 0x997   : > { %v6823_v46 = vrot.slane %v6796_v57, 4  ;;  %v6800_v49 = vsel %vm6505_vm11, %v13775_v3, %v6799_v60  ;;  %v7094_v9 = vperm.slane %v7086_v12, %v13760_v17  ;;  %v7106_v24 = vperm.slane %v7098_v2, %v13760_v17 }
 0x998   : > { %10071 = vrot.lane.b32.xlu0 %v10070_v13, %s10514_s16  ;;  %v6808_v22 = vperm.slane %v6800_v49, %v13734_v41  ;;  %v6809_v31 = vrot.slane %v6804_v55, 4  ;;  %v6812_v51 = vsel %vm6505_vm11, %v6804_v55, %v6811_v43  ;;  %v7121_v18 = vsel %vm6505_vm11, %v7120_v45, %v13951_v56 }
 0x999   : > { %v6820_v11 = vperm.slane %v6812_v51, %v13760_v17  ;;  %v7111_v3 = vrot.slane %v7106_v24, 4  ;;  %v7125_v28 = vperm.slane %v7121_v18, %v13734_v41  ;;  %v7139_v8 = vrot.slane %v13967_v20, 4  ;;  %v5602_v19 = vpop.permute.xlu0 %5601 }
 0x99a   : > { %v6810_v44 = vsel %vm6505_vm11, %v6809_v31, %v6792_v48  ;;  %v6821_v21 = vrot.slane %v6808_v22, 4  ;;  %v6824_v1 = vsel %vm6505_vm11, %v6808_v22, %v6823_v46  ;;  %v7152_v38 = vsel %vm6505_vm11, %v13989_v59, %v7151_v0  ;;  %v5522_v31 = vld [vmem:[#allocation5 + $0xf0] sm:$0xff] }
 0x99b   : > { %v6816_v56 = vperm.slane %v6810_v44, %v13760_v17  ;;  %v6832_v45 = vperm.slane %v6824_v1, %v13760_v17  ;;  %v6835_v7 = vrot.slane %v6820_v11, 4  ;;  %v7112_v29 = vsel %vm6505_vm11, %v7111_v3, %v7094_v9 }
 0x99c   : > { %v6822_v63 = vsel %vm6505_vm11, %v6821_v21, %v6796_v57  ;;  %v7140_v23 = vsel %vm6505_vm11, %v7125_v28, %v7139_v8  ;;  %v7160_v48 = vperm.slane %v7152_v38, %v13760_v17  ;;  %v7113_v27 = vrot.slane %v7094_v9, 4  ;;  %v5507_v8 = vld [vmem:[#allocation5 + $0x78] sm:$0xff] }
 0x99d   : > { %v6828_v36 = vperm.slane %v6822_v63, %v13760_v17  ;;  %v6833_v39 = vrot.slane %v6816_v56, 4  ;;  %v6836_v43 = vsel %vm6505_vm11, 0.0, %v6835_v7  ;;  %v6839_v0 = vrot.slane %v6832_v45, 4 }
 0x99e   : > { %v7223_v50 = vsel %vm6505_vm11, %v6835_v7, %v6816_v56  ;;  %v7228_v16 = vrot.slane %v6836_v43, 4  ;;  %v7148_v60 = vperm.slane %v7140_v23, %v13760_v17  ;;  %v7165_v13 = vrot.slane %v7160_v48, 4 }
 0x99f   : > { %v6834_v55 = vsel %vm6505_vm11, 0.0, %v6833_v39  ;;  %v6837_v57 = vrot.slane %v6828_v36, 4  ;;  %v6840_v12 = vsel %vm6505_vm11, 0.0, %v6839_v0  ;;  %v14125_v2 = vperm.slane %v7223_v50, %v13734_v41 }
 0x9a0   : > { %v7229_v46 = vsel %vm6505_vm11, %v7228_v16, %v6834_v55  ;;  %v7234_v49 = vsel %vm6505_vm11, %v6839_v0, %v6828_v36  ;;  %v7239_v9 = vrot.slane %v6840_v12, 4  ;;  %v7166_v22 = vsel %vm6505_vm11, %v7165_v13, %v7148_v60  ;;  %v6286_v36 = vld [vmem:[#allocation5 + $0x30] sm:$0xff] }
 0x9a1   : > { %v6838_v51 = vsel %vm6505_vm11, 0.0, %v6837_v57  ;;  %v14132_v18 = vperm.slane %v7229_v46, %v13734_v41  ;;  %v14135_v11 = vperm.slane %v7234_v49, %v13734_v41  ;;  %v7247_v3 = vrot.slane %v14125_v2, 4  ;;  %v6345_v44 = vpop.permute.xlu0 %6344 }
 0x9a2   : > { %v10090_v21 = vpack.i.bf16 %v7166_v22, %v7112_v29  ;;  %v7114_v1 = vsel %vm6505_vm11, %v7106_v24, %v7113_v27  ;;  %v7167_v38 = vrot.slane %v7148_v60, 4  ;;  %v7083_v56 = vrot.slane %v14077_v26, 4  ;;  %v6465_v22 = vpop.permute.xlu2 %6464 }
 0x9a3   : > { %v7095_v45 = vrot.slane %v13941_v53, 4  ;;  %v7137_v7 = vrot.slane %v7125_v28, 4  ;;  %v7149_v63 = vrot.slane %v13989_v59, 4  ;;  %v5714_v23 = vmul.f32 %v14059_v32, %v5522_v31  ;;  %v5947_v32 = vpop.f32.mrf.mxu1 }
 0x9a4   : > { %10091 = vrot.lane.b32.xlu1 %v10090_v21, %s10512_s26  ;;  %v7168_v39 = vsel %vm6505_vm11, %v7160_v48, %v7167_v38  ;;  %v7084_v29 = vsel %vm6505_vm11, %v7083_v56, %v13922_v4  ;;  %v5699_v43 = vmul.f32 %v5602_v19, %v5507_v8  ;;  %v6478_v24 = vmul.f32 %v6345_v44, %v6286_v36 }
 0x9a5   : > { %v10095_v27 = vpack.i.bf16 %v7168_v39, %v7114_v1  ;;  %v14148_v26 = vperm.slane %v7084_v29, %v13760_v17  ;;  %v7096_v53 = vsel %vm6505_vm11, %v7095_v45, %v13926_v30  ;;  %v7138_v59 = vsel %vm6505_vm11, %v7137_v7, %v13967_v20 }
 0x9a6   : > { %v14155_v28 = vperm.slane %v7096_v53, %v13760_v17  ;;  %v14158_v48 = vperm.slane %v7138_v59, %v13760_v17  ;;  %v7150_v4 = vsel %vm6505_vm11, %v7149_v63, %v13972_v10  ;;  %v6150_v19 = vadd.f32 %v13814_v25, %v5714_v23 }
 0x9a7   : > { %10096 = vrot.lane.b32.xlu2 %v10095_v27, %s10513_s12  ;;  %v7109_v0 = vrot.slane %v14148_v26, 4  ;;  %v14166_v30 = vperm.slane %v7150_v4, %v13760_v17  ;;  %v6135_v20 = vadd.f32 %v5947_v32, %v5699_v43  ;;  %v6842_v50 = vsel %vm6505_vm11, %v6841_v62, %v6478_v24 }
 0x9a8   : > { %v7163_v16 = vrot.slane %v14158_v48, 4  ;;  %6182 = vst.msk [vmem:[#allocation5 + $0xf0] sm:$0xff] %vm4354_vm0, %v6150_v19  ;;  %v6843_v60 = vrot.slane %v6478_v24, 4  ;;  %v14174_v10 = vperm.slane %v6842_v50, %v13734_v41  ;;  %v7179_v25 = vperm.slane %v14039_v47, %v13734_v41 }
 0x9a9   : > { %v7110_v13 = vsel %vm6505_vm11, %v14155_v28, %v7109_v0  ;;  %6167 = vst.msk [vmem:[#allocation5 + $0x78] sm:$0xff] %vm4354_vm0, %v6135_v20  ;;  %v7190_v55 = vperm.slane %v14034_v61, %v13734_v41  ;;  %v7193_v62 = vrot.slane %v14030_v33, 4  ;;  %v7205_v57 = vrot.slane %v14027_v40, 4 }
 0x9aa   : > { %v7164_v12 = vsel %vm6505_vm11, %v14166_v30, %v7163_v16  ;;  %v6844_v46 = vsel %vm6505_vm11, %v13890_v52, %v6843_v60  ;;  %v6867_v47 = vrot.slane %v14174_v10, 4  ;;  %v7240_v49 = vsel %vm6505_vm11, %v7239_v9, %v6838_v51 }
 0x9ab   : > { %v10085_v31 = vpack.i.bf16 %v7164_v12, %v7110_v13  ;;  %v6852_v8 = vperm.slane %v6844_v46, %v13734_v41  ;;  %v7194_v61 = vsel %vm6505_vm11, %v7179_v25, %v7193_v62  ;;  %v7206_v44 = vsel %vm6505_vm11, %v7190_v55, %v7205_v57  ;;  %v6470_v57 = vpop.permute.xlu0 %6469  ;;  %v6390_v12 = vpop.permute.xlu2 %6389 }
 0x9ac   : > { %v7202_v21 = vperm.slane %v7194_v61, %v13760_v17  ;;  %v7214_v1 = vperm.slane %v7206_v44, %v13760_v17  ;;  %v7244_v38 = vperm.slane %v7240_v49, %v13734_v41  ;;  %v7248_v52 = vsel %vm6505_vm11, %v14132_v18, %v7247_v3 }
 0x9ad   : > { %10086 = vrot.lane.b32.xlu0 %v10085_v31, %s10514_s16  ;;  %v6879_v9 = vrot.slane %v6852_v8, 4  ;;  %v7256_v51 = vperm.slane %v7248_v52, %v13760_v17  ;;  %v7259_v56 = vrot.slane %v14135_v11, 4  ;;  %v7191_v45 = vrot.slane %v7179_v25, 4 }
 0x9ae   : > { %v7221_v7 = vrot.slane %v7202_v21, 4  ;;  %v7219_v63 = vrot.slane %v7214_v1, 4  ;;  %v7203_v23 = vrot.slane %v7190_v55, 4  ;;  %v7245_v36 = vrot.slane %v14132_v18, 4 }
 0x9af   : > { %v6310_v39 = vld [vmem:[#allocation5 + $0xf0] sm:$0xff]  ;;  %v7260_v29 = vsel %vm6505_vm11, %v7244_v38, %v7259_v56  ;;  %v7275_v43 = vrot.slane %v7256_v51, 4  ;;  %v7192_v3 = vsel %vm6505_vm11, %v7191_v45, %v14030_v33  ;;  %v7257_v24 = vrot.slane %v7244_v38, 4 }
 0x9b0   : > { %v6502_v27 = vmul.f32 %v6465_v22, %v6310_v39  ;;  %v7222_v53 = vsel %vm6505_vm11, %v7214_v1, %v7221_v7  ;;  %v7268_v59 = vperm.slane %v7260_v29, %v13760_v17  ;;  %v7220_v32 = vsel %vm6505_vm11, %v7219_v63, %v7202_v21  ;;  %v6311_v21 = vld [vmem:[#allocation5 + $0xf8] sm:$0xff] }
 0x9b1   : > { %v14210_v4 = vperm.slane %v7192_v3, %v13760_v17  ;;  %v7204_v18 = vsel %vm6505_vm11, %v7203_v23, %v14027_v40  ;;  %v7246_v19 = vsel %vm6505_vm11, %v7245_v36, %v14125_v2  ;;  %v7258_v33 = vsel %vm6505_vm11, %v7257_v24, %v14135_v11  ;;  %v6295_v2 = vld [vmem:[#allocation5 + $0x78] sm:$0xff] }
 0x9b2   : > { %v6853_v0 = vrot.slane %v6502_v27, 4  ;;  %v6856_v20 = vsel %vm6505_vm11, %v6502_v27, %v6855_v14  ;;  %v7276_v50 = vsel %vm6505_vm11, %v7268_v59, %v7275_v43  ;;  %v7273_v16 = vrot.slane %v7268_v59, 4 }
 0x9b3   : > { %v6864_v60 = vperm.slane %v6856_v20, %v13734_v41  ;;  %v10110_v25 = vpack.i.bf16 %v7276_v50, %v7222_v53  ;;  %v14224_v13 = vperm.slane %v7204_v18, %v13760_v17  ;;  %v7217_v40 = vrot.slane %v14210_v4, 4 }
 0x9b4   : > { %v6854_v11 = vsel %vm6505_vm11, %v6853_v0, %v14064_v35  ;;  %v7274_v55 = vsel %vm6505_vm11, %v7273_v16, %v7256_v51  ;;  %v14231_v62 = vperm.slane %v7246_v19, %v13760_v17  ;;  %v14234_v14 = vperm.slane %v7258_v33, %v13760_v17 }
 0x9b5   : > { %v6860_v46 = vperm.slane %v6854_v11, %v13734_v41  ;;  %v6877_v49 = vrot.slane %v6864_v60, 4  ;;  %v6880_v22 = vsel %vm6505_vm11, %v6864_v60, %v6879_v9  ;;  %10111 = vrot.lane.b32.xlu2 %v10110_v25, %s10513_s12  ;;  %v10105_v31 = vpack.i.bf16 %v7274_v55, %v7220_v32 }
 0x9b6   : > { %v6888_v35 = vperm.slane %v6880_v22, %v13760_v17  ;;  %v7218_v61 = vsel %vm6505_vm11, %v14224_v13, %v7217_v40  ;;  %v7271_v44 = vrot.slane %v14231_v62, 4  ;;  %v6487_v1 = vmul.f32 %v6390_v12, %v6295_v2 }
 0x9b7   : > { %v6865_v38 = vrot.slane %v6860_v46, 4  ;;  %v6868_v52 = vsel %vm6505_vm11, %v6860_v46, %v6867_v47  ;;  %v6878_v51 = vsel %vm6505_vm11, %v6877_v49, %v6852_v8  ;;  %10106 = vrot.lane.b32.xlu1 %v10105_v31, %s10512_s26  ;;  %v6503_v9 = vmul.f32 %v6470_v57, %v6311_v21 }
 0x9b8   : > { %v6876_v56 = vperm.slane %v6868_v52, %v13760_v17  ;;  %v6884_v45 = vperm.slane %v6878_v51, %v13760_v17  ;;  %v6895_v7 = vrot.slane %v6888_v35, 4  ;;  %v7272_v63 = vsel %vm6505_vm11, %v14234_v14, %v7271_v44 }
 0x9b9   : > { %v6866_v23 = vsel %vm6505_vm11, %v6865_v38, %v14174_v10  ;;  %v10100_v36 = vpack.i.bf16 %v7272_v63, %v7218_v61  ;;  %v6911_v39 = vrot.slane %v6487_v1, 4  ;;  %v6909_v29 = vrot.slane %v6503_v9, 4 }
 0x9ba   : > { %v6872_v47 = vperm.slane %v6866_v23, %v13760_v17  ;;  %v6891_v8 = vrot.slane %v6876_v56, 4  ;;  %v6893_v43 = vrot.slane %v6884_v45, 4  ;;  %v6896_v3 = vsel %vm6505_vm11, 0.0, %v6895_v7 }
 0x9bb   : > { %v7288_v24 = vsel %vm6505_vm11, %v6895_v7, %v6884_v45  ;;  %v7293_v27 = vrot.slane %v6896_v3, 4  ;;  %10101 = vrot.lane.b32.xlu0 %v10100_v36, %s10514_s16  ;;  %v6910_v53 = vsel %vm6505_vm11, %v6909_v29, %v6487_v1  ;;  %v6912_v59 = vsel %vm6505_vm11, %v6503_v9, %v6911_v39 }
 0x9bc   : > { %v6889_v32 = vrot.slane %v6872_v47, 4  ;;  %v6892_v10 = vsel %vm6505_vm11, 0.0, %v6891_v8  ;;  %v6894_v18 = vsel %vm6505_vm11, 0.0, %v6893_v43  ;;  %v7277_v19 = vsel %vm6505_vm11, %v6891_v8, %v6872_v47 }
 0x9bd   : > { %v7281_v33 = vperm.slane %v7277_v19, %v13734_v41  ;;  %v7282_v0 = vrot.slane %v6892_v10, 4  ;;  %v7292_v20 = vperm.slane %v7288_v24, %v13734_v41  ;;  %v7294_v50 = vsel %vm6505_vm11, %v7293_v27, %v6894_v18 }
 0x9be   : > { %v6890_v16 = vsel %vm6505_vm11, 0.0, %v6889_v32  ;;  %v6916_v60 = vperm.slane %v6910_v53, %v13734_v41  ;;  %v6920_v25 = vperm.slane %v6912_v59, %v13734_v41  ;;  %v7298_v40 = vperm.slane %v7294_v50, %v13734_v41 }
 0x9bf   : > { %v7283_v2 = vsel %vm6505_vm11, %v7282_v0, %v6890_v16  ;;  %v7301_v11 = vrot.slane %v7281_v33, 4  ;;  %v7313_v55 = vrot.slane %v7292_v20, 4  ;;  %v6999_v57 = vrot.slane %v14022_v6, 4 }
 0x9c0   : > { %v6921_v12 = vrot.slane %v6916_v60, 4  ;;  %v6924_v46 = vsel %vm6505_vm11, %v6916_v60, %v6923_v15  ;;  %v6933_v49 = vrot.slane %v6920_v25, 4  ;;  %v6936_v22 = vsel %vm6505_vm11, %v6920_v25, %v6935_v34 }
 0x9c1   : > { %v6932_v31 = vperm.slane %v6924_v46, %v13760_v17  ;;  %v6944_v35 = vperm.slane %v6936_v22, %v13760_v17  ;;  %v7287_v61 = vperm.slane %v7283_v2, %v13734_v41  ;;  %v7314_v44 = vsel %vm6505_vm11, %v7298_v40, %v7313_v55 }
 0x9c2   : > { %v6922_v6 = vsel %vm6505_vm11, %v6921_v12, %v13998_v5  ;;  %v6934_v21 = vsel %vm6505_vm11, %v6933_v49, %v13981_v42  ;;  %v7322_v15 = vperm.slane %v7314_v44, %v13760_v17  ;;  %v7311_v1 = vrot.slane %v7298_v40, 4 }
 0x9c3   : > { %v6928_v38 = vperm.slane %v6922_v6, %v13760_v17  ;;  %v6940_v34 = vperm.slane %v6934_v21, %v13760_v17  ;;  %v6947_v52 = vrot.slane %v6932_v31, 4  ;;  %v6951_v51 = vrot.slane %v6944_v35, 4  ;;  %v9622_v6 = vld [vmem:[%s15365_s5 + $0x38] sm:$0xff] }
 0x9c4   : > { %v7302_v9 = vsel %vm6505_vm11, %v7287_v61, %v7301_v11  ;;  %v7327_v56 = vrot.slane %v7322_v15, 4  ;;  %v7299_v45 = vrot.slane %v7287_v61, 4  ;;  %v7312_v7 = vsel %vm6505_vm11, %v7311_v1, %v7292_v20  ;;  %7578 = vmatpush.bf16.msra.mxu0 %v9622_v6 }
 0x9c5   : > { %v6945_v63 = vrot.slane %v6928_v38, 4  ;;  %v6948_v5 = vsel %vm6505_vm11, 0.0, %v6947_v52  ;;  %v6949_v23 = vrot.slane %v6940_v34, 4  ;;  %v6952_v42 = vsel %vm6505_vm11, 0.0, %v6951_v51 }
 0x9c6   : > { %v7331_v36 = vsel %vm6505_vm11, %v6947_v52, %v6928_v38  ;;  %v7336_v39 = vrot.slane %v6948_v5, 4  ;;  %v7342_v29 = vsel %vm6505_vm11, %v6951_v51, %v6940_v34  ;;  %v7347_v47 = vrot.slane %v6952_v42, 4  ;;  %v9621_v51 = vld [vmem:[%s15365_s5 + $0x30] sm:$0xff] }
 0x9c7   : > { %v6946_v8 = vsel %vm6505_vm11, 0.0, %v6945_v63  ;;  %v6950_v43 = vsel %vm6505_vm11, 0.0, %v6949_v23  ;;  %v7335_v3 = vperm.slane %v7331_v36, %v13734_v41  ;;  %v7346_v24 = vperm.slane %v7342_v29, %v13734_v41  ;;  %v9615_v23 = vld [vmem:[%s15365_s5] sm:$0xff] }
 0x9c8   : > { %v7348_v27 = vsel %vm6505_vm11, %v7347_v47, %v6950_v43  ;;  %v7310_v53 = vperm.slane %v7302_v9, %v13760_v17  ;;  %v7337_v59 = vsel %vm6505_vm11, %v7336_v39, %v6946_v8  ;;  %v7300_v32 = vsel %vm6505_vm11, %v7299_v45, %v7281_v33  ;;  %7579 = vmatpush.bf16.msra.mxu0 %v9621_v51  ;;  %v9619_v45 = vld [vmem:[%s15365_s5 + $0x20] sm:$0xff] }
 0x9c9   : > { %v7352_v10 = vperm.slane %v7348_v27, %v13734_v41  ;;  %v7367_v18 = vrot.slane %v7346_v24, 4  ;;  %v7341_v19 = vperm.slane %v7337_v59, %v13734_v41  ;;  %v7355_v0 = vrot.slane %v7335_v3, 4 }
 0x9ca   : > { %v7329_v20 = vrot.slane %v7310_v53, 4  ;;  %v7306_v50 = vperm.slane %v7300_v32, %v13760_v17  ;;  %v7328_v2 = vsel %vm6505_vm11, %v7327_v56, %v7310_v53  ;;  %v7318_v55 = vperm.slane %v7312_v7, %v13760_v17  ;;  %v9617_v7 = vld [vmem:[%s15365_s5 + $0x10] sm:$0xff] }
 0x9cb   : > { %v7356_v16 = vsel %vm6505_vm11, %v7341_v19, %v7355_v0  ;;  %v7368_v60 = vsel %vm6505_vm11, %v7352_v10, %v7367_v18  ;;  %v7353_v25 = vrot.slane %v7341_v19, 4  ;;  %v7365_v40 = vrot.slane %v7352_v10, 4 }
 0x9cc   : > { %v7364_v11 = vperm.slane %v7356_v16, %v13760_v17  ;;  %v7376_v33 = vperm.slane %v7368_v60, %v13760_v17  ;;  %v7000_v46 = vsel %vm6505_vm11, %v6999_v57, %v14015_v58  ;;  %v7053_v49 = vrot.slane %v14054_v54, 4 }
 0x9cd   : > { %v7354_v41 = vsel %vm6505_vm11, %v7353_v25, %v7335_v3  ;;  %v7366_v12 = vsel %vm6505_vm11, %v7365_v40, %v7346_v24  ;;  %v7325_v35 = vrot.slane %v7306_v50, 4  ;;  %v7330_v44 = vsel %vm6505_vm11, %v7322_v15, %v7329_v20 }
 0x9ce   : > { %v7381_v22 = vrot.slane %v7376_v33, 4  ;;  %v7383_v31 = vrot.slane %v7364_v11, 4  ;;  %v7360_v61 = vperm.slane %v7354_v41, %v13760_v17  ;;  %v7054_v21 = vsel %vm6505_vm11, %v7053_v49, %v14051_v37 }
 0x9cf   : > { %v7107_v1 = vrot.slane %v14155_v28, 4  ;;  %v7161_v58 = vrot.slane %v14166_v30, 4  ;;  %v7372_v38 = vperm.slane %v7366_v12, %v13760_v17  ;;  %v7326_v30 = vsel %vm6505_vm11, %v7318_v55, %v7325_v35 }
 0x9d0   : > { %v7382_v54 = vsel %vm6505_vm11, %v7381_v22, %v7364_v11  ;;  %v7384_v57 = vsel %vm6505_vm11, %v7376_v33, %v7383_v31  ;;  %v7379_v34 = vrot.slane %v7360_v61, 4  ;;  %v7215_v56 = vrot.slane %v14224_v13, 4  ;;  %v9618_v13 = vld [vmem:[%s15365_s5 + $0x18] sm:$0xff] }
 0x9d1   : > { %v10120_v52 = vpack.i.bf16 %v7382_v54, %v7328_v2  ;;  %v10125_v15 = vpack.i.bf16 %v7384_v57, %v7330_v44  ;;  %v7108_v37 = vsel %vm6505_vm11, %v7107_v1, %v14148_v26  ;;  %v7162_v28 = vsel %vm6505_vm11, %v7161_v58, %v14158_v48  ;;  %v9620_v26 = vld [vmem:[%s15365_s5 + $0x28] sm:$0xff] }
 0x9d2   : > { %v7380_v9 = vsel %vm6505_vm11, %v7372_v38, %v7379_v34  ;;  %v14345_v48 = vsel %vm6505_vm11, %v7215_v56, %v14210_v4  ;;  %7580 = vmatpush.bf16.msra.mxu0 %v9620_v26  ;;  %v7269_v63 = vrot.slane %v14234_v14, 4  ;;  %v9616_v4 = vld [vmem:[%s15365_s5 + $0x8] sm:$0xff]  ;;  %v7323_v42 = vrot.slane %v7318_v55, 4 }
 0x9d3   : > { %10121 = vrot.lane.b32.xlu1 %v10120_v52, %s10512_s26  ;;  %10126 = vrot.lane.b32.xlu2 %v10125_v15, %s10513_s12  ;;  %v10115_v17 = vpack.i.bf16 %v7380_v9, %v7326_v30  ;;  %v7377_v39 = vrot.slane %v7372_v38, 4 }
 0x9d4   : > { %v7270_v5 = vsel %vm6505_vm11, %v7269_v63, %v14231_v62  ;;  %v14366_v36 = vsel %vm6505_vm11, %v7323_v42, %v7306_v50 }
 0x9d5   : > { %10116 = vrot.lane.b32.xlu0 %v10115_v17, %s10514_s16  ;;  %v14369_v14 = vsel %vm6505_vm11, %v7377_v39, %v7360_v61  ;;  %s15370_s16 = sld [smem:[#allocation108_spill]] }
 0x9d6   : > { %7581 = vmatpush.bf16.msra.mxu0 %v9619_v45 }
 0x9da   : > { %7582 = vmatpush.bf16.msra.mxu0 %v9618_v13 }
 0x9de   : > { %7583 = vmatpush.bf16.msra.mxu0 %v9617_v7 }
 0x9e2   : > { %7584 = vmatpush.bf16.msra.mxu0 %v9616_v4 }
 0x9e6   : > { %7585 = vmatpush.bf16.msra.mxu0 %v9615_v23 }
 0x9ee   : > { %v10082_v47 = vpop.permute.xlu2 %10081 }
 0x9ef   : > { %v10084_v27 = vunpack.i.h.bf16 %v10082_v47  ;;  %v10083_v53 = vunpack.i.l.bf16 %v10082_v47 }
 0xa01   : > { %v10097_v16 = vpop.permute.xlu2 %10096 }
 0xa02   : > { %v10099_v33 = vunpack.i.h.bf16 %v10097_v16  ;;  %v10098_v55 = vunpack.i.l.bf16 %v10097_v16 }
 0xa04   : > { %v10077_v29 = vpop.permute.xlu1 %10076 }
 0xa05   : > { %v10079_v62 = vunpack.i.h.bf16 %v10077_v29  ;;  %v10078_v24 = vunpack.i.l.bf16 %v10077_v29 }
 0xa0a   : > { %v10072_v8 = vpop.permute.xlu0 %10071 }
 0xa0b   : > { %v10074_v43 = vunpack.i.h.bf16 %v10072_v8  ;;  %v10073_v3 = vunpack.i.l.bf16 %v10072_v8  ;;  %v10130_v8 = vld [vmem:[%s15366_s13] ss:$0 sm:$0xff] }
 0xa0d   : > { %v7482_v59 = vsel %vm4354_vm0, %v7054_v21, %v10074_v43  ;;  %v7481_v32 = vsel %vm4354_vm0, %v7000_v46, %v10073_v3 }
 0xa0e   : > { %v7490_v10 = vsel %vm4786_vm2, %v7482_v59, %v10079_v62  ;;  %v7489_v18 = vsel %vm4786_vm2, %v7481_v32, %v10078_v24  ;;  %v7608_v24 = vld [vmem:[%s10799_s6 + $0x8] sm:$0xff]  ;;  %v7609_v32 = vld [vmem:[%s10799_s6 + $0x10] sm:$0xff] }
 0xa0f   : > { %v7498_v19 = vsel %vm7497_vm12, %v7489_v18, %v10083_v53  ;;  %v7499_v0 = vsel %vm7497_vm12, %v7490_v10, %v10084_v27  ;;  %v10112_v44 = vpop.permute.xlu2 %10111 }
 0xa10   : > { %v7506_v20 = vpack.c.bf16 %v7499_v0, %v7498_v19  ;;  %v10114_v57 = vunpack.i.h.bf16 %v10112_v44  ;;  %v10113_v38 = vunpack.i.l.bf16 %v10112_v44  ;;  %v7610_v0 = vld [vmem:[%s10799_s6 + $0x18] sm:$0xff] }
 0xa12   : > { %7586 = vmatmul.bf16.vlgmr.msra.gmra.mxu0 %v7506_v20 }
 0xa16   : > { %v10092_v50 = vpop.permute.xlu1 %10091 }
 0xa17   : > { %v10094_v2 = vunpack.i.h.bf16 %v10092_v50  ;;  %v10093_v11 = vunpack.i.l.bf16 %v10092_v50 }
 0xa1f   : > { %v10087_v60 = vpop.permute.xlu0 %10086 }
 0xa20   : > { %v10089_v25 = vunpack.i.h.bf16 %v10087_v60  ;;  %v10088_v40 = vunpack.i.l.bf16 %v10087_v60  ;;  %v7611_v60 = vld [vmem:[%s10799_s6 + $0x20] sm:$0xff] }
 0xa22   : > { %v7484_v41 = vsel %vm4354_vm0, %v7162_v28, %v10089_v25  ;;  %v7483_v12 = vsel %vm4354_vm0, %v7108_v37, %v10088_v40 }
 0xa23   : > { %v7491_v46 = vsel %vm4786_vm2, %v7483_v12, %v10093_v11  ;;  %v7492_v49 = vsel %vm4786_vm2, %v7484_v41, %v10094_v2  ;;  %v7612_v11 = vld [vmem:[%s10799_s6 + $0x28] sm:$0xff]  ;;  %v7613_v12 = vld [vmem:[%s10799_s6 + $0x30] sm:$0xff] }
 0xa24   : > { %v7500_v22 = vsel %vm7497_vm12, %v7491_v46, %v10098_v55  ;;  %v7501_v31 = vsel %vm7497_vm12, %v7492_v49, %v10099_v33 }
 0xa25   : > { %v7507_v35 = vpack.c.bf16 %v7501_v31, %v7500_v22  ;;  %v10515_v22 = vmov 128.0  }
 0xa26   : > { %10326 = vrcp.f32 %v10515_v22  ;;  %v9356_v22 = vld [vmem:[%s15367_s25 + $0xc8] sm:$0xf] }
 0xa27   : > { %7591 = vmatmul.bf16.gmra.mxu0 %v7507_v35 }
 0xa29   : > { %v10107_v61 = vpop.permute.xlu1 %10106 }
 0xa2a   : > { %v10109_v6 = vunpack.i.h.bf16 %v10107_v61  ;;  %v10108_v21 = vunpack.i.l.bf16 %v10107_v61 }
 0xa2c   : > { %v10327_v31 = vpop.eup %10326 }
 0xa2d   : > { %v10102_v1 = vpop.permute.xlu0 %10101  ;;  %v10127_v17 = vpop.permute.xlu2 %10126  ;;  %v7642_v35 = vmul.f32 128.0, %v10327_v31  ;;  %vm7646_vm13 = vweird.f32 %v10327_v31 }
 0xa2e   : > { %v10104_v58 = vunpack.i.h.bf16 %v10102_v1  ;;  %v10103_v54 = vunpack.i.l.bf16 %v10102_v1  ;;  %v10129_v63 = vunpack.i.h.bf16 %v10127_v17 }
 0xa2f   : > { %v7643_v61 = vsub.f32 1.0, %v7642_v35 }
 0xa30   : > { %v7486_v34 = vsel %vm4354_vm0, %v7270_v5, %v10104_v58  ;;  %v7485_v52 = vsel %vm4354_vm0, %v14345_v48, %v10103_v54  ;;  %v10128_v48 = vunpack.i.l.bf16 %v10127_v17 }
 0xa31   : > { %v7493_v15 = vsel %vm4786_vm2, %v7485_v52, %v10108_v21  ;;  %v7494_v51 = vsel %vm4786_vm2, %v7486_v34, %v10109_v6  ;;  %v7644_v44 = vmul.f32 %v10327_v31, %v7643_v61 }
 0xa32   : > { %v7502_v37 = vsel %vm7497_vm12, %v7493_v15, %v10113_v38  ;;  %v7503_v28 = vsel %vm7497_vm12, %v7494_v51, %v10114_v57  ;;  %v7614_v51 = vld [vmem:[%s10799_s6 + $0x38] sm:$0xff] }
 0xa33   : > { %v7508_v30 = vpack.c.bf16 %v7503_v28, %v7502_v37  ;;  %v7645_v6 = vadd.f32 %v10327_v31, %v7644_v44 }
 0xa35   : > { %v14429_v21 = vsel %vm7646_vm13, %v10327_v31, %v7645_v6  ;;  %v9650_v31 = vld [vmem:[%s15367_s25 + $0xd4] sm:$0xf0]  ;;  %v9648_v6 = vld [vmem:[%s15367_s25 + $0xcc] sm:$0xf] }
 0xa36   : > { %v9357_v44 = vor.u32 %v9650_v31, %v9356_v22  ;;  %v9302_v22 = vld [vmem:[%s15367_s25 + $0x70] sm:$0xf0]  ;;  %v9308_v31 = vld [vmem:[%s15367_s25 + $0x68] sm:$0xf] }
 0xa37   : > { %7596 = vmatmul.bf16.gmra.mxu0 %v7508_v30 }
 0xa45   : > { %v10122_v9 = vpop.permute.xlu1 %10121 }
 0xa46   : > { %v10124_v13 = vunpack.i.h.bf16 %v10122_v9  ;;  %v10123_v7 = vunpack.i.l.bf16 %v10122_v9 }
 0xa47   : > { %v10117_v56 = vpop.permute.xlu0 %10116 }
 0xa48   : > { %v10119_v26 = vunpack.i.h.bf16 %v10117_v56  ;;  %v10118_v45 = vunpack.i.l.bf16 %v10117_v56 }
 0xa4a   : > { %v7488_v4 = vsel %vm4354_vm0, %v14369_v14, %v10119_v26  ;;  %v7487_v5 = vsel %vm4354_vm0, %v14366_v36, %v10118_v45  ;;  %v7607_v14 = vld [vmem:[%s10799_s6] sm:$0xff] }
 0xa4b   : > { %v7495_v23 = vsel %vm4786_vm2, %v7487_v5, %v10123_v7  ;;  %v7496_v42 = vsel %vm4786_vm2, %v7488_v4, %v10124_v13 }
 0xa4c   : > { %v7504_v39 = vsel %vm7497_vm12, %v7495_v23, %v10128_v48  ;;  %v7505_v29 = vsel %vm7497_vm12, %v7496_v42, %v10129_v63 }
 0xa4d   : > { %v7509_v47 = vpack.c.bf16 %v7505_v29, %v7504_v39 }
 0xa4f   : > { %7601 = vmatmul.bf16.gmra.mxu0 %v7509_v47 }
 0xa8f   : > { %v7587_v43 = vpop.f32.mrf.mxu0 }
 0xa90   : > { %v7588_v3 = vadd.f32 %v10130_v8, %v7587_v43 }
 0xa92   : > { %v14402_v36 = vadd.f32 %v7607_v14, %v7588_v3 }
 0xa94   : > { %7625 = vadd.xlane.f32.xlu0 %v14402_v36 }
 0xa97   : > { %v7589_v62 = vpop.f32.mrf.mxu0 }
 0xa98   : > { %v7590_v27 = vadd.f32 %v10130_v8, %v7589_v62  ;;  %v9364_v62 = vld [vmem:[%s15367_s25 + $0xe0] sm:$0xf] }
 0xa9a   : > { %v14406_v53 = vadd.f32 %v7608_v24, %v7590_v27  ;;  %v9653_v24 = vld [vmem:[%s15367_s25 + $0xec] sm:$0xf0]  ;;  %v9651_v27 = vld [vmem:[%s15367_s25 + $0xe4] sm:$0xf] }
 0xa9c   : > { %7627 = vadd.xlane.f32.xlu1 %v14406_v53 }
 0xaa4   : > { %v7592_v59 = vpop.f32.mrf.mxu0 }
 0xaa5   : > { %v7593_v10 = vadd.f32 %v10130_v8, %v7592_v59  ;;  %v9365_v59 = vor.u32 %v9653_v24, %v9364_v62  ;;  %v9641_v62 = vld [vmem:[%s15367_s25 + $0x8c] sm:$0xf0]  ;;  %v9639_v24 = vld [vmem:[%s15367_s25 + $0x84] sm:$0xf] }
 0xaa7   : > { %v14410_v18 = vadd.f32 %v7609_v32, %v7593_v10  ;;  %v9366_v32 = vld [vmem:[%s15367_s25 + $0xf0] sm:$0xf0]  ;;  %v9372_v10 = vld [vmem:[%s15367_s25 + $0xe8] sm:$0xf]  ;;  %8020 = vmatpush.bf16.msrb.mxu1 %v9365_v59 }
 0xaa9   : > { %7629 = vadd.xlane.f32.xlu2 %v14410_v18 }
 0xaac   : > { %v7594_v19 = vpop.f32.mrf.mxu0 }
 0xaad   : > { %v7595_v20 = vadd.f32 %v10130_v8, %v7594_v19  ;;  %v9654_v19 = vld [vmem:[%s15367_s25 + $0xf4] sm:$0xf0] }
 0xaaf   : > { %v14414_v50 = vadd.f32 %v7610_v0, %v7595_v20  ;;  %v9369_v0 = vor.u32 %v9651_v27, %v9366_v32  ;;  %v9373_v20 = vor.u32 %v9654_v19, %v9372_v10  ;;  %v9318_v32 = vld [vmem:[%s15367_s25 + $0x90] sm:$0xf0]  ;;  %v9324_v10 = vld [vmem:[%s15367_s25 + $0x88] sm:$0xf] }
 0xab1   : > { %7631 = vadd.xlane.f32.xlu0 %v14414_v50  ;;  %8049 = vmatpush.bf16.msra.mxu2 %v9369_v0  ;;  %v9321_v0 = vor.u32 %v9639_v24, %v9318_v32  ;;  %v9268_v24 = vld [vmem:[%s15367_s25 + $0x20] sm:$0xf] }
 0xab2   : > { %8078 = vmatpush.bf16.msrb.mxu3 %v9373_v20  ;;  %v9642_v20 = vld [vmem:[%s15367_s25 + $0x94] sm:$0xf0] }
 0xab4   : > { %v7597_v16 = vpop.f32.mrf.mxu0 }
 0xab5   : > { %v7598_v25 = vadd.f32 %v10130_v8, %v7597_v16  ;;  %v9652_v16 = vld [vmem:[%s15367_s25 + $0xec] sm:$0xf] }
 0xab6   : > { %8079 = vmatpush.bf16.msrb.mxu3 %v9357_v44  ;;  %v9636_v44 = vld [vmem:[%s15367_s25 + $0x6c] sm:$0xf] }
 0xab7   : > { %v14418_v40 = vadd.f32 %v7611_v60, %v7598_v25  ;;  %v9374_v60 = vld [vmem:[%s15367_s25 + $0xf8] sm:$0xf0] }
 0xab8   : > { %v9377_v25 = vor.u32 %v9652_v16, %v9374_v60  ;;  %v9640_v16 = vld [vmem:[%s15367_s25 + $0x8c] sm:$0xf]  ;;  %v9326_v60 = vld [vmem:[%s15367_s25 + $0x98] sm:$0xf0] }
 0xab9   : > { %7633 = vadd.xlane.f32.xlu1 %v14418_v40 }
 0xaba   : > { %8107 = vmatpush.bf16.msrb.mxu0 %v9377_v25  ;;  %v9325_v25 = vor.u32 %v9642_v20, %v9324_v10  ;;  %v9270_v20 = vld [vmem:[%s15367_s25 + $0x30] sm:$0xf0] }
 0xabc   : > { %v7599_v2 = vpop.f32.mrf.mxu0 }
 0xabd   : > { %v7600_v33 = vadd.f32 %v10130_v8, %v7599_v2  ;;  %v9348_v2 = vld [vmem:[%s15367_s25 + $0xc0] sm:$0xf] }
 0xabf   : > { %v14422_v55 = vadd.f32 %v7612_v11, %v7600_v33  ;;  %v9649_v11 = vld [vmem:[%s15367_s25 + $0xcc] sm:$0xf0]  ;;  %v9647_v33 = vld [vmem:[%s15367_s25 + $0xc4] sm:$0xf] }
 0xac1   : > { %7635 = vadd.xlane.f32.xlu2 %v14422_v55 }
 0xacc   : > { %v7602_v41 = vpop.f32.mrf.mxu0 }
 0xacd   : > { %v7603_v46 = vadd.f32 %v10130_v8, %v7602_v41 }
 0xacf   : > { %v14426_v49 = vadd.f32 %v7613_v12, %v7603_v46  ;;  %v9349_v12 = vor.u32 %v9649_v11, %v9348_v2  ;;  %v9350_v46 = vld [vmem:[%s15367_s25 + $0xd0] sm:$0xf0]  ;;  %v9329_v2 = vor.u32 %v9640_v16, %v9326_v60  ;;  %v9300_v11 = vld [vmem:[%s15367_s25 + $0x60] sm:$0xf]  ;;  %v9276_v60 = vld [vmem:[%s15367_s25 + $0x28] sm:$0xf] }
 0xad0   : > { %v9353_v61 = vor.u32 %v9647_v33, %v9350_v46  ;;  %v9637_v33 = vld [vmem:[%s15367_s25 + $0x6c] sm:$0xf0] }
 0xad1   : > { %7637 = vadd.xlane.f32.xlu2 %v14426_v49  ;;  %8021 = vmatpush.bf16.msrb.mxu1 %v9349_v12  ;;  %v9301_v46 = vor.u32 %v9637_v33, %v9300_v11  ;;  %v9278_v33 = vld [vmem:[%s15367_s25 + $0x38] sm:$0xf0] }
 0xad2   : > { %8050 = vmatpush.bf16.msra.mxu2 %v9353_v61  ;;  %v9638_v61 = vld [vmem:[%s15367_s25 + $0x74] sm:$0xf0] }
 0xad4   : > { %v7604_v38 = vpop.f32.mrf.mxu0 }
 0xad5   : > { %v7605_v52 = vadd.f32 %v10130_v8, %v7604_v38  ;;  %v9645_v38 = vld [vmem:[%s15367_s25 + $0xac] sm:$0xf0] }
 0xad7   : > { %v14442_v28 = vadd.f32 %v7614_v51, %v7605_v52  ;;  %v9334_v52 = vld [vmem:[%s15367_s25 + $0xb0] sm:$0xf0] }
 0xb07   : > { %v7626_v1 = vpop.xlane.xlu0 %7625 }
 0xb08   : > { %v7648_v58 = vmul.f32 %v14429_v21, %v7626_v1  ;;  %v9358_v1 = vld [vmem:[%s15367_s25 + $0xd8] sm:$0xf0] }
 0xb0a   : > { %v14433_v54 = vsub.f32 %v14402_v36, %v7648_v58  ;;  %v9332_v58 = vld [vmem:[%s15367_s25 + $0xa0] sm:$0xf] }
 0xb0b   : > { %v9333_v51 = vor.u32 %v9645_v38, %v9332_v58  ;;  %v9309_v58 = vor.u32 %v9638_v61, %v9308_v31  ;;  %v9623_v31 = vld [vmem:[%s15367_s25 + $0x4] sm:$0xf] }
 0xb0c   : > { %v7664_v57 = vmul.f32 %v14433_v54, %v14433_v54 }
 0xb0d   : > { %8022 = vmatpush.bf16.msrb.mxu1 %v9333_v51  ;;  %v9284_v51 = vld [vmem:[%s15367_s25 + $0x40] sm:$0xf] }
 0xb0e   : > { %7672 = vadd.xlane.f32.xlu0 %v7664_v57  ;;  %v9361_v57 = vor.u32 %v9648_v6, %v9358_v1  ;;  %v9310_v6 = vld [vmem:[%s15367_s25 + $0x78] sm:$0xf0] }
 0xb0f   : > { %v7628_v34 = vpop.xlane.xlu1 %7627 }
 0xb10   : > { %v7649_v15 = vmul.f32 %v14429_v21, %v7628_v34  ;;  %v9643_v34 = vld [vmem:[%s15367_s25 + $0xa4] sm:$0xf]  ;;  %8108 = vmatpush.bf16.msrb.mxu0 %v9361_v57  ;;  %v9313_v57 = vor.u32 %v9636_v44, %v9310_v6  ;;  %v9260_v6 = vld [vmem:[%s15367_s25 + $0x8] sm:$0xf] }
 0xb12   : > { %v14440_v37 = vsub.f32 %v14406_v53, %v7649_v15 }
 0xb14   : > { %v7665_v30 = vmul.f32 %v14440_v37, %v14440_v37 }
 0xb16   : > { %7674 = vadd.xlane.f32.xlu1 %v7665_v30  ;;  %7639 = vadd.xlane.f32.xlu0 %v14442_v28  ;;  %v9337_v30 = vor.u32 %v9643_v34, %v9334_v52 }
 0xb18   : > { %8051 = vmatpush.bf16.msra.mxu2 %v9337_v30  ;;  %v9633_v30 = vld [vmem:[%s15367_s25 + $0x4c] sm:$0xf0] }
 0xb1c   : > { %v7630_v9 = vpop.xlane.xlu2 %7629  ;;  %8052 = vmatpush.bf16.msra.mxu2 %v9321_v0 }
 0xb1d   : > { %v7650_v17 = vmul.f32 %v14429_v21, %v7630_v9  ;;  %v9340_v9 = vld [vmem:[%s15367_s25 + $0xa8] sm:$0xf] }
 0xb1f   : > { %v14449_v56 = vsub.f32 %v14410_v18, %v7650_v17  ;;  %v9646_v17 = vld [vmem:[%s15367_s25 + $0xb4] sm:$0xf0] }
 0xb21   : > { %v7666_v26 = vmul.f32 %v14449_v56, %v14449_v56 }
 0xb23   : > { %7676 = vadd.xlane.f32.xlu1 %v7666_v26  ;;  %v9341_v26 = vor.u32 %v9646_v17, %v9340_v9  ;;  %v9631_v9 = vld [vmem:[%s15367_s25 + $0x44] sm:$0xf] }
 0xb24   : > { %v7632_v45 = vpop.xlane.xlu0 %7631 }
 0xb25   : > { %v7651_v13 = vmul.f32 %v14429_v21, %v7632_v45  ;;  %v9644_v45 = vld [vmem:[%s15367_s25 + $0xac] sm:$0xf]  ;;  %8080 = vmatpush.bf16.msrb.mxu3 %v9341_v26  ;;  %v9285_v26 = vor.u32 %v9633_v30, %v9284_v51 }
 0xb27   : > { %v14455_v7 = vsub.f32 %v14414_v50, %v7651_v13  ;;  %v9342_v13 = vld [vmem:[%s15367_s25 + $0xb8] sm:$0xf0] }
 0xb29   : > { %v7667_v63 = vmul.f32 %v14455_v7, %v14455_v7  ;;  %8081 = vmatpush.bf16.msrb.mxu3 %v9325_v25  ;;  %v9628_v25 = vld [vmem:[%s15367_s25 + $0x2c] sm:$0xf] }
 0xb2b   : > { %7678 = vadd.xlane.f32.xlu2 %v7667_v63  ;;  %v9345_v63 = vor.u32 %v9644_v45, %v9342_v13  ;;  %v9286_v45 = vld [vmem:[%s15367_s25 + $0x50] sm:$0xf0]  ;;  %v9292_v13 = vld [vmem:[%s15367_s25 + $0x48] sm:$0xf] }
 0xb2c   : > { %v7634_v48 = vpop.xlane.xlu1 %7633 }
 0xb2d   : > { %v7652_v4 = vmul.f32 %v14429_v21, %v7634_v48  ;;  %8109 = vmatpush.bf16.msrb.mxu0 %v9345_v63  ;;  %8082 = vmatpush.bf16.msrb.mxu3 %v9309_v58  ;;  %v9624_v58 = vld [vmem:[%s15367_s25 + $0xc] sm:$0xf] }
 0xb2f   : > { %v14461_v5 = vsub.f32 %v14418_v40, %v7652_v4 }
 0xb31   : > { %v7668_v23 = vmul.f32 %v14461_v5, %v14461_v5  ;;  %8110 = vmatpush.bf16.msrb.mxu0 %v9329_v2 }
 0xb33   : > { %7680 = vadd.xlane.f32.xlu0 %v7668_v23 }
 0xb34   : > { %v7636_v42 = vpop.xlane.xlu2 %7635 }
 0xb35   : > { %v7653_v39 = vmul.f32 %v14429_v21, %v7636_v42  ;;  %8111 = vmatpush.bf16.msrb.mxu0 %v9313_v57 }
 0xb37   : > { %v14467_v29 = vsub.f32 %v14422_v55, %v7653_v39 }
 0xb39   : > { %v7669_v47 = vmul.f32 %v14467_v29, %v14467_v29 }
 0xb3b   : > { %7682 = vadd.xlane.f32.xlu1 %v7669_v47 }
 0xb44   : > { %v7638_v8 = vpop.xlane.xlu2 %7637 }
 0xb45   : > { %v7654_v43 = vmul.f32 %v14429_v21, %v7638_v8 }
 0xb47   : > { %v14473_v14 = vsub.f32 %v14426_v49, %v7654_v43 }
 0xb49   : > { %v7670_v3 = vmul.f32 %v14473_v14, %v14473_v14 }
 0xb4b   : > { %7684 = vadd.xlane.f32.xlu2 %v7670_v3  ;;  %v9316_v3 = vld [vmem:[%s15367_s25 + $0x80] sm:$0xf] }
 0xb4c   : > { %v9317_v59 = vor.u32 %v9641_v62, %v9316_v3 }
 0xb4e   : > { %8023 = vmatpush.bf16.msrb.mxu1 %v9317_v59  ;;  %v9627_v59 = vld [vmem:[%s15367_s25 + $0x24] sm:$0xf] }
 0xb4f   : > { %v9273_v16 = vor.u32 %v9627_v59, %v9270_v20 }
 0xb52   : > { %8024 = vmatpush.bf16.msrb.mxu1 %v9301_v46  ;;  %v9281_v46 = vor.u32 %v9628_v25, %v9278_v33 }
 0xb56   : > { %8025 = vmatpush.bf16.msrb.mxu1 %v9285_v26  ;;  %v14725_v26 = vld [vmem:[%s15371_s10] ss:$0 sm:$0xff]  ;;  %s15374_s10 = sld [smem:[#allocation113_spill]] }
 0xb81   : > { %v7673_v41 = vpop.xlane.xlu0 %7672 }
 0xb82   : > { %v7688_v35 = vmul.f32 %v7673_v41, %v14429_v21  ;;  %v9635_v41 = vld [vmem:[%s15367_s25 + $0x64] sm:$0xf] }
 0xb84   : > { %v14538_v15 = vadd.f32 1e-05, %v7688_v35  ;;  %v9305_v35 = vor.u32 %v9635_v41, %v9302_v22  ;;  %v9252_v41 = vld [vmem:[%s15367_s25] sm:$0xf]  ;;  %v9625_v22 = vld [vmem:[%s15367_s25 + $0xc] sm:$0xf0] }
 0xb86   : > { %10328 = vrsqrt.f32 %v14538_v15  ;;  %vm7710_vm15 = vweird.f32 %v14538_v15  ;;  %8053 = vmatpush.bf16.msra.mxu2 %v9305_v35  ;;  %v9254_v35 = vld [vmem:[%s15367_s25 + $0x10] sm:$0xf0] }
 0xb87   : > { %v9257_v44 = vor.u32 %v9623_v31, %v9254_v35 }
 0xb89   : > { %v7675_v48 = vpop.xlane.xlu1 %7674  ;;  %v7640_v4 = vpop.xlane.xlu0 %7639 }
 0xb8a   : > { %v7689_v23 = vmul.f32 %v7675_v48, %v14429_v21  ;;  %v7655_v42 = vmul.f32 %v14429_v21, %v7640_v4  ;;  %v9289_v4 = vor.u32 %v9631_v9, %v9286_v45 }
 0xb8c   : > { %v14555_v39 = vpop.eup %10328  ;;  %v14557_v47 = vadd.f32 1e-05, %v7689_v23  ;;  %v14560_v8 = vsub.f32 %v14442_v28, %v7655_v42  ;;  %v9634_v23 = vld [vmem:[%s15367_s25 + $0x54] sm:$0xf0]  ;;  %v9632_v42 = vld [vmem:[%s15367_s25 + $0x4c] sm:$0xf]  ;;  %8054 = vmatpush.bf16.msra.mxu2 %v9289_v4 }
 0xb8d   : > { %v7705_v43 = vmul.f32 %v14555_v39, %v14538_v15  ;;  %vm7711_vm14 = vweird.f32 %v14555_v39  ;;  %v9293_v3 = vor.u32 %v9634_v23, %v9292_v13 }
 0xb8e   : > { %10330 = vrsqrt.f32 %v14557_v47  ;;  %v7671_v27 = vmul.f32 %v14560_v8, %v14560_v8  ;;  %vm14632_vm0 = vmor %vm7710_vm15, %vm7711_vm14  ;;  %vm7720_vm2 = vweird.f32 %v14557_v47 }
 0xb8f   : > { %v7706_v19 = vmul.f32 %v14555_v39, %v7705_v43  ;;  %v9294_v43 = vld [vmem:[%s15367_s25 + $0x58] sm:$0xf0]  ;;  %8083 = vmatpush.bf16.msrb.mxu3 %v9293_v3 }
 0xb90   : > { %7686 = vadd.xlane.f32.xlu0 %v7671_v27  ;;  %v9297_v62 = vor.u32 %v9632_v42, %v9294_v43  ;;  %v9629_v27 = vld [vmem:[%s15367_s25 + $0x2c] sm:$0xf0]  ;;  %8055 = vmatpush.bf16.msra.mxu2 %v9273_v16 }
 0xb91   : > { %v7707_v12 = vmul.f32 0.5, %v7706_v19  ;;  %v9269_v0 = vor.u32 %v9629_v27, %v9268_v24 }
 0xb92   : > { %8112 = vmatpush.bf16.msrb.mxu0 %v9297_v62 }
 0xb93   : > { %v7708_v1 = vsub.f32 1.5, %v7707_v12  ;;  %8026 = vmatpush.bf16.msrb.mxu1 %v9269_v0 }
 0xb94   : > { %v14617_v38 = vpop.eup %10330  ;;  %8056 = vmatpush.bf16.msra.mxu2 %v9257_v44 }
 0xb95   : > { %v7709_v34 = vmul.f32 %v14555_v39, %v7708_v1  ;;  %v7715_v52 = vmul.f32 %v14617_v38, %v14557_v47  ;;  %vm7721_vm1 = vweird.f32 %v14617_v38  ;;  %v9626_v1 = vld [vmem:[%s15367_s25 + $0x14] sm:$0xf0] }
 0xb96   : > { %v7677_v15 = vpop.xlane.xlu1 %7676  ;;  %vm7722_vm3 = vmor %vm7720_vm2, %vm7721_vm1  ;;  %8113 = vmatpush.bf16.msrb.mxu0 %v9281_v46  ;;  %v9261_v47 = vor.u32 %v9626_v1, %v9260_v6 }
 0xb97   : > { %v7716_v63 = vmul.f32 %v14617_v38, %v7715_v52  ;;  %v7690_v48 = vmul.f32 %v7677_v15, %v14429_v21  ;;  %v7713_v32 = vsel %vm14632_vm0, %v14555_v39, %v7709_v34  ;;  %v9630_v39 = vld [vmem:[%s15367_s25 + $0x34] sm:$0xf0]  ;;  %v9262_v34 = vld [vmem:[%s15367_s25 + $0x18] sm:$0xf0]  ;;  %v14716_v52 = vld [vmem:[%s15370_s16] ss:$0 sm:$0xff] }
 0xb98   : > { %v9277_v11 = vor.u32 %v9630_v39, %v9276_v60  ;;  %v7784_v12 = vmul.f32 %v7713_v32, %v14433_v54  ;;  %v9253_v54 = vor.u32 %v9625_v22, %v9252_v41  ;;  %v9265_v9 = vor.u32 %v9624_v58, %v9262_v34  ;;  %s15373_s16 = sld [smem:[#allocation111_spill]] }
 0xb99   : > { %v7717_v10 = vmul.f32 0.5, %v7716_v63  ;;  %v14665_v19 = vadd.f32 1e-05, %v7690_v48 }
 0xb9a   : > { %8084 = vmatpush.bf16.msrb.mxu3 %v9277_v11  ;;  %8027 = vmatpush.bf16.msrb.mxu1 %v9253_v54  ;;  %v7795_v15 = vmul.f32 %v14716_v52, %v7784_v12 }
 0xb9b   : > { %v7718_v2 = vsub.f32 1.5, %v7717_v10  ;;  %10332 = vrsqrt.f32 %v14665_v19  ;;  %8114 = vmatpush.bf16.msrb.mxu0 %v9265_v9  ;;  %vm7730_vm5 = vweird.f32 %v14665_v19 }
 0xb9d   : > { %v7719_v61 = vmul.f32 %v14617_v38, %v7718_v2 }
 0xb9e   : > { %v7679_v57 = vpop.xlane.xlu2 %7678  ;;  %8085 = vmatpush.bf16.msrb.mxu3 %v9261_v47 }
 0xb9f   : > { %v7723_v51 = vsel %vm7722_vm3, %v14617_v38, %v7719_v61  ;;  %v7691_v30 = vmul.f32 %v7679_v57, %v14429_v21 }
 0xba0   : > { %v7785_v17 = vmul.f32 %v7723_v51, %v14440_v37  ;;  %v7806_v37 = vadd.f32 %v14725_v26, %v7795_v15 }
 0xba1   : > { %v10333_v45 = vpop.eup %10332  ;;  %v7699_v13 = vadd.f32 1e-05, %v7691_v30 }
 0xba2   : > { %v7725_v63 = vmul.f32 %v10333_v45, %v14665_v19  ;;  %v7796_v38 = vmul.f32 %v14716_v52, %v7785_v17  ;;  %vm7731_vm4 = vweird.f32 %v10333_v45 }
 0xba3   : > { %10334 = vrsqrt.f32 %v7699_v13  ;;  %vm7732_vm6 = vmor %vm7730_vm5, %vm7731_vm4  ;;  %vm7740_vm8 = vweird.f32 %v7699_v13 }
 0xba4   : > { %v7726_v48 = vmul.f32 %v10333_v45, %v7725_v63  ;;  %v7807_v4 = vadd.f32 %v14725_v26, %v7796_v38 }
 0xba6   : > { %v7727_v23 = vmul.f32 0.5, %v7726_v48  ;;  %v7681_v42 = vpop.xlane.xlu0 %7680  ;;  %v7814_v43 = vpack.c.bf16 %v7807_v4, %v7806_v37  ;;  %v14753_v4 = vld [vmem:[%s15372_s14 + $0xf8] sm:$0xff] }
 0xba7   : > { %v7692_v3 = vmul.f32 %v7681_v42, %v14429_v21  ;;  %v9678_v42 = vld [vmem:[%s15372_s14 + $0xb8] sm:$0xff]  ;;  %8531 = vmatpush.bf16.msra.mxu0 %v14753_v4 }
 0xba8   : > { %v7728_v62 = vsub.f32 1.5, %v7727_v23  ;;  %8028 = vmatmul.bf16.vlgmr.msrb.gmra.mxu1 %v7814_v43  ;;  %8057 = vmatmul.bf16.vlgmr.msra.gmra.mxu2 %v7814_v43  ;;  %v9670_v23 = vld [vmem:[%s15372_s14 + $0x78] sm:$0xff] }
 0xba9   : > { %v10335_v24 = vpop.eup %10334  ;;  %v7700_v27 = vadd.f32 1e-05, %v7692_v3  ;;  %8086 = vmatmul.bf16.vlgmr.msrb.gmra.mxu3 %v7814_v43  ;;  %8115 = vmatmul.bf16.vlgmr.msrb.gmra.mxu0 %v7814_v43  ;;  %v9661_v3 = vld [vmem:[%s15372_s14 + $0x30] sm:$0xff] }
 0xbaa   : > { %v7729_v59 = vmul.f32 %v10333_v45, %v7728_v62  ;;  %v7735_v32 = vmul.f32 %v10335_v24, %v7699_v13  ;;  %vm7741_vm7 = vweird.f32 %v10335_v24  ;;  %v14770_v62 = vld [vmem:[%s15372_s14 + $0xf0] sm:$0xff]  ;;  %8473 = vmatpush.bf16.msrb.mxu2 %v9670_v23  ;;  %8502 = vmatpush.bf16.msra.mxu3 %v9678_v42  ;;  %v9671_v23 = vld [vmem:[%s15372_s14 + $0x80] sm:$0xff] }
 0xbab   : > { %10336 = vrsqrt.f32 %v7700_v27  ;;  %vm7742_vm9 = vmor %vm7740_vm8, %vm7741_vm7  ;;  %vm7750_vm11 = vweird.f32 %v7700_v27  ;;  %8532 = vmatpush.bf16.msra.mxu0 %v14770_v62 }
 0xbac   : > { %v7736_v10 = vmul.f32 %v10335_v24, %v7735_v32  ;;  %v7733_v0 = vsel %vm7732_vm6, %v10333_v45, %v7729_v59  ;;  %v9660_v32 = vld [vmem:[%s15372_s14 + $0x28] sm:$0xff] }
 0xbad   : > { %v7786_v2 = vmul.f32 %v7733_v0, %v14449_v56 }
 0xbae   : > { %v7737_v20 = vmul.f32 0.5, %v7736_v10  ;;  %v7683_v16 = vpop.xlane.xlu1 %7682  ;;  %v14786_v10 = vld [vmem:[%s15372_s14 + $0xe8] sm:$0xff] }
 0xbaf   : > { %v7693_v60 = vmul.f32 %v7683_v16, %v14429_v21  ;;  %v7797_v22 = vmul.f32 %v14716_v52, %v7786_v2  ;;  %v9668_v16 = vld [vmem:[%s15372_s14 + $0x68] sm:$0xff]  ;;  %8533 = vmatpush.bf16.msra.mxu0 %v14786_v10  ;;  %v14803_v2 = vld [vmem:[%s15372_s14 + $0xe0] sm:$0xff] }
 0xbb0   : > { %v7738_v39 = vsub.f32 1.5, %v7737_v20 }
 0xbb1   : > { %v10337_v25 = vpop.eup %10336  ;;  %v7701_v11 = vadd.f32 1e-05, %v7693_v60  ;;  %v7808_v44 = vadd.f32 %v14725_v26, %v7797_v22  ;;  %v9676_v60 = vld [vmem:[%s15372_s14 + $0xa8] sm:$0xff]  ;;  %v9657_v22 = vld [vmem:[%s15372_s14 + $0x10] sm:$0xff] }
 0xbb2   : > { %v7739_v33 = vmul.f32 %v10335_v24, %v7738_v39  ;;  %v7745_v41 = vmul.f32 %v10337_v25, %v7700_v27  ;;  %vm7751_vm10 = vweird.f32 %v10337_v25  ;;  %v9677_v27 = vld [vmem:[%s15372_s14 + $0xb0] sm:$0xff] }
 0xbb3   : > { %10338 = vrsqrt.f32 %v7701_v11  ;;  %vm7752_vm12 = vmor %vm7750_vm11, %vm7751_vm10  ;;  %vm7760_vm14 = vweird.f32 %v7701_v11  ;;  %8503 = vmatpush.bf16.msra.mxu3 %v9677_v27  ;;  %8534 = vmatpush.bf16.msra.mxu0 %v14803_v2 }
 0xbb4   : > { %v7743_v12 = vsel %vm7742_vm9, %v10335_v24, %v7739_v33  ;;  %v7746_v19 = vmul.f32 %v10337_v25, %v7745_v41  ;;  %v9669_v24 = vld [vmem:[%s15372_s14 + $0x70] sm:$0xff]  ;;  %v14812_v41 = vld [vmem:[%s15372_s14 + $0xd8] sm:$0xff] }
 0xbb5   : > { %v7787_v46 = vmul.f32 %v7743_v12, %v14455_v7  ;;  %8474 = vmatpush.bf16.msrb.mxu2 %v9669_v24  ;;  %v9667_v12 = vld [vmem:[%s15372_s14 + $0x60] sm:$0xff] }
 0xbb6   : > { %v7747_v31 = vmul.f32 0.5, %v7746_v19  ;;  %v9675_v19 = vld [vmem:[%s15372_s14 + $0xa0] sm:$0xff] }
 0xbb7   : > { %v7798_v35 = vmul.f32 %v14716_v52, %v7787_v46  ;;  %8504 = vmatpush.bf16.msra.mxu3 %v9676_v60  ;;  %8535 = vmatpush.bf16.msra.mxu0 %v14812_v41 }
 0xbb8   : > { %v7748_v61 = vsub.f32 1.5, %v7747_v31  ;;  %v14827_v31 = vld [vmem:[%s15372_s14 + $0xd0] sm:$0xff] }
 0xbb9   : > { %v10339_v54 = vpop.eup %10338  ;;  %v7809_v56 = vadd.f32 %v14725_v26, %v7798_v35  ;;  %8475 = vmatpush.bf16.msrb.mxu2 %v9668_v16 }
 0xbba   : > { %v7749_v6 = vmul.f32 %v10337_v25, %v7748_v61  ;;  %v7755_v1 = vmul.f32 %v10339_v54, %v7701_v11  ;;  %vm7761_vm13 = vweird.f32 %v10339_v54 }
 0xbbb   : > { %v7815_v58 = vpack.c.bf16 %v7809_v56, %v7808_v44  ;;  %vm7762_vm15 = vmor %vm7760_vm14, %vm7761_vm13  ;;  %8505 = vmatpush.bf16.msra.mxu3 %v9675_v19  ;;  %v9666_v44 = vld [vmem:[%s15372_s14 + $0x58] sm:$0xff]  ;;  %8536 = vmatpush.bf16.msra.mxu0 %v14827_v31 }
 0xbbc   : > { %v7756_v57 = vmul.f32 %v10339_v54, %v7755_v1  ;;  %v7753_v7 = vsel %vm7752_vm12, %v10337_v25, %v7749_v6  ;;  %v9659_v25 = vld [vmem:[%s15372_s14 + $0x20] sm:$0xff]  ;;  %v9674_v56 = vld [vmem:[%s15372_s14 + $0x98] sm:$0xff] }
 0xbbd   : > { %8033 = vmatmul.bf16.gmra.mxu1 %v7815_v58  ;;  %8062 = vmatmul.bf16.gmra.mxu2 %v7815_v58  ;;  %v7788_v51 = vmul.f32 %v7753_v7, %v14461_v5  ;;  %v14845_v7 = vld [vmem:[%s15372_s14 + $0xc8] sm:$0xff] }
 0xbbe   : > { %v7757_v47 = vmul.f32 0.5, %v7756_v57  ;;  %8091 = vmatmul.bf16.gmra.mxu3 %v7815_v58  ;;  %8120 = vmatmul.bf16.gmra.mxu0 %v7815_v58  ;;  %v7685_v5 = vpop.xlane.xlu2 %7684  ;;  %v9656_v57 = vld [vmem:[%s15372_s14 + $0x8] sm:$0xff] }
 0xbbf   : > { %v7799_v15 = vmul.f32 %v14716_v52, %v7788_v51  ;;  %v7694_v48 = vmul.f32 %v7685_v5, %v14429_v21  ;;  %8476 = vmatpush.bf16.msrb.mxu2 %v9667_v12  ;;  %8506 = vmatpush.bf16.msra.mxu3 %v9674_v56 }
 0xbc0   : > { %v7758_v34 = vsub.f32 1.5, %v7757_v47  ;;  %v9665_v47 = vld [vmem:[%s15372_s14 + $0x50] sm:$0xff]  ;;  %8537 = vmatpush.bf16.msra.mxu0 %v14845_v7 }
 0xbc1   : > { %v7810_v13 = vadd.f32 %v14725_v26, %v7799_v15  ;;  %v7702_v37 = vadd.f32 1e-05, %v7694_v48 }
 0xbc2   : > { %v7759_v30 = vmul.f32 %v10339_v54, %v7758_v34  ;;  %v9673_v34 = vld [vmem:[%s15372_s14 + $0x90] sm:$0xff] }
 0xbc3   : > { %10340 = vrsqrt.f32 %v7702_v37  ;;  %vm7770_vm1 = vweird.f32 %v7702_v37  ;;  %8477 = vmatpush.bf16.msrb.mxu2 %v9666_v44  ;;  %8507 = vmatpush.bf16.msra.mxu3 %v9673_v34 }
 0xbc4   : > { %v7763_v9 = vsel %vm7762_vm15, %v10339_v54, %v7759_v30  ;;  %v9655_v30 = vld [vmem:[%s15372_s14] sm:$0xff] }
 0xbc5   : > { %v7789_v17 = vmul.f32 %v7763_v9, %v14467_v29  ;;  %v9662_v29 = vld [vmem:[%s15372_s14 + $0x38] sm:$0xff]  ;;  %v14860_v9 = vld [vmem:[%s15372_s14 + $0xc0] sm:$0xff] }
 0xbc6   : > { %8444 = vmatpush.bf16.msra.mxu1 %v9662_v29  ;;  %8538 = vmatpush.bf16.msra.mxu0 %v14860_v9  ;;  %v9663_v29 = vld [vmem:[%s15372_s14 + $0x40] sm:$0xff] }
 0xbc7   : > { %v7800_v45 = vmul.f32 %v14716_v52, %v7789_v17  ;;  %8478 = vmatpush.bf16.msrb.mxu2 %v9665_v47 }
 0xbc9   : > { %v7811_v63 = vadd.f32 %v14725_v26, %v7800_v45  ;;  %v14761_v43 = vpop.eup %10340 }
 0xbca   : > { %v7765_v59 = vmul.f32 %v14761_v43, %v7702_v37  ;;  %8445 = vmatpush.bf16.msra.mxu1 %v9661_v3  ;;  %vm7771_vm0 = vweird.f32 %v14761_v43 }
 0xbcb   : > { %v7816_v38 = vpack.c.bf16 %v7811_v63, %v7810_v13  ;;  %vm7772_vm2 = vmor %vm7770_vm1, %vm7771_vm0  ;;  %v9664_v13 = vld [vmem:[%s15372_s14 + $0x48] sm:$0xff] }
 0xbcc   : > { %v7766_v0 = vmul.f32 %v14761_v43, %v7765_v59  ;;  %v9672_v63 = vld [vmem:[%s15372_s14 + $0x88] sm:$0xff]  ;;  %8479 = vmatpush.bf16.msrb.mxu2 %v9664_v13 }
 0xbcd   : > { %8038 = vmatmul.bf16.gmra.mxu1 %v7816_v38  ;;  %8067 = vmatmul.bf16.gmra.mxu2 %v7816_v38 }
 0xbce   : > { %8096 = vmatmul.bf16.gmra.mxu3 %v7816_v38  ;;  %8125 = vmatmul.bf16.gmra.mxu0 %v7816_v38  ;;  %v7767_v33 = vmul.f32 0.5, %v7766_v0 }
 0xbcf   : > { %8446 = vmatpush.bf16.msra.mxu1 %v9660_v32  ;;  %8508 = vmatpush.bf16.msra.mxu3 %v9672_v63 }
 0xbd0   : > { %v7768_v46 = vsub.f32 1.5, %v7767_v33  ;;  %8480 = vmatpush.bf16.msrb.mxu2 %v9663_v29 }
 0xbd2   : > { %v7769_v61 = vmul.f32 %v14761_v43, %v7768_v46 }
 0xbd3   : > { %8447 = vmatpush.bf16.msra.mxu1 %v9659_v25  ;;  %8509 = vmatpush.bf16.msra.mxu3 %v9671_v23 }
 0xbd4   : > { %v7773_v1 = vsel %vm7772_vm2, %v14761_v43, %v7769_v61  ;;  %9719 = vmatpush.bf16.msra.mxu2 %v14753_v4 }
 0xbd5   : > { %v7790_v17 = vmul.f32 %v7773_v1, %v14473_v14 }
 0xbd7   : > { %v7801_v14 = vmul.f32 %v14716_v52, %v7790_v17 }
 0xbd8   : > { %9720 = vmatpush.bf16.msra.mxu2 %v14770_v62 }
 0xbd9   : > { %v7812_v48 = vadd.f32 %v14725_v26, %v7801_v14 }
 0xbdc   : > { %9721 = vmatpush.bf16.msra.mxu2 %v14786_v10 }
 0xbe0   : > { %9722 = vmatpush.bf16.msra.mxu2 %v14803_v2 }
 0xbe4   : > { %9723 = vmatpush.bf16.msra.mxu2 %v14812_v41 }
 0xbe8   : > { %9724 = vmatpush.bf16.msra.mxu2 %v14827_v31 }
 0xbec   : > { %9725 = vmatpush.bf16.msra.mxu2 %v14845_v7 }
 0xbf0   : > { %9726 = vmatpush.bf16.msra.mxu2 %v14860_v9 }
 0xc03   : > { %v7687_v20 = vpop.xlane.xlu0 %7686 }
 0xc04   : > { %v7695_v39 = vmul.f32 %v7687_v20, %v14429_v21  ;;  %v9658_v21 = vld [vmem:[%s15372_s14 + $0x18] sm:$0xff] }
 0xc05   : > { %8448 = vmatpush.bf16.msra.mxu1 %v9658_v21 }
 0xc06   : > { %v7703_v11 = vadd.f32 1e-05, %v7695_v39 }
 0xc08   : > { %10342 = vrsqrt.f32 %v7703_v11  ;;  %vm7780_vm4 = vweird.f32 %v7703_v11 }
 0xc09   : > { %8449 = vmatpush.bf16.msra.mxu1 %v9657_v22 }
 0xc0d   : > { %8450 = vmatpush.bf16.msra.mxu1 %v9656_v57 }
 0xc0e   : > { %v10343_v35 = vpop.eup %10342 }
 0xc0f   : > { %v7775_v54 = vmul.f32 %v10343_v35, %v7703_v11  ;;  %vm7781_vm3 = vweird.f32 %v10343_v35 }
 0xc10   : > { %vm7782_vm5 = vmor %vm7780_vm4, %vm7781_vm3 }
 0xc11   : > { %v7776_v6 = vmul.f32 %v10343_v35, %v7775_v54  ;;  %8451 = vmatpush.bf16.msra.mxu1 %v9655_v30 }
 0xc13   : > { %v7777_v58 = vmul.f32 0.5, %v7776_v6 }
 0xc15   : > { %v7778_v51 = vsub.f32 1.5, %v7777_v58 }
 0xc17   : > { %v7779_v15 = vmul.f32 %v10343_v35, %v7778_v51 }
 0xc19   : > { %v7783_v45 = vsel %vm7782_vm5, %v10343_v35, %v7779_v15 }
 0xc1a   : > { %v7791_v38 = vmul.f32 %v7783_v45, %v14560_v8  ;;  %v7850_v8 = vld [vmem:[%s15373_s16] sm:$0xf] }
 0xc1b   : > { %v14886_v43 = vperm.slane %v7850_v8, 0  ;;  %v14888_v3 = vperm.slane %v7850_v8, 3  ;;  %v14894_v0 = vperm.slane %v7850_v8, 1  ;;  %v14897_v16 = vperm.slane %v7850_v8, 2 }
 0xc1c   : > { %v7802_v5 = vmul.f32 %v14716_v52, %v7791_v38 }
 0xc1e   : > { %v7813_v37 = vadd.f32 %v14725_v26, %v7802_v5 }
 0xc20   : > { %v7817_v42 = vpack.c.bf16 %v7813_v37, %v7812_v48 }
 0xc22   : > { %8043 = vmatmul.bf16.gmra.mxu1 %v7817_v42  ;;  %8072 = vmatmul.bf16.gmra.mxu2 %v7817_v42 }
 0xc23   : > { %8101 = vmatmul.bf16.gmra.mxu3 %v7817_v42  ;;  %8130 = vmatmul.bf16.gmra.mxu0 %v7817_v42 }
 0xc25   : > { %v8029_v52 = vpop.f32.mrf.mxu1 }
 0xc26   : > { %v8116_v26 = vpop.f32.mrf.mxu0  ;;  %v8030_v4 = vadd.f32 %v8029_v52, %v14886_v43 }
 0xc27   : > { %v8117_v59 = vadd.f32 %v8116_v26, %v14888_v3 }
 0xc28   : > { %v8136_v39 = vmax.f32 %v8030_v4, 0.0 }
 0xc29   : > { %v8139_v25 = vmax.f32 %v8117_v59, 0.0 }
 0xc2b   : > { %v8058_v24 = vpop.f32.mrf.mxu2 }
 0xc2c   : > { %v8087_v27 = vpop.f32.mrf.mxu3  ;;  %v8059_v33 = vadd.f32 %v8058_v24, %v14894_v0 }
 0xc2d   : > { %v8031_v32 = vpop.f32.mrf.mxu1  ;;  %v8088_v2 = vadd.f32 %v8087_v27, %v14897_v16 }
 0xc2e   : > { %v8032_v62 = vadd.f32 %v8031_v32, %v14886_v43  ;;  %v8118_v20 = vpop.f32.mrf.mxu0  ;;  %v8137_v61 = vmax.f32 %v8059_v33, 0.0 }
 0xc2f   : > { %v8119_v60 = vadd.f32 %v8118_v20, %v14888_v3  ;;  %v8138_v44 = vmax.f32 %v8088_v2, 0.0 }
 0xc30   : > { %v8140_v10 = vmax.f32 %v8032_v62, 0.0 }
 0xc31   : > { %v8143_v11 = vmax.f32 %v8119_v60, 0.0 }
 0xc32   : > { %v8168_v21 = vpack.c.bf16 %v8140_v10, %v8136_v39 }
 0xc33   : > { %v8171_v12 = vpack.c.bf16 %v8143_v11, %v8139_v25  ;;  %v8060_v19 = vpop.f32.mrf.mxu2 }
 0xc34   : > { %v8061_v46 = vadd.f32 %v8060_v19, %v14894_v0  ;;  %v8089_v22 = vpop.f32.mrf.mxu3  ;;  %8452 = vmatmul.bf16.vlgmr.msra.gmra.mxu1 %v8168_v21 }
 0xc35   : > { %v8090_v35 = vadd.f32 %v8089_v22, %v14897_v16  ;;  %8539 = vmatmul.bf16.vlgmr.msra.gmra.mxu0 %v8171_v12 }
 0xc36   : > { %v8141_v54 = vmax.f32 %v8061_v46, 0.0 }
 0xc37   : > { %v8142_v41 = vmax.f32 %v8090_v35, 0.0 }
 0xc38   : > { %v8169_v56 = vpack.c.bf16 %v8141_v54, %v8137_v61 }
 0xc39   : > { %v8170_v6 = vpack.c.bf16 %v8142_v41, %v8138_v44 }
 0xc3a   : > { %v8034_v1 = vpop.f32.mrf.mxu1  ;;  %8481 = vmatmul.bf16.vlgmr.msrb.gmra.mxu2 %v8169_v56 }
 0xc3b   : > { %v8121_v58 = vpop.f32.mrf.mxu0  ;;  %8510 = vmatmul.bf16.vlgmr.msra.gmra.mxu3 %v8170_v6  ;;  %v8035_v47 = vadd.f32 %v8034_v1, %v14886_v43 }
 0xc3c   : > { %v8122_v31 = vadd.f32 %v8121_v58, %v14888_v3 }
 0xc3d   : > { %v8144_v45 = vmax.f32 %v8035_v47, 0.0 }
 0xc3e   : > { %v8147_v13 = vmax.f32 %v8122_v31, 0.0 }
 0xc40   : > { %v8063_v57 = vpop.f32.mrf.mxu2 }
 0xc41   : > { %v8092_v34 = vpop.f32.mrf.mxu3  ;;  %v8064_v38 = vadd.f32 %v8063_v57, %v14894_v0 }
 0xc42   : > { %v8036_v51 = vpop.f32.mrf.mxu1  ;;  %v8093_v9 = vadd.f32 %v8092_v34, %v14897_v16 }
 0xc43   : > { %v8037_v30 = vadd.f32 %v8036_v51, %v14886_v43  ;;  %v8123_v17 = vpop.f32.mrf.mxu0  ;;  %v8145_v8 = vmax.f32 %v8064_v38, 0.0 }
 0xc44   : > { %v8124_v15 = vadd.f32 %v8123_v17, %v14888_v3  ;;  %v8146_v24 = vmax.f32 %v8093_v9, 0.0 }
 0xc45   : > { %v8148_v7 = vmax.f32 %v8037_v30, 0.0 }
 0xc46   : > { %v8151_v63 = vmax.f32 %v8124_v15, 0.0 }
 0xc47   : > { %v8172_v14 = vpack.c.bf16 %v8148_v7, %v8144_v45 }
 0xc48   : > { %v8175_v5 = vpack.c.bf16 %v8151_v63, %v8147_v13  ;;  %v8065_v48 = vpop.f32.mrf.mxu2 }
 0xc49   : > { %v8066_v37 = vadd.f32 %v8065_v48, %v14894_v0  ;;  %v8094_v29 = vpop.f32.mrf.mxu3  ;;  %8457 = vmatmul.bf16.gmra.mxu1 %v8172_v14 }
 0xc4a   : > { %v8095_v23 = vadd.f32 %v8094_v29, %v14897_v16  ;;  %8544 = vmatmul.bf16.gmra.mxu0 %v8175_v5  ;;  %v8039_v42 = vpop.f32.mrf.mxu1 }
 0xc4b   : > { %v8149_v52 = vmax.f32 %v8066_v37, 0.0  ;;  %v8126_v26 = vpop.f32.mrf.mxu0  ;;  %v8040_v62 = vadd.f32 %v8039_v42, %v14886_v43 }
 0xc4c   : > { %v8150_v4 = vmax.f32 %v8095_v23, 0.0  ;;  %v8127_v60 = vadd.f32 %v8126_v26, %v14888_v3 }
 0xc4d   : > { %v8173_v27 = vpack.c.bf16 %v8149_v52, %v8145_v8  ;;  %v8152_v33 = vmax.f32 %v8040_v62, 0.0 }
 0xc4e   : > { %v8174_v59 = vpack.c.bf16 %v8150_v4, %v8146_v24  ;;  %v8155_v2 = vmax.f32 %v8127_v60, 0.0  ;;  %v14933_v4 = vld [vmem:[%s15374_s10] ss:$0 sm:$0xff] }
 0xc4f   : > { %8486 = vmatmul.bf16.gmra.mxu2 %v8173_v27 }
 0xc50   : > { %8515 = vmatmul.bf16.gmra.mxu3 %v8174_v59  ;;  %v8068_v32 = vpop.f32.mrf.mxu2 }
 0xc51   : > { %v8097_v20 = vpop.f32.mrf.mxu3  ;;  %v8069_v19 = vadd.f32 %v8068_v32, %v14894_v0 }
 0xc52   : > { %v8041_v39 = vpop.f32.mrf.mxu1  ;;  %v8098_v22 = vadd.f32 %v8097_v20, %v14897_v16 }
 0xc53   : > { %v8042_v10 = vadd.f32 %v8041_v39, %v14886_v43  ;;  %v8128_v25 = vpop.f32.mrf.mxu0  ;;  %v8153_v56 = vmax.f32 %v8069_v19, 0.0 }
 0xc54   : > { %v8129_v11 = vadd.f32 %v8128_v25, %v14888_v3  ;;  %v8154_v1 = vmax.f32 %v8098_v22, 0.0 }
 0xc55   : > { %v8156_v21 = vmax.f32 %v8042_v10, 0.0 }
 0xc56   : > { %v8159_v12 = vmax.f32 %v8129_v11, 0.0 }
 0xc57   : > { %v8176_v46 = vpack.c.bf16 %v8156_v21, %v8152_v33 }
 0xc58   : > { %v8179_v35 = vpack.c.bf16 %v8159_v12, %v8155_v2  ;;  %v8070_v61 = vpop.f32.mrf.mxu2 }
 0xc59   : > { %v8071_v54 = vadd.f32 %v8070_v61, %v14894_v0  ;;  %v8099_v44 = vpop.f32.mrf.mxu3  ;;  %8462 = vmatmul.bf16.gmra.mxu1 %v8176_v46 }
 0xc5a   : > { %v8100_v41 = vadd.f32 %v8099_v44, %v14897_v16  ;;  %8549 = vmatmul.bf16.gmra.mxu0 %v8179_v35 }
 0xc5b   : > { %v8157_v6 = vmax.f32 %v8071_v54, 0.0 }
 0xc5c   : > { %v8158_v58 = vmax.f32 %v8100_v41, 0.0 }
 0xc5d   : > { %v8177_v57 = vpack.c.bf16 %v8157_v6, %v8153_v56 }
 0xc5e   : > { %v8178_v47 = vpack.c.bf16 %v8158_v58, %v8154_v1 }
 0xc5f   : > { %8491 = vmatmul.bf16.gmra.mxu2 %v8177_v57 }
 0xc60   : > { %8520 = vmatmul.bf16.gmra.mxu3 %v8178_v47 }
 0xc9f   : > { %v8044_v34 = vpop.f32.mrf.mxu1 }
 0xca0   : > { %v8045_v51 = vadd.f32 %v8044_v34, %v14886_v43  ;;  %v8131_v38 = vpop.f32.mrf.mxu0 }
 0xca1   : > { %v8132_v27 = vadd.f32 %v8131_v38, %v14888_v3 }
 0xca2   : > { %v8160_v45 = vmax.f32 %v8045_v51, 0.0 }
 0xca3   : > { %v8163_v39 = vmax.f32 %v8132_v27, 0.0 }
 0xca5   : > { %v8073_v31 = vpop.f32.mrf.mxu2 }
 0xca6   : > { %v8102_v30 = vpop.f32.mrf.mxu3  ;;  %v8074_v13 = vadd.f32 %v8073_v31, %v14894_v0 }
 0xca7   : > { %v8046_v17 = vpop.f32.mrf.mxu1  ;;  %v8103_v14 = vadd.f32 %v8102_v30, %v14897_v16 }
 0xca8   : > { %v8047_v15 = vadd.f32 %v8046_v17, %v14886_v43  ;;  %v8161_v29 = vmax.f32 %v8074_v13, 0.0  ;;  %v8133_v26 = vpop.f32.mrf.mxu0 }
 0xca9   : > { %v8162_v42 = vmax.f32 %v8103_v14, 0.0 }
 0xcaa   : > { %v8164_v7 = vmax.f32 %v8047_v15, 0.0 }
 0xcac   : > { %v8180_v63 = vpack.c.bf16 %v8164_v7, %v8160_v45 }
 0xcad   : > { %v8075_v9 = vpop.f32.mrf.mxu2 }
 0xcae   : > { %v8076_v5 = vadd.f32 %v8075_v9, %v14894_v0  ;;  %v8104_v48 = vpop.f32.mrf.mxu3  ;;  %8467 = vmatmul.bf16.gmra.mxu1 %v8180_v63  ;;  %v8134_v0 = vadd.f32 %v8133_v26, %v14888_v3 }
 0xcaf   : > { %v8105_v37 = vadd.f32 %v8104_v48, %v14897_v16 }
 0xcb0   : > { %v8165_v23 = vmax.f32 %v8076_v5, 0.0  ;;  %v8167_v32 = vmax.f32 %v8134_v0, 0.0 }
 0xcb1   : > { %v8166_v8 = vmax.f32 %v8105_v37, 0.0  ;;  %v8453_v24 = vpop.f32.mrf.mxu1 }
 0xcb2   : > { %v8181_v43 = vpack.c.bf16 %v8165_v23, %v8161_v29  ;;  %v8454_v16 = vadd.f32 %v14933_v4, %v8453_v24  ;;  %v8540_v60 = vpop.f32.mrf.mxu0  ;;  %v8183_v11 = vpack.c.bf16 %v8167_v32, %v8163_v39 }
 0xcb3   : > { %v8182_v52 = vpack.c.bf16 %v8166_v8, %v8162_v42 }
 0xcb4   : > { %8496 = vmatmul.bf16.gmra.mxu2 %v8181_v43 }
 0xcb5   : > { %8525 = vmatmul.bf16.gmra.mxu3 %v8182_v52 }
 0xcb9   : > { %v8455_v25 = vpop.f32.mrf.mxu1 }
 0xcba   : > { %v8456_v21 = vadd.f32 %v14933_v4, %v8455_v25  ;;  %v8542_v22 = vpop.f32.mrf.mxu0 }
 0xcbd   : > { %v8482_v59 = vpop.f32.mrf.mxu2 }
 0xcbe   : > { %v8483_v62 = vadd.f32 %v8482_v59, %v8454_v16  ;;  %v8511_v20 = vpop.f32.mrf.mxu3 }
 0xcc0   : > { %v8512_v10 = vadd.f32 %v8511_v20, %v8483_v62 }
 0xcc2   : > { %v8541_v33 = vadd.f32 %v8540_v60, %v8512_v10 }
 0xcc4   : > { %v8560_v2 = vadd.f32 %v8541_v33, %v14402_v36  ;;  %8554 = vmatmul.bf16.vlgmr.msra.gmra.mxu2 %v8183_v11 }
 0xcc5   : > { %v8484_v3 = vpop.f32.mrf.mxu2 }
 0xcc6   : > { %8568 = vst [vmem:[%s10805_s22] sm:$0xff] %v8560_v2  ;;  %v8485_v12 = vadd.f32 %v8484_v3, %v8456_v21  ;;  %v8513_v19 = vpop.f32.mrf.mxu3  ;;  %v8458_v35 = vpop.f32.mrf.mxu1 }
 0xcc7   : > { %v8459_v44 = vadd.f32 %v14933_v4, %v8458_v35  ;;  %v8545_v41 = vpop.f32.mrf.mxu0 }
 0xcc8   : > { %v8514_v46 = vadd.f32 %v8513_v19, %v8485_v12 }
 0xcca   : > { %v8543_v61 = vadd.f32 %v8542_v22, %v8514_v46 }
 0xccc   : > { %v8561_v54 = vadd.f32 %v8543_v61, %v14406_v53 }
 0xcce   : > { %8569 = vst [vmem:[%s10805_s22 + $0x8] sm:$0xff] %v8561_v54  ;;  %v8460_v36 = vpop.f32.mrf.mxu1 }
 0xccf   : > { %v8461_v47 = vadd.f32 %v14933_v4, %v8460_v36  ;;  %v8547_v53 = vpop.f32.mrf.mxu0 }
 0xcd2   : > { %v8487_v56 = vpop.f32.mrf.mxu2 }
 0xcd3   : > { %v8488_v6 = vadd.f32 %v8487_v56, %v8459_v44  ;;  %v8516_v1 = vpop.f32.mrf.mxu3 }
 0xcd5   : > { %v8517_v58 = vadd.f32 %v8516_v1, %v8488_v6 }
 0xcd6   : > { %v8463_v17 = vpop.f32.mrf.mxu1 }
 0xcd7   : > { %v8546_v57 = vadd.f32 %v8545_v41, %v8517_v58  ;;  %v8464_v7 = vadd.f32 %v14933_v4, %v8463_v17  ;;  %v8550_v9 = vpop.f32.mrf.mxu0 }
 0xcd9   : > { %v8562_v34 = vadd.f32 %v8546_v57, %v14410_v18 }
 0xcda   : > { %v8489_v31 = vpop.f32.mrf.mxu2 }
 0xcdb   : > { %8570 = vst [vmem:[%s10805_s22 + $0x10] sm:$0xff] %v8562_v34  ;;  %v8490_v51 = vadd.f32 %v8489_v31, %v8461_v47  ;;  %v8518_v30 = vpop.f32.mrf.mxu3 }
 0xcdd   : > { %v8519_v15 = vadd.f32 %v8518_v30, %v8490_v51 }
 0xcde   : > { %v8465_v5 = vpop.f32.mrf.mxu1 }
 0xcdf   : > { %v8548_v45 = vadd.f32 %v8547_v53, %v8519_v15  ;;  %v8466_v37 = vadd.f32 %v14933_v4, %v8465_v5  ;;  %v8552_v52 = vpop.f32.mrf.mxu0 }
 0xce1   : > { %v8563_v13 = vadd.f32 %v8548_v45, %v14414_v50 }
 0xce2   : > { %v8492_v63 = vpop.f32.mrf.mxu2 }
 0xce3   : > { %8571 = vst [vmem:[%s10805_s22 + $0x18] sm:$0xff] %v8563_v13  ;;  %v8493_v38 = vadd.f32 %v8492_v63, %v8464_v7  ;;  %v8521_v14 = vpop.f32.mrf.mxu3 }
 0xce5   : > { %v8522_v18 = vadd.f32 %v8521_v14, %v8493_v38 }
 0xce7   : > { %v8551_v48 = vadd.f32 %v8550_v9, %v8522_v18 }
 0xce9   : > { %v8564_v29 = vadd.f32 %v8551_v48, %v14418_v40 }
 0xcea   : > { %v8494_v23 = vpop.f32.mrf.mxu2 }
 0xceb   : > { %8572 = vst [vmem:[%s10805_s22 + $0x20] sm:$0xff] %v8564_v29  ;;  %v8495_v42 = vadd.f32 %v8494_v23, %v8466_v37  ;;  %v8523_v8 = vpop.f32.mrf.mxu3 }
 0xced   : > { %v8524_v43 = vadd.f32 %v8523_v8, %v8495_v42 }
 0xcef   : > { %v8553_v50 = vadd.f32 %v8552_v52, %v8524_v43 }
 0xcf1   : > { %v8565_v26 = vadd.f32 %v8553_v50, %v14422_v55 }
 0xcf3   : > { %8573 = vst [vmem:[%s10805_s22 + $0x28] sm:$0xff] %v8565_v26 }
 0xd2b   : > { %v8468_v0 = vpop.f32.mrf.mxu1 }
 0xd2c   : > { %v8469_v16 = vadd.f32 %v14933_v4, %v8468_v0 }
 0xd33   : > { %v8470_v40 = vpop.f32.mrf.mxu1 }
 0xd34   : > { %v8471_v60 = vadd.f32 %v14933_v4, %v8470_v40 }
 0xd37   : > { %v8497_v24 = vpop.f32.mrf.mxu2 }
 0xd38   : > { %v8498_v59 = vadd.f32 %v8497_v24, %v8469_v16  ;;  %v8526_v32 = vpop.f32.mrf.mxu3 }
 0xd3a   : > { %v8527_v62 = vadd.f32 %v8526_v32, %v8498_v59 }
 0xd3f   : > { %v8499_v27 = vpop.f32.mrf.mxu2 }
 0xd40   : > { %v8500_v10 = vadd.f32 %v8499_v27, %v8471_v60  ;;  %v8528_v55 = vpop.f32.mrf.mxu3 }
 0xd42   : > { %v8529_v11 = vadd.f32 %v8528_v55, %v8500_v10 }
 0xd47   : > { %v8555_v20 = vpop.f32.mrf.mxu2 }
 0xd48   : > { %v8556_v39 = vadd.f32 %v8555_v20, %v8527_v62 }
 0xd4a   : > { %v8566_v25 = vadd.f32 %v8556_v39, %v14426_v49 }
 0xd4c   : > { %8574 = vst [vmem:[%s10805_s22 + $0x30] sm:$0xff] %v8566_v25 }
 0xd4f   : > { %v8557_v33 = vpop.f32.mrf.mxu2 }
 0xd50   : > { %v8558_v21 = vadd.f32 %v8557_v33, %v8529_v11 }
 0xd52   : > { %v8567_v2 = vadd.f32 %v8558_v21, %v14442_v28 }
 0xd54   : > { %8575 = vst [vmem:[%s10805_s22 + $0x38] sm:$0xff] %v8567_v2 }
 0xd55 PF: > { %s15375_s13 = sld [smem:[#allocation17_spill]]  ;;  %s8592_s9 = sshll.u32 %s10805_s22, 4  ;;  %s8593_s9 = int_to_ptr.vmem [resolvable:$true] %s8592_s9 }
 0xd56   : > { %s15376_s6 = sld [smem:[#allocation18_spill]]  ;;  %s15379_s14 = sand.u32 1, %s10456_s30  }
 0xd57   : > { %s9731_s8 = scalar_select %p10714_p12, [#allocation7], [#allocation13] }
 0xd58   : > { %s15377_s17 = sld [smem:[#allocation114_spill]]  ;;  %s8577_s24 = scalar_lea.sflag [#allocation12], %s15379_s14 }
 0xd5b   : > { %s15404_s13 = smov (!%p10714_p12, %s15375_s13), 0 }
 0xd5c   : > { %s8584_s18 = sld [smem:[%s9731_s8 + %s15404_s13]]  ;;  %s9730_s28 = smul.u32 24, %s15376_s6 }
 0xd5e   : > { %s15378_s10 = smov %s15377_s17 }
 0xd5f   : > { %s10388_s6 = scalar_lea.hbm %s15378_s10, 384 }
 0xd62   : > { %s9507_s3 = sshll.u32 %s8584_s18, 3 }
 0xd63   : > { %s8589_s4 = sadd.s32 %s9730_s28, %s9507_s3 }
 0xd64   : > { %s9508_s26 = sshll.u32 %s8589_s4, 3 }
 0xd65   : > { %s8591_s20 = scalar_lea.hbm %s15377_s17, %s9508_s26 }
 0xd66   : > { %s8594_s5 = sshll.u32 %s8591_s20, 4  ;;  %s8595_s5 = int_to_ptr.hbm [resolvable:$true] %s8594_s5 }
 0xd67   : > { %s10382_s25 = sshra.s32 %s8595_s5, 4  ;;  %s10383_s25 = int_to_ptr.hbm [resolvable:$true] %s10382_s25 }
 0xd68   : > { %s10384_s21 = scalar_lea.hbm %s10383_s25, 64  ;;  %p10389_p2 = scmp.lt.s32.totalorder %s10383_s25, %s15378_s10 }
 0xd69   : > { %p10385_p11 = scmp.ne.s32.totalorder %s10383_s25, %s10384_s21  ;;  %p10390_p3 = scmp.lt.s32.totalorder %s10388_s6, %s10384_s21 }
 0xd6b   : > { %p10386_p13 = pnand %p10385_p11, %p10714_p12  ;;  %p10391_p4 = por %p10390_p3, %p10389_p2 }
 0xd6d   : > { %p10387_p0 = pneg %p10386_p13 }
 0xd6f   : > { %p10392_p5 = pnand %p10391_p4, %p10387_p0 }
 0xd71   : > { %10395 = shalt.err (!%p10392_p5)
}
 0xd72   : > { %s10516_s14 = smov 128   ;;  %s10517_s28 = smov 8  }
 0xd73   : > { %9733 = dma.vmem_to_hbm [thread:$0]  (%p10714_p12), %s8593_s9, 1024, %s8595_s5, %s8577_s24, %s10516_s14, %s10516_s14, %s10517_s28  }
 0xd74 PF: > { %p9739_p6 = scmp.ge.s32.totalorder %s10496_s23, 2  ;;  %s8609_s3 = sand.u32 1, %s10452_s29  }
 0xd75   : > { %s8610_s4 = scalar_lea.sflag [#allocation12], %s8609_s3 }
 0xd76   : > { %p9736_p7 = pnand %p9739_p6, %p10720_p1 }
 0xd78   : > { %p9737_p8 = pneg %p9736_p7 }
 0xd7a   : > { %10447 = dma.done.wait (%p9737_p8), %s8610_s4, 1024  }
 0xd7b   : > { %10449 = vsyncadd (%p9737_p8), %s8610_s4, 4294966272  ;;  %s42_s23 = sadd.s32 1, %s10496_s23   ;;  %s15380_s21 = sld [smem:[#allocation19_spill]] }
 0xd7c   : > { %p39_p9 = scmp.ge.s32.totalorder %s42_s23, 14   ;;  %s15381_s20 = sld [smem:[#allocation20_spill]] }
 0xd7d   : > { %s15382_s27 = sld [smem:[#allocation21_spill]]  ;;  %s15384_s29 = smov %s10456_s30 }
 0xd7e   : > { %s15383_s22 = sld [smem:[#allocation22_spill]]  ;;  %s15385_s30 = smov %s10460_s0 }
 0xd7f   : > { %s15386_s0 = smov %s10725_s2  ;;  %s15387_s17 = smov %s10468_s1 }
 0xd80   : > { %s15388_s1 = smov %s10712_s15  ;;  %s15389_s18 = smov %s10476_s11 }
 0xd81   : > { %s15390_s11 = smov %s10703_s19  ;;  %s15391_s19 = smov %s15380_s21 }
 0xd82   :  { %41 = sbr.rel (!%p39_p9) target bundleno = 36 (0x24), region = 221 }
 0xd83   : > { %s15392_s21 = smov %s15382_s27 }
 0xd87   :  { %8616 = vsyncpa [#allocation12], 1 }
 0xd88   :  { %8618 = vsyncpa [#allocation12 + $0x1], 1 }

</bundles_post_ra>
